<compile_context>
chip_gen: v7x
topology: tpu7x:2x2x1
jax: 0.10.0
libtpu: 0.0.40
codegen_flags: <defaults>
</compile_context>

<pallas_src>
import jax
import jax.numpy as jnp
from jax.experimental import pallas as pl
from jax.experimental.pallas import tpu as pltpu


# ----------------------- hyperparameters (small, consistent) -----------------------
class hps:
    CHARACTER_EMB_SIZE = 32
    LSTM_HIDDEN_SIZE = 16            # 2 * 16 == CHARACTER_EMB_SIZE (required by ctx concat)
    N_MEL_FILTERBANKS = 16
    PRENET_HIDDEN_SIZE = 32
    DECODER_RNN_HIDDEN_DIM = 32
    ATTENTION_DIM = 32
    ATTENTION_LOCATION_FILTERS = 8
    ATTENTION_LOCATION_KERNEL_SIZE = 5
    POSTNET_NUM_FILTERS = 32
    POSTNET_KERNEL_SIZE = 5
    CLIPMIN = 1e-5


CHARACTERS_NUM = 40
CONV_K = 5                            # encoder / postnet conv kernel size
OUT_W = 128                           # lane-dense output slab: [mel | mel_post | stop | 0-pad]


# =============================== in-kernel helpers ===============================

def _lstm_cell(g, c_prev, H):
    """PyTorch gate order (i, f, g, o) on a (1, 4H) pre-activation row."""
    i = jax.nn.sigmoid(g[:, 0:H])
    f = jax.nn.sigmoid(g[:, H:2 * H])
    n = jnp.tanh(g[:, 2 * H:3 * H])
    o = jax.nn.sigmoid(g[:, 3 * H:4 * H])
    c = f * c_prev + i * n
    h = o * jnp.tanh(c)
    return h, c


def _conv_bn_act(x, w_flat, scale, shift, ksize, activation):
    """Channels-last 'same' Conv1d(bias=False) + eval BatchNorm + activation.
    K accumulated per-tap dots (no im2col lane concat): y = sum_k shift_k(x) @ W_k."""
    S, Ci = x.shape
    pad = (ksize - 1) // 2
    z = jnp.zeros((pad, Ci), jnp.float32)
    xp = jnp.concatenate([z, x, z], axis=0)                               # sublane concat only
    y = None
    for k in range(ksize):
        yk = jnp.dot(xp[k:k + S, :], w_flat[k * Ci:(k + 1) * Ci, :],
                     preferred_element_type=jnp.float32)
        y = yk if y is None else y + yk
    y = y * scale + shift
    if activation == "relu":
        y = jnp.maximum(y, 0.0)
    elif activation == "tanh":
        y = jnp.tanh(y)
    return y


# =============================== the fused kernel ===============================

def _tacotron2_kernel(len_ref, text_ref, mels_ref, *rest):
    (emb,
     cw0, cs0, cb0, cw1, cs1, cb1, cw2, cs2, cb2,
     wfx, wfh, bf, wbx, wbh, bb,
     w1p, b1p, w2p, b2p, wel, bel,
     w1x, w1c, w1h, b1, w2x, w2h, b2,
     wr1, wr2, vloc, walign,
     wmsh, wmsc, bms,
     pw0, ps0, pb0, pw1, ps1, pb1, pw2, ps2, pb2, pw3, ps3, pb3, pw4, ps4, pb4,
     wpl, bpl,
     out_ref,
     x_sc, hseq_f, hseq_b, ca_sc) = rest

    L = hps.LSTM_HIDDEN_SIZE
    E = hps.CHARACTER_EMB_SIZE
    H = hps.DECODER_RNN_HIDDEN_DIM
    A = hps.ATTENTION_DIM
    NM = hps.N_MEL_FILTERBANKS
    KL = hps.ATTENTION_LOCATION_KERNEL_SIZE
    LPAD = (KL - 1) // 2
    S = x_sc.shape[0]
    T = mels_ref.shape[0]

    b = pl.program_id(0)
    length = len_ref[b]

    # ------------------------------- encoder -------------------------------
    # embedding lookup as a one-hot @ table dot (idle MXU; no XLA gather)
    tok = text_ref[...]                                                   # (S, 1) int32
    iota_c = jax.lax.broadcasted_iota(jnp.int32, (S, CHARACTERS_NUM), 1)
    x = jnp.dot((iota_c == tok).astype(jnp.float32), emb[...],
                preferred_element_type=jnp.float32)                       # (S, E)

    # 3x (Conv1d + BN + ReLU), per-tap dots, stays in VMEM
    x = _conv_bn_act(x, cw0[...], cs0[...], cb0[...], CONV_K, "relu")
    x = _conv_bn_act(x, cw1[...], cs1[...], cb1[...], CONV_K, "relu")
    x = _conv_bn_act(x, cw2[...], cs2[...], cb2[...], CONV_K, "relu")
    x_sc[...] = x                                                         # ref needed for dyn bwd reads

    hseq_f[...] = jnp.zeros_like(hseq_f)
    hseq_b[...] = jnp.zeros_like(hseq_b)

    wfx_v, wfh_v, bf_v = wfx[...], wfh[...], bf[...]
    wbx_v, wbh_v, bb_v = wbx[...], wbh[...], bb[...]

    # bidirectional LSTM with pack_padded_sequence semantics.
    # Fully unrolled (S small); branch-free via masked selects + a trash row.
    zl = jnp.zeros((1, L), jnp.float32)
    hf, cf, hb, cb = zl, zl, zl, zl
    for s in range(S):
        valid = s < length
        # forward direction at position s
        xt = x[s:s + 1, :]
        gf = (jnp.dot(xt, wfx_v, preferred_element_type=jnp.float32)
              + jnp.dot(hf, wfh_v, preferred_element_type=jnp.float32) + bf_v)
        hf_n, cf_n = _lstm_cell(gf, cf, L)
        hf = jnp.where(valid, hf_n, hf)
        cf = jnp.where(valid, cf_n, cf)
        hseq_f[pl.ds(s, 1), :] = jnp.where(valid, hf_n, jnp.zeros_like(hf_n))
        # backward direction at position length-1-s (packed reverse starts at length-1)
        jr = jnp.where(valid, length - 1 - s, 0)                          # safe read row
        xj = x_sc[pl.ds(jr, 1), :]
        gb = (jnp.dot(xj, wbx_v, preferred_element_type=jnp.float32)
              + jnp.dot(hb, wbh_v, preferred_element_type=jnp.float32) + bb_v)
        hb_n, cb_n = _lstm_cell(gb, cb, L)
        hb = jnp.where(valid, hb_n, hb)
        cb = jnp.where(valid, cb_n, cb)
        jw = jnp.where(valid, length - 1 - s, S)                          # row S = trash row
        hseq_b[pl.ds(jw, 1), :] = hb_n

    # padding rows were never written -> zero (pad_packed semantics)
    enc = jnp.concatenate([hseq_f[...], hseq_b[pl.ds(0, S), :]], axis=1)  # (S, 2L)

    # ------------------------------- decoder -------------------------------
    # prenet on the whole (T, NM) chunk: two fused Linear+ReLU (dropout = identity)
    pren = jnp.maximum(jnp.dot(mels_ref[...], w1p[...],
                               preferred_element_type=jnp.float32) + b1p[...], 0.0)
    pren = jnp.maximum(jnp.dot(pren, w2p[...],
                               preferred_element_type=jnp.float32) + b2p[...], 0.0)   # (T, P)

    penc = jnp.dot(enc, wel[...], preferred_element_type=jnp.float32) + bel[...]      # (S, A)
    pos = jax.lax.broadcasted_iota(jnp.int32, (S, 1), 0)
    attn_mask = pos < length                                                          # (S, 1)
    neg_big = jnp.float32(-1e30)                                                      # finite mask

    ca_sc[...] = jnp.zeros_like(ca_sc)       # padded cumulative attention; live rows [LPAD, LPAD+S)

    # loop-invariant loads / broadcasts hoisted out of the timestep loop
    w1x_v, w1c_v, w1h_v, b1_v = w1x[...], w1c[...], w1h[...], b1[...]
    w2x_v, w2h_v, b2_v = w2x[...], w2h[...], b2[...]
    wr1_v, wr2_v, walign_v = wr1[...], wr2[...], walign[...]
    wmsh_v, wmsc_v, bms_v = wmsh[...], wmsc[...], bms[...]
    vloc_rows = [jnp.broadcast_to(vloc[pl.ds(k, 1), :], (S, A)) for k in range(KL)]

    zh = jnp.zeros((1, H), jnp.float32)
    h1, c1, h2, c2 = zh, zh, zh, zh
    ctx = jnp.zeros((1, E), jnp.float32)
    for t in range(T):                                                    # fully unrolled
        xt = pren[t:t + 1, :]                                             # (1, P)

        # 2-layer decoder LSTM with split weights (no lane concats)
        g1 = (jnp.dot(xt, w1x_v, preferred_element_type=jnp.float32)
              + jnp.dot(ctx, w1c_v, preferred_element_type=jnp.float32)
              + jnp.dot(h1, w1h_v, preferred_element_type=jnp.float32) + b1_v)
        h1, c1 = _lstm_cell(g1, c1, H)
        g2 = (jnp.dot(h1, w2x_v, preferred_element_type=jnp.float32)
              + jnp.dot(h2, w2h_v, preferred_element_type=jnp.float32) + b2_v)
        h2, c2 = _lstm_cell(g2, c2, H)

        # location-sensitive attention (loc-conv fused with loc-linear as vloc taps)
        rnn_term = (jnp.dot(h1, wr1_v, preferred_element_type=jnp.float32)
                    + jnp.dot(h2, wr2_v, preferred_element_type=jnp.float32))         # (1, A)
        loc = vloc_rows[0] * ca_sc[pl.ds(0, S), :]
        for k in range(1, KL):
            loc = loc + vloc_rows[k] * ca_sc[pl.ds(k, S), :]                          # (S, A)
        energies = jnp.tanh(rnn_term + loc + penc)
        logits = jnp.dot(energies, walign_v, preferred_element_type=jnp.float32)      # (S, 1)
        logits = jnp.where(attn_mask, logits, neg_big)
        m = jnp.max(logits, axis=0, keepdims=True)
        e = jnp.exp(logits - m)
        align = e / jnp.sum(e, axis=0, keepdims=True)      # exact softmax (matches reference)
        ctx = jnp.sum(align * enc, axis=0, keepdims=True)                             # (1, E)
        ca_sc[pl.ds(LPAD, S), :] = ca_sc[pl.ds(LPAD, S), :] + align

        # fused [mel | stop] projection, one lane-dense 128-wide row per step
        ms = (jnp.dot(h2, wmsh_v, preferred_element_type=jnp.float32)
              + jnp.dot(ctx, wmsc_v, preferred_element_type=jnp.float32) + bms_v)     # (1, 128)
        out_ref[pl.ds(t, 1), :] = ms

    # --------------------- postnet (reads the slab back from VMEM) ---------------------
    mel = out_ref[pl.ds(0, T), pl.ds(0, NM)]                                          # (T, NM)
    # first layer uses Identity: reference passes a truthy positional arg as `last_layer`
    y = _conv_bn_act(mel, pw0[...], ps0[...], pb0[...], CONV_K, "none")
    y = _conv_bn_act(y, pw1[...], ps1[...], pb1[...], CONV_K, "tanh")
    y = _conv_bn_act(y, pw2[...], ps2[...], pb2[...], CONV_K, "tanh")
    y = _conv_bn_act(y, pw3[...], ps3[...], pb3[...], CONV_K, "tanh")
    y = _conv_bn_act(y, pw4[...], ps4[...], pb4[...], CONV_K, "none")
    post = jnp.dot(y, wpl[...], preferred_element_type=jnp.float32) + bpl[...]        # (T, NM)
    out_ref[pl.ds(0, T), pl.ds(NM, NM)] = mel + post                                  # residual add


def tacotron2_pallas_call(packed, text_ids, mels_cl, lengths):
    B, S, _ = text_ids.shape
    T = mels_cl.shape[1]
    NM = hps.N_MEL_FILTERBANKS
    E = hps.CHARACTER_EMB_SIZE
    L = hps.LSTM_HIDDEN_SIZE
    LPAD = (hps.ATTENTION_LOCATION_KERNEL_SIZE - 1) // 2

    def bspec(*tail):
        nd = len(tail)
        return pl.BlockSpec((None,) + tuple(tail), lambda b, lens: (b,) + (0,) * nd)

    def wspec(shape):
        nd = len(shape)
        return pl.BlockSpec(tuple(shape), lambda b, lens: (0,) * nd)

    grid_spec = pltpu.PrefetchScalarGridSpec(
        num_scalar_prefetch=1,
        grid=(B,),
        in_specs=[bspec(S, 1), bspec(T, NM)] + [wspec(w.shape) for w in packed],
        out_specs=bspec(T, OUT_W),
        scratch_shapes=[pltpu.VMEM((S, E), jnp.float32),               # conv output (LSTM input)
                        pltpu.VMEM((S, L), jnp.float32),               # forward hidden sequence
                        pltpu.VMEM((S + 1, L), jnp.float32),           # backward hidden seq (+trash row)
                        pltpu.VMEM((S + 2 * LPAD, 1), jnp.float32)],   # padded cumulative attention
    )
    # Total VMEM footprint is a few tens of KB, far below every generation's scoped limit.
    return pl.pallas_call(
        _tacotron2_kernel,
        grid_spec=grid_spec,
        out_shape=jax.ShapeDtypeStruct((B, T, OUT_W), jnp.float32),
        compiler_params=pltpu.CompilerParams(dimension_semantics=("parallel",)),
    )(lengths, text_ids, mels_cl, *packed)


# =============================== params & packing ===============================

def bn_scale_shift(c, eps=1e-5):
    scale = c["gamma"] / jnp.sqrt(c["var"] + eps)
    shift = c["beta"] - c["mean"] * scale
    return scale[None, :], shift[None, :]


def init_params(key):
    keys = jax.random.split(key, 100)
    kit = iter(keys)

    def w(shape, scale=0.1):
        return scale * jax.random.normal(next(kit), shape, dtype=jnp.float32)

    E, L, A = hps.CHARACTER_EMB_SIZE, hps.LSTM_HIDDEN_SIZE, hps.ATTENTION_DIM
    H, P, NM = hps.DECODER_RNN_HIDDEN_DIM, hps.PRENET_HIDDEN_SIZE, hps.N_MEL_FILTERBANKS
    F, PF = hps.ATTENTION_LOCATION_FILTERS, hps.POSTNET_NUM_FILTERS
    KP, KL = hps.POSTNET_KERNEL_SIZE, hps.ATTENTION_LOCATION_KERNEL_SIZE

    def lstm_params(in_dim, hid):
        return dict(w_ih=w((4 * hid, in_dim)), w_hh=w((4 * hid, hid)),
                    b_ih=w((4 * hid,), 0.05), b_hh=w((4 * hid,), 0.05))

    def bn_params(ch):
        return dict(gamma=1.0 + w((ch,), 0.05), beta=w((ch,), 0.05),
                    mean=w((ch,), 0.01), var=1.0 + jnp.abs(w((ch,), 0.05)))

    p = {}
    p["emb"] = w((CHARACTERS_NUM, E), 0.3)
    p["enc_conv"] = [dict(w=w((E, E, 5)), **bn_params(E)) for _ in range(3)]
    p["enc_lstm_f"] = lstm_params(E, L)
    p["enc_lstm_b"] = lstm_params(E, L)
    p["prenet1"] = dict(w=w((P, NM)), b=w((P,), 0.05))
    p["prenet2"] = dict(w=w((P, P)), b=w((P,), 0.05))
    p["encoder_linear"] = dict(w=w((A, 2 * L)), b=w((A,), 0.05))
    p["dec_lstm0"] = lstm_params(P + E, H)
    p["dec_lstm1"] = lstm_params(H, H)
    p["attn_loc_conv"] = w((F, 1, KL))      # torch Conv1d weight (out, in=1, K)
    p["attn_loc_lin"] = w((A, F))
    p["attn_rnn_lin"] = w((A, 2 * H))
    p["attn_align_lin"] = w((1, A))
    p["linear_projection"] = dict(w=w((NM, H + E)), b=w((NM,), 0.05))
    p["stop_projection"] = dict(w=w((1, H + E)), b=w((1,), 0.05))
    in_c = NM
    p["postnet"] = []
    for _ in range(5):
        p["postnet"].append(dict(w=w((PF, in_c, KP)), **bn_params(PF)))
        in_c = PF
    p["post_linear"] = dict(w=w((NM, PF)), b=w((NM,), 0.05))
    return p


def pack_params(p):
    """One-time (outside jit) packing of all weights into the kernel's layout."""
    E, L, A = hps.CHARACTER_EMB_SIZE, hps.LSTM_HIDDEN_SIZE, hps.ATTENTION_DIM
    H, P, NM = hps.DECODER_RNN_HIDDEN_DIM, hps.PRENET_HIDDEN_SIZE, hps.N_MEL_FILTERBANKS
    PF = hps.POSTNET_NUM_FILTERS

    packed = [p["emb"]]
    # encoder convs: (Co, Ci, K) -> (K*Ci, Co) tap-major flat weight + folded BN
    for c in p["enc_conv"]:
        scale, shift = bn_scale_shift(c)
        cin = c["w"].shape[1]
        packed += [jnp.transpose(c["w"], (2, 1, 0)).reshape(CONV_K * cin, c["w"].shape[0]),
                   scale, shift]
    # encoder bi-LSTM (split x / h weights, summed biases)
    for lp in (p["enc_lstm_f"], p["enc_lstm_b"]):
        packed += [lp["w_ih"].T, lp["w_hh"].T, (lp["b_ih"] + lp["b_hh"])[None, :]]
    # prenet + encoder_linear
    packed += [p["prenet1"]["w"].T, p["prenet1"]["b"][None, :],
               p["prenet2"]["w"].T, p["prenet2"]["b"][None, :],
               p["encoder_linear"]["w"].T, p["encoder_linear"]["b"][None, :]]
    # decoder LSTM layer 1 (input = [prenet | ctx]) with split weights
    w_ih0_t = p["dec_lstm0"]["w_ih"].T                                    # (P+E, 4H)
    packed += [w_ih0_t[:P, :], w_ih0_t[P:, :], p["dec_lstm0"]["w_hh"].T,
               (p["dec_lstm0"]["b_ih"] + p["dec_lstm0"]["b_hh"])[None, :]]
    # decoder LSTM layer 2
    packed += [p["dec_lstm1"]["w_ih"].T, p["dec_lstm1"]["w_hh"].T,
               (p["dec_lstm1"]["b_ih"] + p["dec_lstm1"]["b_hh"])[None, :]]
    # attention: rnn term (split for h1/h2), fused loc conv x loc linear, alignment vector
    wr = p["attn_rnn_lin"].T                                              # (2H, A)
    packed += [wr[:H, :], wr[H:, :]]
    vloc = jnp.einsum("fk,af->ka", p["attn_loc_conv"][:, 0, :], p["attn_loc_lin"])
    packed += [vloc, p["attn_align_lin"].T]
    # fused [mel | stop] projection into a 128-lane slab (mel at 0:NM, stop at 2*NM)
    wms = jnp.zeros((H + E, OUT_W), jnp.float32)
    wms = wms.at[:, :NM].set(p["linear_projection"]["w"].T)
    wms = wms.at[:, 2 * NM].set(p["stop_projection"]["w"][0, :])
    bms = jnp.zeros((1, OUT_W), jnp.float32)
    bms = bms.at[0, :NM].set(p["linear_projection"]["b"])
    bms = bms.at[0, 2 * NM].set(p["stop_projection"]["b"][0])
    packed += [wms[:H, :], wms[H:, :], bms]
    # postnet convs
    for c in p["postnet"]:
        scale, shift = bn_scale_shift(c)
        cin = c["w"].shape[1]
        packed += [jnp.transpose(c["w"], (2, 1, 0)).reshape(CONV_K * cin, PF), scale, shift]
    packed += [p["post_linear"]["w"].T, p["post_linear"]["b"][None, :]]
    return tuple(packed)                                                  # 53 arrays


# =============================== model forward ===============================

@jax.jit
def tacotron2_forward(packed, text, mels, lengths):
    B, S = text.shape
    NM = hps.N_MEL_FILTERBANKS
    text_ids = text.astype(jnp.int32).reshape(B, S, 1)
    mels_cl = jnp.transpose(mels, (0, 2, 1))                              # (B, T, NM)
    slab = tacotron2_pallas_call(packed, text_ids, mels_cl, lengths.astype(jnp.int32))
    result_mel = jnp.transpose(slab[:, :, :NM], (0, 2, 1))                # (B, NM, T)
    result_mel_post = jnp.transpose(slab[:, :, NM:2 * NM], (0, 2, 1))     # (B, NM, T)
    result_stops = slab[:, :, 2 * NM]                                     # (B, T)
    return result_mel, result_mel_post, result_stops


# ====================================== main ======================================

if __name__ == "__main__":
    key = jax.random.PRNGKey(0)
    pkey, tkey, mkey = jax.random.split(key, 3)
    params = init_params(pkey)
    packed = pack_params(params)        # weight packing happens ONCE, outside the jitted forward

    B, S_text, T_mel = 2, 8, 8
    text = jax.random.randint(tkey, (B, S_text), 0, CHARACTERS_NUM, dtype=jnp.int32)
    mels = jax.random.normal(mkey, (B, hps.N_MEL_FILTERBANKS, T_mel), dtype=jnp.float32)
    mask_idx = [8, 6]                   # variable lengths; max == S_text (pad_packed max length)
    lengths = jnp.asarray(mask_idx, dtype=jnp.int32)

    result_mel, result_mel_post, result_stops = tacotron2_forward(packed, text, mels, lengths)
    (result_mel, result_mel_post, result_stops) = jax.block_until_ready(
        (result_mel, result_mel_post, result_stops))

    assert result_mel.shape == (B, hps.N_MEL_FILTERBANKS, T_mel)
    assert result_mel_post.shape == (B, hps.N_MEL_FILTERBANKS, T_mel)
    assert result_stops.shape == (B, T_mel)
    assert bool(jnp.all(jnp.isfinite(result_mel)))
    assert bool(jnp.all(jnp.isfinite(result_mel_post)))
    assert bool(jnp.all(jnp.isfinite(result_stops)))
    print("KERNEL_OK")
</pallas_src>

<mosaic_0001>
module attributes {stable_mosaic.version = 11 : i64} {
  func.func @_tacotron2_kernel(%arg0: i32, %arg1: memref<2xi32, #tpu.memory_space<smem>>, %arg2: memref<1x8x1xi32, #tpu.memory_space<vmem>>, %arg3: memref<1x8x16xf32, #tpu.memory_space<vmem>>, %arg4: memref<40x32xf32, #tpu.memory_space<vmem>>, %arg5: memref<160x32xf32, #tpu.memory_space<vmem>>, %arg6: memref<1x32xf32, #tpu.memory_space<vmem>>, %arg7: memref<1x32xf32, #tpu.memory_space<vmem>>, %arg8: memref<160x32xf32, #tpu.memory_space<vmem>>, %arg9: memref<1x32xf32, #tpu.memory_space<vmem>>, %arg10: memref<1x32xf32, #tpu.memory_space<vmem>>, %arg11: memref<160x32xf32, #tpu.memory_space<vmem>>, %arg12: memref<1x32xf32, #tpu.memory_space<vmem>>, %arg13: memref<1x32xf32, #tpu.memory_space<vmem>>, %arg14: memref<32x64xf32, #tpu.memory_space<vmem>>, %arg15: memref<16x64xf32, #tpu.memory_space<vmem>>, %arg16: memref<1x64xf32, #tpu.memory_space<vmem>>, %arg17: memref<32x64xf32, #tpu.memory_space<vmem>>, %arg18: memref<16x64xf32, #tpu.memory_space<vmem>>, %arg19: memref<1x64xf32, #tpu.memory_space<vmem>>, %arg20: memref<16x32xf32, #tpu.memory_space<vmem>>, %arg21: memref<1x32xf32, #tpu.memory_space<vmem>>, %arg22: memref<32x32xf32, #tpu.memory_space<vmem>>, %arg23: memref<1x32xf32, #tpu.memory_space<vmem>>, %arg24: memref<32x32xf32, #tpu.memory_space<vmem>>, %arg25: memref<1x32xf32, #tpu.memory_space<vmem>>, %arg26: memref<32x128xf32, #tpu.memory_space<vmem>>, %arg27: memref<32x128xf32, #tpu.memory_space<vmem>>, %arg28: memref<32x128xf32, #tpu.memory_space<vmem>>, %arg29: memref<1x128xf32, #tpu.memory_space<vmem>>, %arg30: memref<32x128xf32, #tpu.memory_space<vmem>>, %arg31: memref<32x128xf32, #tpu.memory_space<vmem>>, %arg32: memref<1x128xf32, #tpu.memory_space<vmem>>, %arg33: memref<32x32xf32, #tpu.memory_space<vmem>>, %arg34: memref<32x32xf32, #tpu.memory_space<vmem>>, %arg35: memref<5x32xf32, #tpu.memory_space<vmem>>, %arg36: memref<32x1xf32, #tpu.memory_space<vmem>>, %arg37: memref<32x128xf32, #tpu.memory_space<vmem>>, %arg38: memref<32x128xf32, #tpu.memory_space<vmem>>, %arg39: memref<1x128xf32, #tpu.memory_space<vmem>>, %arg40: memref<80x32xf32, #tpu.memory_space<vmem>>, %arg41: memref<1x32xf32, #tpu.memory_space<vmem>>, %arg42: memref<1x32xf32, #tpu.memory_space<vmem>>, %arg43: memref<160x32xf32, #tpu.memory_space<vmem>>, %arg44: memref<1x32xf32, #tpu.memory_space<vmem>>, %arg45: memref<1x32xf32, #tpu.memory_space<vmem>>, %arg46: memref<160x32xf32, #tpu.memory_space<vmem>>, %arg47: memref<1x32xf32, #tpu.memory_space<vmem>>, %arg48: memref<1x32xf32, #tpu.memory_space<vmem>>, %arg49: memref<160x32xf32, #tpu.memory_space<vmem>>, %arg50: memref<1x32xf32, #tpu.memory_space<vmem>>, %arg51: memref<1x32xf32, #tpu.memory_space<vmem>>, %arg52: memref<160x32xf32, #tpu.memory_space<vmem>>, %arg53: memref<1x32xf32, #tpu.memory_space<vmem>>, %arg54: memref<1x32xf32, #tpu.memory_space<vmem>>, %arg55: memref<32x16xf32, #tpu.memory_space<vmem>>, %arg56: memref<1x16xf32, #tpu.memory_space<vmem>>, %arg57: memref<1x8x128xf32, #tpu.memory_space<vmem>>, %arg58: memref<8x32xf32, #tpu.memory_space<vmem>>, %arg59: memref<8x16xf32, #tpu.memory_space<vmem>>, %arg60: memref<9x16xf32, #tpu.memory_space<vmem>>, %arg61: memref<12x1xf32, #tpu.memory_space<vmem>>) attributes {dimension_semantics = [#tpu.dimension_semantics<parallel>], iteration_bounds = array<i64: 2>, scalar_prefetch = 1 : i64, scratch_operands = 4 : i64, tpu.core_type = #tpu.core_type<tc>, window_params = [{transform_indices = @transform_0, window_bounds = array<i64: 1, 8, 1>}, {transform_indices = @transform_1, window_bounds = array<i64: 1, 8, 16>}, {pipeline_mode = #tpu.pipeline_mode<synchronous>, transform_indices = @transform_2, window_bounds = array<i64: 40, 32>}, {pipeline_mode = #tpu.pipeline_mode<synchronous>, transform_indices = @transform_3, window_bounds = array<i64: 160, 32>}, {pipeline_mode = #tpu.pipeline_mode<synchronous>, transform_indices = @transform_4, window_bounds = array<i64: 1, 32>}, {pipeline_mode = #tpu.pipeline_mode<synchronous>, transform_indices = @transform_5, window_bounds = array<i64: 1, 32>}, {pipeline_mode = #tpu.pipeline_mode<synchronous>, transform_indices = @transform_6, window_bounds = array<i64: 160, 32>}, {pipeline_mode = #tpu.pipeline_mode<synchronous>, transform_indices = @transform_7, window_bounds = array<i64: 1, 32>}, {pipeline_mode = #tpu.pipeline_mode<synchronous>, transform_indices = @transform_8, window_bounds = array<i64: 1, 32>}, {pipeline_mode = #tpu.pipeline_mode<synchronous>, transform_indices = @transform_9, window_bounds = array<i64: 160, 32>}, {pipeline_mode = #tpu.pipeline_mode<synchronous>, transform_indices = @transform_10, window_bounds = array<i64: 1, 32>}, {pipeline_mode = #tpu.pipeline_mode<synchronous>, transform_indices = @transform_11, window_bounds = array<i64: 1, 32>}, {pipeline_mode = #tpu.pipeline_mode<synchronous>, transform_indices = @transform_12, window_bounds = array<i64: 32, 64>}, {pipeline_mode = #tpu.pipeline_mode<synchronous>, transform_indices = @transform_13, window_bounds = array<i64: 16, 64>}, {pipeline_mode = #tpu.pipeline_mode<synchronous>, transform_indices = @transform_14, window_bounds = array<i64: 1, 64>}, {pipeline_mode = #tpu.pipeline_mode<synchronous>, transform_indices = @transform_15, window_bounds = array<i64: 32, 64>}, {pipeline_mode = #tpu.pipeline_mode<synchronous>, transform_indices = @transform_16, window_bounds = array<i64: 16, 64>}, {pipeline_mode = #tpu.pipeline_mode<synchronous>, transform_indices = @transform_17, window_bounds = array<i64: 1, 64>}, {pipeline_mode = #tpu.pipeline_mode<synchronous>, transform_indices = @transform_18, window_bounds = array<i64: 16, 32>}, {pipeline_mode = #tpu.pipeline_mode<synchronous>, transform_indices = @transform_19, window_bounds = array<i64: 1, 32>}, {pipeline_mode = #tpu.pipeline_mode<synchronous>, transform_indices = @transform_20, window_bounds = array<i64: 32, 32>}, {pipeline_mode = #tpu.pipeline_mode<synchronous>, transform_indices = @transform_21, window_bounds = array<i64: 1, 32>}, {pipeline_mode = #tpu.pipeline_mode<synchronous>, transform_indices = @transform_22, window_bounds = array<i64: 32, 32>}, {pipeline_mode = #tpu.pipeline_mode<synchronous>, transform_indices = @transform_23, window_bounds = array<i64: 1, 32>}, {pipeline_mode = #tpu.pipeline_mode<synchronous>, transform_indices = @transform_24, window_bounds = array<i64: 32, 128>}, {pipeline_mode = #tpu.pipeline_mode<synchronous>, transform_indices = @transform_25, window_bounds = array<i64: 32, 128>}, {pipeline_mode = #tpu.pipeline_mode<synchronous>, transform_indices = @transform_26, window_bounds = array<i64: 32, 128>}, {pipeline_mode = #tpu.pipeline_mode<synchronous>, transform_indices = @transform_27, window_bounds = array<i64: 1, 128>}, {pipeline_mode = #tpu.pipeline_mode<synchronous>, transform_indices = @transform_28, window_bounds = array<i64: 32, 128>}, {pipeline_mode = #tpu.pipeline_mode<synchronous>, transform_indices = @transform_29, window_bounds = array<i64: 32, 128>}, {pipeline_mode = #tpu.pipeline_mode<synchronous>, transform_indices = @transform_30, window_bounds = array<i64: 1, 128>}, {pipeline_mode = #tpu.pipeline_mode<synchronous>, transform_indices = @transform_31, window_bounds = array<i64: 32, 32>}, {pipeline_mode = #tpu.pipeline_mode<synchronous>, transform_indices = @transform_32, window_bounds = array<i64: 32, 32>}, {pipeline_mode = #tpu.pipeline_mode<synchronous>, transform_indices = @transform_33, window_bounds = array<i64: 5, 32>}, {pipeline_mode = #tpu.pipeline_mode<synchronous>, transform_indices = @transform_34, window_bounds = array<i64: 32, 1>}, {pipeline_mode = #tpu.pipeline_mode<synchronous>, transform_indices = @transform_35, window_bounds = array<i64: 32, 128>}, {pipeline_mode = #tpu.pipeline_mode<synchronous>, transform_indices = @transform_36, window_bounds = array<i64: 32, 128>}, {pipeline_mode = #tpu.pipeline_mode<synchronous>, transform_indices = @transform_37, window_bounds = array<i64: 1, 128>}, {pipeline_mode = #tpu.pipeline_mode<synchronous>, transform_indices = @transform_38, window_bounds = array<i64: 80, 32>}, {pipeline_mode = #tpu.pipeline_mode<synchronous>, transform_indices = @transform_39, window_bounds = array<i64: 1, 32>}, {pipeline_mode = #tpu.pipeline_mode<synchronous>, transform_indices = @transform_40, window_bounds = array<i64: 1, 32>}, {pipeline_mode = #tpu.pipeline_mode<synchronous>, transform_indices = @transform_41, window_bounds = array<i64: 160, 32>}, {pipeline_mode = #tpu.pipeline_mode<synchronous>, transform_indices = @transform_42, window_bounds = array<i64: 1, 32>}, {pipeline_mode = #tpu.pipeline_mode<synchronous>, transform_indices = @transform_43, window_bounds = array<i64: 1, 32>}, {pipeline_mode = #tpu.pipeline_mode<synchronous>, transform_indices = @transform_44, window_bounds = array<i64: 160, 32>}, {pipeline_mode = #tpu.pipeline_mode<synchronous>, transform_indices = @transform_45, window_bounds = array<i64: 1, 32>}, {pipeline_mode = #tpu.pipeline_mode<synchronous>, transform_indices = @transform_46, window_bounds = array<i64: 1, 32>}, {pipeline_mode = #tpu.pipeline_mode<synchronous>, transform_indices = @transform_47, window_bounds = array<i64: 160, 32>}, {pipeline_mode = #tpu.pipeline_mode<synchronous>, transform_indices = @transform_48, window_bounds = array<i64: 1, 32>}, {pipeline_mode = #tpu.pipeline_mode<synchronous>, transform_indices = @transform_49, window_bounds = array<i64: 1, 32>}, {pipeline_mode = #tpu.pipeline_mode<synchronous>, transform_indices = @transform_50, window_bounds = array<i64: 160, 32>}, {pipeline_mode = #tpu.pipeline_mode<synchronous>, transform_indices = @transform_51, window_bounds = array<i64: 1, 32>}, {pipeline_mode = #tpu.pipeline_mode<synchronous>, transform_indices = @transform_52, window_bounds = array<i64: 1, 32>}, {pipeline_mode = #tpu.pipeline_mode<synchronous>, transform_indices = @transform_53, window_bounds = array<i64: 32, 16>}, {pipeline_mode = #tpu.pipeline_mode<synchronous>, transform_indices = @transform_54, window_bounds = array<i64: 1, 16>}, {transform_indices = @transform_55, window_bounds = array<i64: 1, 8, 128>}]} {
    %0 = arith.index_cast %arg0 : i32 to index
    %1 = memref.load %arg1[%0] : memref<2xi32, #tpu.memory_space<smem>>
    %c0 = arith.constant 0 : index
    %c0_0 = arith.constant 0 : index
    %c0_1 = arith.constant 0 : index
    %2 = vector.load %arg2[%c0, %c0_0, %c0_1] : memref<1x8x1xi32, #tpu.memory_space<vmem>>, vector<1x8x1xi32>
    %3 = vector.shape_cast %2 : vector<1x8x1xi32> to vector<8x1xi32>
    %4 = tpu.iota {dimensions = array<i32: 1>} : vector<8x40xi32>
    %5 = vector.broadcast %3 : vector<8x1xi32> to vector<8x40xi32>
    %6 = arith.cmpi eq, %4, %5 : vector<8x40xi32>
    %7 = arith.extui %6 : vector<8x40xi1> to vector<8x40xi32>
    %8 = arith.sitofp %7 : vector<8x40xi32> to vector<8x40xf32>
    %c0_2 = arith.constant 0 : index
    %c0_3 = arith.constant 0 : index
    %9 = vector.load %arg4[%c0_2, %c0_3] : memref<40x32xf32, #tpu.memory_space<vmem>>, vector<40x32xf32>
    %cst = arith.constant dense<0.000000e+00> : vector<8x32xf32>
    %10 = tpu.matmul %8, %9, %cst {dimension_numbers = #tpu.dot_dimension_numbers<[1], [0], [0], [1], [0, 0, 1, 1], [], []>} : vector<8x40xf32>, vector<40x32xf32>, vector<8x32xf32> -> vector<8x32xf32>
    %c0_4 = arith.constant 0 : index
    %c0_5 = arith.constant 0 : index
    %11 = vector.load %arg5[%c0_4, %c0_5] : memref<160x32xf32, #tpu.memory_space<vmem>>, vector<160x32xf32>
    %c0_6 = arith.constant 0 : index
    %c0_7 = arith.constant 0 : index
    %12 = vector.load %arg6[%c0_6, %c0_7] : memref<1x32xf32, #tpu.memory_space<vmem>>, vector<1x32xf32>
    %c0_8 = arith.constant 0 : index
    %c0_9 = arith.constant 0 : index
    %13 = vector.load %arg7[%c0_8, %c0_9] : memref<1x32xf32, #tpu.memory_space<vmem>>, vector<1x32xf32>
    %cst_10 = arith.constant 0.000000e+00 : f32
    %14 = vector.broadcast %cst_10 : f32 to vector<2x32xf32>
    %15 = tpu.concatenate %14, %10, %14 in 0 : vector<2x32xf32>, vector<8x32xf32>, vector<2x32xf32> -> vector<12x32xf32>
    %16 = vector.extract_strided_slice %15 {offsets = [0, 0], sizes = [8, 32], strides = [1, 1]} : vector<12x32xf32> to vector<8x32xf32>
    %17 = vector.extract_strided_slice %11 {offsets = [0, 0], sizes = [32, 32], strides = [1, 1]} : vector<160x32xf32> to vector<32x32xf32>
    %cst_11 = arith.constant dense<0.000000e+00> : vector<8x32xf32>
    %18 = tpu.matmul %16, %17, %cst_11 {dimension_numbers = #tpu.dot_dimension_numbers<[1], [0], [0], [1], [0, 0, 1, 1], [], []>} : vector<8x32xf32>, vector<32x32xf32>, vector<8x32xf32> -> vector<8x32xf32>
    %19 = vector.extract_strided_slice %15 {offsets = [1, 0], sizes = [8, 32], strides = [1, 1]} : vector<12x32xf32> to vector<8x32xf32>
    %20 = vector.extract_strided_slice %11 {offsets = [32, 0], sizes = [32, 32], strides = [1, 1]} : vector<160x32xf32> to vector<32x32xf32>
    %cst_12 = arith.constant dense<0.000000e+00> : vector<8x32xf32>
    %21 = tpu.matmul %19, %20, %cst_12 {dimension_numbers = #tpu.dot_dimension_numbers<[1], [0], [0], [1], [0, 0, 1, 1], [], []>} : vector<8x32xf32>, vector<32x32xf32>, vector<8x32xf32> -> vector<8x32xf32>
    %22 = arith.addf %18, %21 : vector<8x32xf32>
    %23 = vector.extract_strided_slice %15 {offsets = [2, 0], sizes = [8, 32], strides = [1, 1]} : vector<12x32xf32> to vector<8x32xf32>
    %24 = vector.extract_strided_slice %11 {offsets = [64, 0], sizes = [32, 32], strides = [1, 1]} : vector<160x32xf32> to vector<32x32xf32>
    %cst_13 = arith.constant dense<0.000000e+00> : vector<8x32xf32>
    %25 = tpu.matmul %23, %24, %cst_13 {dimension_numbers = #tpu.dot_dimension_numbers<[1], [0], [0], [1], [0, 0, 1, 1], [], []>} : vector<8x32xf32>, vector<32x32xf32>, vector<8x32xf32> -> vector<8x32xf32>
    %26 = arith.addf %22, %25 : vector<8x32xf32>
    %27 = vector.extract_strided_slice %15 {offsets = [3, 0], sizes = [8, 32], strides = [1, 1]} : vector<12x32xf32> to vector<8x32xf32>
    %28 = vector.extract_strided_slice %11 {offsets = [96, 0], sizes = [32, 32], strides = [1, 1]} : vector<160x32xf32> to vector<32x32xf32>
    %cst_14 = arith.constant dense<0.000000e+00> : vector<8x32xf32>
    %29 = tpu.matmul %27, %28, %cst_14 {dimension_numbers = #tpu.dot_dimension_numbers<[1], [0], [0], [1], [0, 0, 1, 1], [], []>} : vector<8x32xf32>, vector<32x32xf32>, vector<8x32xf32> -> vector<8x32xf32>
    %30 = arith.addf %26, %29 : vector<8x32xf32>
    %31 = vector.extract_strided_slice %15 {offsets = [4, 0], sizes = [8, 32], strides = [1, 1]} : vector<12x32xf32> to vector<8x32xf32>
    %32 = vector.extract_strided_slice %11 {offsets = [128, 0], sizes = [32, 32], strides = [1, 1]} : vector<160x32xf32> to vector<32x32xf32>
    %cst_15 = arith.constant dense<0.000000e+00> : vector<8x32xf32>
    %33 = tpu.matmul %31, %32, %cst_15 {dimension_numbers = #tpu.dot_dimension_numbers<[1], [0], [0], [1], [0, 0, 1, 1], [], []>} : vector<8x32xf32>, vector<32x32xf32>, vector<8x32xf32> -> vector<8x32xf32>
    %34 = arith.addf %30, %33 : vector<8x32xf32>
    %35 = vector.broadcast %12 : vector<1x32xf32> to vector<8x32xf32>
    %36 = arith.mulf %34, %35 : vector<8x32xf32>
    %37 = vector.broadcast %13 : vector<1x32xf32> to vector<8x32xf32>
    %38 = arith.addf %36, %37 : vector<8x32xf32>
    %cst_16 = arith.constant 0.000000e+00 : f32
    %39 = vector.broadcast %cst_16 : f32 to vector<8x32xf32>
    %40 = arith.maximumf %38, %39 : vector<8x32xf32>
    %c0_17 = arith.constant 0 : index
    %c0_18 = arith.constant 0 : index
    %41 = vector.load %arg8[%c0_17, %c0_18] : memref<160x32xf32, #tpu.memory_space<vmem>>, vector<160x32xf32>
    %c0_19 = arith.constant 0 : index
    %c0_20 = arith.constant 0 : index
    %42 = vector.load %arg9[%c0_19, %c0_20] : memref<1x32xf32, #tpu.memory_space<vmem>>, vector<1x32xf32>
    %c0_21 = arith.constant 0 : index
    %c0_22 = arith.constant 0 : index
    %43 = vector.load %arg10[%c0_21, %c0_22] : memref<1x32xf32, #tpu.memory_space<vmem>>, vector<1x32xf32>
    %cst_23 = arith.constant 0.000000e+00 : f32
    %44 = vector.broadcast %cst_23 : f32 to vector<2x32xf32>
    %45 = tpu.concatenate %44, %40, %44 in 0 : vector<2x32xf32>, vector<8x32xf32>, vector<2x32xf32> -> vector<12x32xf32>
    %46 = vector.extract_strided_slice %45 {offsets = [0, 0], sizes = [8, 32], strides = [1, 1]} : vector<12x32xf32> to vector<8x32xf32>
    %47 = vector.extract_strided_slice %41 {offsets = [0, 0], sizes = [32, 32], strides = [1, 1]} : vector<160x32xf32> to vector<32x32xf32>
    %cst_24 = arith.constant dense<0.000000e+00> : vector<8x32xf32>
    %48 = tpu.matmul %46, %47, %cst_24 {dimension_numbers = #tpu.dot_dimension_numbers<[1], [0], [0], [1], [0, 0, 1, 1], [], []>} : vector<8x32xf32>, vector<32x32xf32>, vector<8x32xf32> -> vector<8x32xf32>
    %49 = vector.extract_strided_slice %45 {offsets = [1, 0], sizes = [8, 32], strides = [1, 1]} : vector<12x32xf32> to vector<8x32xf32>
    %50 = vector.extract_strided_slice %41 {offsets = [32, 0], sizes = [32, 32], strides = [1, 1]} : vector<160x32xf32> to vector<32x32xf32>
    %cst_25 = arith.constant dense<0.000000e+00> : vector<8x32xf32>
    %51 = tpu.matmul %49, %50, %cst_25 {dimension_numbers = #tpu.dot_dimension_numbers<[1], [0], [0], [1], [0, 0, 1, 1], [], []>} : vector<8x32xf32>, vector<32x32xf32>, vector<8x32xf32> -> vector<8x32xf32>
    %52 = arith.addf %48, %51 : vector<8x32xf32>
    %53 = vector.extract_strided_slice %45 {offsets = [2, 0], sizes = [8, 32], strides = [1, 1]} : vector<12x32xf32> to vector<8x32xf32>
    %54 = vector.extract_strided_slice %41 {offsets = [64, 0], sizes = [32, 32], strides = [1, 1]} : vector<160x32xf32> to vector<32x32xf32>
    %cst_26 = arith.constant dense<0.000000e+00> : vector<8x32xf32>
    %55 = tpu.matmul %53, %54, %cst_26 {dimension_numbers = #tpu.dot_dimension_numbers<[1], [0], [0], [1], [0, 0, 1, 1], [], []>} : vector<8x32xf32>, vector<32x32xf32>, vector<8x32xf32> -> vector<8x32xf32>
    %56 = arith.addf %52, %55 : vector<8x32xf32>
    %57 = vector.extract_strided_slice %45 {offsets = [3, 0], sizes = [8, 32], strides = [1, 1]} : vector<12x32xf32> to vector<8x32xf32>
    %58 = vector.extract_strided_slice %41 {offsets = [96, 0], sizes = [32, 32], strides = [1, 1]} : vector<160x32xf32> to vector<32x32xf32>
    %cst_27 = arith.constant dense<0.000000e+00> : vector<8x32xf32>
    %59 = tpu.matmul %57, %58, %cst_27 {dimension_numbers = #tpu.dot_dimension_numbers<[1], [0], [0], [1], [0, 0, 1, 1], [], []>} : vector<8x32xf32>, vector<32x32xf32>, vector<8x32xf32> -> vector<8x32xf32>
    %60 = arith.addf %56, %59 : vector<8x32xf32>
    %61 = vector.extract_strided_slice %45 {offsets = [4, 0], sizes = [8, 32], strides = [1, 1]} : vector<12x32xf32> to vector<8x32xf32>
    %62 = vector.extract_strided_slice %41 {offsets = [128, 0], sizes = [32, 32], strides = [1, 1]} : vector<160x32xf32> to vector<32x32xf32>
    %cst_28 = arith.constant dense<0.000000e+00> : vector<8x32xf32>
    %63 = tpu.matmul %61, %62, %cst_28 {dimension_numbers = #tpu.dot_dimension_numbers<[1], [0], [0], [1], [0, 0, 1, 1], [], []>} : vector<8x32xf32>, vector<32x32xf32>, vector<8x32xf32> -> vector<8x32xf32>
    %64 = arith.addf %60, %63 : vector<8x32xf32>
    %65 = vector.broadcast %42 : vector<1x32xf32> to vector<8x32xf32>
    %66 = arith.mulf %64, %65 : vector<8x32xf32>
    %67 = vector.broadcast %43 : vector<1x32xf32> to vector<8x32xf32>
    %68 = arith.addf %66, %67 : vector<8x32xf32>
    %cst_29 = arith.constant 0.000000e+00 : f32
    %69 = vector.broadcast %cst_29 : f32 to vector<8x32xf32>
    %70 = arith.maximumf %68, %69 : vector<8x32xf32>
    %c0_30 = arith.constant 0 : index
    %c0_31 = arith.constant 0 : index
    %71 = vector.load %arg11[%c0_30, %c0_31] : memref<160x32xf32, #tpu.memory_space<vmem>>, vector<160x32xf32>
    %c0_32 = arith.constant 0 : index
    %c0_33 = arith.constant 0 : index
    %72 = vector.load %arg12[%c0_32, %c0_33] : memref<1x32xf32, #tpu.memory_space<vmem>>, vector<1x32xf32>
    %c0_34 = arith.constant 0 : index
    %c0_35 = arith.constant 0 : index
    %73 = vector.load %arg13[%c0_34, %c0_35] : memref<1x32xf32, #tpu.memory_space<vmem>>, vector<1x32xf32>
    %cst_36 = arith.constant 0.000000e+00 : f32
    %74 = vector.broadcast %cst_36 : f32 to vector<2x32xf32>
    %75 = tpu.concatenate %74, %70, %74 in 0 : vector<2x32xf32>, vector<8x32xf32>, vector<2x32xf32> -> vector<12x32xf32>
    %76 = vector.extract_strided_slice %75 {offsets = [0, 0], sizes = [8, 32], strides = [1, 1]} : vector<12x32xf32> to vector<8x32xf32>
    %77 = vector.extract_strided_slice %71 {offsets = [0, 0], sizes = [32, 32], strides = [1, 1]} : vector<160x32xf32> to vector<32x32xf32>
    %cst_37 = arith.constant dense<0.000000e+00> : vector<8x32xf32>
    %78 = tpu.matmul %76, %77, %cst_37 {dimension_numbers = #tpu.dot_dimension_numbers<[1], [0], [0], [1], [0, 0, 1, 1], [], []>} : vector<8x32xf32>, vector<32x32xf32>, vector<8x32xf32> -> vector<8x32xf32>
    %79 = vector.extract_strided_slice %75 {offsets = [1, 0], sizes = [8, 32], strides = [1, 1]} : vector<12x32xf32> to vector<8x32xf32>
    %80 = vector.extract_strided_slice %71 {offsets = [32, 0], sizes = [32, 32], strides = [1, 1]} : vector<160x32xf32> to vector<32x32xf32>
    %cst_38 = arith.constant dense<0.000000e+00> : vector<8x32xf32>
    %81 = tpu.matmul %79, %80, %cst_38 {dimension_numbers = #tpu.dot_dimension_numbers<[1], [0], [0], [1], [0, 0, 1, 1], [], []>} : vector<8x32xf32>, vector<32x32xf32>, vector<8x32xf32> -> vector<8x32xf32>
    %82 = arith.addf %78, %81 : vector<8x32xf32>
    %83 = vector.extract_strided_slice %75 {offsets = [2, 0], sizes = [8, 32], strides = [1, 1]} : vector<12x32xf32> to vector<8x32xf32>
    %84 = vector.extract_strided_slice %71 {offsets = [64, 0], sizes = [32, 32], strides = [1, 1]} : vector<160x32xf32> to vector<32x32xf32>
    %cst_39 = arith.constant dense<0.000000e+00> : vector<8x32xf32>
    %85 = tpu.matmul %83, %84, %cst_39 {dimension_numbers = #tpu.dot_dimension_numbers<[1], [0], [0], [1], [0, 0, 1, 1], [], []>} : vector<8x32xf32>, vector<32x32xf32>, vector<8x32xf32> -> vector<8x32xf32>
    %86 = arith.addf %82, %85 : vector<8x32xf32>
    %87 = vector.extract_strided_slice %75 {offsets = [3, 0], sizes = [8, 32], strides = [1, 1]} : vector<12x32xf32> to vector<8x32xf32>
    %88 = vector.extract_strided_slice %71 {offsets = [96, 0], sizes = [32, 32], strides = [1, 1]} : vector<160x32xf32> to vector<32x32xf32>
    %cst_40 = arith.constant dense<0.000000e+00> : vector<8x32xf32>
    %89 = tpu.matmul %87, %88, %cst_40 {dimension_numbers = #tpu.dot_dimension_numbers<[1], [0], [0], [1], [0, 0, 1, 1], [], []>} : vector<8x32xf32>, vector<32x32xf32>, vector<8x32xf32> -> vector<8x32xf32>
    %90 = arith.addf %86, %89 : vector<8x32xf32>
    %91 = vector.extract_strided_slice %75 {offsets = [4, 0], sizes = [8, 32], strides = [1, 1]} : vector<12x32xf32> to vector<8x32xf32>
    %92 = vector.extract_strided_slice %71 {offsets = [128, 0], sizes = [32, 32], strides = [1, 1]} : vector<160x32xf32> to vector<32x32xf32>
    %cst_41 = arith.constant dense<0.000000e+00> : vector<8x32xf32>
    %93 = tpu.matmul %91, %92, %cst_41 {dimension_numbers = #tpu.dot_dimension_numbers<[1], [0], [0], [1], [0, 0, 1, 1], [], []>} : vector<8x32xf32>, vector<32x32xf32>, vector<8x32xf32> -> vector<8x32xf32>
    %94 = arith.addf %90, %93 : vector<8x32xf32>
    %95 = vector.broadcast %72 : vector<1x32xf32> to vector<8x32xf32>
    %96 = arith.mulf %94, %95 : vector<8x32xf32>
    %97 = vector.broadcast %73 : vector<1x32xf32> to vector<8x32xf32>
    %98 = arith.addf %96, %97 : vector<8x32xf32>
    %cst_42 = arith.constant 0.000000e+00 : f32
    %99 = vector.broadcast %cst_42 : f32 to vector<8x32xf32>
    %100 = arith.maximumf %98, %99 : vector<8x32xf32>
    %c0_43 = arith.constant 0 : index
    %c0_44 = arith.constant 0 : index
    %101 = vector.load %arg58[%c0_43, %c0_44] : memref<8x32xf32, #tpu.memory_space<vmem>>, vector<8x32xf32>
    tpu.vector_store %arg58[%c0_43, %c0_44], %100 {strides = array<i32>} : memref<8x32xf32, #tpu.memory_space<vmem>>, vector<8x32xf32>,
    %cst_45 = arith.constant 0.000000e+00 : f32
    %102 = vector.broadcast %cst_45 : f32 to vector<8x16xf32>
    %c0_46 = arith.constant 0 : index
    %c0_47 = arith.constant 0 : index
    %103 = vector.load %arg59[%c0_46, %c0_47] : memref<8x16xf32, #tpu.memory_space<vmem>>, vector<8x16xf32>
    tpu.vector_store %arg59[%c0_46, %c0_47], %102 {strides = array<i32>} : memref<8x16xf32, #tpu.memory_space<vmem>>, vector<8x16xf32>,
    %cst_48 = arith.constant 0.000000e+00 : f32
    %104 = vector.broadcast %cst_48 : f32 to vector<9x16xf32>
    %c0_49 = arith.constant 0 : index
    %c0_50 = arith.constant 0 : index
    %105 = vector.load %arg60[%c0_49, %c0_50] : memref<9x16xf32, #tpu.memory_space<vmem>>, vector<9x16xf32>
    tpu.vector_store %arg60[%c0_49, %c0_50], %104 {strides = array<i32>} : memref<9x16xf32, #tpu.memory_space<vmem>>, vector<9x16xf32>,
    %c0_51 = arith.constant 0 : index
    %c0_52 = arith.constant 0 : index
    %106 = vector.load %arg14[%c0_51, %c0_52] : memref<32x64xf32, #tpu.memory_space<vmem>>, vector<32x64xf32>
    %c0_53 = arith.constant 0 : index
    %c0_54 = arith.constant 0 : index
    %107 = vector.load %arg15[%c0_53, %c0_54] : memref<16x64xf32, #tpu.memory_space<vmem>>, vector<16x64xf32>
    %c0_55 = arith.constant 0 : index
    %c0_56 = arith.constant 0 : index
    %108 = vector.load %arg16[%c0_55, %c0_56] : memref<1x64xf32, #tpu.memory_space<vmem>>, vector<1x64xf32>
    %c0_57 = arith.constant 0 : index
    %c0_58 = arith.constant 0 : index
    %109 = vector.load %arg17[%c0_57, %c0_58] : memref<32x64xf32, #tpu.memory_space<vmem>>, vector<32x64xf32>
    %c0_59 = arith.constant 0 : index
    %c0_60 = arith.constant 0 : index
    %110 = vector.load %arg18[%c0_59, %c0_60] : memref<16x64xf32, #tpu.memory_space<vmem>>, vector<16x64xf32>
    %c0_61 = arith.constant 0 : index
    %c0_62 = arith.constant 0 : index
    %111 = vector.load %arg19[%c0_61, %c0_62] : memref<1x64xf32, #tpu.memory_space<vmem>>, vector<1x64xf32>
    %cst_63 = arith.constant 0.000000e+00 : f32
    %112 = vector.broadcast %cst_63 : f32 to vector<1x16xf32>
    %c0_i32 = arith.constant 0 : i32
    %113 = arith.cmpi sgt, %1, %c0_i32 : i32
    %114 = vector.extract_strided_slice %100 {offsets = [0, 0], sizes = [1, 32], strides = [1, 1]} : vector<8x32xf32> to vector<1x32xf32>
    %cst_64 = arith.constant dense<0.000000e+00> : vector<1x64xf32>
    %115 = tpu.matmul %114, %106, %cst_64 {dimension_numbers = #tpu.dot_dimension_numbers<[1], [0], [0], [1], [0, 0, 1, 1], [], []>} : vector<1x32xf32>, vector<32x64xf32>, vector<1x64xf32> -> vector<1x64xf32>
    %cst_65 = arith.constant dense<0.000000e+00> : vector<1x64xf32>
    %116 = tpu.matmul %112, %107, %cst_65 {dimension_numbers = #tpu.dot_dimension_numbers<[1], [0], [0], [1], [0, 0, 1, 1], [], []>} : vector<1x16xf32>, vector<16x64xf32>, vector<1x64xf32> -> vector<1x64xf32>
    %117 = arith.addf %115, %116 : vector<1x64xf32>
    %118 = arith.addf %117, %108 : vector<1x64xf32>
    %119 = vector.extract_strided_slice %118 {offsets = [0, 0], sizes = [1, 16], strides = [1, 1]} : vector<1x64xf32> to vector<1x16xf32>
    %120 = arith.negf %119 : vector<1x16xf32>
    %121 = math.exp %120 : vector<1x16xf32>
    %cst_66 = arith.constant 1.000000e+00 : f32
    %122 = vector.broadcast %cst_66 : f32 to vector<1x16xf32>
    %123 = arith.addf %122, %121 : vector<1x16xf32>
    %124 = arith.divf %122, %123 : vector<1x16xf32>
    %125 = vector.extract_strided_slice %118 {offsets = [0, 16], sizes = [1, 16], strides = [1, 1]} : vector<1x64xf32> to vector<1x16xf32>
    %126 = arith.negf %125 : vector<1x16xf32>
    %127 = math.exp %126 : vector<1x16xf32>
    %cst_67 = arith.constant 1.000000e+00 : f32
    %128 = vector.broadcast %cst_67 : f32 to vector<1x16xf32>
    %129 = arith.addf %128, %127 : vector<1x16xf32>
    %130 = arith.divf %128, %129 : vector<1x16xf32>
    %131 = vector.extract_strided_slice %118 {offsets = [0, 32], sizes = [1, 16], strides = [1, 1]} : vector<1x64xf32> to vector<1x16xf32>
    %132 = math.tanh %131 : vector<1x16xf32>
    %133 = vector.extract_strided_slice %118 {offsets = [0, 48], sizes = [1, 16], strides = [1, 1]} : vector<1x64xf32> to vector<1x16xf32>
    %134 = arith.negf %133 : vector<1x16xf32>
    %135 = math.exp %134 : vector<1x16xf32>
    %cst_68 = arith.constant 1.000000e+00 : f32
    %136 = vector.broadcast %cst_68 : f32 to vector<1x16xf32>
    %137 = arith.addf %136, %135 : vector<1x16xf32>
    %138 = arith.divf %136, %137 : vector<1x16xf32>
    %139 = arith.mulf %130, %112 : vector<1x16xf32>
    %140 = arith.mulf %124, %132 : vector<1x16xf32>
    %141 = arith.addf %139, %140 : vector<1x16xf32>
    %142 = math.tanh %141 : vector<1x16xf32>
    %143 = arith.mulf %138, %142 : vector<1x16xf32>
    %144 = arith.select %113, %143, %112 : vector<1x16xf32>
    %145 = arith.select %113, %141, %112 : vector<1x16xf32>
    %cst_69 = arith.constant 0.000000e+00 : f32
    %146 = vector.broadcast %cst_69 : f32 to vector<1x16xf32>
    %147 = arith.select %113, %143, %146 : vector<1x16xf32>
    %c0_70 = arith.constant 0 : index
    %c0_71 = arith.constant 0 : index
    %148 = vector.load %arg59[%c0_70, %c0_71] : memref<8x16xf32, #tpu.memory_space<vmem>>, vector<1x16xf32>
    tpu.vector_store %arg59[%c0_70, %c0_71], %147 {strides = array<i32>} : memref<8x16xf32, #tpu.memory_space<vmem>>, vector<1x16xf32>,
    %c1_i32 = arith.constant 1 : i32
    %149 = arith.subi %1, %c1_i32 : i32
    %c0_i32_72 = arith.constant 0 : i32
    %150 = arith.subi %149, %c0_i32_72 : i32
    %c0_i32_73 = arith.constant 0 : i32
    %151 = arith.select %113, %150, %c0_i32_73 : i32
    %152 = arith.index_cast %151 : i32 to index
    %c0_74 = arith.constant 0 : index
    %153 = vector.load %arg58[%152, %c0_74] : memref<8x32xf32, #tpu.memory_space<vmem>>, vector<1x32xf32>
    %cst_75 = arith.constant dense<0.000000e+00> : vector<1x64xf32>
    %154 = tpu.matmul %153, %109, %cst_75 {dimension_numbers = #tpu.dot_dimension_numbers<[1], [0], [0], [1], [0, 0, 1, 1], [], []>} : vector<1x32xf32>, vector<32x64xf32>, vector<1x64xf32> -> vector<1x64xf32>
    %cst_76 = arith.constant dense<0.000000e+00> : vector<1x64xf32>
    %155 = tpu.matmul %112, %110, %cst_76 {dimension_numbers = #tpu.dot_dimension_numbers<[1], [0], [0], [1], [0, 0, 1, 1], [], []>} : vector<1x16xf32>, vector<16x64xf32>, vector<1x64xf32> -> vector<1x64xf32>
    %156 = arith.addf %154, %155 : vector<1x64xf32>
    %157 = arith.addf %156, %111 : vector<1x64xf32>
    %158 = vector.extract_strided_slice %157 {offsets = [0, 0], sizes = [1, 16], strides = [1, 1]} : vector<1x64xf32> to vector<1x16xf32>
    %159 = arith.negf %158 : vector<1x16xf32>
    %160 = math.exp %159 : vector<1x16xf32>
    %cst_77 = arith.constant 1.000000e+00 : f32
    %161 = vector.broadcast %cst_77 : f32 to vector<1x16xf32>
    %162 = arith.addf %161, %160 : vector<1x16xf32>
    %163 = arith.divf %161, %162 : vector<1x16xf32>
    %164 = vector.extract_strided_slice %157 {offsets = [0, 16], sizes = [1, 16], strides = [1, 1]} : vector<1x64xf32> to vector<1x16xf32>
    %165 = arith.negf %164 : vector<1x16xf32>
    %166 = math.exp %165 : vector<1x16xf32>
    %cst_78 = arith.constant 1.000000e+00 : f32
    %167 = vector.broadcast %cst_78 : f32 to vector<1x16xf32>
    %168 = arith.addf %167, %166 : vector<1x16xf32>
    %169 = arith.divf %167, %168 : vector<1x16xf32>
    %170 = vector.extract_strided_slice %157 {offsets = [0, 32], sizes = [1, 16], strides = [1, 1]} : vector<1x64xf32> to vector<1x16xf32>
    %171 = math.tanh %170 : vector<1x16xf32>
    %172 = vector.extract_strided_slice %157 {offsets = [0, 48], sizes = [1, 16], strides = [1, 1]} : vector<1x64xf32> to vector<1x16xf32>
    %173 = arith.negf %172 : vector<1x16xf32>
    %174 = math.exp %173 : vector<1x16xf32>
    %cst_79 = arith.constant 1.000000e+00 : f32
    %175 = vector.broadcast %cst_79 : f32 to vector<1x16xf32>
    %176 = arith.addf %175, %174 : vector<1x16xf32>
    %177 = arith.divf %175, %176 : vector<1x16xf32>
    %178 = arith.mulf %169, %112 : vector<1x16xf32>
    %179 = arith.mulf %163, %171 : vector<1x16xf32>
    %180 = arith.addf %178, %179 : vector<1x16xf32>
    %181 = math.tanh %180 : vector<1x16xf32>
    %182 = arith.mulf %177, %181 : vector<1x16xf32>
    %183 = arith.select %113, %182, %112 : vector<1x16xf32>
    %184 = arith.select %113, %180, %112 : vector<1x16xf32>
    %c1_i32_80 = arith.constant 1 : i32
    %185 = arith.subi %1, %c1_i32_80 : i32
    %c0_i32_81 = arith.constant 0 : i32
    %186 = arith.subi %185, %c0_i32_81 : i32
    %c8_i32 = arith.constant 8 : i32
    %187 = arith.select %113, %186, %c8_i32 : i32
    %188 = arith.index_cast %187 : i32 to index
    %c0_82 = arith.constant 0 : index
    %189 = vector.load %arg60[%188, %c0_82] : memref<9x16xf32, #tpu.memory_space<vmem>>, vector<1x16xf32>
    tpu.vector_store %arg60[%188, %c0_82], %182 {strides = array<i32>} : memref<9x16xf32, #tpu.memory_space<vmem>>, vector<1x16xf32>,
    %c1_i32_83 = arith.constant 1 : i32
    %190 = arith.cmpi sgt, %1, %c1_i32_83 : i32
    %191 = vector.extract_strided_slice %100 {offsets = [1, 0], sizes = [1, 32], strides = [1, 1]} : vector<8x32xf32> to vector<1x32xf32>
    %cst_84 = arith.constant dense<0.000000e+00> : vector<1x64xf32>
    %192 = tpu.matmul %191, %106, %cst_84 {dimension_numbers = #tpu.dot_dimension_numbers<[1], [0], [0], [1], [0, 0, 1, 1], [], []>} : vector<1x32xf32>, vector<32x64xf32>, vector<1x64xf32> -> vector<1x64xf32>
    %cst_85 = arith.constant dense<0.000000e+00> : vector<1x64xf32>
    %193 = tpu.matmul %144, %107, %cst_85 {dimension_numbers = #tpu.dot_dimension_numbers<[1], [0], [0], [1], [0, 0, 1, 1], [], []>} : vector<1x16xf32>, vector<16x64xf32>, vector<1x64xf32> -> vector<1x64xf32>
    %194 = arith.addf %192, %193 : vector<1x64xf32>
    %195 = arith.addf %194, %108 : vector<1x64xf32>
    %196 = vector.extract_strided_slice %195 {offsets = [0, 0], sizes = [1, 16], strides = [1, 1]} : vector<1x64xf32> to vector<1x16xf32>
    %197 = arith.negf %196 : vector<1x16xf32>
    %198 = math.exp %197 : vector<1x16xf32>
    %cst_86 = arith.constant 1.000000e+00 : f32
    %199 = vector.broadcast %cst_86 : f32 to vector<1x16xf32>
    %200 = arith.addf %199, %198 : vector<1x16xf32>
    %201 = arith.divf %199, %200 : vector<1x16xf32>
    %202 = vector.extract_strided_slice %195 {offsets = [0, 16], sizes = [1, 16], strides = [1, 1]} : vector<1x64xf32> to vector<1x16xf32>
    %203 = arith.negf %202 : vector<1x16xf32>
    %204 = math.exp %203 : vector<1x16xf32>
    %cst_87 = arith.constant 1.000000e+00 : f32
    %205 = vector.broadcast %cst_87 : f32 to vector<1x16xf32>
    %206 = arith.addf %205, %204 : vector<1x16xf32>
    %207 = arith.divf %205, %206 : vector<1x16xf32>
    %208 = vector.extract_strided_slice %195 {offsets = [0, 32], sizes = [1, 16], strides = [1, 1]} : vector<1x64xf32> to vector<1x16xf32>
    %209 = math.tanh %208 : vector<1x16xf32>
    %210 = vector.extract_strided_slice %195 {offsets = [0, 48], sizes = [1, 16], strides = [1, 1]} : vector<1x64xf32> to vector<1x16xf32>
    %211 = arith.negf %210 : vector<1x16xf32>
    %212 = math.exp %211 : vector<1x16xf32>
    %cst_88 = arith.constant 1.000000e+00 : f32
    %213 = vector.broadcast %cst_88 : f32 to vector<1x16xf32>
    %214 = arith.addf %213, %212 : vector<1x16xf32>
    %215 = arith.divf %213, %214 : vector<1x16xf32>
    %216 = arith.mulf %207, %145 : vector<1x16xf32>
    %217 = arith.mulf %201, %209 : vector<1x16xf32>
    %218 = arith.addf %216, %217 : vector<1x16xf32>
    %219 = math.tanh %218 : vector<1x16xf32>
    %220 = arith.mulf %215, %219 : vector<1x16xf32>
    %221 = arith.select %190, %220, %144 : vector<1x16xf32>
    %222 = arith.select %190, %218, %145 : vector<1x16xf32>
    %cst_89 = arith.constant 0.000000e+00 : f32
    %223 = vector.broadcast %cst_89 : f32 to vector<1x16xf32>
    %224 = arith.select %190, %220, %223 : vector<1x16xf32>
    %c1 = arith.constant 1 : index
    %c0_90 = arith.constant 0 : index
    %225 = vector.load %arg59[%c1, %c0_90] : memref<8x16xf32, #tpu.memory_space<vmem>>, vector<1x16xf32>
    tpu.vector_store %arg59[%c1, %c0_90], %224 {strides = array<i32>} : memref<8x16xf32, #tpu.memory_space<vmem>>, vector<1x16xf32>,
    %c1_i32_91 = arith.constant 1 : i32
    %226 = arith.subi %1, %c1_i32_91 : i32
    %c1_i32_92 = arith.constant 1 : i32
    %227 = arith.subi %226, %c1_i32_92 : i32
    %c0_i32_93 = arith.constant 0 : i32
    %228 = arith.select %190, %227, %c0_i32_93 : i32
    %229 = arith.index_cast %228 : i32 to index
    %c0_94 = arith.constant 0 : index
    %230 = vector.load %arg58[%229, %c0_94] : memref<8x32xf32, #tpu.memory_space<vmem>>, vector<1x32xf32>
    %cst_95 = arith.constant dense<0.000000e+00> : vector<1x64xf32>
    %231 = tpu.matmul %230, %109, %cst_95 {dimension_numbers = #tpu.dot_dimension_numbers<[1], [0], [0], [1], [0, 0, 1, 1], [], []>} : vector<1x32xf32>, vector<32x64xf32>, vector<1x64xf32> -> vector<1x64xf32>
    %cst_96 = arith.constant dense<0.000000e+00> : vector<1x64xf32>
    %232 = tpu.matmul %183, %110, %cst_96 {dimension_numbers = #tpu.dot_dimension_numbers<[1], [0], [0], [1], [0, 0, 1, 1], [], []>} : vector<1x16xf32>, vector<16x64xf32>, vector<1x64xf32> -> vector<1x64xf32>
    %233 = arith.addf %231, %232 : vector<1x64xf32>
    %234 = arith.addf %233, %111 : vector<1x64xf32>
    %235 = vector.extract_strided_slice %234 {offsets = [0, 0], sizes = [1, 16], strides = [1, 1]} : vector<1x64xf32> to vector<1x16xf32>
    %236 = arith.negf %235 : vector<1x16xf32>
    %237 = math.exp %236 : vector<1x16xf32>
    %cst_97 = arith.constant 1.000000e+00 : f32
    %238 = vector.broadcast %cst_97 : f32 to vector<1x16xf32>
    %239 = arith.addf %238, %237 : vector<1x16xf32>
    %240 = arith.divf %238, %239 : vector<1x16xf32>
    %241 = vector.extract_strided_slice %234 {offsets = [0, 16], sizes = [1, 16], strides = [1, 1]} : vector<1x64xf32> to vector<1x16xf32>
    %242 = arith.negf %241 : vector<1x16xf32>
    %243 = math.exp %242 : vector<1x16xf32>
    %cst_98 = arith.constant 1.000000e+00 : f32
    %244 = vector.broadcast %cst_98 : f32 to vector<1x16xf32>
    %245 = arith.addf %244, %243 : vector<1x16xf32>
    %246 = arith.divf %244, %245 : vector<1x16xf32>
    %247 = vector.extract_strided_slice %234 {offsets = [0, 32], sizes = [1, 16], strides = [1, 1]} : vector<1x64xf32> to vector<1x16xf32>
    %248 = math.tanh %247 : vector<1x16xf32>
    %249 = vector.extract_strided_slice %234 {offsets = [0, 48], sizes = [1, 16], strides = [1, 1]} : vector<1x64xf32> to vector<1x16xf32>
    %250 = arith.negf %249 : vector<1x16xf32>
    %251 = math.exp %250 : vector<1x16xf32>
    %cst_99 = arith.constant 1.000000e+00 : f32
    %252 = vector.broadcast %cst_99 : f32 to vector<1x16xf32>
    %253 = arith.addf %252, %251 : vector<1x16xf32>
    %254 = arith.divf %252, %253 : vector<1x16xf32>
    %255 = arith.mulf %246, %184 : vector<1x16xf32>
    %256 = arith.mulf %240, %248 : vector<1x16xf32>
    %257 = arith.addf %255, %256 : vector<1x16xf32>
    %258 = math.tanh %257 : vector<1x16xf32>
    %259 = arith.mulf %254, %258 : vector<1x16xf32>
    %260 = arith.select %190, %259, %183 : vector<1x16xf32>
    %261 = arith.select %190, %257, %184 : vector<1x16xf32>
    %c1_i32_100 = arith.constant 1 : i32
    %262 = arith.subi %1, %c1_i32_100 : i32
    %c1_i32_101 = arith.constant 1 : i32
    %263 = arith.subi %262, %c1_i32_101 : i32
    %c8_i32_102 = arith.constant 8 : i32
    %264 = arith.select %190, %263, %c8_i32_102 : i32
    %265 = arith.index_cast %264 : i32 to index
    %c0_103 = arith.constant 0 : index
    %266 = vector.load %arg60[%265, %c0_103] : memref<9x16xf32, #tpu.memory_space<vmem>>, vector<1x16xf32>
    tpu.vector_store %arg60[%265, %c0_103], %259 {strides = array<i32>} : memref<9x16xf32, #tpu.memory_space<vmem>>, vector<1x16xf32>,
    %c2_i32 = arith.constant 2 : i32
    %267 = arith.cmpi sgt, %1, %c2_i32 : i32
    %268 = vector.extract_strided_slice %100 {offsets = [2, 0], sizes = [1, 32], strides = [1, 1]} : vector<8x32xf32> to vector<1x32xf32>
    %cst_104 = arith.constant dense<0.000000e+00> : vector<1x64xf32>
    %269 = tpu.matmul %268, %106, %cst_104 {dimension_numbers = #tpu.dot_dimension_numbers<[1], [0], [0], [1], [0, 0, 1, 1], [], []>} : vector<1x32xf32>, vector<32x64xf32>, vector<1x64xf32> -> vector<1x64xf32>
    %cst_105 = arith.constant dense<0.000000e+00> : vector<1x64xf32>
    %270 = tpu.matmul %221, %107, %cst_105 {dimension_numbers = #tpu.dot_dimension_numbers<[1], [0], [0], [1], [0, 0, 1, 1], [], []>} : vector<1x16xf32>, vector<16x64xf32>, vector<1x64xf32> -> vector<1x64xf32>
    %271 = arith.addf %269, %270 : vector<1x64xf32>
    %272 = arith.addf %271, %108 : vector<1x64xf32>
    %273 = vector.extract_strided_slice %272 {offsets = [0, 0], sizes = [1, 16], strides = [1, 1]} : vector<1x64xf32> to vector<1x16xf32>
    %274 = arith.negf %273 : vector<1x16xf32>
    %275 = math.exp %274 : vector<1x16xf32>
    %cst_106 = arith.constant 1.000000e+00 : f32
    %276 = vector.broadcast %cst_106 : f32 to vector<1x16xf32>
    %277 = arith.addf %276, %275 : vector<1x16xf32>
    %278 = arith.divf %276, %277 : vector<1x16xf32>
    %279 = vector.extract_strided_slice %272 {offsets = [0, 16], sizes = [1, 16], strides = [1, 1]} : vector<1x64xf32> to vector<1x16xf32>
    %280 = arith.negf %279 : vector<1x16xf32>
    %281 = math.exp %280 : vector<1x16xf32>
    %cst_107 = arith.constant 1.000000e+00 : f32
    %282 = vector.broadcast %cst_107 : f32 to vector<1x16xf32>
    %283 = arith.addf %282, %281 : vector<1x16xf32>
    %284 = arith.divf %282, %283 : vector<1x16xf32>
    %285 = vector.extract_strided_slice %272 {offsets = [0, 32], sizes = [1, 16], strides = [1, 1]} : vector<1x64xf32> to vector<1x16xf32>
    %286 = math.tanh %285 : vector<1x16xf32>
    %287 = vector.extract_strided_slice %272 {offsets = [0, 48], sizes = [1, 16], strides = [1, 1]} : vector<1x64xf32> to vector<1x16xf32>
    %288 = arith.negf %287 : vector<1x16xf32>
    %289 = math.exp %288 : vector<1x16xf32>
    %cst_108 = arith.constant 1.000000e+00 : f32
    %290 = vector.broadcast %cst_108 : f32 to vector<1x16xf32>
    %291 = arith.addf %290, %289 : vector<1x16xf32>
    %292 = arith.divf %290, %291 : vector<1x16xf32>
    %293 = arith.mulf %284, %222 : vector<1x16xf32>
    %294 = arith.mulf %278, %286 : vector<1x16xf32>
    %295 = arith.addf %293, %294 : vector<1x16xf32>
    %296 = math.tanh %295 : vector<1x16xf32>
    %297 = arith.mulf %292, %296 : vector<1x16xf32>
    %298 = arith.select %267, %297, %221 : vector<1x16xf32>
    %299 = arith.select %267, %295, %222 : vector<1x16xf32>
    %cst_109 = arith.constant 0.000000e+00 : f32
    %300 = vector.broadcast %cst_109 : f32 to vector<1x16xf32>
    %301 = arith.select %267, %297, %300 : vector<1x16xf32>
    %c2 = arith.constant 2 : index
    %c0_110 = arith.constant 0 : index
    %302 = vector.load %arg59[%c2, %c0_110] : memref<8x16xf32, #tpu.memory_space<vmem>>, vector<1x16xf32>
    tpu.vector_store %arg59[%c2, %c0_110], %301 {strides = array<i32>} : memref<8x16xf32, #tpu.memory_space<vmem>>, vector<1x16xf32>,
    %c1_i32_111 = arith.constant 1 : i32
    %303 = arith.subi %1, %c1_i32_111 : i32
    %c2_i32_112 = arith.constant 2 : i32
    %304 = arith.subi %303, %c2_i32_112 : i32
    %c0_i32_113 = arith.constant 0 : i32
    %305 = arith.select %267, %304, %c0_i32_113 : i32
    %306 = arith.index_cast %305 : i32 to index
    %c0_114 = arith.constant 0 : index
    %307 = vector.load %arg58[%306, %c0_114] : memref<8x32xf32, #tpu.memory_space<vmem>>, vector<1x32xf32>
    %cst_115 = arith.constant dense<0.000000e+00> : vector<1x64xf32>
    %308 = tpu.matmul %307, %109, %cst_115 {dimension_numbers = #tpu.dot_dimension_numbers<[1], [0], [0], [1], [0, 0, 1, 1], [], []>} : vector<1x32xf32>, vector<32x64xf32>, vector<1x64xf32> -> vector<1x64xf32>
    %cst_116 = arith.constant dense<0.000000e+00> : vector<1x64xf32>
    %309 = tpu.matmul %260, %110, %cst_116 {dimension_numbers = #tpu.dot_dimension_numbers<[1], [0], [0], [1], [0, 0, 1, 1], [], []>} : vector<1x16xf32>, vector<16x64xf32>, vector<1x64xf32> -> vector<1x64xf32>
    %310 = arith.addf %308, %309 : vector<1x64xf32>
    %311 = arith.addf %310, %111 : vector<1x64xf32>
    %312 = vector.extract_strided_slice %311 {offsets = [0, 0], sizes = [1, 16], strides = [1, 1]} : vector<1x64xf32> to vector<1x16xf32>
    %313 = arith.negf %312 : vector<1x16xf32>
    %314 = math.exp %313 : vector<1x16xf32>
    %cst_117 = arith.constant 1.000000e+00 : f32
    %315 = vector.broadcast %cst_117 : f32 to vector<1x16xf32>
    %316 = arith.addf %315, %314 : vector<1x16xf32>
    %317 = arith.divf %315, %316 : vector<1x16xf32>
    %318 = vector.extract_strided_slice %311 {offsets = [0, 16], sizes = [1, 16], strides = [1, 1]} : vector<1x64xf32> to vector<1x16xf32>
    %319 = arith.negf %318 : vector<1x16xf32>
    %320 = math.exp %319 : vector<1x16xf32>
    %cst_118 = arith.constant 1.000000e+00 : f32
    %321 = vector.broadcast %cst_118 : f32 to vector<1x16xf32>
    %322 = arith.addf %321, %320 : vector<1x16xf32>
    %323 = arith.divf %321, %322 : vector<1x16xf32>
    %324 = vector.extract_strided_slice %311 {offsets = [0, 32], sizes = [1, 16], strides = [1, 1]} : vector<1x64xf32> to vector<1x16xf32>
    %325 = math.tanh %324 : vector<1x16xf32>
    %326 = vector.extract_strided_slice %311 {offsets = [0, 48], sizes = [1, 16], strides = [1, 1]} : vector<1x64xf32> to vector<1x16xf32>
    %327 = arith.negf %326 : vector<1x16xf32>
    %328 = math.exp %327 : vector<1x16xf32>
    %cst_119 = arith.constant 1.000000e+00 : f32
    %329 = vector.broadcast %cst_119 : f32 to vector<1x16xf32>
    %330 = arith.addf %329, %328 : vector<1x16xf32>
    %331 = arith.divf %329, %330 : vector<1x16xf32>
    %332 = arith.mulf %323, %261 : vector<1x16xf32>
    %333 = arith.mulf %317, %325 : vector<1x16xf32>
    %334 = arith.addf %332, %333 : vector<1x16xf32>
    %335 = math.tanh %334 : vector<1x16xf32>
    %336 = arith.mulf %331, %335 : vector<1x16xf32>
    %337 = arith.select %267, %336, %260 : vector<1x16xf32>
    %338 = arith.select %267, %334, %261 : vector<1x16xf32>
    %c1_i32_120 = arith.constant 1 : i32
    %339 = arith.subi %1, %c1_i32_120 : i32
    %c2_i32_121 = arith.constant 2 : i32
    %340 = arith.subi %339, %c2_i32_121 : i32
    %c8_i32_122 = arith.constant 8 : i32
    %341 = arith.select %267, %340, %c8_i32_122 : i32
    %342 = arith.index_cast %341 : i32 to index
    %c0_123 = arith.constant 0 : index
    %343 = vector.load %arg60[%342, %c0_123] : memref<9x16xf32, #tpu.memory_space<vmem>>, vector<1x16xf32>
    tpu.vector_store %arg60[%342, %c0_123], %336 {strides = array<i32>} : memref<9x16xf32, #tpu.memory_space<vmem>>, vector<1x16xf32>,
    %c3_i32 = arith.constant 3 : i32
    %344 = arith.cmpi sgt, %1, %c3_i32 : i32
    %345 = vector.extract_strided_slice %100 {offsets = [3, 0], sizes = [1, 32], strides = [1, 1]} : vector<8x32xf32> to vector<1x32xf32>
    %cst_124 = arith.constant dense<0.000000e+00> : vector<1x64xf32>
    %346 = tpu.matmul %345, %106, %cst_124 {dimension_numbers = #tpu.dot_dimension_numbers<[1], [0], [0], [1], [0, 0, 1, 1], [], []>} : vector<1x32xf32>, vector<32x64xf32>, vector<1x64xf32> -> vector<1x64xf32>
    %cst_125 = arith.constant dense<0.000000e+00> : vector<1x64xf32>
    %347 = tpu.matmul %298, %107, %cst_125 {dimension_numbers = #tpu.dot_dimension_numbers<[1], [0], [0], [1], [0, 0, 1, 1], [], []>} : vector<1x16xf32>, vector<16x64xf32>, vector<1x64xf32> -> vector<1x64xf32>
    %348 = arith.addf %346, %347 : vector<1x64xf32>
    %349 = arith.addf %348, %108 : vector<1x64xf32>
    %350 = vector.extract_strided_slice %349 {offsets = [0, 0], sizes = [1, 16], strides = [1, 1]} : vector<1x64xf32> to vector<1x16xf32>
    %351 = arith.negf %350 : vector<1x16xf32>
    %352 = math.exp %351 : vector<1x16xf32>
    %cst_126 = arith.constant 1.000000e+00 : f32
    %353 = vector.broadcast %cst_126 : f32 to vector<1x16xf32>
    %354 = arith.addf %353, %352 : vector<1x16xf32>
    %355 = arith.divf %353, %354 : vector<1x16xf32>
    %356 = vector.extract_strided_slice %349 {offsets = [0, 16], sizes = [1, 16], strides = [1, 1]} : vector<1x64xf32> to vector<1x16xf32>
    %357 = arith.negf %356 : vector<1x16xf32>
    %358 = math.exp %357 : vector<1x16xf32>
    %cst_127 = arith.constant 1.000000e+00 : f32
    %359 = vector.broadcast %cst_127 : f32 to vector<1x16xf32>
    %360 = arith.addf %359, %358 : vector<1x16xf32>
    %361 = arith.divf %359, %360 : vector<1x16xf32>
    %362 = vector.extract_strided_slice %349 {offsets = [0, 32], sizes = [1, 16], strides = [1, 1]} : vector<1x64xf32> to vector<1x16xf32>
    %363 = math.tanh %362 : vector<1x16xf32>
    %364 = vector.extract_strided_slice %349 {offsets = [0, 48], sizes = [1, 16], strides = [1, 1]} : vector<1x64xf32> to vector<1x16xf32>
    %365 = arith.negf %364 : vector<1x16xf32>
    %366 = math.exp %365 : vector<1x16xf32>
    %cst_128 = arith.constant 1.000000e+00 : f32
    %367 = vector.broadcast %cst_128 : f32 to vector<1x16xf32>
    %368 = arith.addf %367, %366 : vector<1x16xf32>
    %369 = arith.divf %367, %368 : vector<1x16xf32>
    %370 = arith.mulf %361, %299 : vector<1x16xf32>
    %371 = arith.mulf %355, %363 : vector<1x16xf32>
    %372 = arith.addf %370, %371 : vector<1x16xf32>
    %373 = math.tanh %372 : vector<1x16xf32>
    %374 = arith.mulf %369, %373 : vector<1x16xf32>
    %375 = arith.select %344, %374, %298 : vector<1x16xf32>
    %376 = arith.select %344, %372, %299 : vector<1x16xf32>
    %cst_129 = arith.constant 0.000000e+00 : f32
    %377 = vector.broadcast %cst_129 : f32 to vector<1x16xf32>
    %378 = arith.select %344, %374, %377 : vector<1x16xf32>
    %c3 = arith.constant 3 : index
    %c0_130 = arith.constant 0 : index
    %379 = vector.load %arg59[%c3, %c0_130] : memref<8x16xf32, #tpu.memory_space<vmem>>, vector<1x16xf32>
    tpu.vector_store %arg59[%c3, %c0_130], %378 {strides = array<i32>} : memref<8x16xf32, #tpu.memory_space<vmem>>, vector<1x16xf32>,
    %c1_i32_131 = arith.constant 1 : i32
    %380 = arith.subi %1, %c1_i32_131 : i32
    %c3_i32_132 = arith.constant 3 : i32
    %381 = arith.subi %380, %c3_i32_132 : i32
    %c0_i32_133 = arith.constant 0 : i32
    %382 = arith.select %344, %381, %c0_i32_133 : i32
    %383 = arith.index_cast %382 : i32 to index
    %c0_134 = arith.constant 0 : index
    %384 = vector.load %arg58[%383, %c0_134] : memref<8x32xf32, #tpu.memory_space<vmem>>, vector<1x32xf32>
    %cst_135 = arith.constant dense<0.000000e+00> : vector<1x64xf32>
    %385 = tpu.matmul %384, %109, %cst_135 {dimension_numbers = #tpu.dot_dimension_numbers<[1], [0], [0], [1], [0, 0, 1, 1], [], []>} : vector<1x32xf32>, vector<32x64xf32>, vector<1x64xf32> -> vector<1x64xf32>
    %cst_136 = arith.constant dense<0.000000e+00> : vector<1x64xf32>
    %386 = tpu.matmul %337, %110, %cst_136 {dimension_numbers = #tpu.dot_dimension_numbers<[1], [0], [0], [1], [0, 0, 1, 1], [], []>} : vector<1x16xf32>, vector<16x64xf32>, vector<1x64xf32> -> vector<1x64xf32>
    %387 = arith.addf %385, %386 : vector<1x64xf32>
    %388 = arith.addf %387, %111 : vector<1x64xf32>
    %389 = vector.extract_strided_slice %388 {offsets = [0, 0], sizes = [1, 16], strides = [1, 1]} : vector<1x64xf32> to vector<1x16xf32>
    %390 = arith.negf %389 : vector<1x16xf32>
    %391 = math.exp %390 : vector<1x16xf32>
    %cst_137 = arith.constant 1.000000e+00 : f32
    %392 = vector.broadcast %cst_137 : f32 to vector<1x16xf32>
    %393 = arith.addf %392, %391 : vector<1x16xf32>
    %394 = arith.divf %392, %393 : vector<1x16xf32>
    %395 = vector.extract_strided_slice %388 {offsets = [0, 16], sizes = [1, 16], strides = [1, 1]} : vector<1x64xf32> to vector<1x16xf32>
    %396 = arith.negf %395 : vector<1x16xf32>
    %397 = math.exp %396 : vector<1x16xf32>
    %cst_138 = arith.constant 1.000000e+00 : f32
    %398 = vector.broadcast %cst_138 : f32 to vector<1x16xf32>
    %399 = arith.addf %398, %397 : vector<1x16xf32>
    %400 = arith.divf %398, %399 : vector<1x16xf32>
    %401 = vector.extract_strided_slice %388 {offsets = [0, 32], sizes = [1, 16], strides = [1, 1]} : vector<1x64xf32> to vector<1x16xf32>
    %402 = math.tanh %401 : vector<1x16xf32>
    %403 = vector.extract_strided_slice %388 {offsets = [0, 48], sizes = [1, 16], strides = [1, 1]} : vector<1x64xf32> to vector<1x16xf32>
    %404 = arith.negf %403 : vector<1x16xf32>
    %405 = math.exp %404 : vector<1x16xf32>
    %cst_139 = arith.constant 1.000000e+00 : f32
    %406 = vector.broadcast %cst_139 : f32 to vector<1x16xf32>
    %407 = arith.addf %406, %405 : vector<1x16xf32>
    %408 = arith.divf %406, %407 : vector<1x16xf32>
    %409 = arith.mulf %400, %338 : vector<1x16xf32>
    %410 = arith.mulf %394, %402 : vector<1x16xf32>
    %411 = arith.addf %409, %410 : vector<1x16xf32>
    %412 = math.tanh %411 : vector<1x16xf32>
    %413 = arith.mulf %408, %412 : vector<1x16xf32>
    %414 = arith.select %344, %413, %337 : vector<1x16xf32>
    %415 = arith.select %344, %411, %338 : vector<1x16xf32>
    %c1_i32_140 = arith.constant 1 : i32
    %416 = arith.subi %1, %c1_i32_140 : i32
    %c3_i32_141 = arith.constant 3 : i32
    %417 = arith.subi %416, %c3_i32_141 : i32
    %c8_i32_142 = arith.constant 8 : i32
    %418 = arith.select %344, %417, %c8_i32_142 : i32
    %419 = arith.index_cast %418 : i32 to index
    %c0_143 = arith.constant 0 : index
    %420 = vector.load %arg60[%419, %c0_143] : memref<9x16xf32, #tpu.memory_space<vmem>>, vector<1x16xf32>
    tpu.vector_store %arg60[%419, %c0_143], %413 {strides = array<i32>} : memref<9x16xf32, #tpu.memory_space<vmem>>, vector<1x16xf32>,
    %c4_i32 = arith.constant 4 : i32
    %421 = arith.cmpi sgt, %1, %c4_i32 : i32
    %422 = vector.extract_strided_slice %100 {offsets = [4, 0], sizes = [1, 32], strides = [1, 1]} : vector<8x32xf32> to vector<1x32xf32>
    %cst_144 = arith.constant dense<0.000000e+00> : vector<1x64xf32>
    %423 = tpu.matmul %422, %106, %cst_144 {dimension_numbers = #tpu.dot_dimension_numbers<[1], [0], [0], [1], [0, 0, 1, 1], [], []>} : vector<1x32xf32>, vector<32x64xf32>, vector<1x64xf32> -> vector<1x64xf32>
    %cst_145 = arith.constant dense<0.000000e+00> : vector<1x64xf32>
    %424 = tpu.matmul %375, %107, %cst_145 {dimension_numbers = #tpu.dot_dimension_numbers<[1], [0], [0], [1], [0, 0, 1, 1], [], []>} : vector<1x16xf32>, vector<16x64xf32>, vector<1x64xf32> -> vector<1x64xf32>
    %425 = arith.addf %423, %424 : vector<1x64xf32>
    %426 = arith.addf %425, %108 : vector<1x64xf32>
    %427 = vector.extract_strided_slice %426 {offsets = [0, 0], sizes = [1, 16], strides = [1, 1]} : vector<1x64xf32> to vector<1x16xf32>
    %428 = arith.negf %427 : vector<1x16xf32>
    %429 = math.exp %428 : vector<1x16xf32>
    %cst_146 = arith.constant 1.000000e+00 : f32
    %430 = vector.broadcast %cst_146 : f32 to vector<1x16xf32>
    %431 = arith.addf %430, %429 : vector<1x16xf32>
    %432 = arith.divf %430, %431 : vector<1x16xf32>
    %433 = vector.extract_strided_slice %426 {offsets = [0, 16], sizes = [1, 16], strides = [1, 1]} : vector<1x64xf32> to vector<1x16xf32>
    %434 = arith.negf %433 : vector<1x16xf32>
    %435 = math.exp %434 : vector<1x16xf32>
    %cst_147 = arith.constant 1.000000e+00 : f32
    %436 = vector.broadcast %cst_147 : f32 to vector<1x16xf32>
    %437 = arith.addf %436, %435 : vector<1x16xf32>
    %438 = arith.divf %436, %437 : vector<1x16xf32>
    %439 = vector.extract_strided_slice %426 {offsets = [0, 32], sizes = [1, 16], strides = [1, 1]} : vector<1x64xf32> to vector<1x16xf32>
    %440 = math.tanh %439 : vector<1x16xf32>
    %441 = vector.extract_strided_slice %426 {offsets = [0, 48], sizes = [1, 16], strides = [1, 1]} : vector<1x64xf32> to vector<1x16xf32>
    %442 = arith.negf %441 : vector<1x16xf32>
    %443 = math.exp %442 : vector<1x16xf32>
    %cst_148 = arith.constant 1.000000e+00 : f32
    %444 = vector.broadcast %cst_148 : f32 to vector<1x16xf32>
    %445 = arith.addf %444, %443 : vector<1x16xf32>
    %446 = arith.divf %444, %445 : vector<1x16xf32>
    %447 = arith.mulf %438, %376 : vector<1x16xf32>
    %448 = arith.mulf %432, %440 : vector<1x16xf32>
    %449 = arith.addf %447, %448 : vector<1x16xf32>
    %450 = math.tanh %449 : vector<1x16xf32>
    %451 = arith.mulf %446, %450 : vector<1x16xf32>
    %452 = arith.select %421, %451, %375 : vector<1x16xf32>
    %453 = arith.select %421, %449, %376 : vector<1x16xf32>
    %cst_149 = arith.constant 0.000000e+00 : f32
    %454 = vector.broadcast %cst_149 : f32 to vector<1x16xf32>
    %455 = arith.select %421, %451, %454 : vector<1x16xf32>
    %c4 = arith.constant 4 : index
    %c0_150 = arith.constant 0 : index
    %456 = vector.load %arg59[%c4, %c0_150] : memref<8x16xf32, #tpu.memory_space<vmem>>, vector<1x16xf32>
    tpu.vector_store %arg59[%c4, %c0_150], %455 {strides = array<i32>} : memref<8x16xf32, #tpu.memory_space<vmem>>, vector<1x16xf32>,
    %c1_i32_151 = arith.constant 1 : i32
    %457 = arith.subi %1, %c1_i32_151 : i32
    %c4_i32_152 = arith.constant 4 : i32
    %458 = arith.subi %457, %c4_i32_152 : i32
    %c0_i32_153 = arith.constant 0 : i32
    %459 = arith.select %421, %458, %c0_i32_153 : i32
    %460 = arith.index_cast %459 : i32 to index
    %c0_154 = arith.constant 0 : index
    %461 = vector.load %arg58[%460, %c0_154] : memref<8x32xf32, #tpu.memory_space<vmem>>, vector<1x32xf32>
    %cst_155 = arith.constant dense<0.000000e+00> : vector<1x64xf32>
    %462 = tpu.matmul %461, %109, %cst_155 {dimension_numbers = #tpu.dot_dimension_numbers<[1], [0], [0], [1], [0, 0, 1, 1], [], []>} : vector<1x32xf32>, vector<32x64xf32>, vector<1x64xf32> -> vector<1x64xf32>
    %cst_156 = arith.constant dense<0.000000e+00> : vector<1x64xf32>
    %463 = tpu.matmul %414, %110, %cst_156 {dimension_numbers = #tpu.dot_dimension_numbers<[1], [0], [0], [1], [0, 0, 1, 1], [], []>} : vector<1x16xf32>, vector<16x64xf32>, vector<1x64xf32> -> vector<1x64xf32>
    %464 = arith.addf %462, %463 : vector<1x64xf32>
    %465 = arith.addf %464, %111 : vector<1x64xf32>
    %466 = vector.extract_strided_slice %465 {offsets = [0, 0], sizes = [1, 16], strides = [1, 1]} : vector<1x64xf32> to vector<1x16xf32>
    %467 = arith.negf %466 : vector<1x16xf32>
    %468 = math.exp %467 : vector<1x16xf32>
    %cst_157 = arith.constant 1.000000e+00 : f32
    %469 = vector.broadcast %cst_157 : f32 to vector<1x16xf32>
    %470 = arith.addf %469, %468 : vector<1x16xf32>
    %471 = arith.divf %469, %470 : vector<1x16xf32>
    %472 = vector.extract_strided_slice %465 {offsets = [0, 16], sizes = [1, 16], strides = [1, 1]} : vector<1x64xf32> to vector<1x16xf32>
    %473 = arith.negf %472 : vector<1x16xf32>
    %474 = math.exp %473 : vector<1x16xf32>
    %cst_158 = arith.constant 1.000000e+00 : f32
    %475 = vector.broadcast %cst_158 : f32 to vector<1x16xf32>
    %476 = arith.addf %475, %474 : vector<1x16xf32>
    %477 = arith.divf %475, %476 : vector<1x16xf32>
    %478 = vector.extract_strided_slice %465 {offsets = [0, 32], sizes = [1, 16], strides = [1, 1]} : vector<1x64xf32> to vector<1x16xf32>
    %479 = math.tanh %478 : vector<1x16xf32>
    %480 = vector.extract_strided_slice %465 {offsets = [0, 48], sizes = [1, 16], strides = [1, 1]} : vector<1x64xf32> to vector<1x16xf32>
    %481 = arith.negf %480 : vector<1x16xf32>
    %482 = math.exp %481 : vector<1x16xf32>
    %cst_159 = arith.constant 1.000000e+00 : f32
    %483 = vector.broadcast %cst_159 : f32 to vector<1x16xf32>
    %484 = arith.addf %483, %482 : vector<1x16xf32>
    %485 = arith.divf %483, %484 : vector<1x16xf32>
    %486 = arith.mulf %477, %415 : vector<1x16xf32>
    %487 = arith.mulf %471, %479 : vector<1x16xf32>
    %488 = arith.addf %486, %487 : vector<1x16xf32>
    %489 = math.tanh %488 : vector<1x16xf32>
    %490 = arith.mulf %485, %489 : vector<1x16xf32>
    %491 = arith.select %421, %490, %414 : vector<1x16xf32>
    %492 = arith.select %421, %488, %415 : vector<1x16xf32>
    %c1_i32_160 = arith.constant 1 : i32
    %493 = arith.subi %1, %c1_i32_160 : i32
    %c4_i32_161 = arith.constant 4 : i32
    %494 = arith.subi %493, %c4_i32_161 : i32
    %c8_i32_162 = arith.constant 8 : i32
    %495 = arith.select %421, %494, %c8_i32_162 : i32
    %496 = arith.index_cast %495 : i32 to index
    %c0_163 = arith.constant 0 : index
    %497 = vector.load %arg60[%496, %c0_163] : memref<9x16xf32, #tpu.memory_space<vmem>>, vector<1x16xf32>
    tpu.vector_store %arg60[%496, %c0_163], %490 {strides = array<i32>} : memref<9x16xf32, #tpu.memory_space<vmem>>, vector<1x16xf32>,
    %c5_i32 = arith.constant 5 : i32
    %498 = arith.cmpi sgt, %1, %c5_i32 : i32
    %499 = vector.extract_strided_slice %100 {offsets = [5, 0], sizes = [1, 32], strides = [1, 1]} : vector<8x32xf32> to vector<1x32xf32>
    %cst_164 = arith.constant dense<0.000000e+00> : vector<1x64xf32>
    %500 = tpu.matmul %499, %106, %cst_164 {dimension_numbers = #tpu.dot_dimension_numbers<[1], [0], [0], [1], [0, 0, 1, 1], [], []>} : vector<1x32xf32>, vector<32x64xf32>, vector<1x64xf32> -> vector<1x64xf32>
    %cst_165 = arith.constant dense<0.000000e+00> : vector<1x64xf32>
    %501 = tpu.matmul %452, %107, %cst_165 {dimension_numbers = #tpu.dot_dimension_numbers<[1], [0], [0], [1], [0, 0, 1, 1], [], []>} : vector<1x16xf32>, vector<16x64xf32>, vector<1x64xf32> -> vector<1x64xf32>
    %502 = arith.addf %500, %501 : vector<1x64xf32>
    %503 = arith.addf %502, %108 : vector<1x64xf32>
    %504 = vector.extract_strided_slice %503 {offsets = [0, 0], sizes = [1, 16], strides = [1, 1]} : vector<1x64xf32> to vector<1x16xf32>
    %505 = arith.negf %504 : vector<1x16xf32>
    %506 = math.exp %505 : vector<1x16xf32>
    %cst_166 = arith.constant 1.000000e+00 : f32
    %507 = vector.broadcast %cst_166 : f32 to vector<1x16xf32>
    %508 = arith.addf %507, %506 : vector<1x16xf32>
    %509 = arith.divf %507, %508 : vector<1x16xf32>
    %510 = vector.extract_strided_slice %503 {offsets = [0, 16], sizes = [1, 16], strides = [1, 1]} : vector<1x64xf32> to vector<1x16xf32>
    %511 = arith.negf %510 : vector<1x16xf32>
    %512 = math.exp %511 : vector<1x16xf32>
    %cst_167 = arith.constant 1.000000e+00 : f32
    %513 = vector.broadcast %cst_167 : f32 to vector<1x16xf32>
    %514 = arith.addf %513, %512 : vector<1x16xf32>
    %515 = arith.divf %513, %514 : vector<1x16xf32>
    %516 = vector.extract_strided_slice %503 {offsets = [0, 32], sizes = [1, 16], strides = [1, 1]} : vector<1x64xf32> to vector<1x16xf32>
    %517 = math.tanh %516 : vector<1x16xf32>
    %518 = vector.extract_strided_slice %503 {offsets = [0, 48], sizes = [1, 16], strides = [1, 1]} : vector<1x64xf32> to vector<1x16xf32>
    %519 = arith.negf %518 : vector<1x16xf32>
    %520 = math.exp %519 : vector<1x16xf32>
    %cst_168 = arith.constant 1.000000e+00 : f32
    %521 = vector.broadcast %cst_168 : f32 to vector<1x16xf32>
    %522 = arith.addf %521, %520 : vector<1x16xf32>
    %523 = arith.divf %521, %522 : vector<1x16xf32>
    %524 = arith.mulf %515, %453 : vector<1x16xf32>
    %525 = arith.mulf %509, %517 : vector<1x16xf32>
    %526 = arith.addf %524, %525 : vector<1x16xf32>
    %527 = math.tanh %526 : vector<1x16xf32>
    %528 = arith.mulf %523, %527 : vector<1x16xf32>
    %529 = arith.select %498, %528, %452 : vector<1x16xf32>
    %530 = arith.select %498, %526, %453 : vector<1x16xf32>
    %cst_169 = arith.constant 0.000000e+00 : f32
    %531 = vector.broadcast %cst_169 : f32 to vector<1x16xf32>
    %532 = arith.select %498, %528, %531 : vector<1x16xf32>
    %c5 = arith.constant 5 : index
    %c0_170 = arith.constant 0 : index
    %533 = vector.load %arg59[%c5, %c0_170] : memref<8x16xf32, #tpu.memory_space<vmem>>, vector<1x16xf32>
    tpu.vector_store %arg59[%c5, %c0_170], %532 {strides = array<i32>} : memref<8x16xf32, #tpu.memory_space<vmem>>, vector<1x16xf32>,
    %c1_i32_171 = arith.constant 1 : i32
    %534 = arith.subi %1, %c1_i32_171 : i32
    %c5_i32_172 = arith.constant 5 : i32
    %535 = arith.subi %534, %c5_i32_172 : i32
    %c0_i32_173 = arith.constant 0 : i32
    %536 = arith.select %498, %535, %c0_i32_173 : i32
    %537 = arith.index_cast %536 : i32 to index
    %c0_174 = arith.constant 0 : index
    %538 = vector.load %arg58[%537, %c0_174] : memref<8x32xf32, #tpu.memory_space<vmem>>, vector<1x32xf32>
    %cst_175 = arith.constant dense<0.000000e+00> : vector<1x64xf32>
    %539 = tpu.matmul %538, %109, %cst_175 {dimension_numbers = #tpu.dot_dimension_numbers<[1], [0], [0], [1], [0, 0, 1, 1], [], []>} : vector<1x32xf32>, vector<32x64xf32>, vector<1x64xf32> -> vector<1x64xf32>
    %cst_176 = arith.constant dense<0.000000e+00> : vector<1x64xf32>
    %540 = tpu.matmul %491, %110, %cst_176 {dimension_numbers = #tpu.dot_dimension_numbers<[1], [0], [0], [1], [0, 0, 1, 1], [], []>} : vector<1x16xf32>, vector<16x64xf32>, vector<1x64xf32> -> vector<1x64xf32>
    %541 = arith.addf %539, %540 : vector<1x64xf32>
    %542 = arith.addf %541, %111 : vector<1x64xf32>
    %543 = vector.extract_strided_slice %542 {offsets = [0, 0], sizes = [1, 16], strides = [1, 1]} : vector<1x64xf32> to vector<1x16xf32>
    %544 = arith.negf %543 : vector<1x16xf32>
    %545 = math.exp %544 : vector<1x16xf32>
    %cst_177 = arith.constant 1.000000e+00 : f32
    %546 = vector.broadcast %cst_177 : f32 to vector<1x16xf32>
    %547 = arith.addf %546, %545 : vector<1x16xf32>
    %548 = arith.divf %546, %547 : vector<1x16xf32>
    %549 = vector.extract_strided_slice %542 {offsets = [0, 16], sizes = [1, 16], strides = [1, 1]} : vector<1x64xf32> to vector<1x16xf32>
    %550 = arith.negf %549 : vector<1x16xf32>
    %551 = math.exp %550 : vector<1x16xf32>
    %cst_178 = arith.constant 1.000000e+00 : f32
    %552 = vector.broadcast %cst_178 : f32 to vector<1x16xf32>
    %553 = arith.addf %552, %551 : vector<1x16xf32>
    %554 = arith.divf %552, %553 : vector<1x16xf32>
    %555 = vector.extract_strided_slice %542 {offsets = [0, 32], sizes = [1, 16], strides = [1, 1]} : vector<1x64xf32> to vector<1x16xf32>
    %556 = math.tanh %555 : vector<1x16xf32>
    %557 = vector.extract_strided_slice %542 {offsets = [0, 48], sizes = [1, 16], strides = [1, 1]} : vector<1x64xf32> to vector<1x16xf32>
    %558 = arith.negf %557 : vector<1x16xf32>
    %559 = math.exp %558 : vector<1x16xf32>
    %cst_179 = arith.constant 1.000000e+00 : f32
    %560 = vector.broadcast %cst_179 : f32 to vector<1x16xf32>
    %561 = arith.addf %560, %559 : vector<1x16xf32>
    %562 = arith.divf %560, %561 : vector<1x16xf32>
    %563 = arith.mulf %554, %492 : vector<1x16xf32>
    %564 = arith.mulf %548, %556 : vector<1x16xf32>
    %565 = arith.addf %563, %564 : vector<1x16xf32>
    %566 = math.tanh %565 : vector<1x16xf32>
    %567 = arith.mulf %562, %566 : vector<1x16xf32>
    %568 = arith.select %498, %567, %491 : vector<1x16xf32>
    %569 = arith.select %498, %565, %492 : vector<1x16xf32>
    %c1_i32_180 = arith.constant 1 : i32
    %570 = arith.subi %1, %c1_i32_180 : i32
    %c5_i32_181 = arith.constant 5 : i32
    %571 = arith.subi %570, %c5_i32_181 : i32
    %c8_i32_182 = arith.constant 8 : i32
    %572 = arith.select %498, %571, %c8_i32_182 : i32
    %573 = arith.index_cast %572 : i32 to index
    %c0_183 = arith.constant 0 : index
    %574 = vector.load %arg60[%573, %c0_183] : memref<9x16xf32, #tpu.memory_space<vmem>>, vector<1x16xf32>
    tpu.vector_store %arg60[%573, %c0_183], %567 {strides = array<i32>} : memref<9x16xf32, #tpu.memory_space<vmem>>, vector<1x16xf32>,
    %c6_i32 = arith.constant 6 : i32
    %575 = arith.cmpi sgt, %1, %c6_i32 : i32
    %576 = vector.extract_strided_slice %100 {offsets = [6, 0], sizes = [1, 32], strides = [1, 1]} : vector<8x32xf32> to vector<1x32xf32>
    %cst_184 = arith.constant dense<0.000000e+00> : vector<1x64xf32>
    %577 = tpu.matmul %576, %106, %cst_184 {dimension_numbers = #tpu.dot_dimension_numbers<[1], [0], [0], [1], [0, 0, 1, 1], [], []>} : vector<1x32xf32>, vector<32x64xf32>, vector<1x64xf32> -> vector<1x64xf32>
    %cst_185 = arith.constant dense<0.000000e+00> : vector<1x64xf32>
    %578 = tpu.matmul %529, %107, %cst_185 {dimension_numbers = #tpu.dot_dimension_numbers<[1], [0], [0], [1], [0, 0, 1, 1], [], []>} : vector<1x16xf32>, vector<16x64xf32>, vector<1x64xf32> -> vector<1x64xf32>
    %579 = arith.addf %577, %578 : vector<1x64xf32>
    %580 = arith.addf %579, %108 : vector<1x64xf32>
    %581 = vector.extract_strided_slice %580 {offsets = [0, 0], sizes = [1, 16], strides = [1, 1]} : vector<1x64xf32> to vector<1x16xf32>
    %582 = arith.negf %581 : vector<1x16xf32>
    %583 = math.exp %582 : vector<1x16xf32>
    %cst_186 = arith.constant 1.000000e+00 : f32
    %584 = vector.broadcast %cst_186 : f32 to vector<1x16xf32>
    %585 = arith.addf %584, %583 : vector<1x16xf32>
    %586 = arith.divf %584, %585 : vector<1x16xf32>
    %587 = vector.extract_strided_slice %580 {offsets = [0, 16], sizes = [1, 16], strides = [1, 1]} : vector<1x64xf32> to vector<1x16xf32>
    %588 = arith.negf %587 : vector<1x16xf32>
    %589 = math.exp %588 : vector<1x16xf32>
    %cst_187 = arith.constant 1.000000e+00 : f32
    %590 = vector.broadcast %cst_187 : f32 to vector<1x16xf32>
    %591 = arith.addf %590, %589 : vector<1x16xf32>
    %592 = arith.divf %590, %591 : vector<1x16xf32>
    %593 = vector.extract_strided_slice %580 {offsets = [0, 32], sizes = [1, 16], strides = [1, 1]} : vector<1x64xf32> to vector<1x16xf32>
    %594 = math.tanh %593 : vector<1x16xf32>
    %595 = vector.extract_strided_slice %580 {offsets = [0, 48], sizes = [1, 16], strides = [1, 1]} : vector<1x64xf32> to vector<1x16xf32>
    %596 = arith.negf %595 : vector<1x16xf32>
    %597 = math.exp %596 : vector<1x16xf32>
    %cst_188 = arith.constant 1.000000e+00 : f32
    %598 = vector.broadcast %cst_188 : f32 to vector<1x16xf32>
    %599 = arith.addf %598, %597 : vector<1x16xf32>
    %600 = arith.divf %598, %599 : vector<1x16xf32>
    %601 = arith.mulf %592, %530 : vector<1x16xf32>
    %602 = arith.mulf %586, %594 : vector<1x16xf32>
    %603 = arith.addf %601, %602 : vector<1x16xf32>
    %604 = math.tanh %603 : vector<1x16xf32>
    %605 = arith.mulf %600, %604 : vector<1x16xf32>
    %606 = arith.select %575, %605, %529 : vector<1x16xf32>
    %607 = arith.select %575, %603, %530 : vector<1x16xf32>
    %cst_189 = arith.constant 0.000000e+00 : f32
    %608 = vector.broadcast %cst_189 : f32 to vector<1x16xf32>
    %609 = arith.select %575, %605, %608 : vector<1x16xf32>
    %c6 = arith.constant 6 : index
    %c0_190 = arith.constant 0 : index
    %610 = vector.load %arg59[%c6, %c0_190] : memref<8x16xf32, #tpu.memory_space<vmem>>, vector<1x16xf32>
    tpu.vector_store %arg59[%c6, %c0_190], %609 {strides = array<i32>} : memref<8x16xf32, #tpu.memory_space<vmem>>, vector<1x16xf32>,
    %c1_i32_191 = arith.constant 1 : i32
    %611 = arith.subi %1, %c1_i32_191 : i32
    %c6_i32_192 = arith.constant 6 : i32
    %612 = arith.subi %611, %c6_i32_192 : i32
    %c0_i32_193 = arith.constant 0 : i32
    %613 = arith.select %575, %612, %c0_i32_193 : i32
    %614 = arith.index_cast %613 : i32 to index
    %c0_194 = arith.constant 0 : index
    %615 = vector.load %arg58[%614, %c0_194] : memref<8x32xf32, #tpu.memory_space<vmem>>, vector<1x32xf32>
    %cst_195 = arith.constant dense<0.000000e+00> : vector<1x64xf32>
    %616 = tpu.matmul %615, %109, %cst_195 {dimension_numbers = #tpu.dot_dimension_numbers<[1], [0], [0], [1], [0, 0, 1, 1], [], []>} : vector<1x32xf32>, vector<32x64xf32>, vector<1x64xf32> -> vector<1x64xf32>
    %cst_196 = arith.constant dense<0.000000e+00> : vector<1x64xf32>
    %617 = tpu.matmul %568, %110, %cst_196 {dimension_numbers = #tpu.dot_dimension_numbers<[1], [0], [0], [1], [0, 0, 1, 1], [], []>} : vector<1x16xf32>, vector<16x64xf32>, vector<1x64xf32> -> vector<1x64xf32>
    %618 = arith.addf %616, %617 : vector<1x64xf32>
    %619 = arith.addf %618, %111 : vector<1x64xf32>
    %620 = vector.extract_strided_slice %619 {offsets = [0, 0], sizes = [1, 16], strides = [1, 1]} : vector<1x64xf32> to vector<1x16xf32>
    %621 = arith.negf %620 : vector<1x16xf32>
    %622 = math.exp %621 : vector<1x16xf32>
    %cst_197 = arith.constant 1.000000e+00 : f32
    %623 = vector.broadcast %cst_197 : f32 to vector<1x16xf32>
    %624 = arith.addf %623, %622 : vector<1x16xf32>
    %625 = arith.divf %623, %624 : vector<1x16xf32>
    %626 = vector.extract_strided_slice %619 {offsets = [0, 16], sizes = [1, 16], strides = [1, 1]} : vector<1x64xf32> to vector<1x16xf32>
    %627 = arith.negf %626 : vector<1x16xf32>
    %628 = math.exp %627 : vector<1x16xf32>
    %cst_198 = arith.constant 1.000000e+00 : f32
    %629 = vector.broadcast %cst_198 : f32 to vector<1x16xf32>
    %630 = arith.addf %629, %628 : vector<1x16xf32>
    %631 = arith.divf %629, %630 : vector<1x16xf32>
    %632 = vector.extract_strided_slice %619 {offsets = [0, 32], sizes = [1, 16], strides = [1, 1]} : vector<1x64xf32> to vector<1x16xf32>
    %633 = math.tanh %632 : vector<1x16xf32>
    %634 = vector.extract_strided_slice %619 {offsets = [0, 48], sizes = [1, 16], strides = [1, 1]} : vector<1x64xf32> to vector<1x16xf32>
    %635 = arith.negf %634 : vector<1x16xf32>
    %636 = math.exp %635 : vector<1x16xf32>
    %cst_199 = arith.constant 1.000000e+00 : f32
    %637 = vector.broadcast %cst_199 : f32 to vector<1x16xf32>
    %638 = arith.addf %637, %636 : vector<1x16xf32>
    %639 = arith.divf %637, %638 : vector<1x16xf32>
    %640 = arith.mulf %631, %569 : vector<1x16xf32>
    %641 = arith.mulf %625, %633 : vector<1x16xf32>
    %642 = arith.addf %640, %641 : vector<1x16xf32>
    %643 = math.tanh %642 : vector<1x16xf32>
    %644 = arith.mulf %639, %643 : vector<1x16xf32>
    %645 = arith.select %575, %644, %568 : vector<1x16xf32>
    %646 = arith.select %575, %642, %569 : vector<1x16xf32>
    %c1_i32_200 = arith.constant 1 : i32
    %647 = arith.subi %1, %c1_i32_200 : i32
    %c6_i32_201 = arith.constant 6 : i32
    %648 = arith.subi %647, %c6_i32_201 : i32
    %c8_i32_202 = arith.constant 8 : i32
    %649 = arith.select %575, %648, %c8_i32_202 : i32
    %650 = arith.index_cast %649 : i32 to index
    %c0_203 = arith.constant 0 : index
    %651 = vector.load %arg60[%650, %c0_203] : memref<9x16xf32, #tpu.memory_space<vmem>>, vector<1x16xf32>
    tpu.vector_store %arg60[%650, %c0_203], %644 {strides = array<i32>} : memref<9x16xf32, #tpu.memory_space<vmem>>, vector<1x16xf32>,
    %c7_i32 = arith.constant 7 : i32
    %652 = arith.cmpi sgt, %1, %c7_i32 : i32
    %653 = vector.extract_strided_slice %100 {offsets = [7, 0], sizes = [1, 32], strides = [1, 1]} : vector<8x32xf32> to vector<1x32xf32>
    %cst_204 = arith.constant dense<0.000000e+00> : vector<1x64xf32>
    %654 = tpu.matmul %653, %106, %cst_204 {dimension_numbers = #tpu.dot_dimension_numbers<[1], [0], [0], [1], [0, 0, 1, 1], [], []>} : vector<1x32xf32>, vector<32x64xf32>, vector<1x64xf32> -> vector<1x64xf32>
    %cst_205 = arith.constant dense<0.000000e+00> : vector<1x64xf32>
    %655 = tpu.matmul %606, %107, %cst_205 {dimension_numbers = #tpu.dot_dimension_numbers<[1], [0], [0], [1], [0, 0, 1, 1], [], []>} : vector<1x16xf32>, vector<16x64xf32>, vector<1x64xf32> -> vector<1x64xf32>
    %656 = arith.addf %654, %655 : vector<1x64xf32>
    %657 = arith.addf %656, %108 : vector<1x64xf32>
    %658 = vector.extract_strided_slice %657 {offsets = [0, 0], sizes = [1, 16], strides = [1, 1]} : vector<1x64xf32> to vector<1x16xf32>
    %659 = arith.negf %658 : vector<1x16xf32>
    %660 = math.exp %659 : vector<1x16xf32>
    %cst_206 = arith.constant 1.000000e+00 : f32
    %661 = vector.broadcast %cst_206 : f32 to vector<1x16xf32>
    %662 = arith.addf %661, %660 : vector<1x16xf32>
    %663 = arith.divf %661, %662 : vector<1x16xf32>
    %664 = vector.extract_strided_slice %657 {offsets = [0, 16], sizes = [1, 16], strides = [1, 1]} : vector<1x64xf32> to vector<1x16xf32>
    %665 = arith.negf %664 : vector<1x16xf32>
    %666 = math.exp %665 : vector<1x16xf32>
    %cst_207 = arith.constant 1.000000e+00 : f32
    %667 = vector.broadcast %cst_207 : f32 to vector<1x16xf32>
    %668 = arith.addf %667, %666 : vector<1x16xf32>
    %669 = arith.divf %667, %668 : vector<1x16xf32>
    %670 = vector.extract_strided_slice %657 {offsets = [0, 32], sizes = [1, 16], strides = [1, 1]} : vector<1x64xf32> to vector<1x16xf32>
    %671 = math.tanh %670 : vector<1x16xf32>
    %672 = vector.extract_strided_slice %657 {offsets = [0, 48], sizes = [1, 16], strides = [1, 1]} : vector<1x64xf32> to vector<1x16xf32>
    %673 = arith.negf %672 : vector<1x16xf32>
    %674 = math.exp %673 : vector<1x16xf32>
    %cst_208 = arith.constant 1.000000e+00 : f32
    %675 = vector.broadcast %cst_208 : f32 to vector<1x16xf32>
    %676 = arith.addf %675, %674 : vector<1x16xf32>
    %677 = arith.divf %675, %676 : vector<1x16xf32>
    %678 = arith.mulf %669, %607 : vector<1x16xf32>
    %679 = arith.mulf %663, %671 : vector<1x16xf32>
    %680 = arith.addf %678, %679 : vector<1x16xf32>
    %681 = math.tanh %680 : vector<1x16xf32>
    %682 = arith.mulf %677, %681 : vector<1x16xf32>
    %cst_209 = arith.constant 0.000000e+00 : f32
    %683 = vector.broadcast %cst_209 : f32 to vector<1x16xf32>
    %684 = arith.select %652, %682, %683 : vector<1x16xf32>
    %c7 = arith.constant 7 : index
    %c0_210 = arith.constant 0 : index
    %685 = vector.load %arg59[%c7, %c0_210] : memref<8x16xf32, #tpu.memory_space<vmem>>, vector<1x16xf32>
    tpu.vector_store %arg59[%c7, %c0_210], %684 {strides = array<i32>} : memref<8x16xf32, #tpu.memory_space<vmem>>, vector<1x16xf32>,
    %c1_i32_211 = arith.constant 1 : i32
    %686 = arith.subi %1, %c1_i32_211 : i32
    %c7_i32_212 = arith.constant 7 : i32
    %687 = arith.subi %686, %c7_i32_212 : i32
    %c0_i32_213 = arith.constant 0 : i32
    %688 = arith.select %652, %687, %c0_i32_213 : i32
    %689 = arith.index_cast %688 : i32 to index
    %c0_214 = arith.constant 0 : index
    %690 = vector.load %arg58[%689, %c0_214] : memref<8x32xf32, #tpu.memory_space<vmem>>, vector<1x32xf32>
    %cst_215 = arith.constant dense<0.000000e+00> : vector<1x64xf32>
    %691 = tpu.matmul %690, %109, %cst_215 {dimension_numbers = #tpu.dot_dimension_numbers<[1], [0], [0], [1], [0, 0, 1, 1], [], []>} : vector<1x32xf32>, vector<32x64xf32>, vector<1x64xf32> -> vector<1x64xf32>
    %cst_216 = arith.constant dense<0.000000e+00> : vector<1x64xf32>
    %692 = tpu.matmul %645, %110, %cst_216 {dimension_numbers = #tpu.dot_dimension_numbers<[1], [0], [0], [1], [0, 0, 1, 1], [], []>} : vector<1x16xf32>, vector<16x64xf32>, vector<1x64xf32> -> vector<1x64xf32>
    %693 = arith.addf %691, %692 : vector<1x64xf32>
    %694 = arith.addf %693, %111 : vector<1x64xf32>
    %695 = vector.extract_strided_slice %694 {offsets = [0, 0], sizes = [1, 16], strides = [1, 1]} : vector<1x64xf32> to vector<1x16xf32>
    %696 = arith.negf %695 : vector<1x16xf32>
    %697 = math.exp %696 : vector<1x16xf32>
    %cst_217 = arith.constant 1.000000e+00 : f32
    %698 = vector.broadcast %cst_217 : f32 to vector<1x16xf32>
    %699 = arith.addf %698, %697 : vector<1x16xf32>
    %700 = arith.divf %698, %699 : vector<1x16xf32>
    %701 = vector.extract_strided_slice %694 {offsets = [0, 16], sizes = [1, 16], strides = [1, 1]} : vector<1x64xf32> to vector<1x16xf32>
    %702 = arith.negf %701 : vector<1x16xf32>
    %703 = math.exp %702 : vector<1x16xf32>
    %cst_218 = arith.constant 1.000000e+00 : f32
    %704 = vector.broadcast %cst_218 : f32 to vector<1x16xf32>
    %705 = arith.addf %704, %703 : vector<1x16xf32>
    %706 = arith.divf %704, %705 : vector<1x16xf32>
    %707 = vector.extract_strided_slice %694 {offsets = [0, 32], sizes = [1, 16], strides = [1, 1]} : vector<1x64xf32> to vector<1x16xf32>
    %708 = math.tanh %707 : vector<1x16xf32>
    %709 = vector.extract_strided_slice %694 {offsets = [0, 48], sizes = [1, 16], strides = [1, 1]} : vector<1x64xf32> to vector<1x16xf32>
    %710 = arith.negf %709 : vector<1x16xf32>
    %711 = math.exp %710 : vector<1x16xf32>
    %cst_219 = arith.constant 1.000000e+00 : f32
    %712 = vector.broadcast %cst_219 : f32 to vector<1x16xf32>
    %713 = arith.addf %712, %711 : vector<1x16xf32>
    %714 = arith.divf %712, %713 : vector<1x16xf32>
    %715 = arith.mulf %706, %646 : vector<1x16xf32>
    %716 = arith.mulf %700, %708 : vector<1x16xf32>
    %717 = arith.addf %715, %716 : vector<1x16xf32>
    %718 = math.tanh %717 : vector<1x16xf32>
    %719 = arith.mulf %714, %718 : vector<1x16xf32>
    %c1_i32_220 = arith.constant 1 : i32
    %720 = arith.subi %1, %c1_i32_220 : i32
    %c7_i32_221 = arith.constant 7 : i32
    %721 = arith.subi %720, %c7_i32_221 : i32
    %c8_i32_222 = arith.constant 8 : i32
    %722 = arith.select %652, %721, %c8_i32_222 : i32
    %723 = arith.index_cast %722 : i32 to index
    %c0_223 = arith.constant 0 : index
    %724 = vector.load %arg60[%723, %c0_223] : memref<9x16xf32, #tpu.memory_space<vmem>>, vector<1x16xf32>
    tpu.vector_store %arg60[%723, %c0_223], %719 {strides = array<i32>} : memref<9x16xf32, #tpu.memory_space<vmem>>, vector<1x16xf32>,
    %c0_224 = arith.constant 0 : index
    %c0_225 = arith.constant 0 : index
    %725 = vector.load %arg59[%c0_224, %c0_225] : memref<8x16xf32, #tpu.memory_space<vmem>>, vector<8x16xf32>
    %c0_226 = arith.constant 0 : index
    %c0_227 = arith.constant 0 : index
    %726 = vector.load %arg60[%c0_226, %c0_227] : memref<9x16xf32, #tpu.memory_space<vmem>>, vector<8x16xf32>
    %727 = tpu.concatenate %725, %726 in 1 : vector<8x16xf32>, vector<8x16xf32> -> vector<8x32xf32>
    %c0_228 = arith.constant 0 : index
    %c0_229 = arith.constant 0 : index
    %c0_230 = arith.constant 0 : index
    %728 = vector.load %arg3[%c0_228, %c0_229, %c0_230] : memref<1x8x16xf32, #tpu.memory_space<vmem>>, vector<1x8x16xf32>
    %729 = vector.shape_cast %728 : vector<1x8x16xf32> to vector<8x16xf32>
    %c0_231 = arith.constant 0 : index
    %c0_232 = arith.constant 0 : index
    %730 = vector.load %arg20[%c0_231, %c0_232] : memref<16x32xf32, #tpu.memory_space<vmem>>, vector<16x32xf32>
    %cst_233 = arith.constant dense<0.000000e+00> : vector<8x32xf32>
    %731 = tpu.matmul %729, %730, %cst_233 {dimension_numbers = #tpu.dot_dimension_numbers<[1], [0], [0], [1], [0, 0, 1, 1], [], []>} : vector<8x16xf32>, vector<16x32xf32>, vector<8x32xf32> -> vector<8x32xf32>
    %c0_234 = arith.constant 0 : index
    %c0_235 = arith.constant 0 : index
    %732 = vector.load %arg21[%c0_234, %c0_235] : memref<1x32xf32, #tpu.memory_space<vmem>>, vector<1x32xf32>
    %733 = vector.broadcast %732 : vector<1x32xf32> to vector<8x32xf32>
    %734 = arith.addf %731, %733 : vector<8x32xf32>
    %cst_236 = arith.constant 0.000000e+00 : f32
    %735 = vector.broadcast %cst_236 : f32 to vector<8x32xf32>
    %736 = arith.maximumf %734, %735 : vector<8x32xf32>
    %c0_237 = arith.constant 0 : index
    %c0_238 = arith.constant 0 : index
    %737 = vector.load %arg22[%c0_237, %c0_238] : memref<32x32xf32, #tpu.memory_space<vmem>>, vector<32x32xf32>
    %cst_239 = arith.constant dense<0.000000e+00> : vector<8x32xf32>
    %738 = tpu.matmul %736, %737, %cst_239 {dimension_numbers = #tpu.dot_dimension_numbers<[1], [0], [0], [1], [0, 0, 1, 1], [], []>} : vector<8x32xf32>, vector<32x32xf32>, vector<8x32xf32> -> vector<8x32xf32>
    %c0_240 = arith.constant 0 : index
    %c0_241 = arith.constant 0 : index
    %739 = vector.load %arg23[%c0_240, %c0_241] : memref<1x32xf32, #tpu.memory_space<vmem>>, vector<1x32xf32>
    %740 = vector.broadcast %739 : vector<1x32xf32> to vector<8x32xf32>
    %741 = arith.addf %738, %740 : vector<8x32xf32>
    %cst_242 = arith.constant 0.000000e+00 : f32
    %742 = vector.broadcast %cst_242 : f32 to vector<8x32xf32>
    %743 = arith.maximumf %741, %742 : vector<8x32xf32>
    %c0_243 = arith.constant 0 : index
    %c0_244 = arith.constant 0 : index
    %744 = vector.load %arg24[%c0_243, %c0_244] : memref<32x32xf32, #tpu.memory_space<vmem>>, vector<32x32xf32>
    %cst_245 = arith.constant dense<0.000000e+00> : vector<8x32xf32>
    %745 = tpu.matmul %727, %744, %cst_245 {dimension_numbers = #tpu.dot_dimension_numbers<[1], [0], [0], [1], [0, 0, 1, 1], [], []>} : vector<8x32xf32>, vector<32x32xf32>, vector<8x32xf32> -> vector<8x32xf32>
    %c0_246 = arith.constant 0 : index
    %c0_247 = arith.constant 0 : index
    %746 = vector.load %arg25[%c0_246, %c0_247] : memref<1x32xf32, #tpu.memory_space<vmem>>, vector<1x32xf32>
    %747 = vector.broadcast %746 : vector<1x32xf32> to vector<8x32xf32>
    %748 = arith.addf %745, %747 : vector<8x32xf32>
    %749 = tpu.iota {dimensions = array<i32: 0>} : vector<8x1xi32>
    %750 = vector.broadcast %1 : i32 to vector<8x1xi32>
    %751 = arith.cmpi slt, %749, %750 : vector<8x1xi32>
    %cst_248 = arith.constant 0.000000e+00 : f32
    %752 = vector.broadcast %cst_248 : f32 to vector<12x1xf32>
    %c0_249 = arith.constant 0 : index
    %c0_250 = arith.constant 0 : index
    %753 = vector.load %arg61[%c0_249, %c0_250] : memref<12x1xf32, #tpu.memory_space<vmem>>, vector<12x1xf32>
    tpu.vector_store %arg61[%c0_249, %c0_250], %752 {strides = array<i32>} : memref<12x1xf32, #tpu.memory_space<vmem>>, vector<12x1xf32>,
    %c0_251 = arith.constant 0 : index
    %c0_252 = arith.constant 0 : index
    %754 = vector.load %arg26[%c0_251, %c0_252] : memref<32x128xf32, #tpu.memory_space<vmem>>, vector<32x128xf32>
    %c0_253 = arith.constant 0 : index
    %c0_254 = arith.constant 0 : index
    %755 = vector.load %arg27[%c0_253, %c0_254] : memref<32x128xf32, #tpu.memory_space<vmem>>, vector<32x128xf32>
    %c0_255 = arith.constant 0 : index
    %c0_256 = arith.constant 0 : index
    %756 = vector.load %arg28[%c0_255, %c0_256] : memref<32x128xf32, #tpu.memory_space<vmem>>, vector<32x128xf32>
    %c0_257 = arith.constant 0 : index
    %c0_258 = arith.constant 0 : index
    %757 = vector.load %arg29[%c0_257, %c0_258] : memref<1x128xf32, #tpu.memory_space<vmem>>, vector<1x128xf32>
    %c0_259 = arith.constant 0 : index
    %c0_260 = arith.constant 0 : index
    %758 = vector.load %arg30[%c0_259, %c0_260] : memref<32x128xf32, #tpu.memory_space<vmem>>, vector<32x128xf32>
    %c0_261 = arith.constant 0 : index
    %c0_262 = arith.constant 0 : index
    %759 = vector.load %arg31[%c0_261, %c0_262] : memref<32x128xf32, #tpu.memory_space<vmem>>, vector<32x128xf32>
    %c0_263 = arith.constant 0 : index
    %c0_264 = arith.constant 0 : index
    %760 = vector.load %arg32[%c0_263, %c0_264] : memref<1x128xf32, #tpu.memory_space<vmem>>, vector<1x128xf32>
    %c0_265 = arith.constant 0 : index
    %c0_266 = arith.constant 0 : index
    %761 = vector.load %arg33[%c0_265, %c0_266] : memref<32x32xf32, #tpu.memory_space<vmem>>, vector<32x32xf32>
    %c0_267 = arith.constant 0 : index
    %c0_268 = arith.constant 0 : index
    %762 = vector.load %arg34[%c0_267, %c0_268] : memref<32x32xf32, #tpu.memory_space<vmem>>, vector<32x32xf32>
    %c0_269 = arith.constant 0 : index
    %c0_270 = arith.constant 0 : index
    %763 = vector.load %arg36[%c0_269, %c0_270] : memref<32x1xf32, #tpu.memory_space<vmem>>, vector<32x1xf32>
    %c0_271 = arith.constant 0 : index
    %c0_272 = arith.constant 0 : index
    %764 = vector.load %arg37[%c0_271, %c0_272] : memref<32x128xf32, #tpu.memory_space<vmem>>, vector<32x128xf32>
    %c0_273 = arith.constant 0 : index
    %c0_274 = arith.constant 0 : index
    %765 = vector.load %arg38[%c0_273, %c0_274] : memref<32x128xf32, #tpu.memory_space<vmem>>, vector<32x128xf32>
    %c0_275 = arith.constant 0 : index
    %c0_276 = arith.constant 0 : index
    %766 = vector.load %arg39[%c0_275, %c0_276] : memref<1x128xf32, #tpu.memory_space<vmem>>, vector<1x128xf32>
    %c0_277 = arith.constant 0 : index
    %c0_278 = arith.constant 0 : index
    %767 = vector.load %arg35[%c0_277, %c0_278] : memref<5x32xf32, #tpu.memory_space<vmem>>, vector<1x32xf32>
    %768 = vector.shape_cast %767 : vector<1x32xf32> to vector<1x32xf32>
    %769 = vector.broadcast %768 : vector<1x32xf32> to vector<8x32xf32>
    %c1_279 = arith.constant 1 : index
    %c0_280 = arith.constant 0 : index
    %770 = vector.load %arg35[%c1_279, %c0_280] : memref<5x32xf32, #tpu.memory_space<vmem>>, vector<1x32xf32>
    %771 = vector.shape_cast %770 : vector<1x32xf32> to vector<1x32xf32>
    %772 = vector.broadcast %771 : vector<1x32xf32> to vector<8x32xf32>
    %c2_281 = arith.constant 2 : index
    %c0_282 = arith.constant 0 : index
    %773 = vector.load %arg35[%c2_281, %c0_282] : memref<5x32xf32, #tpu.memory_space<vmem>>, vector<1x32xf32>
    %774 = vector.shape_cast %773 : vector<1x32xf32> to vector<1x32xf32>
    %775 = vector.broadcast %774 : vector<1x32xf32> to vector<8x32xf32>
    %c3_283 = arith.constant 3 : index
    %c0_284 = arith.constant 0 : index
    %776 = vector.load %arg35[%c3_283, %c0_284] : memref<5x32xf32, #tpu.memory_space<vmem>>, vector<1x32xf32>
    %777 = vector.shape_cast %776 : vector<1x32xf32> to vector<1x32xf32>
    %778 = vector.broadcast %777 : vector<1x32xf32> to vector<8x32xf32>
    %c4_285 = arith.constant 4 : index
    %c0_286 = arith.constant 0 : index
    %779 = vector.load %arg35[%c4_285, %c0_286] : memref<5x32xf32, #tpu.memory_space<vmem>>, vector<1x32xf32>
    %780 = vector.shape_cast %779 : vector<1x32xf32> to vector<1x32xf32>
    %781 = vector.broadcast %780 : vector<1x32xf32> to vector<8x32xf32>
    %cst_287 = arith.constant 0.000000e+00 : f32
    %782 = vector.broadcast %cst_287 : f32 to vector<1x32xf32>
    %cst_288 = arith.constant 0.000000e+00 : f32
    %783 = vector.broadcast %cst_288 : f32 to vector<1x32xf32>
    %784 = vector.extract_strided_slice %743 {offsets = [0, 0], sizes = [1, 32], strides = [1, 1]} : vector<8x32xf32> to vector<1x32xf32>
    %cst_289 = arith.constant dense<0.000000e+00> : vector<1x128xf32>
    %785 = tpu.matmul %784, %754, %cst_289 {dimension_numbers = #tpu.dot_dimension_numbers<[1], [0], [0], [1], [0, 0, 1, 1], [], []>} : vector<1x32xf32>, vector<32x128xf32>, vector<1x128xf32> -> vector<1x128xf32>
    %cst_290 = arith.constant dense<0.000000e+00> : vector<1x128xf32>
    %786 = tpu.matmul %783, %755, %cst_290 {dimension_numbers = #tpu.dot_dimension_numbers<[1], [0], [0], [1], [0, 0, 1, 1], [], []>} : vector<1x32xf32>, vector<32x128xf32>, vector<1x128xf32> -> vector<1x128xf32>
    %787 = arith.addf %785, %786 : vector<1x128xf32>
    %cst_291 = arith.constant dense<0.000000e+00> : vector<1x128xf32>
    %788 = tpu.matmul %782, %756, %cst_291 {dimension_numbers = #tpu.dot_dimension_numbers<[1], [0], [0], [1], [0, 0, 1, 1], [], []>} : vector<1x32xf32>, vector<32x128xf32>, vector<1x128xf32> -> vector<1x128xf32>
    %789 = arith.addf %787, %788 : vector<1x128xf32>
    %790 = arith.addf %789, %757 : vector<1x128xf32>
    %791 = vector.extract_strided_slice %790 {offsets = [0, 0], sizes = [1, 32], strides = [1, 1]} : vector<1x128xf32> to vector<1x32xf32>
    %792 = arith.negf %791 : vector<1x32xf32>
    %793 = math.exp %792 : vector<1x32xf32>
    %cst_292 = arith.constant 1.000000e+00 : f32
    %794 = vector.broadcast %cst_292 : f32 to vector<1x32xf32>
    %795 = arith.addf %794, %793 : vector<1x32xf32>
    %796 = arith.divf %794, %795 : vector<1x32xf32>
    %797 = vector.extract_strided_slice %790 {offsets = [0, 32], sizes = [1, 32], strides = [1, 1]} : vector<1x128xf32> to vector<1x32xf32>
    %798 = arith.negf %797 : vector<1x32xf32>
    %799 = math.exp %798 : vector<1x32xf32>
    %cst_293 = arith.constant 1.000000e+00 : f32
    %800 = vector.broadcast %cst_293 : f32 to vector<1x32xf32>
    %801 = arith.addf %800, %799 : vector<1x32xf32>
    %802 = arith.divf %800, %801 : vector<1x32xf32>
    %803 = vector.extract_strided_slice %790 {offsets = [0, 64], sizes = [1, 32], strides = [1, 1]} : vector<1x128xf32> to vector<1x32xf32>
    %804 = math.tanh %803 : vector<1x32xf32>
    %805 = vector.extract_strided_slice %790 {offsets = [0, 96], sizes = [1, 32], strides = [1, 1]} : vector<1x128xf32> to vector<1x32xf32>
    %806 = arith.negf %805 : vector<1x32xf32>
    %807 = math.exp %806 : vector<1x32xf32>
    %cst_294 = arith.constant 1.000000e+00 : f32
    %808 = vector.broadcast %cst_294 : f32 to vector<1x32xf32>
    %809 = arith.addf %808, %807 : vector<1x32xf32>
    %810 = arith.divf %808, %809 : vector<1x32xf32>
    %811 = arith.mulf %802, %782 : vector<1x32xf32>
    %812 = arith.mulf %796, %804 : vector<1x32xf32>
    %813 = arith.addf %811, %812 : vector<1x32xf32>
    %814 = math.tanh %813 : vector<1x32xf32>
    %815 = arith.mulf %810, %814 : vector<1x32xf32>
    %cst_295 = arith.constant dense<0.000000e+00> : vector<1x128xf32>
    %816 = tpu.matmul %815, %758, %cst_295 {dimension_numbers = #tpu.dot_dimension_numbers<[1], [0], [0], [1], [0, 0, 1, 1], [], []>} : vector<1x32xf32>, vector<32x128xf32>, vector<1x128xf32> -> vector<1x128xf32>
    %cst_296 = arith.constant dense<0.000000e+00> : vector<1x128xf32>
    %817 = tpu.matmul %782, %759, %cst_296 {dimension_numbers = #tpu.dot_dimension_numbers<[1], [0], [0], [1], [0, 0, 1, 1], [], []>} : vector<1x32xf32>, vector<32x128xf32>, vector<1x128xf32> -> vector<1x128xf32>
    %818 = arith.addf %816, %817 : vector<1x128xf32>
    %819 = arith.addf %818, %760 : vector<1x128xf32>
    %820 = vector.extract_strided_slice %819 {offsets = [0, 0], sizes = [1, 32], strides = [1, 1]} : vector<1x128xf32> to vector<1x32xf32>
    %821 = arith.negf %820 : vector<1x32xf32>
    %822 = math.exp %821 : vector<1x32xf32>
    %cst_297 = arith.constant 1.000000e+00 : f32
    %823 = vector.broadcast %cst_297 : f32 to vector<1x32xf32>
    %824 = arith.addf %823, %822 : vector<1x32xf32>
    %825 = arith.divf %823, %824 : vector<1x32xf32>
    %826 = vector.extract_strided_slice %819 {offsets = [0, 32], sizes = [1, 32], strides = [1, 1]} : vector<1x128xf32> to vector<1x32xf32>
    %827 = arith.negf %826 : vector<1x32xf32>
    %828 = math.exp %827 : vector<1x32xf32>
    %cst_298 = arith.constant 1.000000e+00 : f32
    %829 = vector.broadcast %cst_298 : f32 to vector<1x32xf32>
    %830 = arith.addf %829, %828 : vector<1x32xf32>
    %831 = arith.divf %829, %830 : vector<1x32xf32>
    %832 = vector.extract_strided_slice %819 {offsets = [0, 64], sizes = [1, 32], strides = [1, 1]} : vector<1x128xf32> to vector<1x32xf32>
    %833 = math.tanh %832 : vector<1x32xf32>
    %834 = vector.extract_strided_slice %819 {offsets = [0, 96], sizes = [1, 32], strides = [1, 1]} : vector<1x128xf32> to vector<1x32xf32>
    %835 = arith.negf %834 : vector<1x32xf32>
    %836 = math.exp %835 : vector<1x32xf32>
    %cst_299 = arith.constant 1.000000e+00 : f32
    %837 = vector.broadcast %cst_299 : f32 to vector<1x32xf32>
    %838 = arith.addf %837, %836 : vector<1x32xf32>
    %839 = arith.divf %837, %838 : vector<1x32xf32>
    %840 = arith.mulf %831, %782 : vector<1x32xf32>
    %841 = arith.mulf %825, %833 : vector<1x32xf32>
    %842 = arith.addf %840, %841 : vector<1x32xf32>
    %843 = math.tanh %842 : vector<1x32xf32>
    %844 = arith.mulf %839, %843 : vector<1x32xf32>
    %cst_300 = arith.constant dense<0.000000e+00> : vector<1x32xf32>
    %845 = tpu.matmul %815, %761, %cst_300 {dimension_numbers = #tpu.dot_dimension_numbers<[1], [0], [0], [1], [0, 0, 1, 1], [], []>} : vector<1x32xf32>, vector<32x32xf32>, vector<1x32xf32> -> vector<1x32xf32>
    %cst_301 = arith.constant dense<0.000000e+00> : vector<1x32xf32>
    %846 = tpu.matmul %844, %762, %cst_301 {dimension_numbers = #tpu.dot_dimension_numbers<[1], [0], [0], [1], [0, 0, 1, 1], [], []>} : vector<1x32xf32>, vector<32x32xf32>, vector<1x32xf32> -> vector<1x32xf32>
    %847 = arith.addf %845, %846 : vector<1x32xf32>
    %c0_302 = arith.constant 0 : index
    %c0_303 = arith.constant 0 : index
    %848 = vector.load %arg61[%c0_302, %c0_303] : memref<12x1xf32, #tpu.memory_space<vmem>>, vector<8x1xf32>
    %849 = vector.broadcast %848 : vector<8x1xf32> to vector<8x32xf32>
    %850 = arith.mulf %769, %849 : vector<8x32xf32>
    %c1_304 = arith.constant 1 : index
    %c0_305 = arith.constant 0 : index
    %851 = vector.load %arg61[%c1_304, %c0_305] : memref<12x1xf32, #tpu.memory_space<vmem>>, vector<8x1xf32>
    %852 = vector.broadcast %851 : vector<8x1xf32> to vector<8x32xf32>
    %853 = arith.mulf %772, %852 : vector<8x32xf32>
    %854 = arith.addf %850, %853 : vector<8x32xf32>
    %c2_306 = arith.constant 2 : index
    %c0_307 = arith.constant 0 : index
    %855 = vector.load %arg61[%c2_306, %c0_307] : memref<12x1xf32, #tpu.memory_space<vmem>>, vector<8x1xf32>
    %856 = vector.broadcast %855 : vector<8x1xf32> to vector<8x32xf32>
    %857 = arith.mulf %775, %856 : vector<8x32xf32>
    %858 = arith.addf %854, %857 : vector<8x32xf32>
    %c3_308 = arith.constant 3 : index
    %c0_309 = arith.constant 0 : index
    %859 = vector.load %arg61[%c3_308, %c0_309] : memref<12x1xf32, #tpu.memory_space<vmem>>, vector<8x1xf32>
    %860 = vector.broadcast %859 : vector<8x1xf32> to vector<8x32xf32>
    %861 = arith.mulf %778, %860 : vector<8x32xf32>
    %862 = arith.addf %858, %861 : vector<8x32xf32>
    %c4_310 = arith.constant 4 : index
    %c0_311 = arith.constant 0 : index
    %863 = vector.load %arg61[%c4_310, %c0_311] : memref<12x1xf32, #tpu.memory_space<vmem>>, vector<8x1xf32>
    %864 = vector.broadcast %863 : vector<8x1xf32> to vector<8x32xf32>
    %865 = arith.mulf %781, %864 : vector<8x32xf32>
    %866 = arith.addf %862, %865 : vector<8x32xf32>
    %867 = vector.broadcast %847 : vector<1x32xf32> to vector<8x32xf32>
    %868 = arith.addf %867, %866 : vector<8x32xf32>
    %869 = arith.addf %868, %748 : vector<8x32xf32>
    %870 = math.tanh %869 : vector<8x32xf32>
    %cst_312 = arith.constant dense<0.000000e+00> : vector<8x1xf32>
    %871 = tpu.matmul %870, %763, %cst_312 {dimension_numbers = #tpu.dot_dimension_numbers<[1], [0], [0], [1], [0, 0, 1, 1], [], []>} : vector<8x32xf32>, vector<32x1xf32>, vector<8x1xf32> -> vector<8x1xf32>
    %cst_313 = arith.constant -1.000000e+30 : f32
    %872 = vector.broadcast %cst_313 : f32 to vector<8x1xf32>
    %873 = arith.select %751, %871, %872 : vector<8x1xi1>, vector<8x1xf32>
    %cst_314 = arith.constant dense<0xFF800000> : vector<1xf32>
    %874 = vector.multi_reduction <maximumf>, %873, %cst_314 [0] : vector<8x1xf32> to vector<1xf32>
    %875 = vector.shape_cast %874 : vector<1xf32> to vector<1x1xf32>
    %876 = vector.broadcast %875 : vector<1x1xf32> to vector<8x1xf32>
    %877 = arith.subf %873, %876 : vector<8x1xf32>
    %878 = math.exp %877 : vector<8x1xf32>
    %cst_315 = arith.constant dense<0.000000e+00> : vector<1xf32>
    %879 = vector.multi_reduction <add>, %878, %cst_315 [0] : vector<8x1xf32> to vector<1xf32>
    %880 = vector.shape_cast %879 : vector<1xf32> to vector<1x1xf32>
    %881 = vector.broadcast %880 : vector<1x1xf32> to vector<8x1xf32>
    %882 = arith.divf %878, %881 : vector<8x1xf32>
    %883 = vector.broadcast %882 : vector<8x1xf32> to vector<8x32xf32>
    %884 = arith.mulf %883, %727 : vector<8x32xf32>
    %cst_316 = arith.constant dense<0.000000e+00> : vector<32xf32>
    %885 = vector.multi_reduction <add>, %884, %cst_316 [0] : vector<8x32xf32> to vector<32xf32>
    %886 = vector.shape_cast %885 : vector<32xf32> to vector<1x32xf32>
    %c2_317 = arith.constant 2 : index
    %c0_318 = arith.constant 0 : index
    %887 = vector.load %arg61[%c2_317, %c0_318] : memref<12x1xf32, #tpu.memory_space<vmem>>, vector<8x1xf32>
    %888 = arith.addf %887, %882 : vector<8x1xf32>
    %c2_319 = arith.constant 2 : index
    %c0_320 = arith.constant 0 : index
    %889 = vector.load %arg61[%c2_319, %c0_320] : memref<12x1xf32, #tpu.memory_space<vmem>>, vector<8x1xf32>
    tpu.vector_store %arg61[%c2_319, %c0_320], %888 {strides = array<i32>} : memref<12x1xf32, #tpu.memory_space<vmem>>, vector<8x1xf32>,
    %cst_321 = arith.constant dense<0.000000e+00> : vector<1x128xf32>
    %890 = tpu.matmul %844, %764, %cst_321 {dimension_numbers = #tpu.dot_dimension_numbers<[1], [0], [0], [1], [0, 0, 1, 1], [], []>} : vector<1x32xf32>, vector<32x128xf32>, vector<1x128xf32> -> vector<1x128xf32>
    %cst_322 = arith.constant dense<0.000000e+00> : vector<1x128xf32>
    %891 = tpu.matmul %886, %765, %cst_322 {dimension_numbers = #tpu.dot_dimension_numbers<[1], [0], [0], [1], [0, 0, 1, 1], [], []>} : vector<1x32xf32>, vector<32x128xf32>, vector<1x128xf32> -> vector<1x128xf32>
    %892 = arith.addf %890, %891 : vector<1x128xf32>
    %893 = arith.addf %892, %766 : vector<1x128xf32>
    %c0_323 = arith.constant 0 : index
    %c0_324 = arith.constant 0 : index
    %c0_325 = arith.constant 0 : index
    %894 = vector.load %arg57[%c0_323, %c0_324, %c0_325] : memref<1x8x128xf32, #tpu.memory_space<vmem>>, vector<1x1x128xf32>
    %895 = vector.shape_cast %894 : vector<1x1x128xf32> to vector<1x128xf32>
    %896 = vector.shape_cast %893 : vector<1x128xf32> to vector<1x1x128xf32>
    tpu.vector_store %arg57[%c0_323, %c0_324, %c0_325], %896 {strides = array<i32>} : memref<1x8x128xf32, #tpu.memory_space<vmem>>, vector<1x1x128xf32>,
    %897 = vector.extract_strided_slice %743 {offsets = [1, 0], sizes = [1, 32], strides = [1, 1]} : vector<8x32xf32> to vector<1x32xf32>
    %cst_326 = arith.constant dense<0.000000e+00> : vector<1x128xf32>
    %898 = tpu.matmul %897, %754, %cst_326 {dimension_numbers = #tpu.dot_dimension_numbers<[1], [0], [0], [1], [0, 0, 1, 1], [], []>} : vector<1x32xf32>, vector<32x128xf32>, vector<1x128xf32> -> vector<1x128xf32>
    %cst_327 = arith.constant dense<0.000000e+00> : vector<1x128xf32>
    %899 = tpu.matmul %886, %755, %cst_327 {dimension_numbers = #tpu.dot_dimension_numbers<[1], [0], [0], [1], [0, 0, 1, 1], [], []>} : vector<1x32xf32>, vector<32x128xf32>, vector<1x128xf32> -> vector<1x128xf32>
    %900 = arith.addf %898, %899 : vector<1x128xf32>
    %cst_328 = arith.constant dense<0.000000e+00> : vector<1x128xf32>
    %901 = tpu.matmul %815, %756, %cst_328 {dimension_numbers = #tpu.dot_dimension_numbers<[1], [0], [0], [1], [0, 0, 1, 1], [], []>} : vector<1x32xf32>, vector<32x128xf32>, vector<1x128xf32> -> vector<1x128xf32>
    %902 = arith.addf %900, %901 : vector<1x128xf32>
    %903 = arith.addf %902, %757 : vector<1x128xf32>
    %904 = vector.extract_strided_slice %903 {offsets = [0, 0], sizes = [1, 32], strides = [1, 1]} : vector<1x128xf32> to vector<1x32xf32>
    %905 = arith.negf %904 : vector<1x32xf32>
    %906 = math.exp %905 : vector<1x32xf32>
    %cst_329 = arith.constant 1.000000e+00 : f32
    %907 = vector.broadcast %cst_329 : f32 to vector<1x32xf32>
    %908 = arith.addf %907, %906 : vector<1x32xf32>
    %909 = arith.divf %907, %908 : vector<1x32xf32>
    %910 = vector.extract_strided_slice %903 {offsets = [0, 32], sizes = [1, 32], strides = [1, 1]} : vector<1x128xf32> to vector<1x32xf32>
    %911 = arith.negf %910 : vector<1x32xf32>
    %912 = math.exp %911 : vector<1x32xf32>
    %cst_330 = arith.constant 1.000000e+00 : f32
    %913 = vector.broadcast %cst_330 : f32 to vector<1x32xf32>
    %914 = arith.addf %913, %912 : vector<1x32xf32>
    %915 = arith.divf %913, %914 : vector<1x32xf32>
    %916 = vector.extract_strided_slice %903 {offsets = [0, 64], sizes = [1, 32], strides = [1, 1]} : vector<1x128xf32> to vector<1x32xf32>
    %917 = math.tanh %916 : vector<1x32xf32>
    %918 = vector.extract_strided_slice %903 {offsets = [0, 96], sizes = [1, 32], strides = [1, 1]} : vector<1x128xf32> to vector<1x32xf32>
    %919 = arith.negf %918 : vector<1x32xf32>
    %920 = math.exp %919 : vector<1x32xf32>
    %cst_331 = arith.constant 1.000000e+00 : f32
    %921 = vector.broadcast %cst_331 : f32 to vector<1x32xf32>
    %922 = arith.addf %921, %920 : vector<1x32xf32>
    %923 = arith.divf %921, %922 : vector<1x32xf32>
    %924 = arith.mulf %915, %813 : vector<1x32xf32>
    %925 = arith.mulf %909, %917 : vector<1x32xf32>
    %926 = arith.addf %924, %925 : vector<1x32xf32>
    %927 = math.tanh %926 : vector<1x32xf32>
    %928 = arith.mulf %923, %927 : vector<1x32xf32>
    %cst_332 = arith.constant dense<0.000000e+00> : vector<1x128xf32>
    %929 = tpu.matmul %928, %758, %cst_332 {dimension_numbers = #tpu.dot_dimension_numbers<[1], [0], [0], [1], [0, 0, 1, 1], [], []>} : vector<1x32xf32>, vector<32x128xf32>, vector<1x128xf32> -> vector<1x128xf32>
    %cst_333 = arith.constant dense<0.000000e+00> : vector<1x128xf32>
    %930 = tpu.matmul %844, %759, %cst_333 {dimension_numbers = #tpu.dot_dimension_numbers<[1], [0], [0], [1], [0, 0, 1, 1], [], []>} : vector<1x32xf32>, vector<32x128xf32>, vector<1x128xf32> -> vector<1x128xf32>
    %931 = arith.addf %929, %930 : vector<1x128xf32>
    %932 = arith.addf %931, %760 : vector<1x128xf32>
    %933 = vector.extract_strided_slice %932 {offsets = [0, 0], sizes = [1, 32], strides = [1, 1]} : vector<1x128xf32> to vector<1x32xf32>
    %934 = arith.negf %933 : vector<1x32xf32>
    %935 = math.exp %934 : vector<1x32xf32>
    %cst_334 = arith.constant 1.000000e+00 : f32
    %936 = vector.broadcast %cst_334 : f32 to vector<1x32xf32>
    %937 = arith.addf %936, %935 : vector<1x32xf32>
    %938 = arith.divf %936, %937 : vector<1x32xf32>
    %939 = vector.extract_strided_slice %932 {offsets = [0, 32], sizes = [1, 32], strides = [1, 1]} : vector<1x128xf32> to vector<1x32xf32>
    %940 = arith.negf %939 : vector<1x32xf32>
    %941 = math.exp %940 : vector<1x32xf32>
    %cst_335 = arith.constant 1.000000e+00 : f32
    %942 = vector.broadcast %cst_335 : f32 to vector<1x32xf32>
    %943 = arith.addf %942, %941 : vector<1x32xf32>
    %944 = arith.divf %942, %943 : vector<1x32xf32>
    %945 = vector.extract_strided_slice %932 {offsets = [0, 64], sizes = [1, 32], strides = [1, 1]} : vector<1x128xf32> to vector<1x32xf32>
    %946 = math.tanh %945 : vector<1x32xf32>
    %947 = vector.extract_strided_slice %932 {offsets = [0, 96], sizes = [1, 32], strides = [1, 1]} : vector<1x128xf32> to vector<1x32xf32>
    %948 = arith.negf %947 : vector<1x32xf32>
    %949 = math.exp %948 : vector<1x32xf32>
    %cst_336 = arith.constant 1.000000e+00 : f32
    %950 = vector.broadcast %cst_336 : f32 to vector<1x32xf32>
    %951 = arith.addf %950, %949 : vector<1x32xf32>
    %952 = arith.divf %950, %951 : vector<1x32xf32>
    %953 = arith.mulf %944, %842 : vector<1x32xf32>
    %954 = arith.mulf %938, %946 : vector<1x32xf32>
    %955 = arith.addf %953, %954 : vector<1x32xf32>
    %956 = math.tanh %955 : vector<1x32xf32>
    %957 = arith.mulf %952, %956 : vector<1x32xf32>
    %cst_337 = arith.constant dense<0.000000e+00> : vector<1x32xf32>
    %958 = tpu.matmul %928, %761, %cst_337 {dimension_numbers = #tpu.dot_dimension_numbers<[1], [0], [0], [1], [0, 0, 1, 1], [], []>} : vector<1x32xf32>, vector<32x32xf32>, vector<1x32xf32> -> vector<1x32xf32>
    %cst_338 = arith.constant dense<0.000000e+00> : vector<1x32xf32>
    %959 = tpu.matmul %957, %762, %cst_338 {dimension_numbers = #tpu.dot_dimension_numbers<[1], [0], [0], [1], [0, 0, 1, 1], [], []>} : vector<1x32xf32>, vector<32x32xf32>, vector<1x32xf32> -> vector<1x32xf32>
    %960 = arith.addf %958, %959 : vector<1x32xf32>
    %c0_339 = arith.constant 0 : index
    %c0_340 = arith.constant 0 : index
    %961 = vector.load %arg61[%c0_339, %c0_340] : memref<12x1xf32, #tpu.memory_space<vmem>>, vector<8x1xf32>
    %962 = vector.broadcast %961 : vector<8x1xf32> to vector<8x32xf32>
    %963 = arith.mulf %769, %962 : vector<8x32xf32>
    %c1_341 = arith.constant 1 : index
    %c0_342 = arith.constant 0 : index
    %964 = vector.load %arg61[%c1_341, %c0_342] : memref<12x1xf32, #tpu.memory_space<vmem>>, vector<8x1xf32>
    %965 = vector.broadcast %964 : vector<8x1xf32> to vector<8x32xf32>
    %966 = arith.mulf %772, %965 : vector<8x32xf32>
    %967 = arith.addf %963, %966 : vector<8x32xf32>
    %c2_343 = arith.constant 2 : index
    %c0_344 = arith.constant 0 : index
    %968 = vector.load %arg61[%c2_343, %c0_344] : memref<12x1xf32, #tpu.memory_space<vmem>>, vector<8x1xf32>
    %969 = vector.broadcast %968 : vector<8x1xf32> to vector<8x32xf32>
    %970 = arith.mulf %775, %969 : vector<8x32xf32>
    %971 = arith.addf %967, %970 : vector<8x32xf32>
    %c3_345 = arith.constant 3 : index
    %c0_346 = arith.constant 0 : index
    %972 = vector.load %arg61[%c3_345, %c0_346] : memref<12x1xf32, #tpu.memory_space<vmem>>, vector<8x1xf32>
    %973 = vector.broadcast %972 : vector<8x1xf32> to vector<8x32xf32>
    %974 = arith.mulf %778, %973 : vector<8x32xf32>
    %975 = arith.addf %971, %974 : vector<8x32xf32>
    %c4_347 = arith.constant 4 : index
    %c0_348 = arith.constant 0 : index
    %976 = vector.load %arg61[%c4_347, %c0_348] : memref<12x1xf32, #tpu.memory_space<vmem>>, vector<8x1xf32>
    %977 = vector.broadcast %976 : vector<8x1xf32> to vector<8x32xf32>
    %978 = arith.mulf %781, %977 : vector<8x32xf32>
    %979 = arith.addf %975, %978 : vector<8x32xf32>
    %980 = vector.broadcast %960 : vector<1x32xf32> to vector<8x32xf32>
    %981 = arith.addf %980, %979 : vector<8x32xf32>
    %982 = arith.addf %981, %748 : vector<8x32xf32>
    %983 = math.tanh %982 : vector<8x32xf32>
    %cst_349 = arith.constant dense<0.000000e+00> : vector<8x1xf32>
    %984 = tpu.matmul %983, %763, %cst_349 {dimension_numbers = #tpu.dot_dimension_numbers<[1], [0], [0], [1], [0, 0, 1, 1], [], []>} : vector<8x32xf32>, vector<32x1xf32>, vector<8x1xf32> -> vector<8x1xf32>
    %cst_350 = arith.constant -1.000000e+30 : f32
    %985 = vector.broadcast %cst_350 : f32 to vector<8x1xf32>
    %986 = arith.select %751, %984, %985 : vector<8x1xi1>, vector<8x1xf32>
    %cst_351 = arith.constant dense<0xFF800000> : vector<1xf32>
    %987 = vector.multi_reduction <maximumf>, %986, %cst_351 [0] : vector<8x1xf32> to vector<1xf32>
    %988 = vector.shape_cast %987 : vector<1xf32> to vector<1x1xf32>
    %989 = vector.broadcast %988 : vector<1x1xf32> to vector<8x1xf32>
    %990 = arith.subf %986, %989 : vector<8x1xf32>
    %991 = math.exp %990 : vector<8x1xf32>
    %cst_352 = arith.constant dense<0.000000e+00> : vector<1xf32>
    %992 = vector.multi_reduction <add>, %991, %cst_352 [0] : vector<8x1xf32> to vector<1xf32>
    %993 = vector.shape_cast %992 : vector<1xf32> to vector<1x1xf32>
    %994 = vector.broadcast %993 : vector<1x1xf32> to vector<8x1xf32>
    %995 = arith.divf %991, %994 : vector<8x1xf32>
    %996 = vector.broadcast %995 : vector<8x1xf32> to vector<8x32xf32>
    %997 = arith.mulf %996, %727 : vector<8x32xf32>
    %cst_353 = arith.constant dense<0.000000e+00> : vector<32xf32>
    %998 = vector.multi_reduction <add>, %997, %cst_353 [0] : vector<8x32xf32> to vector<32xf32>
    %999 = vector.shape_cast %998 : vector<32xf32> to vector<1x32xf32>
    %c2_354 = arith.constant 2 : index
    %c0_355 = arith.constant 0 : index
    %1000 = vector.load %arg61[%c2_354, %c0_355] : memref<12x1xf32, #tpu.memory_space<vmem>>, vector<8x1xf32>
    %1001 = arith.addf %1000, %995 : vector<8x1xf32>
    %c2_356 = arith.constant 2 : index
    %c0_357 = arith.constant 0 : index
    %1002 = vector.load %arg61[%c2_356, %c0_357] : memref<12x1xf32, #tpu.memory_space<vmem>>, vector<8x1xf32>
    tpu.vector_store %arg61[%c2_356, %c0_357], %1001 {strides = array<i32>} : memref<12x1xf32, #tpu.memory_space<vmem>>, vector<8x1xf32>,
    %cst_358 = arith.constant dense<0.000000e+00> : vector<1x128xf32>
    %1003 = tpu.matmul %957, %764, %cst_358 {dimension_numbers = #tpu.dot_dimension_numbers<[1], [0], [0], [1], [0, 0, 1, 1], [], []>} : vector<1x32xf32>, vector<32x128xf32>, vector<1x128xf32> -> vector<1x128xf32>
    %cst_359 = arith.constant dense<0.000000e+00> : vector<1x128xf32>
    %1004 = tpu.matmul %999, %765, %cst_359 {dimension_numbers = #tpu.dot_dimension_numbers<[1], [0], [0], [1], [0, 0, 1, 1], [], []>} : vector<1x32xf32>, vector<32x128xf32>, vector<1x128xf32> -> vector<1x128xf32>
    %1005 = arith.addf %1003, %1004 : vector<1x128xf32>
    %1006 = arith.addf %1005, %766 : vector<1x128xf32>
    %c0_360 = arith.constant 0 : index
    %c1_361 = arith.constant 1 : index
    %c0_362 = arith.constant 0 : index
    %1007 = vector.load %arg57[%c0_360, %c1_361, %c0_362] : memref<1x8x128xf32, #tpu.memory_space<vmem>>, vector<1x1x128xf32>
    %1008 = vector.shape_cast %1007 : vector<1x1x128xf32> to vector<1x128xf32>
    %1009 = vector.shape_cast %1006 : vector<1x128xf32> to vector<1x1x128xf32>
    tpu.vector_store %arg57[%c0_360, %c1_361, %c0_362], %1009 {strides = array<i32>} : memref<1x8x128xf32, #tpu.memory_space<vmem>>, vector<1x1x128xf32>,
    %1010 = vector.extract_strided_slice %743 {offsets = [2, 0], sizes = [1, 32], strides = [1, 1]} : vector<8x32xf32> to vector<1x32xf32>
    %cst_363 = arith.constant dense<0.000000e+00> : vector<1x128xf32>
    %1011 = tpu.matmul %1010, %754, %cst_363 {dimension_numbers = #tpu.dot_dimension_numbers<[1], [0], [0], [1], [0, 0, 1, 1], [], []>} : vector<1x32xf32>, vector<32x128xf32>, vector<1x128xf32> -> vector<1x128xf32>
    %cst_364 = arith.constant dense<0.000000e+00> : vector<1x128xf32>
    %1012 = tpu.matmul %999, %755, %cst_364 {dimension_numbers = #tpu.dot_dimension_numbers<[1], [0], [0], [1], [0, 0, 1, 1], [], []>} : vector<1x32xf32>, vector<32x128xf32>, vector<1x128xf32> -> vector<1x128xf32>
    %1013 = arith.addf %1011, %1012 : vector<1x128xf32>
    %cst_365 = arith.constant dense<0.000000e+00> : vector<1x128xf32>
    %1014 = tpu.matmul %928, %756, %cst_365 {dimension_numbers = #tpu.dot_dimension_numbers<[1], [0], [0], [1], [0, 0, 1, 1], [], []>} : vector<1x32xf32>, vector<32x128xf32>, vector<1x128xf32> -> vector<1x128xf32>
    %1015 = arith.addf %1013, %1014 : vector<1x128xf32>
    %1016 = arith.addf %1015, %757 : vector<1x128xf32>
    %1017 = vector.extract_strided_slice %1016 {offsets = [0, 0], sizes = [1, 32], strides = [1, 1]} : vector<1x128xf32> to vector<1x32xf32>
    %1018 = arith.negf %1017 : vector<1x32xf32>
    %1019 = math.exp %1018 : vector<1x32xf32>
    %cst_366 = arith.constant 1.000000e+00 : f32
    %1020 = vector.broadcast %cst_366 : f32 to vector<1x32xf32>
    %1021 = arith.addf %1020, %1019 : vector<1x32xf32>
    %1022 = arith.divf %1020, %1021 : vector<1x32xf32>
    %1023 = vector.extract_strided_slice %1016 {offsets = [0, 32], sizes = [1, 32], strides = [1, 1]} : vector<1x128xf32> to vector<1x32xf32>
    %1024 = arith.negf %1023 : vector<1x32xf32>
    %1025 = math.exp %1024 : vector<1x32xf32>
    %cst_367 = arith.constant 1.000000e+00 : f32
    %1026 = vector.broadcast %cst_367 : f32 to vector<1x32xf32>
    %1027 = arith.addf %1026, %1025 : vector<1x32xf32>
    %1028 = arith.divf %1026, %1027 : vector<1x32xf32>
    %1029 = vector.extract_strided_slice %1016 {offsets = [0, 64], sizes = [1, 32], strides = [1, 1]} : vector<1x128xf32> to vector<1x32xf32>
    %1030 = math.tanh %1029 : vector<1x32xf32>
    %1031 = vector.extract_strided_slice %1016 {offsets = [0, 96], sizes = [1, 32], strides = [1, 1]} : vector<1x128xf32> to vector<1x32xf32>
    %1032 = arith.negf %1031 : vector<1x32xf32>
    %1033 = math.exp %1032 : vector<1x32xf32>
    %cst_368 = arith.constant 1.000000e+00 : f32
    %1034 = vector.broadcast %cst_368 : f32 to vector<1x32xf32>
    %1035 = arith.addf %1034, %1033 : vector<1x32xf32>
    %1036 = arith.divf %1034, %1035 : vector<1x32xf32>
    %1037 = arith.mulf %1028, %926 : vector<1x32xf32>
    %1038 = arith.mulf %1022, %1030 : vector<1x32xf32>
    %1039 = arith.addf %1037, %1038 : vector<1x32xf32>
    %1040 = math.tanh %1039 : vector<1x32xf32>
    %1041 = arith.mulf %1036, %1040 : vector<1x32xf32>
    %cst_369 = arith.constant dense<0.000000e+00> : vector<1x128xf32>
    %1042 = tpu.matmul %1041, %758, %cst_369 {dimension_numbers = #tpu.dot_dimension_numbers<[1], [0], [0], [1], [0, 0, 1, 1], [], []>} : vector<1x32xf32>, vector<32x128xf32>, vector<1x128xf32> -> vector<1x128xf32>
    %cst_370 = arith.constant dense<0.000000e+00> : vector<1x128xf32>
    %1043 = tpu.matmul %957, %759, %cst_370 {dimension_numbers = #tpu.dot_dimension_numbers<[1], [0], [0], [1], [0, 0, 1, 1], [], []>} : vector<1x32xf32>, vector<32x128xf32>, vector<1x128xf32> -> vector<1x128xf32>
    %1044 = arith.addf %1042, %1043 : vector<1x128xf32>
    %1045 = arith.addf %1044, %760 : vector<1x128xf32>
    %1046 = vector.extract_strided_slice %1045 {offsets = [0, 0], sizes = [1, 32], strides = [1, 1]} : vector<1x128xf32> to vector<1x32xf32>
    %1047 = arith.negf %1046 : vector<1x32xf32>
    %1048 = math.exp %1047 : vector<1x32xf32>
    %cst_371 = arith.constant 1.000000e+00 : f32
    %1049 = vector.broadcast %cst_371 : f32 to vector<1x32xf32>
    %1050 = arith.addf %1049, %1048 : vector<1x32xf32>
    %1051 = arith.divf %1049, %1050 : vector<1x32xf32>
    %1052 = vector.extract_strided_slice %1045 {offsets = [0, 32], sizes = [1, 32], strides = [1, 1]} : vector<1x128xf32> to vector<1x32xf32>
    %1053 = arith.negf %1052 : vector<1x32xf32>
    %1054 = math.exp %1053 : vector<1x32xf32>
    %cst_372 = arith.constant 1.000000e+00 : f32
    %1055 = vector.broadcast %cst_372 : f32 to vector<1x32xf32>
    %1056 = arith.addf %1055, %1054 : vector<1x32xf32>
    %1057 = arith.divf %1055, %1056 : vector<1x32xf32>
    %1058 = vector.extract_strided_slice %1045 {offsets = [0, 64], sizes = [1, 32], strides = [1, 1]} : vector<1x128xf32> to vector<1x32xf32>
    %1059 = math.tanh %1058 : vector<1x32xf32>
    %1060 = vector.extract_strided_slice %1045 {offsets = [0, 96], sizes = [1, 32], strides = [1, 1]} : vector<1x128xf32> to vector<1x32xf32>
    %1061 = arith.negf %1060 : vector<1x32xf32>
    %1062 = math.exp %1061 : vector<1x32xf32>
    %cst_373 = arith.constant 1.000000e+00 : f32
    %1063 = vector.broadcast %cst_373 : f32 to vector<1x32xf32>
    %1064 = arith.addf %1063, %1062 : vector<1x32xf32>
    %1065 = arith.divf %1063, %1064 : vector<1x32xf32>
    %1066 = arith.mulf %1057, %955 : vector<1x32xf32>
    %1067 = arith.mulf %1051, %1059 : vector<1x32xf32>
    %1068 = arith.addf %1066, %1067 : vector<1x32xf32>
    %1069 = math.tanh %1068 : vector<1x32xf32>
    %1070 = arith.mulf %1065, %1069 : vector<1x32xf32>
    %cst_374 = arith.constant dense<0.000000e+00> : vector<1x32xf32>
    %1071 = tpu.matmul %1041, %761, %cst_374 {dimension_numbers = #tpu.dot_dimension_numbers<[1], [0], [0], [1], [0, 0, 1, 1], [], []>} : vector<1x32xf32>, vector<32x32xf32>, vector<1x32xf32> -> vector<1x32xf32>
    %cst_375 = arith.constant dense<0.000000e+00> : vector<1x32xf32>
    %1072 = tpu.matmul %1070, %762, %cst_375 {dimension_numbers = #tpu.dot_dimension_numbers<[1], [0], [0], [1], [0, 0, 1, 1], [], []>} : vector<1x32xf32>, vector<32x32xf32>, vector<1x32xf32> -> vector<1x32xf32>
    %1073 = arith.addf %1071, %1072 : vector<1x32xf32>
    %c0_376 = arith.constant 0 : index
    %c0_377 = arith.constant 0 : index
    %1074 = vector.load %arg61[%c0_376, %c0_377] : memref<12x1xf32, #tpu.memory_space<vmem>>, vector<8x1xf32>
    %1075 = vector.broadcast %1074 : vector<8x1xf32> to vector<8x32xf32>
    %1076 = arith.mulf %769, %1075 : vector<8x32xf32>
    %c1_378 = arith.constant 1 : index
    %c0_379 = arith.constant 0 : index
    %1077 = vector.load %arg61[%c1_378, %c0_379] : memref<12x1xf32, #tpu.memory_space<vmem>>, vector<8x1xf32>
    %1078 = vector.broadcast %1077 : vector<8x1xf32> to vector<8x32xf32>
    %1079 = arith.mulf %772, %1078 : vector<8x32xf32>
    %1080 = arith.addf %1076, %1079 : vector<8x32xf32>
    %c2_380 = arith.constant 2 : index
    %c0_381 = arith.constant 0 : index
    %1081 = vector.load %arg61[%c2_380, %c0_381] : memref<12x1xf32, #tpu.memory_space<vmem>>, vector<8x1xf32>
    %1082 = vector.broadcast %1081 : vector<8x1xf32> to vector<8x32xf32>
    %1083 = arith.mulf %775, %1082 : vector<8x32xf32>
    %1084 = arith.addf %1080, %1083 : vector<8x32xf32>
    %c3_382 = arith.constant 3 : index
    %c0_383 = arith.constant 0 : index
    %1085 = vector.load %arg61[%c3_382, %c0_383] : memref<12x1xf32, #tpu.memory_space<vmem>>, vector<8x1xf32>
    %1086 = vector.broadcast %1085 : vector<8x1xf32> to vector<8x32xf32>
    %1087 = arith.mulf %778, %1086 : vector<8x32xf32>
    %1088 = arith.addf %1084, %1087 : vector<8x32xf32>
    %c4_384 = arith.constant 4 : index
    %c0_385 = arith.constant 0 : index
    %1089 = vector.load %arg61[%c4_384, %c0_385] : memref<12x1xf32, #tpu.memory_space<vmem>>, vector<8x1xf32>
    %1090 = vector.broadcast %1089 : vector<8x1xf32> to vector<8x32xf32>
    %1091 = arith.mulf %781, %1090 : vector<8x32xf32>
    %1092 = arith.addf %1088, %1091 : vector<8x32xf32>
    %1093 = vector.broadcast %1073 : vector<1x32xf32> to vector<8x32xf32>
    %1094 = arith.addf %1093, %1092 : vector<8x32xf32>
    %1095 = arith.addf %1094, %748 : vector<8x32xf32>
    %1096 = math.tanh %1095 : vector<8x32xf32>
    %cst_386 = arith.constant dense<0.000000e+00> : vector<8x1xf32>
    %1097 = tpu.matmul %1096, %763, %cst_386 {dimension_numbers = #tpu.dot_dimension_numbers<[1], [0], [0], [1], [0, 0, 1, 1], [], []>} : vector<8x32xf32>, vector<32x1xf32>, vector<8x1xf32> -> vector<8x1xf32>
    %cst_387 = arith.constant -1.000000e+30 : f32
    %1098 = vector.broadcast %cst_387 : f32 to vector<8x1xf32>
    %1099 = arith.select %751, %1097, %1098 : vector<8x1xi1>, vector<8x1xf32>
    %cst_388 = arith.constant dense<0xFF800000> : vector<1xf32>
    %1100 = vector.multi_reduction <maximumf>, %1099, %cst_388 [0] : vector<8x1xf32> to vector<1xf32>
    %1101 = vector.shape_cast %1100 : vector<1xf32> to vector<1x1xf32>
    %1102 = vector.broadcast %1101 : vector<1x1xf32> to vector<8x1xf32>
    %1103 = arith.subf %1099, %1102 : vector<8x1xf32>
    %1104 = math.exp %1103 : vector<8x1xf32>
    %cst_389 = arith.constant dense<0.000000e+00> : vector<1xf32>
    %1105 = vector.multi_reduction <add>, %1104, %cst_389 [0] : vector<8x1xf32> to vector<1xf32>
    %1106 = vector.shape_cast %1105 : vector<1xf32> to vector<1x1xf32>
    %1107 = vector.broadcast %1106 : vector<1x1xf32> to vector<8x1xf32>
    %1108 = arith.divf %1104, %1107 : vector<8x1xf32>
    %1109 = vector.broadcast %1108 : vector<8x1xf32> to vector<8x32xf32>
    %1110 = arith.mulf %1109, %727 : vector<8x32xf32>
    %cst_390 = arith.constant dense<0.000000e+00> : vector<32xf32>
    %1111 = vector.multi_reduction <add>, %1110, %cst_390 [0] : vector<8x32xf32> to vector<32xf32>
    %1112 = vector.shape_cast %1111 : vector<32xf32> to vector<1x32xf32>
    %c2_391 = arith.constant 2 : index
    %c0_392 = arith.constant 0 : index
    %1113 = vector.load %arg61[%c2_391, %c0_392] : memref<12x1xf32, #tpu.memory_space<vmem>>, vector<8x1xf32>
    %1114 = arith.addf %1113, %1108 : vector<8x1xf32>
    %c2_393 = arith.constant 2 : index
    %c0_394 = arith.constant 0 : index
    %1115 = vector.load %arg61[%c2_393, %c0_394] : memref<12x1xf32, #tpu.memory_space<vmem>>, vector<8x1xf32>
    tpu.vector_store %arg61[%c2_393, %c0_394], %1114 {strides = array<i32>} : memref<12x1xf32, #tpu.memory_space<vmem>>, vector<8x1xf32>,
    %cst_395 = arith.constant dense<0.000000e+00> : vector<1x128xf32>
    %1116 = tpu.matmul %1070, %764, %cst_395 {dimension_numbers = #tpu.dot_dimension_numbers<[1], [0], [0], [1], [0, 0, 1, 1], [], []>} : vector<1x32xf32>, vector<32x128xf32>, vector<1x128xf32> -> vector<1x128xf32>
    %cst_396 = arith.constant dense<0.000000e+00> : vector<1x128xf32>
    %1117 = tpu.matmul %1112, %765, %cst_396 {dimension_numbers = #tpu.dot_dimension_numbers<[1], [0], [0], [1], [0, 0, 1, 1], [], []>} : vector<1x32xf32>, vector<32x128xf32>, vector<1x128xf32> -> vector<1x128xf32>
    %1118 = arith.addf %1116, %1117 : vector<1x128xf32>
    %1119 = arith.addf %1118, %766 : vector<1x128xf32>
    %c0_397 = arith.constant 0 : index
    %c2_398 = arith.constant 2 : index
    %c0_399 = arith.constant 0 : index
    %1120 = vector.load %arg57[%c0_397, %c2_398, %c0_399] : memref<1x8x128xf32, #tpu.memory_space<vmem>>, vector<1x1x128xf32>
    %1121 = vector.shape_cast %1120 : vector<1x1x128xf32> to vector<1x128xf32>
    %1122 = vector.shape_cast %1119 : vector<1x128xf32> to vector<1x1x128xf32>
    tpu.vector_store %arg57[%c0_397, %c2_398, %c0_399], %1122 {strides = array<i32>} : memref<1x8x128xf32, #tpu.memory_space<vmem>>, vector<1x1x128xf32>,
    %1123 = vector.extract_strided_slice %743 {offsets = [3, 0], sizes = [1, 32], strides = [1, 1]} : vector<8x32xf32> to vector<1x32xf32>
    %cst_400 = arith.constant dense<0.000000e+00> : vector<1x128xf32>
    %1124 = tpu.matmul %1123, %754, %cst_400 {dimension_numbers = #tpu.dot_dimension_numbers<[1], [0], [0], [1], [0, 0, 1, 1], [], []>} : vector<1x32xf32>, vector<32x128xf32>, vector<1x128xf32> -> vector<1x128xf32>
    %cst_401 = arith.constant dense<0.000000e+00> : vector<1x128xf32>
    %1125 = tpu.matmul %1112, %755, %cst_401 {dimension_numbers = #tpu.dot_dimension_numbers<[1], [0], [0], [1], [0, 0, 1, 1], [], []>} : vector<1x32xf32>, vector<32x128xf32>, vector<1x128xf32> -> vector<1x128xf32>
    %1126 = arith.addf %1124, %1125 : vector<1x128xf32>
    %cst_402 = arith.constant dense<0.000000e+00> : vector<1x128xf32>
    %1127 = tpu.matmul %1041, %756, %cst_402 {dimension_numbers = #tpu.dot_dimension_numbers<[1], [0], [0], [1], [0, 0, 1, 1], [], []>} : vector<1x32xf32>, vector<32x128xf32>, vector<1x128xf32> -> vector<1x128xf32>
    %1128 = arith.addf %1126, %1127 : vector<1x128xf32>
    %1129 = arith.addf %1128, %757 : vector<1x128xf32>
    %1130 = vector.extract_strided_slice %1129 {offsets = [0, 0], sizes = [1, 32], strides = [1, 1]} : vector<1x128xf32> to vector<1x32xf32>
    %1131 = arith.negf %1130 : vector<1x32xf32>
    %1132 = math.exp %1131 : vector<1x32xf32>
    %cst_403 = arith.constant 1.000000e+00 : f32
    %1133 = vector.broadcast %cst_403 : f32 to vector<1x32xf32>
    %1134 = arith.addf %1133, %1132 : vector<1x32xf32>
    %1135 = arith.divf %1133, %1134 : vector<1x32xf32>
    %1136 = vector.extract_strided_slice %1129 {offsets = [0, 32], sizes = [1, 32], strides = [1, 1]} : vector<1x128xf32> to vector<1x32xf32>
    %1137 = arith.negf %1136 : vector<1x32xf32>
    %1138 = math.exp %1137 : vector<1x32xf32>
    %cst_404 = arith.constant 1.000000e+00 : f32
    %1139 = vector.broadcast %cst_404 : f32 to vector<1x32xf32>
    %1140 = arith.addf %1139, %1138 : vector<1x32xf32>
    %1141 = arith.divf %1139, %1140 : vector<1x32xf32>
    %1142 = vector.extract_strided_slice %1129 {offsets = [0, 64], sizes = [1, 32], strides = [1, 1]} : vector<1x128xf32> to vector<1x32xf32>
    %1143 = math.tanh %1142 : vector<1x32xf32>
    %1144 = vector.extract_strided_slice %1129 {offsets = [0, 96], sizes = [1, 32], strides = [1, 1]} : vector<1x128xf32> to vector<1x32xf32>
    %1145 = arith.negf %1144 : vector<1x32xf32>
    %1146 = math.exp %1145 : vector<1x32xf32>
    %cst_405 = arith.constant 1.000000e+00 : f32
    %1147 = vector.broadcast %cst_405 : f32 to vector<1x32xf32>
    %1148 = arith.addf %1147, %1146 : vector<1x32xf32>
    %1149 = arith.divf %1147, %1148 : vector<1x32xf32>
    %1150 = arith.mulf %1141, %1039 : vector<1x32xf32>
    %1151 = arith.mulf %1135, %1143 : vector<1x32xf32>
    %1152 = arith.addf %1150, %1151 : vector<1x32xf32>
    %1153 = math.tanh %1152 : vector<1x32xf32>
    %1154 = arith.mulf %1149, %1153 : vector<1x32xf32>
    %cst_406 = arith.constant dense<0.000000e+00> : vector<1x128xf32>
    %1155 = tpu.matmul %1154, %758, %cst_406 {dimension_numbers = #tpu.dot_dimension_numbers<[1], [0], [0], [1], [0, 0, 1, 1], [], []>} : vector<1x32xf32>, vector<32x128xf32>, vector<1x128xf32> -> vector<1x128xf32>
    %cst_407 = arith.constant dense<0.000000e+00> : vector<1x128xf32>
    %1156 = tpu.matmul %1070, %759, %cst_407 {dimension_numbers = #tpu.dot_dimension_numbers<[1], [0], [0], [1], [0, 0, 1, 1], [], []>} : vector<1x32xf32>, vector<32x128xf32>, vector<1x128xf32> -> vector<1x128xf32>
    %1157 = arith.addf %1155, %1156 : vector<1x128xf32>
    %1158 = arith.addf %1157, %760 : vector<1x128xf32>
    %1159 = vector.extract_strided_slice %1158 {offsets = [0, 0], sizes = [1, 32], strides = [1, 1]} : vector<1x128xf32> to vector<1x32xf32>
    %1160 = arith.negf %1159 : vector<1x32xf32>
    %1161 = math.exp %1160 : vector<1x32xf32>
    %cst_408 = arith.constant 1.000000e+00 : f32
    %1162 = vector.broadcast %cst_408 : f32 to vector<1x32xf32>
    %1163 = arith.addf %1162, %1161 : vector<1x32xf32>
    %1164 = arith.divf %1162, %1163 : vector<1x32xf32>
    %1165 = vector.extract_strided_slice %1158 {offsets = [0, 32], sizes = [1, 32], strides = [1, 1]} : vector<1x128xf32> to vector<1x32xf32>
    %1166 = arith.negf %1165 : vector<1x32xf32>
    %1167 = math.exp %1166 : vector<1x32xf32>
    %cst_409 = arith.constant 1.000000e+00 : f32
    %1168 = vector.broadcast %cst_409 : f32 to vector<1x32xf32>
    %1169 = arith.addf %1168, %1167 : vector<1x32xf32>
    %1170 = arith.divf %1168, %1169 : vector<1x32xf32>
    %1171 = vector.extract_strided_slice %1158 {offsets = [0, 64], sizes = [1, 32], strides = [1, 1]} : vector<1x128xf32> to vector<1x32xf32>
    %1172 = math.tanh %1171 : vector<1x32xf32>
    %1173 = vector.extract_strided_slice %1158 {offsets = [0, 96], sizes = [1, 32], strides = [1, 1]} : vector<1x128xf32> to vector<1x32xf32>
    %1174 = arith.negf %1173 : vector<1x32xf32>
    %1175 = math.exp %1174 : vector<1x32xf32>
    %cst_410 = arith.constant 1.000000e+00 : f32
    %1176 = vector.broadcast %cst_410 : f32 to vector<1x32xf32>
    %1177 = arith.addf %1176, %1175 : vector<1x32xf32>
    %1178 = arith.divf %1176, %1177 : vector<1x32xf32>
    %1179 = arith.mulf %1170, %1068 : vector<1x32xf32>
    %1180 = arith.mulf %1164, %1172 : vector<1x32xf32>
    %1181 = arith.addf %1179, %1180 : vector<1x32xf32>
    %1182 = math.tanh %1181 : vector<1x32xf32>
    %1183 = arith.mulf %1178, %1182 : vector<1x32xf32>
    %cst_411 = arith.constant dense<0.000000e+00> : vector<1x32xf32>
    %1184 = tpu.matmul %1154, %761, %cst_411 {dimension_numbers = #tpu.dot_dimension_numbers<[1], [0], [0], [1], [0, 0, 1, 1], [], []>} : vector<1x32xf32>, vector<32x32xf32>, vector<1x32xf32> -> vector<1x32xf32>
    %cst_412 = arith.constant dense<0.000000e+00> : vector<1x32xf32>
    %1185 = tpu.matmul %1183, %762, %cst_412 {dimension_numbers = #tpu.dot_dimension_numbers<[1], [0], [0], [1], [0, 0, 1, 1], [], []>} : vector<1x32xf32>, vector<32x32xf32>, vector<1x32xf32> -> vector<1x32xf32>
    %1186 = arith.addf %1184, %1185 : vector<1x32xf32>
    %c0_413 = arith.constant 0 : index
    %c0_414 = arith.constant 0 : index
    %1187 = vector.load %arg61[%c0_413, %c0_414] : memref<12x1xf32, #tpu.memory_space<vmem>>, vector<8x1xf32>
    %1188 = vector.broadcast %1187 : vector<8x1xf32> to vector<8x32xf32>
    %1189 = arith.mulf %769, %1188 : vector<8x32xf32>
    %c1_415 = arith.constant 1 : index
    %c0_416 = arith.constant 0 : index
    %1190 = vector.load %arg61[%c1_415, %c0_416] : memref<12x1xf32, #tpu.memory_space<vmem>>, vector<8x1xf32>
    %1191 = vector.broadcast %1190 : vector<8x1xf32> to vector<8x32xf32>
    %1192 = arith.mulf %772, %1191 : vector<8x32xf32>
    %1193 = arith.addf %1189, %1192 : vector<8x32xf32>
    %c2_417 = arith.constant 2 : index
    %c0_418 = arith.constant 0 : index
    %1194 = vector.load %arg61[%c2_417, %c0_418] : memref<12x1xf32, #tpu.memory_space<vmem>>, vector<8x1xf32>
    %1195 = vector.broadcast %1194 : vector<8x1xf32> to vector<8x32xf32>
    %1196 = arith.mulf %775, %1195 : vector<8x32xf32>
    %1197 = arith.addf %1193, %1196 : vector<8x32xf32>
    %c3_419 = arith.constant 3 : index
    %c0_420 = arith.constant 0 : index
    %1198 = vector.load %arg61[%c3_419, %c0_420] : memref<12x1xf32, #tpu.memory_space<vmem>>, vector<8x1xf32>
    %1199 = vector.broadcast %1198 : vector<8x1xf32> to vector<8x32xf32>
    %1200 = arith.mulf %778, %1199 : vector<8x32xf32>
    %1201 = arith.addf %1197, %1200 : vector<8x32xf32>
    %c4_421 = arith.constant 4 : index
    %c0_422 = arith.constant 0 : index
    %1202 = vector.load %arg61[%c4_421, %c0_422] : memref<12x1xf32, #tpu.memory_space<vmem>>, vector<8x1xf32>
    %1203 = vector.broadcast %1202 : vector<8x1xf32> to vector<8x32xf32>
    %1204 = arith.mulf %781, %1203 : vector<8x32xf32>
    %1205 = arith.addf %1201, %1204 : vector<8x32xf32>
    %1206 = vector.broadcast %1186 : vector<1x32xf32> to vector<8x32xf32>
    %1207 = arith.addf %1206, %1205 : vector<8x32xf32>
    %1208 = arith.addf %1207, %748 : vector<8x32xf32>
    %1209 = math.tanh %1208 : vector<8x32xf32>
    %cst_423 = arith.constant dense<0.000000e+00> : vector<8x1xf32>
    %1210 = tpu.matmul %1209, %763, %cst_423 {dimension_numbers = #tpu.dot_dimension_numbers<[1], [0], [0], [1], [0, 0, 1, 1], [], []>} : vector<8x32xf32>, vector<32x1xf32>, vector<8x1xf32> -> vector<8x1xf32>
    %cst_424 = arith.constant -1.000000e+30 : f32
    %1211 = vector.broadcast %cst_424 : f32 to vector<8x1xf32>
    %1212 = arith.select %751, %1210, %1211 : vector<8x1xi1>, vector<8x1xf32>
    %cst_425 = arith.constant dense<0xFF800000> : vector<1xf32>
    %1213 = vector.multi_reduction <maximumf>, %1212, %cst_425 [0] : vector<8x1xf32> to vector<1xf32>
    %1214 = vector.shape_cast %1213 : vector<1xf32> to vector<1x1xf32>
    %1215 = vector.broadcast %1214 : vector<1x1xf32> to vector<8x1xf32>
    %1216 = arith.subf %1212, %1215 : vector<8x1xf32>
    %1217 = math.exp %1216 : vector<8x1xf32>
    %cst_426 = arith.constant dense<0.000000e+00> : vector<1xf32>
    %1218 = vector.multi_reduction <add>, %1217, %cst_426 [0] : vector<8x1xf32> to vector<1xf32>
    %1219 = vector.shape_cast %1218 : vector<1xf32> to vector<1x1xf32>
    %1220 = vector.broadcast %1219 : vector<1x1xf32> to vector<8x1xf32>
    %1221 = arith.divf %1217, %1220 : vector<8x1xf32>
    %1222 = vector.broadcast %1221 : vector<8x1xf32> to vector<8x32xf32>
    %1223 = arith.mulf %1222, %727 : vector<8x32xf32>
    %cst_427 = arith.constant dense<0.000000e+00> : vector<32xf32>
    %1224 = vector.multi_reduction <add>, %1223, %cst_427 [0] : vector<8x32xf32> to vector<32xf32>
    %1225 = vector.shape_cast %1224 : vector<32xf32> to vector<1x32xf32>
    %c2_428 = arith.constant 2 : index
    %c0_429 = arith.constant 0 : index
    %1226 = vector.load %arg61[%c2_428, %c0_429] : memref<12x1xf32, #tpu.memory_space<vmem>>, vector<8x1xf32>
    %1227 = arith.addf %1226, %1221 : vector<8x1xf32>
    %c2_430 = arith.constant 2 : index
    %c0_431 = arith.constant 0 : index
    %1228 = vector.load %arg61[%c2_430, %c0_431] : memref<12x1xf32, #tpu.memory_space<vmem>>, vector<8x1xf32>
    tpu.vector_store %arg61[%c2_430, %c0_431], %1227 {strides = array<i32>} : memref<12x1xf32, #tpu.memory_space<vmem>>, vector<8x1xf32>,
    %cst_432 = arith.constant dense<0.000000e+00> : vector<1x128xf32>
    %1229 = tpu.matmul %1183, %764, %cst_432 {dimension_numbers = #tpu.dot_dimension_numbers<[1], [0], [0], [1], [0, 0, 1, 1], [], []>} : vector<1x32xf32>, vector<32x128xf32>, vector<1x128xf32> -> vector<1x128xf32>
    %cst_433 = arith.constant dense<0.000000e+00> : vector<1x128xf32>
    %1230 = tpu.matmul %1225, %765, %cst_433 {dimension_numbers = #tpu.dot_dimension_numbers<[1], [0], [0], [1], [0, 0, 1, 1], [], []>} : vector<1x32xf32>, vector<32x128xf32>, vector<1x128xf32> -> vector<1x128xf32>
    %1231 = arith.addf %1229, %1230 : vector<1x128xf32>
    %1232 = arith.addf %1231, %766 : vector<1x128xf32>
    %c0_434 = arith.constant 0 : index
    %c3_435 = arith.constant 3 : index
    %c0_436 = arith.constant 0 : index
    %1233 = vector.load %arg57[%c0_434, %c3_435, %c0_436] : memref<1x8x128xf32, #tpu.memory_space<vmem>>, vector<1x1x128xf32>
    %1234 = vector.shape_cast %1233 : vector<1x1x128xf32> to vector<1x128xf32>
    %1235 = vector.shape_cast %1232 : vector<1x128xf32> to vector<1x1x128xf32>
    tpu.vector_store %arg57[%c0_434, %c3_435, %c0_436], %1235 {strides = array<i32>} : memref<1x8x128xf32, #tpu.memory_space<vmem>>, vector<1x1x128xf32>,
    %1236 = vector.extract_strided_slice %743 {offsets = [4, 0], sizes = [1, 32], strides = [1, 1]} : vector<8x32xf32> to vector<1x32xf32>
    %cst_437 = arith.constant dense<0.000000e+00> : vector<1x128xf32>
    %1237 = tpu.matmul %1236, %754, %cst_437 {dimension_numbers = #tpu.dot_dimension_numbers<[1], [0], [0], [1], [0, 0, 1, 1], [], []>} : vector<1x32xf32>, vector<32x128xf32>, vector<1x128xf32> -> vector<1x128xf32>
    %cst_438 = arith.constant dense<0.000000e+00> : vector<1x128xf32>
    %1238 = tpu.matmul %1225, %755, %cst_438 {dimension_numbers = #tpu.dot_dimension_numbers<[1], [0], [0], [1], [0, 0, 1, 1], [], []>} : vector<1x32xf32>, vector<32x128xf32>, vector<1x128xf32> -> vector<1x128xf32>
    %1239 = arith.addf %1237, %1238 : vector<1x128xf32>
    %cst_439 = arith.constant dense<0.000000e+00> : vector<1x128xf32>
    %1240 = tpu.matmul %1154, %756, %cst_439 {dimension_numbers = #tpu.dot_dimension_numbers<[1], [0], [0], [1], [0, 0, 1, 1], [], []>} : vector<1x32xf32>, vector<32x128xf32>, vector<1x128xf32> -> vector<1x128xf32>
    %1241 = arith.addf %1239, %1240 : vector<1x128xf32>
    %1242 = arith.addf %1241, %757 : vector<1x128xf32>
    %1243 = vector.extract_strided_slice %1242 {offsets = [0, 0], sizes = [1, 32], strides = [1, 1]} : vector<1x128xf32> to vector<1x32xf32>
    %1244 = arith.negf %1243 : vector<1x32xf32>
    %1245 = math.exp %1244 : vector<1x32xf32>
    %cst_440 = arith.constant 1.000000e+00 : f32
    %1246 = vector.broadcast %cst_440 : f32 to vector<1x32xf32>
    %1247 = arith.addf %1246, %1245 : vector<1x32xf32>
    %1248 = arith.divf %1246, %1247 : vector<1x32xf32>
    %1249 = vector.extract_strided_slice %1242 {offsets = [0, 32], sizes = [1, 32], strides = [1, 1]} : vector<1x128xf32> to vector<1x32xf32>
    %1250 = arith.negf %1249 : vector<1x32xf32>
    %1251 = math.exp %1250 : vector<1x32xf32>
    %cst_441 = arith.constant 1.000000e+00 : f32
    %1252 = vector.broadcast %cst_441 : f32 to vector<1x32xf32>
    %1253 = arith.addf %1252, %1251 : vector<1x32xf32>
    %1254 = arith.divf %1252, %1253 : vector<1x32xf32>
    %1255 = vector.extract_strided_slice %1242 {offsets = [0, 64], sizes = [1, 32], strides = [1, 1]} : vector<1x128xf32> to vector<1x32xf32>
    %1256 = math.tanh %1255 : vector<1x32xf32>
    %1257 = vector.extract_strided_slice %1242 {offsets = [0, 96], sizes = [1, 32], strides = [1, 1]} : vector<1x128xf32> to vector<1x32xf32>
    %1258 = arith.negf %1257 : vector<1x32xf32>
    %1259 = math.exp %1258 : vector<1x32xf32>
    %cst_442 = arith.constant 1.000000e+00 : f32
    %1260 = vector.broadcast %cst_442 : f32 to vector<1x32xf32>
    %1261 = arith.addf %1260, %1259 : vector<1x32xf32>
    %1262 = arith.divf %1260, %1261 : vector<1x32xf32>
    %1263 = arith.mulf %1254, %1152 : vector<1x32xf32>
    %1264 = arith.mulf %1248, %1256 : vector<1x32xf32>
    %1265 = arith.addf %1263, %1264 : vector<1x32xf32>
    %1266 = math.tanh %1265 : vector<1x32xf32>
    %1267 = arith.mulf %1262, %1266 : vector<1x32xf32>
    %cst_443 = arith.constant dense<0.000000e+00> : vector<1x128xf32>
    %1268 = tpu.matmul %1267, %758, %cst_443 {dimension_numbers = #tpu.dot_dimension_numbers<[1], [0], [0], [1], [0, 0, 1, 1], [], []>} : vector<1x32xf32>, vector<32x128xf32>, vector<1x128xf32> -> vector<1x128xf32>
    %cst_444 = arith.constant dense<0.000000e+00> : vector<1x128xf32>
    %1269 = tpu.matmul %1183, %759, %cst_444 {dimension_numbers = #tpu.dot_dimension_numbers<[1], [0], [0], [1], [0, 0, 1, 1], [], []>} : vector<1x32xf32>, vector<32x128xf32>, vector<1x128xf32> -> vector<1x128xf32>
    %1270 = arith.addf %1268, %1269 : vector<1x128xf32>
    %1271 = arith.addf %1270, %760 : vector<1x128xf32>
    %1272 = vector.extract_strided_slice %1271 {offsets = [0, 0], sizes = [1, 32], strides = [1, 1]} : vector<1x128xf32> to vector<1x32xf32>
    %1273 = arith.negf %1272 : vector<1x32xf32>
    %1274 = math.exp %1273 : vector<1x32xf32>
    %cst_445 = arith.constant 1.000000e+00 : f32
    %1275 = vector.broadcast %cst_445 : f32 to vector<1x32xf32>
    %1276 = arith.addf %1275, %1274 : vector<1x32xf32>
    %1277 = arith.divf %1275, %1276 : vector<1x32xf32>
    %1278 = vector.extract_strided_slice %1271 {offsets = [0, 32], sizes = [1, 32], strides = [1, 1]} : vector<1x128xf32> to vector<1x32xf32>
    %1279 = arith.negf %1278 : vector<1x32xf32>
    %1280 = math.exp %1279 : vector<1x32xf32>
    %cst_446 = arith.constant 1.000000e+00 : f32
    %1281 = vector.broadcast %cst_446 : f32 to vector<1x32xf32>
    %1282 = arith.addf %1281, %1280 : vector<1x32xf32>
    %1283 = arith.divf %1281, %1282 : vector<1x32xf32>
    %1284 = vector.extract_strided_slice %1271 {offsets = [0, 64], sizes = [1, 32], strides = [1, 1]} : vector<1x128xf32> to vector<1x32xf32>
    %1285 = math.tanh %1284 : vector<1x32xf32>
    %1286 = vector.extract_strided_slice %1271 {offsets = [0, 96], sizes = [1, 32], strides = [1, 1]} : vector<1x128xf32> to vector<1x32xf32>
    %1287 = arith.negf %1286 : vector<1x32xf32>
    %1288 = math.exp %1287 : vector<1x32xf32>
    %cst_447 = arith.constant 1.000000e+00 : f32
    %1289 = vector.broadcast %cst_447 : f32 to vector<1x32xf32>
    %1290 = arith.addf %1289, %1288 : vector<1x32xf32>
    %1291 = arith.divf %1289, %1290 : vector<1x32xf32>
    %1292 = arith.mulf %1283, %1181 : vector<1x32xf32>
    %1293 = arith.mulf %1277, %1285 : vector<1x32xf32>
    %1294 = arith.addf %1292, %1293 : vector<1x32xf32>
    %1295 = math.tanh %1294 : vector<1x32xf32>
    %1296 = arith.mulf %1291, %1295 : vector<1x32xf32>
    %cst_448 = arith.constant dense<0.000000e+00> : vector<1x32xf32>
    %1297 = tpu.matmul %1267, %761, %cst_448 {dimension_numbers = #tpu.dot_dimension_numbers<[1], [0], [0], [1], [0, 0, 1, 1], [], []>} : vector<1x32xf32>, vector<32x32xf32>, vector<1x32xf32> -> vector<1x32xf32>
    %cst_449 = arith.constant dense<0.000000e+00> : vector<1x32xf32>
    %1298 = tpu.matmul %1296, %762, %cst_449 {dimension_numbers = #tpu.dot_dimension_numbers<[1], [0], [0], [1], [0, 0, 1, 1], [], []>} : vector<1x32xf32>, vector<32x32xf32>, vector<1x32xf32> -> vector<1x32xf32>
    %1299 = arith.addf %1297, %1298 : vector<1x32xf32>
    %c0_450 = arith.constant 0 : index
    %c0_451 = arith.constant 0 : index
    %1300 = vector.load %arg61[%c0_450, %c0_451] : memref<12x1xf32, #tpu.memory_space<vmem>>, vector<8x1xf32>
    %1301 = vector.broadcast %1300 : vector<8x1xf32> to vector<8x32xf32>
    %1302 = arith.mulf %769, %1301 : vector<8x32xf32>
    %c1_452 = arith.constant 1 : index
    %c0_453 = arith.constant 0 : index
    %1303 = vector.load %arg61[%c1_452, %c0_453] : memref<12x1xf32, #tpu.memory_space<vmem>>, vector<8x1xf32>
    %1304 = vector.broadcast %1303 : vector<8x1xf32> to vector<8x32xf32>
    %1305 = arith.mulf %772, %1304 : vector<8x32xf32>
    %1306 = arith.addf %1302, %1305 : vector<8x32xf32>
    %c2_454 = arith.constant 2 : index
    %c0_455 = arith.constant 0 : index
    %1307 = vector.load %arg61[%c2_454, %c0_455] : memref<12x1xf32, #tpu.memory_space<vmem>>, vector<8x1xf32>
    %1308 = vector.broadcast %1307 : vector<8x1xf32> to vector<8x32xf32>
    %1309 = arith.mulf %775, %1308 : vector<8x32xf32>
    %1310 = arith.addf %1306, %1309 : vector<8x32xf32>
    %c3_456 = arith.constant 3 : index
    %c0_457 = arith.constant 0 : index
    %1311 = vector.load %arg61[%c3_456, %c0_457] : memref<12x1xf32, #tpu.memory_space<vmem>>, vector<8x1xf32>
    %1312 = vector.broadcast %1311 : vector<8x1xf32> to vector<8x32xf32>
    %1313 = arith.mulf %778, %1312 : vector<8x32xf32>
    %1314 = arith.addf %1310, %1313 : vector<8x32xf32>
    %c4_458 = arith.constant 4 : index
    %c0_459 = arith.constant 0 : index
    %1315 = vector.load %arg61[%c4_458, %c0_459] : memref<12x1xf32, #tpu.memory_space<vmem>>, vector<8x1xf32>
    %1316 = vector.broadcast %1315 : vector<8x1xf32> to vector<8x32xf32>
    %1317 = arith.mulf %781, %1316 : vector<8x32xf32>
    %1318 = arith.addf %1314, %1317 : vector<8x32xf32>
    %1319 = vector.broadcast %1299 : vector<1x32xf32> to vector<8x32xf32>
    %1320 = arith.addf %1319, %1318 : vector<8x32xf32>
    %1321 = arith.addf %1320, %748 : vector<8x32xf32>
    %1322 = math.tanh %1321 : vector<8x32xf32>
    %cst_460 = arith.constant dense<0.000000e+00> : vector<8x1xf32>
    %1323 = tpu.matmul %1322, %763, %cst_460 {dimension_numbers = #tpu.dot_dimension_numbers<[1], [0], [0], [1], [0, 0, 1, 1], [], []>} : vector<8x32xf32>, vector<32x1xf32>, vector<8x1xf32> -> vector<8x1xf32>
    %cst_461 = arith.constant -1.000000e+30 : f32
    %1324 = vector.broadcast %cst_461 : f32 to vector<8x1xf32>
    %1325 = arith.select %751, %1323, %1324 : vector<8x1xi1>, vector<8x1xf32>
    %cst_462 = arith.constant dense<0xFF800000> : vector<1xf32>
    %1326 = vector.multi_reduction <maximumf>, %1325, %cst_462 [0] : vector<8x1xf32> to vector<1xf32>
    %1327 = vector.shape_cast %1326 : vector<1xf32> to vector<1x1xf32>
    %1328 = vector.broadcast %1327 : vector<1x1xf32> to vector<8x1xf32>
    %1329 = arith.subf %1325, %1328 : vector<8x1xf32>
    %1330 = math.exp %1329 : vector<8x1xf32>
    %cst_463 = arith.constant dense<0.000000e+00> : vector<1xf32>
    %1331 = vector.multi_reduction <add>, %1330, %cst_463 [0] : vector<8x1xf32> to vector<1xf32>
    %1332 = vector.shape_cast %1331 : vector<1xf32> to vector<1x1xf32>
    %1333 = vector.broadcast %1332 : vector<1x1xf32> to vector<8x1xf32>
    %1334 = arith.divf %1330, %1333 : vector<8x1xf32>
    %1335 = vector.broadcast %1334 : vector<8x1xf32> to vector<8x32xf32>
    %1336 = arith.mulf %1335, %727 : vector<8x32xf32>
    %cst_464 = arith.constant dense<0.000000e+00> : vector<32xf32>
    %1337 = vector.multi_reduction <add>, %1336, %cst_464 [0] : vector<8x32xf32> to vector<32xf32>
    %1338 = vector.shape_cast %1337 : vector<32xf32> to vector<1x32xf32>
    %c2_465 = arith.constant 2 : index
    %c0_466 = arith.constant 0 : index
    %1339 = vector.load %arg61[%c2_465, %c0_466] : memref<12x1xf32, #tpu.memory_space<vmem>>, vector<8x1xf32>
    %1340 = arith.addf %1339, %1334 : vector<8x1xf32>
    %c2_467 = arith.constant 2 : index
    %c0_468 = arith.constant 0 : index
    %1341 = vector.load %arg61[%c2_467, %c0_468] : memref<12x1xf32, #tpu.memory_space<vmem>>, vector<8x1xf32>
    tpu.vector_store %arg61[%c2_467, %c0_468], %1340 {strides = array<i32>} : memref<12x1xf32, #tpu.memory_space<vmem>>, vector<8x1xf32>,
    %cst_469 = arith.constant dense<0.000000e+00> : vector<1x128xf32>
    %1342 = tpu.matmul %1296, %764, %cst_469 {dimension_numbers = #tpu.dot_dimension_numbers<[1], [0], [0], [1], [0, 0, 1, 1], [], []>} : vector<1x32xf32>, vector<32x128xf32>, vector<1x128xf32> -> vector<1x128xf32>
    %cst_470 = arith.constant dense<0.000000e+00> : vector<1x128xf32>
    %1343 = tpu.matmul %1338, %765, %cst_470 {dimension_numbers = #tpu.dot_dimension_numbers<[1], [0], [0], [1], [0, 0, 1, 1], [], []>} : vector<1x32xf32>, vector<32x128xf32>, vector<1x128xf32> -> vector<1x128xf32>
    %1344 = arith.addf %1342, %1343 : vector<1x128xf32>
    %1345 = arith.addf %1344, %766 : vector<1x128xf32>
    %c0_471 = arith.constant 0 : index
    %c4_472 = arith.constant 4 : index
    %c0_473 = arith.constant 0 : index
    %1346 = vector.load %arg57[%c0_471, %c4_472, %c0_473] : memref<1x8x128xf32, #tpu.memory_space<vmem>>, vector<1x1x128xf32>
    %1347 = vector.shape_cast %1346 : vector<1x1x128xf32> to vector<1x128xf32>
    %1348 = vector.shape_cast %1345 : vector<1x128xf32> to vector<1x1x128xf32>
    tpu.vector_store %arg57[%c0_471, %c4_472, %c0_473], %1348 {strides = array<i32>} : memref<1x8x128xf32, #tpu.memory_space<vmem>>, vector<1x1x128xf32>,
    %1349 = vector.extract_strided_slice %743 {offsets = [5, 0], sizes = [1, 32], strides = [1, 1]} : vector<8x32xf32> to vector<1x32xf32>
    %cst_474 = arith.constant dense<0.000000e+00> : vector<1x128xf32>
    %1350 = tpu.matmul %1349, %754, %cst_474 {dimension_numbers = #tpu.dot_dimension_numbers<[1], [0], [0], [1], [0, 0, 1, 1], [], []>} : vector<1x32xf32>, vector<32x128xf32>, vector<1x128xf32> -> vector<1x128xf32>
    %cst_475 = arith.constant dense<0.000000e+00> : vector<1x128xf32>
    %1351 = tpu.matmul %1338, %755, %cst_475 {dimension_numbers = #tpu.dot_dimension_numbers<[1], [0], [0], [1], [0, 0, 1, 1], [], []>} : vector<1x32xf32>, vector<32x128xf32>, vector<1x128xf32> -> vector<1x128xf32>
    %1352 = arith.addf %1350, %1351 : vector<1x128xf32>
    %cst_476 = arith.constant dense<0.000000e+00> : vector<1x128xf32>
    %1353 = tpu.matmul %1267, %756, %cst_476 {dimension_numbers = #tpu.dot_dimension_numbers<[1], [0], [0], [1], [0, 0, 1, 1], [], []>} : vector<1x32xf32>, vector<32x128xf32>, vector<1x128xf32> -> vector<1x128xf32>
    %1354 = arith.addf %1352, %1353 : vector<1x128xf32>
    %1355 = arith.addf %1354, %757 : vector<1x128xf32>
    %1356 = vector.extract_strided_slice %1355 {offsets = [0, 0], sizes = [1, 32], strides = [1, 1]} : vector<1x128xf32> to vector<1x32xf32>
    %1357 = arith.negf %1356 : vector<1x32xf32>
    %1358 = math.exp %1357 : vector<1x32xf32>
    %cst_477 = arith.constant 1.000000e+00 : f32
    %1359 = vector.broadcast %cst_477 : f32 to vector<1x32xf32>
    %1360 = arith.addf %1359, %1358 : vector<1x32xf32>
    %1361 = arith.divf %1359, %1360 : vector<1x32xf32>
    %1362 = vector.extract_strided_slice %1355 {offsets = [0, 32], sizes = [1, 32], strides = [1, 1]} : vector<1x128xf32> to vector<1x32xf32>
    %1363 = arith.negf %1362 : vector<1x32xf32>
    %1364 = math.exp %1363 : vector<1x32xf32>
    %cst_478 = arith.constant 1.000000e+00 : f32
    %1365 = vector.broadcast %cst_478 : f32 to vector<1x32xf32>
    %1366 = arith.addf %1365, %1364 : vector<1x32xf32>
    %1367 = arith.divf %1365, %1366 : vector<1x32xf32>
    %1368 = vector.extract_strided_slice %1355 {offsets = [0, 64], sizes = [1, 32], strides = [1, 1]} : vector<1x128xf32> to vector<1x32xf32>
    %1369 = math.tanh %1368 : vector<1x32xf32>
    %1370 = vector.extract_strided_slice %1355 {offsets = [0, 96], sizes = [1, 32], strides = [1, 1]} : vector<1x128xf32> to vector<1x32xf32>
    %1371 = arith.negf %1370 : vector<1x32xf32>
    %1372 = math.exp %1371 : vector<1x32xf32>
    %cst_479 = arith.constant 1.000000e+00 : f32
    %1373 = vector.broadcast %cst_479 : f32 to vector<1x32xf32>
    %1374 = arith.addf %1373, %1372 : vector<1x32xf32>
    %1375 = arith.divf %1373, %1374 : vector<1x32xf32>
    %1376 = arith.mulf %1367, %1265 : vector<1x32xf32>
    %1377 = arith.mulf %1361, %1369 : vector<1x32xf32>
    %1378 = arith.addf %1376, %1377 : vector<1x32xf32>
    %1379 = math.tanh %1378 : vector<1x32xf32>
    %1380 = arith.mulf %1375, %1379 : vector<1x32xf32>
    %cst_480 = arith.constant dense<0.000000e+00> : vector<1x128xf32>
    %1381 = tpu.matmul %1380, %758, %cst_480 {dimension_numbers = #tpu.dot_dimension_numbers<[1], [0], [0], [1], [0, 0, 1, 1], [], []>} : vector<1x32xf32>, vector<32x128xf32>, vector<1x128xf32> -> vector<1x128xf32>
    %cst_481 = arith.constant dense<0.000000e+00> : vector<1x128xf32>
    %1382 = tpu.matmul %1296, %759, %cst_481 {dimension_numbers = #tpu.dot_dimension_numbers<[1], [0], [0], [1], [0, 0, 1, 1], [], []>} : vector<1x32xf32>, vector<32x128xf32>, vector<1x128xf32> -> vector<1x128xf32>
    %1383 = arith.addf %1381, %1382 : vector<1x128xf32>
    %1384 = arith.addf %1383, %760 : vector<1x128xf32>
    %1385 = vector.extract_strided_slice %1384 {offsets = [0, 0], sizes = [1, 32], strides = [1, 1]} : vector<1x128xf32> to vector<1x32xf32>
    %1386 = arith.negf %1385 : vector<1x32xf32>
    %1387 = math.exp %1386 : vector<1x32xf32>
    %cst_482 = arith.constant 1.000000e+00 : f32
    %1388 = vector.broadcast %cst_482 : f32 to vector<1x32xf32>
    %1389 = arith.addf %1388, %1387 : vector<1x32xf32>
    %1390 = arith.divf %1388, %1389 : vector<1x32xf32>
    %1391 = vector.extract_strided_slice %1384 {offsets = [0, 32], sizes = [1, 32], strides = [1, 1]} : vector<1x128xf32> to vector<1x32xf32>
    %1392 = arith.negf %1391 : vector<1x32xf32>
    %1393 = math.exp %1392 : vector<1x32xf32>
    %cst_483 = arith.constant 1.000000e+00 : f32
    %1394 = vector.broadcast %cst_483 : f32 to vector<1x32xf32>
    %1395 = arith.addf %1394, %1393 : vector<1x32xf32>
    %1396 = arith.divf %1394, %1395 : vector<1x32xf32>
    %1397 = vector.extract_strided_slice %1384 {offsets = [0, 64], sizes = [1, 32], strides = [1, 1]} : vector<1x128xf32> to vector<1x32xf32>
    %1398 = math.tanh %1397 : vector<1x32xf32>
    %1399 = vector.extract_strided_slice %1384 {offsets = [0, 96], sizes = [1, 32], strides = [1, 1]} : vector<1x128xf32> to vector<1x32xf32>
    %1400 = arith.negf %1399 : vector<1x32xf32>
    %1401 = math.exp %1400 : vector<1x32xf32>
    %cst_484 = arith.constant 1.000000e+00 : f32
    %1402 = vector.broadcast %cst_484 : f32 to vector<1x32xf32>
    %1403 = arith.addf %1402, %1401 : vector<1x32xf32>
    %1404 = arith.divf %1402, %1403 : vector<1x32xf32>
    %1405 = arith.mulf %1396, %1294 : vector<1x32xf32>
    %1406 = arith.mulf %1390, %1398 : vector<1x32xf32>
    %1407 = arith.addf %1405, %1406 : vector<1x32xf32>
    %1408 = math.tanh %1407 : vector<1x32xf32>
    %1409 = arith.mulf %1404, %1408 : vector<1x32xf32>
    %cst_485 = arith.constant dense<0.000000e+00> : vector<1x32xf32>
    %1410 = tpu.matmul %1380, %761, %cst_485 {dimension_numbers = #tpu.dot_dimension_numbers<[1], [0], [0], [1], [0, 0, 1, 1], [], []>} : vector<1x32xf32>, vector<32x32xf32>, vector<1x32xf32> -> vector<1x32xf32>
    %cst_486 = arith.constant dense<0.000000e+00> : vector<1x32xf32>
    %1411 = tpu.matmul %1409, %762, %cst_486 {dimension_numbers = #tpu.dot_dimension_numbers<[1], [0], [0], [1], [0, 0, 1, 1], [], []>} : vector<1x32xf32>, vector<32x32xf32>, vector<1x32xf32> -> vector<1x32xf32>
    %1412 = arith.addf %1410, %1411 : vector<1x32xf32>
    %c0_487 = arith.constant 0 : index
    %c0_488 = arith.constant 0 : index
    %1413 = vector.load %arg61[%c0_487, %c0_488] : memref<12x1xf32, #tpu.memory_space<vmem>>, vector<8x1xf32>
    %1414 = vector.broadcast %1413 : vector<8x1xf32> to vector<8x32xf32>
    %1415 = arith.mulf %769, %1414 : vector<8x32xf32>
    %c1_489 = arith.constant 1 : index
    %c0_490 = arith.constant 0 : index
    %1416 = vector.load %arg61[%c1_489, %c0_490] : memref<12x1xf32, #tpu.memory_space<vmem>>, vector<8x1xf32>
    %1417 = vector.broadcast %1416 : vector<8x1xf32> to vector<8x32xf32>
    %1418 = arith.mulf %772, %1417 : vector<8x32xf32>
    %1419 = arith.addf %1415, %1418 : vector<8x32xf32>
    %c2_491 = arith.constant 2 : index
    %c0_492 = arith.constant 0 : index
    %1420 = vector.load %arg61[%c2_491, %c0_492] : memref<12x1xf32, #tpu.memory_space<vmem>>, vector<8x1xf32>
    %1421 = vector.broadcast %1420 : vector<8x1xf32> to vector<8x32xf32>
    %1422 = arith.mulf %775, %1421 : vector<8x32xf32>
    %1423 = arith.addf %1419, %1422 : vector<8x32xf32>
    %c3_493 = arith.constant 3 : index
    %c0_494 = arith.constant 0 : index
    %1424 = vector.load %arg61[%c3_493, %c0_494] : memref<12x1xf32, #tpu.memory_space<vmem>>, vector<8x1xf32>
    %1425 = vector.broadcast %1424 : vector<8x1xf32> to vector<8x32xf32>
    %1426 = arith.mulf %778, %1425 : vector<8x32xf32>
    %1427 = arith.addf %1423, %1426 : vector<8x32xf32>
    %c4_495 = arith.constant 4 : index
    %c0_496 = arith.constant 0 : index
    %1428 = vector.load %arg61[%c4_495, %c0_496] : memref<12x1xf32, #tpu.memory_space<vmem>>, vector<8x1xf32>
    %1429 = vector.broadcast %1428 : vector<8x1xf32> to vector<8x32xf32>
    %1430 = arith.mulf %781, %1429 : vector<8x32xf32>
    %1431 = arith.addf %1427, %1430 : vector<8x32xf32>
    %1432 = vector.broadcast %1412 : vector<1x32xf32> to vector<8x32xf32>
    %1433 = arith.addf %1432, %1431 : vector<8x32xf32>
    %1434 = arith.addf %1433, %748 : vector<8x32xf32>
    %1435 = math.tanh %1434 : vector<8x32xf32>
    %cst_497 = arith.constant dense<0.000000e+00> : vector<8x1xf32>
    %1436 = tpu.matmul %1435, %763, %cst_497 {dimension_numbers = #tpu.dot_dimension_numbers<[1], [0], [0], [1], [0, 0, 1, 1], [], []>} : vector<8x32xf32>, vector<32x1xf32>, vector<8x1xf32> -> vector<8x1xf32>
    %cst_498 = arith.constant -1.000000e+30 : f32
    %1437 = vector.broadcast %cst_498 : f32 to vector<8x1xf32>
    %1438 = arith.select %751, %1436, %1437 : vector<8x1xi1>, vector<8x1xf32>
    %cst_499 = arith.constant dense<0xFF800000> : vector<1xf32>
    %1439 = vector.multi_reduction <maximumf>, %1438, %cst_499 [0] : vector<8x1xf32> to vector<1xf32>
    %1440 = vector.shape_cast %1439 : vector<1xf32> to vector<1x1xf32>
    %1441 = vector.broadcast %1440 : vector<1x1xf32> to vector<8x1xf32>
    %1442 = arith.subf %1438, %1441 : vector<8x1xf32>
    %1443 = math.exp %1442 : vector<8x1xf32>
    %cst_500 = arith.constant dense<0.000000e+00> : vector<1xf32>
    %1444 = vector.multi_reduction <add>, %1443, %cst_500 [0] : vector<8x1xf32> to vector<1xf32>
    %1445 = vector.shape_cast %1444 : vector<1xf32> to vector<1x1xf32>
    %1446 = vector.broadcast %1445 : vector<1x1xf32> to vector<8x1xf32>
    %1447 = arith.divf %1443, %1446 : vector<8x1xf32>
    %1448 = vector.broadcast %1447 : vector<8x1xf32> to vector<8x32xf32>
    %1449 = arith.mulf %1448, %727 : vector<8x32xf32>
    %cst_501 = arith.constant dense<0.000000e+00> : vector<32xf32>
    %1450 = vector.multi_reduction <add>, %1449, %cst_501 [0] : vector<8x32xf32> to vector<32xf32>
    %1451 = vector.shape_cast %1450 : vector<32xf32> to vector<1x32xf32>
    %c2_502 = arith.constant 2 : index
    %c0_503 = arith.constant 0 : index
    %1452 = vector.load %arg61[%c2_502, %c0_503] : memref<12x1xf32, #tpu.memory_space<vmem>>, vector<8x1xf32>
    %1453 = arith.addf %1452, %1447 : vector<8x1xf32>
    %c2_504 = arith.constant 2 : index
    %c0_505 = arith.constant 0 : index
    %1454 = vector.load %arg61[%c2_504, %c0_505] : memref<12x1xf32, #tpu.memory_space<vmem>>, vector<8x1xf32>
    tpu.vector_store %arg61[%c2_504, %c0_505], %1453 {strides = array<i32>} : memref<12x1xf32, #tpu.memory_space<vmem>>, vector<8x1xf32>,
    %cst_506 = arith.constant dense<0.000000e+00> : vector<1x128xf32>
    %1455 = tpu.matmul %1409, %764, %cst_506 {dimension_numbers = #tpu.dot_dimension_numbers<[1], [0], [0], [1], [0, 0, 1, 1], [], []>} : vector<1x32xf32>, vector<32x128xf32>, vector<1x128xf32> -> vector<1x128xf32>
    %cst_507 = arith.constant dense<0.000000e+00> : vector<1x128xf32>
    %1456 = tpu.matmul %1451, %765, %cst_507 {dimension_numbers = #tpu.dot_dimension_numbers<[1], [0], [0], [1], [0, 0, 1, 1], [], []>} : vector<1x32xf32>, vector<32x128xf32>, vector<1x128xf32> -> vector<1x128xf32>
    %1457 = arith.addf %1455, %1456 : vector<1x128xf32>
    %1458 = arith.addf %1457, %766 : vector<1x128xf32>
    %c0_508 = arith.constant 0 : index
    %c5_509 = arith.constant 5 : index
    %c0_510 = arith.constant 0 : index
    %1459 = vector.load %arg57[%c0_508, %c5_509, %c0_510] : memref<1x8x128xf32, #tpu.memory_space<vmem>>, vector<1x1x128xf32>
    %1460 = vector.shape_cast %1459 : vector<1x1x128xf32> to vector<1x128xf32>
    %1461 = vector.shape_cast %1458 : vector<1x128xf32> to vector<1x1x128xf32>
    tpu.vector_store %arg57[%c0_508, %c5_509, %c0_510], %1461 {strides = array<i32>} : memref<1x8x128xf32, #tpu.memory_space<vmem>>, vector<1x1x128xf32>,
    %1462 = vector.extract_strided_slice %743 {offsets = [6, 0], sizes = [1, 32], strides = [1, 1]} : vector<8x32xf32> to vector<1x32xf32>
    %cst_511 = arith.constant dense<0.000000e+00> : vector<1x128xf32>
    %1463 = tpu.matmul %1462, %754, %cst_511 {dimension_numbers = #tpu.dot_dimension_numbers<[1], [0], [0], [1], [0, 0, 1, 1], [], []>} : vector<1x32xf32>, vector<32x128xf32>, vector<1x128xf32> -> vector<1x128xf32>
    %cst_512 = arith.constant dense<0.000000e+00> : vector<1x128xf32>
    %1464 = tpu.matmul %1451, %755, %cst_512 {dimension_numbers = #tpu.dot_dimension_numbers<[1], [0], [0], [1], [0, 0, 1, 1], [], []>} : vector<1x32xf32>, vector<32x128xf32>, vector<1x128xf32> -> vector<1x128xf32>
    %1465 = arith.addf %1463, %1464 : vector<1x128xf32>
    %cst_513 = arith.constant dense<0.000000e+00> : vector<1x128xf32>
    %1466 = tpu.matmul %1380, %756, %cst_513 {dimension_numbers = #tpu.dot_dimension_numbers<[1], [0], [0], [1], [0, 0, 1, 1], [], []>} : vector<1x32xf32>, vector<32x128xf32>, vector<1x128xf32> -> vector<1x128xf32>
    %1467 = arith.addf %1465, %1466 : vector<1x128xf32>
    %1468 = arith.addf %1467, %757 : vector<1x128xf32>
    %1469 = vector.extract_strided_slice %1468 {offsets = [0, 0], sizes = [1, 32], strides = [1, 1]} : vector<1x128xf32> to vector<1x32xf32>
    %1470 = arith.negf %1469 : vector<1x32xf32>
    %1471 = math.exp %1470 : vector<1x32xf32>
    %cst_514 = arith.constant 1.000000e+00 : f32
    %1472 = vector.broadcast %cst_514 : f32 to vector<1x32xf32>
    %1473 = arith.addf %1472, %1471 : vector<1x32xf32>
    %1474 = arith.divf %1472, %1473 : vector<1x32xf32>
    %1475 = vector.extract_strided_slice %1468 {offsets = [0, 32], sizes = [1, 32], strides = [1, 1]} : vector<1x128xf32> to vector<1x32xf32>
    %1476 = arith.negf %1475 : vector<1x32xf32>
    %1477 = math.exp %1476 : vector<1x32xf32>
    %cst_515 = arith.constant 1.000000e+00 : f32
    %1478 = vector.broadcast %cst_515 : f32 to vector<1x32xf32>
    %1479 = arith.addf %1478, %1477 : vector<1x32xf32>
    %1480 = arith.divf %1478, %1479 : vector<1x32xf32>
    %1481 = vector.extract_strided_slice %1468 {offsets = [0, 64], sizes = [1, 32], strides = [1, 1]} : vector<1x128xf32> to vector<1x32xf32>
    %1482 = math.tanh %1481 : vector<1x32xf32>
    %1483 = vector.extract_strided_slice %1468 {offsets = [0, 96], sizes = [1, 32], strides = [1, 1]} : vector<1x128xf32> to vector<1x32xf32>
    %1484 = arith.negf %1483 : vector<1x32xf32>
    %1485 = math.exp %1484 : vector<1x32xf32>
    %cst_516 = arith.constant 1.000000e+00 : f32
    %1486 = vector.broadcast %cst_516 : f32 to vector<1x32xf32>
    %1487 = arith.addf %1486, %1485 : vector<1x32xf32>
    %1488 = arith.divf %1486, %1487 : vector<1x32xf32>
    %1489 = arith.mulf %1480, %1378 : vector<1x32xf32>
    %1490 = arith.mulf %1474, %1482 : vector<1x32xf32>
    %1491 = arith.addf %1489, %1490 : vector<1x32xf32>
    %1492 = math.tanh %1491 : vector<1x32xf32>
    %1493 = arith.mulf %1488, %1492 : vector<1x32xf32>
    %cst_517 = arith.constant dense<0.000000e+00> : vector<1x128xf32>
    %1494 = tpu.matmul %1493, %758, %cst_517 {dimension_numbers = #tpu.dot_dimension_numbers<[1], [0], [0], [1], [0, 0, 1, 1], [], []>} : vector<1x32xf32>, vector<32x128xf32>, vector<1x128xf32> -> vector<1x128xf32>
    %cst_518 = arith.constant dense<0.000000e+00> : vector<1x128xf32>
    %1495 = tpu.matmul %1409, %759, %cst_518 {dimension_numbers = #tpu.dot_dimension_numbers<[1], [0], [0], [1], [0, 0, 1, 1], [], []>} : vector<1x32xf32>, vector<32x128xf32>, vector<1x128xf32> -> vector<1x128xf32>
    %1496 = arith.addf %1494, %1495 : vector<1x128xf32>
    %1497 = arith.addf %1496, %760 : vector<1x128xf32>
    %1498 = vector.extract_strided_slice %1497 {offsets = [0, 0], sizes = [1, 32], strides = [1, 1]} : vector<1x128xf32> to vector<1x32xf32>
    %1499 = arith.negf %1498 : vector<1x32xf32>
    %1500 = math.exp %1499 : vector<1x32xf32>
    %cst_519 = arith.constant 1.000000e+00 : f32
    %1501 = vector.broadcast %cst_519 : f32 to vector<1x32xf32>
    %1502 = arith.addf %1501, %1500 : vector<1x32xf32>
    %1503 = arith.divf %1501, %1502 : vector<1x32xf32>
    %1504 = vector.extract_strided_slice %1497 {offsets = [0, 32], sizes = [1, 32], strides = [1, 1]} : vector<1x128xf32> to vector<1x32xf32>
    %1505 = arith.negf %1504 : vector<1x32xf32>
    %1506 = math.exp %1505 : vector<1x32xf32>
    %cst_520 = arith.constant 1.000000e+00 : f32
    %1507 = vector.broadcast %cst_520 : f32 to vector<1x32xf32>
    %1508 = arith.addf %1507, %1506 : vector<1x32xf32>
    %1509 = arith.divf %1507, %1508 : vector<1x32xf32>
    %1510 = vector.extract_strided_slice %1497 {offsets = [0, 64], sizes = [1, 32], strides = [1, 1]} : vector<1x128xf32> to vector<1x32xf32>
    %1511 = math.tanh %1510 : vector<1x32xf32>
    %1512 = vector.extract_strided_slice %1497 {offsets = [0, 96], sizes = [1, 32], strides = [1, 1]} : vector<1x128xf32> to vector<1x32xf32>
    %1513 = arith.negf %1512 : vector<1x32xf32>
    %1514 = math.exp %1513 : vector<1x32xf32>
    %cst_521 = arith.constant 1.000000e+00 : f32
    %1515 = vector.broadcast %cst_521 : f32 to vector<1x32xf32>
    %1516 = arith.addf %1515, %1514 : vector<1x32xf32>
    %1517 = arith.divf %1515, %1516 : vector<1x32xf32>
    %1518 = arith.mulf %1509, %1407 : vector<1x32xf32>
    %1519 = arith.mulf %1503, %1511 : vector<1x32xf32>
    %1520 = arith.addf %1518, %1519 : vector<1x32xf32>
    %1521 = math.tanh %1520 : vector<1x32xf32>
    %1522 = arith.mulf %1517, %1521 : vector<1x32xf32>
    %cst_522 = arith.constant dense<0.000000e+00> : vector<1x32xf32>
    %1523 = tpu.matmul %1493, %761, %cst_522 {dimension_numbers = #tpu.dot_dimension_numbers<[1], [0], [0], [1], [0, 0, 1, 1], [], []>} : vector<1x32xf32>, vector<32x32xf32>, vector<1x32xf32> -> vector<1x32xf32>
    %cst_523 = arith.constant dense<0.000000e+00> : vector<1x32xf32>
    %1524 = tpu.matmul %1522, %762, %cst_523 {dimension_numbers = #tpu.dot_dimension_numbers<[1], [0], [0], [1], [0, 0, 1, 1], [], []>} : vector<1x32xf32>, vector<32x32xf32>, vector<1x32xf32> -> vector<1x32xf32>
    %1525 = arith.addf %1523, %1524 : vector<1x32xf32>
    %c0_524 = arith.constant 0 : index
    %c0_525 = arith.constant 0 : index
    %1526 = vector.load %arg61[%c0_524, %c0_525] : memref<12x1xf32, #tpu.memory_space<vmem>>, vector<8x1xf32>
    %1527 = vector.broadcast %1526 : vector<8x1xf32> to vector<8x32xf32>
    %1528 = arith.mulf %769, %1527 : vector<8x32xf32>
    %c1_526 = arith.constant 1 : index
    %c0_527 = arith.constant 0 : index
    %1529 = vector.load %arg61[%c1_526, %c0_527] : memref<12x1xf32, #tpu.memory_space<vmem>>, vector<8x1xf32>
    %1530 = vector.broadcast %1529 : vector<8x1xf32> to vector<8x32xf32>
    %1531 = arith.mulf %772, %1530 : vector<8x32xf32>
    %1532 = arith.addf %1528, %1531 : vector<8x32xf32>
    %c2_528 = arith.constant 2 : index
    %c0_529 = arith.constant 0 : index
    %1533 = vector.load %arg61[%c2_528, %c0_529] : memref<12x1xf32, #tpu.memory_space<vmem>>, vector<8x1xf32>
    %1534 = vector.broadcast %1533 : vector<8x1xf32> to vector<8x32xf32>
    %1535 = arith.mulf %775, %1534 : vector<8x32xf32>
    %1536 = arith.addf %1532, %1535 : vector<8x32xf32>
    %c3_530 = arith.constant 3 : index
    %c0_531 = arith.constant 0 : index
    %1537 = vector.load %arg61[%c3_530, %c0_531] : memref<12x1xf32, #tpu.memory_space<vmem>>, vector<8x1xf32>
    %1538 = vector.broadcast %1537 : vector<8x1xf32> to vector<8x32xf32>
    %1539 = arith.mulf %778, %1538 : vector<8x32xf32>
    %1540 = arith.addf %1536, %1539 : vector<8x32xf32>
    %c4_532 = arith.constant 4 : index
    %c0_533 = arith.constant 0 : index
    %1541 = vector.load %arg61[%c4_532, %c0_533] : memref<12x1xf32, #tpu.memory_space<vmem>>, vector<8x1xf32>
    %1542 = vector.broadcast %1541 : vector<8x1xf32> to vector<8x32xf32>
    %1543 = arith.mulf %781, %1542 : vector<8x32xf32>
    %1544 = arith.addf %1540, %1543 : vector<8x32xf32>
    %1545 = vector.broadcast %1525 : vector<1x32xf32> to vector<8x32xf32>
    %1546 = arith.addf %1545, %1544 : vector<8x32xf32>
    %1547 = arith.addf %1546, %748 : vector<8x32xf32>
    %1548 = math.tanh %1547 : vector<8x32xf32>
    %cst_534 = arith.constant dense<0.000000e+00> : vector<8x1xf32>
    %1549 = tpu.matmul %1548, %763, %cst_534 {dimension_numbers = #tpu.dot_dimension_numbers<[1], [0], [0], [1], [0, 0, 1, 1], [], []>} : vector<8x32xf32>, vector<32x1xf32>, vector<8x1xf32> -> vector<8x1xf32>
    %cst_535 = arith.constant -1.000000e+30 : f32
    %1550 = vector.broadcast %cst_535 : f32 to vector<8x1xf32>
    %1551 = arith.select %751, %1549, %1550 : vector<8x1xi1>, vector<8x1xf32>
    %cst_536 = arith.constant dense<0xFF800000> : vector<1xf32>
    %1552 = vector.multi_reduction <maximumf>, %1551, %cst_536 [0] : vector<8x1xf32> to vector<1xf32>
    %1553 = vector.shape_cast %1552 : vector<1xf32> to vector<1x1xf32>
    %1554 = vector.broadcast %1553 : vector<1x1xf32> to vector<8x1xf32>
    %1555 = arith.subf %1551, %1554 : vector<8x1xf32>
    %1556 = math.exp %1555 : vector<8x1xf32>
    %cst_537 = arith.constant dense<0.000000e+00> : vector<1xf32>
    %1557 = vector.multi_reduction <add>, %1556, %cst_537 [0] : vector<8x1xf32> to vector<1xf32>
    %1558 = vector.shape_cast %1557 : vector<1xf32> to vector<1x1xf32>
    %1559 = vector.broadcast %1558 : vector<1x1xf32> to vector<8x1xf32>
    %1560 = arith.divf %1556, %1559 : vector<8x1xf32>
    %1561 = vector.broadcast %1560 : vector<8x1xf32> to vector<8x32xf32>
    %1562 = arith.mulf %1561, %727 : vector<8x32xf32>
    %cst_538 = arith.constant dense<0.000000e+00> : vector<32xf32>
    %1563 = vector.multi_reduction <add>, %1562, %cst_538 [0] : vector<8x32xf32> to vector<32xf32>
    %1564 = vector.shape_cast %1563 : vector<32xf32> to vector<1x32xf32>
    %c2_539 = arith.constant 2 : index
    %c0_540 = arith.constant 0 : index
    %1565 = vector.load %arg61[%c2_539, %c0_540] : memref<12x1xf32, #tpu.memory_space<vmem>>, vector<8x1xf32>
    %1566 = arith.addf %1565, %1560 : vector<8x1xf32>
    %c2_541 = arith.constant 2 : index
    %c0_542 = arith.constant 0 : index
    %1567 = vector.load %arg61[%c2_541, %c0_542] : memref<12x1xf32, #tpu.memory_space<vmem>>, vector<8x1xf32>
    tpu.vector_store %arg61[%c2_541, %c0_542], %1566 {strides = array<i32>} : memref<12x1xf32, #tpu.memory_space<vmem>>, vector<8x1xf32>,
    %cst_543 = arith.constant dense<0.000000e+00> : vector<1x128xf32>
    %1568 = tpu.matmul %1522, %764, %cst_543 {dimension_numbers = #tpu.dot_dimension_numbers<[1], [0], [0], [1], [0, 0, 1, 1], [], []>} : vector<1x32xf32>, vector<32x128xf32>, vector<1x128xf32> -> vector<1x128xf32>
    %cst_544 = arith.constant dense<0.000000e+00> : vector<1x128xf32>
    %1569 = tpu.matmul %1564, %765, %cst_544 {dimension_numbers = #tpu.dot_dimension_numbers<[1], [0], [0], [1], [0, 0, 1, 1], [], []>} : vector<1x32xf32>, vector<32x128xf32>, vector<1x128xf32> -> vector<1x128xf32>
    %1570 = arith.addf %1568, %1569 : vector<1x128xf32>
    %1571 = arith.addf %1570, %766 : vector<1x128xf32>
    %c0_545 = arith.constant 0 : index
    %c6_546 = arith.constant 6 : index
    %c0_547 = arith.constant 0 : index
    %1572 = vector.load %arg57[%c0_545, %c6_546, %c0_547] : memref<1x8x128xf32, #tpu.memory_space<vmem>>, vector<1x1x128xf32>
    %1573 = vector.shape_cast %1572 : vector<1x1x128xf32> to vector<1x128xf32>
    %1574 = vector.shape_cast %1571 : vector<1x128xf32> to vector<1x1x128xf32>
    tpu.vector_store %arg57[%c0_545, %c6_546, %c0_547], %1574 {strides = array<i32>} : memref<1x8x128xf32, #tpu.memory_space<vmem>>, vector<1x1x128xf32>,
    %1575 = vector.extract_strided_slice %743 {offsets = [7, 0], sizes = [1, 32], strides = [1, 1]} : vector<8x32xf32> to vector<1x32xf32>
    %cst_548 = arith.constant dense<0.000000e+00> : vector<1x128xf32>
    %1576 = tpu.matmul %1575, %754, %cst_548 {dimension_numbers = #tpu.dot_dimension_numbers<[1], [0], [0], [1], [0, 0, 1, 1], [], []>} : vector<1x32xf32>, vector<32x128xf32>, vector<1x128xf32> -> vector<1x128xf32>
    %cst_549 = arith.constant dense<0.000000e+00> : vector<1x128xf32>
    %1577 = tpu.matmul %1564, %755, %cst_549 {dimension_numbers = #tpu.dot_dimension_numbers<[1], [0], [0], [1], [0, 0, 1, 1], [], []>} : vector<1x32xf32>, vector<32x128xf32>, vector<1x128xf32> -> vector<1x128xf32>
    %1578 = arith.addf %1576, %1577 : vector<1x128xf32>
    %cst_550 = arith.constant dense<0.000000e+00> : vector<1x128xf32>
    %1579 = tpu.matmul %1493, %756, %cst_550 {dimension_numbers = #tpu.dot_dimension_numbers<[1], [0], [0], [1], [0, 0, 1, 1], [], []>} : vector<1x32xf32>, vector<32x128xf32>, vector<1x128xf32> -> vector<1x128xf32>
    %1580 = arith.addf %1578, %1579 : vector<1x128xf32>
    %1581 = arith.addf %1580, %757 : vector<1x128xf32>
    %1582 = vector.extract_strided_slice %1581 {offsets = [0, 0], sizes = [1, 32], strides = [1, 1]} : vector<1x128xf32> to vector<1x32xf32>
    %1583 = arith.negf %1582 : vector<1x32xf32>
    %1584 = math.exp %1583 : vector<1x32xf32>
    %cst_551 = arith.constant 1.000000e+00 : f32
    %1585 = vector.broadcast %cst_551 : f32 to vector<1x32xf32>
    %1586 = arith.addf %1585, %1584 : vector<1x32xf32>
    %1587 = arith.divf %1585, %1586 : vector<1x32xf32>
    %1588 = vector.extract_strided_slice %1581 {offsets = [0, 32], sizes = [1, 32], strides = [1, 1]} : vector<1x128xf32> to vector<1x32xf32>
    %1589 = arith.negf %1588 : vector<1x32xf32>
    %1590 = math.exp %1589 : vector<1x32xf32>
    %cst_552 = arith.constant 1.000000e+00 : f32
    %1591 = vector.broadcast %cst_552 : f32 to vector<1x32xf32>
    %1592 = arith.addf %1591, %1590 : vector<1x32xf32>
    %1593 = arith.divf %1591, %1592 : vector<1x32xf32>
    %1594 = vector.extract_strided_slice %1581 {offsets = [0, 64], sizes = [1, 32], strides = [1, 1]} : vector<1x128xf32> to vector<1x32xf32>
    %1595 = math.tanh %1594 : vector<1x32xf32>
    %1596 = vector.extract_strided_slice %1581 {offsets = [0, 96], sizes = [1, 32], strides = [1, 1]} : vector<1x128xf32> to vector<1x32xf32>
    %1597 = arith.negf %1596 : vector<1x32xf32>
    %1598 = math.exp %1597 : vector<1x32xf32>
    %cst_553 = arith.constant 1.000000e+00 : f32
    %1599 = vector.broadcast %cst_553 : f32 to vector<1x32xf32>
    %1600 = arith.addf %1599, %1598 : vector<1x32xf32>
    %1601 = arith.divf %1599, %1600 : vector<1x32xf32>
    %1602 = arith.mulf %1593, %1491 : vector<1x32xf32>
    %1603 = arith.mulf %1587, %1595 : vector<1x32xf32>
    %1604 = arith.addf %1602, %1603 : vector<1x32xf32>
    %1605 = math.tanh %1604 : vector<1x32xf32>
    %1606 = arith.mulf %1601, %1605 : vector<1x32xf32>
    %cst_554 = arith.constant dense<0.000000e+00> : vector<1x128xf32>
    %1607 = tpu.matmul %1606, %758, %cst_554 {dimension_numbers = #tpu.dot_dimension_numbers<[1], [0], [0], [1], [0, 0, 1, 1], [], []>} : vector<1x32xf32>, vector<32x128xf32>, vector<1x128xf32> -> vector<1x128xf32>
    %cst_555 = arith.constant dense<0.000000e+00> : vector<1x128xf32>
    %1608 = tpu.matmul %1522, %759, %cst_555 {dimension_numbers = #tpu.dot_dimension_numbers<[1], [0], [0], [1], [0, 0, 1, 1], [], []>} : vector<1x32xf32>, vector<32x128xf32>, vector<1x128xf32> -> vector<1x128xf32>
    %1609 = arith.addf %1607, %1608 : vector<1x128xf32>
    %1610 = arith.addf %1609, %760 : vector<1x128xf32>
    %1611 = vector.extract_strided_slice %1610 {offsets = [0, 0], sizes = [1, 32], strides = [1, 1]} : vector<1x128xf32> to vector<1x32xf32>
    %1612 = arith.negf %1611 : vector<1x32xf32>
    %1613 = math.exp %1612 : vector<1x32xf32>
    %cst_556 = arith.constant 1.000000e+00 : f32
    %1614 = vector.broadcast %cst_556 : f32 to vector<1x32xf32>
    %1615 = arith.addf %1614, %1613 : vector<1x32xf32>
    %1616 = arith.divf %1614, %1615 : vector<1x32xf32>
    %1617 = vector.extract_strided_slice %1610 {offsets = [0, 32], sizes = [1, 32], strides = [1, 1]} : vector<1x128xf32> to vector<1x32xf32>
    %1618 = arith.negf %1617 : vector<1x32xf32>
    %1619 = math.exp %1618 : vector<1x32xf32>
    %cst_557 = arith.constant 1.000000e+00 : f32
    %1620 = vector.broadcast %cst_557 : f32 to vector<1x32xf32>
    %1621 = arith.addf %1620, %1619 : vector<1x32xf32>
    %1622 = arith.divf %1620, %1621 : vector<1x32xf32>
    %1623 = vector.extract_strided_slice %1610 {offsets = [0, 64], sizes = [1, 32], strides = [1, 1]} : vector<1x128xf32> to vector<1x32xf32>
    %1624 = math.tanh %1623 : vector<1x32xf32>
    %1625 = vector.extract_strided_slice %1610 {offsets = [0, 96], sizes = [1, 32], strides = [1, 1]} : vector<1x128xf32> to vector<1x32xf32>
    %1626 = arith.negf %1625 : vector<1x32xf32>
    %1627 = math.exp %1626 : vector<1x32xf32>
    %cst_558 = arith.constant 1.000000e+00 : f32
    %1628 = vector.broadcast %cst_558 : f32 to vector<1x32xf32>
    %1629 = arith.addf %1628, %1627 : vector<1x32xf32>
    %1630 = arith.divf %1628, %1629 : vector<1x32xf32>
    %1631 = arith.mulf %1622, %1520 : vector<1x32xf32>
    %1632 = arith.mulf %1616, %1624 : vector<1x32xf32>
    %1633 = arith.addf %1631, %1632 : vector<1x32xf32>
    %1634 = math.tanh %1633 : vector<1x32xf32>
    %1635 = arith.mulf %1630, %1634 : vector<1x32xf32>
    %cst_559 = arith.constant dense<0.000000e+00> : vector<1x32xf32>
    %1636 = tpu.matmul %1606, %761, %cst_559 {dimension_numbers = #tpu.dot_dimension_numbers<[1], [0], [0], [1], [0, 0, 1, 1], [], []>} : vector<1x32xf32>, vector<32x32xf32>, vector<1x32xf32> -> vector<1x32xf32>
    %cst_560 = arith.constant dense<0.000000e+00> : vector<1x32xf32>
    %1637 = tpu.matmul %1635, %762, %cst_560 {dimension_numbers = #tpu.dot_dimension_numbers<[1], [0], [0], [1], [0, 0, 1, 1], [], []>} : vector<1x32xf32>, vector<32x32xf32>, vector<1x32xf32> -> vector<1x32xf32>
    %1638 = arith.addf %1636, %1637 : vector<1x32xf32>
    %c0_561 = arith.constant 0 : index
    %c0_562 = arith.constant 0 : index
    %1639 = vector.load %arg61[%c0_561, %c0_562] : memref<12x1xf32, #tpu.memory_space<vmem>>, vector<8x1xf32>
    %1640 = vector.broadcast %1639 : vector<8x1xf32> to vector<8x32xf32>
    %1641 = arith.mulf %769, %1640 : vector<8x32xf32>
    %c1_563 = arith.constant 1 : index
    %c0_564 = arith.constant 0 : index
    %1642 = vector.load %arg61[%c1_563, %c0_564] : memref<12x1xf32, #tpu.memory_space<vmem>>, vector<8x1xf32>
    %1643 = vector.broadcast %1642 : vector<8x1xf32> to vector<8x32xf32>
    %1644 = arith.mulf %772, %1643 : vector<8x32xf32>
    %1645 = arith.addf %1641, %1644 : vector<8x32xf32>
    %c2_565 = arith.constant 2 : index
    %c0_566 = arith.constant 0 : index
    %1646 = vector.load %arg61[%c2_565, %c0_566] : memref<12x1xf32, #tpu.memory_space<vmem>>, vector<8x1xf32>
    %1647 = vector.broadcast %1646 : vector<8x1xf32> to vector<8x32xf32>
    %1648 = arith.mulf %775, %1647 : vector<8x32xf32>
    %1649 = arith.addf %1645, %1648 : vector<8x32xf32>
    %c3_567 = arith.constant 3 : index
    %c0_568 = arith.constant 0 : index
    %1650 = vector.load %arg61[%c3_567, %c0_568] : memref<12x1xf32, #tpu.memory_space<vmem>>, vector<8x1xf32>
    %1651 = vector.broadcast %1650 : vector<8x1xf32> to vector<8x32xf32>
    %1652 = arith.mulf %778, %1651 : vector<8x32xf32>
    %1653 = arith.addf %1649, %1652 : vector<8x32xf32>
    %c4_569 = arith.constant 4 : index
    %c0_570 = arith.constant 0 : index
    %1654 = vector.load %arg61[%c4_569, %c0_570] : memref<12x1xf32, #tpu.memory_space<vmem>>, vector<8x1xf32>
    %1655 = vector.broadcast %1654 : vector<8x1xf32> to vector<8x32xf32>
    %1656 = arith.mulf %781, %1655 : vector<8x32xf32>
    %1657 = arith.addf %1653, %1656 : vector<8x32xf32>
    %1658 = vector.broadcast %1638 : vector<1x32xf32> to vector<8x32xf32>
    %1659 = arith.addf %1658, %1657 : vector<8x32xf32>
    %1660 = arith.addf %1659, %748 : vector<8x32xf32>
    %1661 = math.tanh %1660 : vector<8x32xf32>
    %cst_571 = arith.constant dense<0.000000e+00> : vector<8x1xf32>
    %1662 = tpu.matmul %1661, %763, %cst_571 {dimension_numbers = #tpu.dot_dimension_numbers<[1], [0], [0], [1], [0, 0, 1, 1], [], []>} : vector<8x32xf32>, vector<32x1xf32>, vector<8x1xf32> -> vector<8x1xf32>
    %cst_572 = arith.constant -1.000000e+30 : f32
    %1663 = vector.broadcast %cst_572 : f32 to vector<8x1xf32>
    %1664 = arith.select %751, %1662, %1663 : vector<8x1xi1>, vector<8x1xf32>
    %cst_573 = arith.constant dense<0xFF800000> : vector<1xf32>
    %1665 = vector.multi_reduction <maximumf>, %1664, %cst_573 [0] : vector<8x1xf32> to vector<1xf32>
    %1666 = vector.shape_cast %1665 : vector<1xf32> to vector<1x1xf32>
    %1667 = vector.broadcast %1666 : vector<1x1xf32> to vector<8x1xf32>
    %1668 = arith.subf %1664, %1667 : vector<8x1xf32>
    %1669 = math.exp %1668 : vector<8x1xf32>
    %cst_574 = arith.constant dense<0.000000e+00> : vector<1xf32>
    %1670 = vector.multi_reduction <add>, %1669, %cst_574 [0] : vector<8x1xf32> to vector<1xf32>
    %1671 = vector.shape_cast %1670 : vector<1xf32> to vector<1x1xf32>
    %1672 = vector.broadcast %1671 : vector<1x1xf32> to vector<8x1xf32>
    %1673 = arith.divf %1669, %1672 : vector<8x1xf32>
    %1674 = vector.broadcast %1673 : vector<8x1xf32> to vector<8x32xf32>
    %1675 = arith.mulf %1674, %727 : vector<8x32xf32>
    %cst_575 = arith.constant dense<0.000000e+00> : vector<32xf32>
    %1676 = vector.multi_reduction <add>, %1675, %cst_575 [0] : vector<8x32xf32> to vector<32xf32>
    %1677 = vector.shape_cast %1676 : vector<32xf32> to vector<1x32xf32>
    %c2_576 = arith.constant 2 : index
    %c0_577 = arith.constant 0 : index
    %1678 = vector.load %arg61[%c2_576, %c0_577] : memref<12x1xf32, #tpu.memory_space<vmem>>, vector<8x1xf32>
    %1679 = arith.addf %1678, %1673 : vector<8x1xf32>
    %c2_578 = arith.constant 2 : index
    %c0_579 = arith.constant 0 : index
    %1680 = vector.load %arg61[%c2_578, %c0_579] : memref<12x1xf32, #tpu.memory_space<vmem>>, vector<8x1xf32>
    tpu.vector_store %arg61[%c2_578, %c0_579], %1679 {strides = array<i32>} : memref<12x1xf32, #tpu.memory_space<vmem>>, vector<8x1xf32>,
    %cst_580 = arith.constant dense<0.000000e+00> : vector<1x128xf32>
    %1681 = tpu.matmul %1635, %764, %cst_580 {dimension_numbers = #tpu.dot_dimension_numbers<[1], [0], [0], [1], [0, 0, 1, 1], [], []>} : vector<1x32xf32>, vector<32x128xf32>, vector<1x128xf32> -> vector<1x128xf32>
    %cst_581 = arith.constant dense<0.000000e+00> : vector<1x128xf32>
    %1682 = tpu.matmul %1677, %765, %cst_581 {dimension_numbers = #tpu.dot_dimension_numbers<[1], [0], [0], [1], [0, 0, 1, 1], [], []>} : vector<1x32xf32>, vector<32x128xf32>, vector<1x128xf32> -> vector<1x128xf32>
    %1683 = arith.addf %1681, %1682 : vector<1x128xf32>
    %1684 = arith.addf %1683, %766 : vector<1x128xf32>
    %c0_582 = arith.constant 0 : index
    %c7_583 = arith.constant 7 : index
    %c0_584 = arith.constant 0 : index
    %1685 = vector.load %arg57[%c0_582, %c7_583, %c0_584] : memref<1x8x128xf32, #tpu.memory_space<vmem>>, vector<1x1x128xf32>
    %1686 = vector.shape_cast %1685 : vector<1x1x128xf32> to vector<1x128xf32>
    %1687 = vector.shape_cast %1684 : vector<1x128xf32> to vector<1x1x128xf32>
    tpu.vector_store %arg57[%c0_582, %c7_583, %c0_584], %1687 {strides = array<i32>} : memref<1x8x128xf32, #tpu.memory_space<vmem>>, vector<1x1x128xf32>,
    %c0_585 = arith.constant 0 : index
    %c0_586 = arith.constant 0 : index
    %c0_587 = arith.constant 0 : index
    %1688 = vector.load %arg57[%c0_585, %c0_586, %c0_587] : memref<1x8x128xf32, #tpu.memory_space<vmem>>, vector<1x8x16xf32>
    %1689 = vector.shape_cast %1688 : vector<1x8x16xf32> to vector<8x16xf32>
    %c0_588 = arith.constant 0 : index
    %c0_589 = arith.constant 0 : index
    %1690 = vector.load %arg40[%c0_588, %c0_589] : memref<80x32xf32, #tpu.memory_space<vmem>>, vector<80x32xf32>
    %c0_590 = arith.constant 0 : index
    %c0_591 = arith.constant 0 : index
    %1691 = vector.load %arg41[%c0_590, %c0_591] : memref<1x32xf32, #tpu.memory_space<vmem>>, vector<1x32xf32>
    %c0_592 = arith.constant 0 : index
    %c0_593 = arith.constant 0 : index
    %1692 = vector.load %arg42[%c0_592, %c0_593] : memref<1x32xf32, #tpu.memory_space<vmem>>, vector<1x32xf32>
    %cst_594 = arith.constant 0.000000e+00 : f32
    %1693 = vector.broadcast %cst_594 : f32 to vector<2x16xf32>
    %1694 = tpu.concatenate %1693, %1689, %1693 in 0 : vector<2x16xf32>, vector<8x16xf32>, vector<2x16xf32> -> vector<12x16xf32>
    %1695 = vector.extract_strided_slice %1694 {offsets = [0, 0], sizes = [8, 16], strides = [1, 1]} : vector<12x16xf32> to vector<8x16xf32>
    %1696 = vector.extract_strided_slice %1690 {offsets = [0, 0], sizes = [16, 32], strides = [1, 1]} : vector<80x32xf32> to vector<16x32xf32>
    %cst_595 = arith.constant dense<0.000000e+00> : vector<8x32xf32>
    %1697 = tpu.matmul %1695, %1696, %cst_595 {dimension_numbers = #tpu.dot_dimension_numbers<[1], [0], [0], [1], [0, 0, 1, 1], [], []>} : vector<8x16xf32>, vector<16x32xf32>, vector<8x32xf32> -> vector<8x32xf32>
    %1698 = vector.extract_strided_slice %1694 {offsets = [1, 0], sizes = [8, 16], strides = [1, 1]} : vector<12x16xf32> to vector<8x16xf32>
    %1699 = vector.extract_strided_slice %1690 {offsets = [16, 0], sizes = [16, 32], strides = [1, 1]} : vector<80x32xf32> to vector<16x32xf32>
    %cst_596 = arith.constant dense<0.000000e+00> : vector<8x32xf32>
    %1700 = tpu.matmul %1698, %1699, %cst_596 {dimension_numbers = #tpu.dot_dimension_numbers<[1], [0], [0], [1], [0, 0, 1, 1], [], []>} : vector<8x16xf32>, vector<16x32xf32>, vector<8x32xf32> -> vector<8x32xf32>
    %1701 = arith.addf %1697, %1700 : vector<8x32xf32>
    %1702 = vector.extract_strided_slice %1694 {offsets = [2, 0], sizes = [8, 16], strides = [1, 1]} : vector<12x16xf32> to vector<8x16xf32>
    %1703 = vector.extract_strided_slice %1690 {offsets = [32, 0], sizes = [16, 32], strides = [1, 1]} : vector<80x32xf32> to vector<16x32xf32>
    %cst_597 = arith.constant dense<0.000000e+00> : vector<8x32xf32>
    %1704 = tpu.matmul %1702, %1703, %cst_597 {dimension_numbers = #tpu.dot_dimension_numbers<[1], [0], [0], [1], [0, 0, 1, 1], [], []>} : vector<8x16xf32>, vector<16x32xf32>, vector<8x32xf32> -> vector<8x32xf32>
    %1705 = arith.addf %1701, %1704 : vector<8x32xf32>
    %1706 = vector.extract_strided_slice %1694 {offsets = [3, 0], sizes = [8, 16], strides = [1, 1]} : vector<12x16xf32> to vector<8x16xf32>
    %1707 = vector.extract_strided_slice %1690 {offsets = [48, 0], sizes = [16, 32], strides = [1, 1]} : vector<80x32xf32> to vector<16x32xf32>
    %cst_598 = arith.constant dense<0.000000e+00> : vector<8x32xf32>
    %1708 = tpu.matmul %1706, %1707, %cst_598 {dimension_numbers = #tpu.dot_dimension_numbers<[1], [0], [0], [1], [0, 0, 1, 1], [], []>} : vector<8x16xf32>, vector<16x32xf32>, vector<8x32xf32> -> vector<8x32xf32>
    %1709 = arith.addf %1705, %1708 : vector<8x32xf32>
    %1710 = vector.extract_strided_slice %1694 {offsets = [4, 0], sizes = [8, 16], strides = [1, 1]} : vector<12x16xf32> to vector<8x16xf32>
    %1711 = vector.extract_strided_slice %1690 {offsets = [64, 0], sizes = [16, 32], strides = [1, 1]} : vector<80x32xf32> to vector<16x32xf32>
    %cst_599 = arith.constant dense<0.000000e+00> : vector<8x32xf32>
    %1712 = tpu.matmul %1710, %1711, %cst_599 {dimension_numbers = #tpu.dot_dimension_numbers<[1], [0], [0], [1], [0, 0, 1, 1], [], []>} : vector<8x16xf32>, vector<16x32xf32>, vector<8x32xf32> -> vector<8x32xf32>
    %1713 = arith.addf %1709, %1712 : vector<8x32xf32>
    %1714 = vector.broadcast %1691 : vector<1x32xf32> to vector<8x32xf32>
    %1715 = arith.mulf %1713, %1714 : vector<8x32xf32>
    %1716 = vector.broadcast %1692 : vector<1x32xf32> to vector<8x32xf32>
    %1717 = arith.addf %1715, %1716 : vector<8x32xf32>
    %c0_600 = arith.constant 0 : index
    %c0_601 = arith.constant 0 : index
    %1718 = vector.load %arg43[%c0_600, %c0_601] : memref<160x32xf32, #tpu.memory_space<vmem>>, vector<160x32xf32>
    %c0_602 = arith.constant 0 : index
    %c0_603 = arith.constant 0 : index
    %1719 = vector.load %arg44[%c0_602, %c0_603] : memref<1x32xf32, #tpu.memory_space<vmem>>, vector<1x32xf32>
    %c0_604 = arith.constant 0 : index
    %c0_605 = arith.constant 0 : index
    %1720 = vector.load %arg45[%c0_604, %c0_605] : memref<1x32xf32, #tpu.memory_space<vmem>>, vector<1x32xf32>
    %cst_606 = arith.constant 0.000000e+00 : f32
    %1721 = vector.broadcast %cst_606 : f32 to vector<2x32xf32>
    %1722 = tpu.concatenate %1721, %1717, %1721 in 0 : vector<2x32xf32>, vector<8x32xf32>, vector<2x32xf32> -> vector<12x32xf32>
    %1723 = vector.extract_strided_slice %1722 {offsets = [0, 0], sizes = [8, 32], strides = [1, 1]} : vector<12x32xf32> to vector<8x32xf32>
    %1724 = vector.extract_strided_slice %1718 {offsets = [0, 0], sizes = [32, 32], strides = [1, 1]} : vector<160x32xf32> to vector<32x32xf32>
    %cst_607 = arith.constant dense<0.000000e+00> : vector<8x32xf32>
    %1725 = tpu.matmul %1723, %1724, %cst_607 {dimension_numbers = #tpu.dot_dimension_numbers<[1], [0], [0], [1], [0, 0, 1, 1], [], []>} : vector<8x32xf32>, vector<32x32xf32>, vector<8x32xf32> -> vector<8x32xf32>
    %1726 = vector.extract_strided_slice %1722 {offsets = [1, 0], sizes = [8, 32], strides = [1, 1]} : vector<12x32xf32> to vector<8x32xf32>
    %1727 = vector.extract_strided_slice %1718 {offsets = [32, 0], sizes = [32, 32], strides = [1, 1]} : vector<160x32xf32> to vector<32x32xf32>
    %cst_608 = arith.constant dense<0.000000e+00> : vector<8x32xf32>
    %1728 = tpu.matmul %1726, %1727, %cst_608 {dimension_numbers = #tpu.dot_dimension_numbers<[1], [0], [0], [1], [0, 0, 1, 1], [], []>} : vector<8x32xf32>, vector<32x32xf32>, vector<8x32xf32> -> vector<8x32xf32>
    %1729 = arith.addf %1725, %1728 : vector<8x32xf32>
    %1730 = vector.extract_strided_slice %1722 {offsets = [2, 0], sizes = [8, 32], strides = [1, 1]} : vector<12x32xf32> to vector<8x32xf32>
    %1731 = vector.extract_strided_slice %1718 {offsets = [64, 0], sizes = [32, 32], strides = [1, 1]} : vector<160x32xf32> to vector<32x32xf32>
    %cst_609 = arith.constant dense<0.000000e+00> : vector<8x32xf32>
    %1732 = tpu.matmul %1730, %1731, %cst_609 {dimension_numbers = #tpu.dot_dimension_numbers<[1], [0], [0], [1], [0, 0, 1, 1], [], []>} : vector<8x32xf32>, vector<32x32xf32>, vector<8x32xf32> -> vector<8x32xf32>
    %1733 = arith.addf %1729, %1732 : vector<8x32xf32>
    %1734 = vector.extract_strided_slice %1722 {offsets = [3, 0], sizes = [8, 32], strides = [1, 1]} : vector<12x32xf32> to vector<8x32xf32>
    %1735 = vector.extract_strided_slice %1718 {offsets = [96, 0], sizes = [32, 32], strides = [1, 1]} : vector<160x32xf32> to vector<32x32xf32>
    %cst_610 = arith.constant dense<0.000000e+00> : vector<8x32xf32>
    %1736 = tpu.matmul %1734, %1735, %cst_610 {dimension_numbers = #tpu.dot_dimension_numbers<[1], [0], [0], [1], [0, 0, 1, 1], [], []>} : vector<8x32xf32>, vector<32x32xf32>, vector<8x32xf32> -> vector<8x32xf32>
    %1737 = arith.addf %1733, %1736 : vector<8x32xf32>
    %1738 = vector.extract_strided_slice %1722 {offsets = [4, 0], sizes = [8, 32], strides = [1, 1]} : vector<12x32xf32> to vector<8x32xf32>
    %1739 = vector.extract_strided_slice %1718 {offsets = [128, 0], sizes = [32, 32], strides = [1, 1]} : vector<160x32xf32> to vector<32x32xf32>
    %cst_611 = arith.constant dense<0.000000e+00> : vector<8x32xf32>
    %1740 = tpu.matmul %1738, %1739, %cst_611 {dimension_numbers = #tpu.dot_dimension_numbers<[1], [0], [0], [1], [0, 0, 1, 1], [], []>} : vector<8x32xf32>, vector<32x32xf32>, vector<8x32xf32> -> vector<8x32xf32>
    %1741 = arith.addf %1737, %1740 : vector<8x32xf32>
    %1742 = vector.broadcast %1719 : vector<1x32xf32> to vector<8x32xf32>
    %1743 = arith.mulf %1741, %1742 : vector<8x32xf32>
    %1744 = vector.broadcast %1720 : vector<1x32xf32> to vector<8x32xf32>
    %1745 = arith.addf %1743, %1744 : vector<8x32xf32>
    %1746 = math.tanh %1745 : vector<8x32xf32>
    %c0_612 = arith.constant 0 : index
    %c0_613 = arith.constant 0 : index
    %1747 = vector.load %arg46[%c0_612, %c0_613] : memref<160x32xf32, #tpu.memory_space<vmem>>, vector<160x32xf32>
    %c0_614 = arith.constant 0 : index
    %c0_615 = arith.constant 0 : index
    %1748 = vector.load %arg47[%c0_614, %c0_615] : memref<1x32xf32, #tpu.memory_space<vmem>>, vector<1x32xf32>
    %c0_616 = arith.constant 0 : index
    %c0_617 = arith.constant 0 : index
    %1749 = vector.load %arg48[%c0_616, %c0_617] : memref<1x32xf32, #tpu.memory_space<vmem>>, vector<1x32xf32>
    %cst_618 = arith.constant 0.000000e+00 : f32
    %1750 = vector.broadcast %cst_618 : f32 to vector<2x32xf32>
    %1751 = tpu.concatenate %1750, %1746, %1750 in 0 : vector<2x32xf32>, vector<8x32xf32>, vector<2x32xf32> -> vector<12x32xf32>
    %1752 = vector.extract_strided_slice %1751 {offsets = [0, 0], sizes = [8, 32], strides = [1, 1]} : vector<12x32xf32> to vector<8x32xf32>
    %1753 = vector.extract_strided_slice %1747 {offsets = [0, 0], sizes = [32, 32], strides = [1, 1]} : vector<160x32xf32> to vector<32x32xf32>
    %cst_619 = arith.constant dense<0.000000e+00> : vector<8x32xf32>
    %1754 = tpu.matmul %1752, %1753, %cst_619 {dimension_numbers = #tpu.dot_dimension_numbers<[1], [0], [0], [1], [0, 0, 1, 1], [], []>} : vector<8x32xf32>, vector<32x32xf32>, vector<8x32xf32> -> vector<8x32xf32>
    %1755 = vector.extract_strided_slice %1751 {offsets = [1, 0], sizes = [8, 32], strides = [1, 1]} : vector<12x32xf32> to vector<8x32xf32>
    %1756 = vector.extract_strided_slice %1747 {offsets = [32, 0], sizes = [32, 32], strides = [1, 1]} : vector<160x32xf32> to vector<32x32xf32>
    %cst_620 = arith.constant dense<0.000000e+00> : vector<8x32xf32>
    %1757 = tpu.matmul %1755, %1756, %cst_620 {dimension_numbers = #tpu.dot_dimension_numbers<[1], [0], [0], [1], [0, 0, 1, 1], [], []>} : vector<8x32xf32>, vector<32x32xf32>, vector<8x32xf32> -> vector<8x32xf32>
    %1758 = arith.addf %1754, %1757 : vector<8x32xf32>
    %1759 = vector.extract_strided_slice %1751 {offsets = [2, 0], sizes = [8, 32], strides = [1, 1]} : vector<12x32xf32> to vector<8x32xf32>
    %1760 = vector.extract_strided_slice %1747 {offsets = [64, 0], sizes = [32, 32], strides = [1, 1]} : vector<160x32xf32> to vector<32x32xf32>
    %cst_621 = arith.constant dense<0.000000e+00> : vector<8x32xf32>
    %1761 = tpu.matmul %1759, %1760, %cst_621 {dimension_numbers = #tpu.dot_dimension_numbers<[1], [0], [0], [1], [0, 0, 1, 1], [], []>} : vector<8x32xf32>, vector<32x32xf32>, vector<8x32xf32> -> vector<8x32xf32>
    %1762 = arith.addf %1758, %1761 : vector<8x32xf32>
    %1763 = vector.extract_strided_slice %1751 {offsets = [3, 0], sizes = [8, 32], strides = [1, 1]} : vector<12x32xf32> to vector<8x32xf32>
    %1764 = vector.extract_strided_slice %1747 {offsets = [96, 0], sizes = [32, 32], strides = [1, 1]} : vector<160x32xf32> to vector<32x32xf32>
    %cst_622 = arith.constant dense<0.000000e+00> : vector<8x32xf32>
    %1765 = tpu.matmul %1763, %1764, %cst_622 {dimension_numbers = #tpu.dot_dimension_numbers<[1], [0], [0], [1], [0, 0, 1, 1], [], []>} : vector<8x32xf32>, vector<32x32xf32>, vector<8x32xf32> -> vector<8x32xf32>
    %1766 = arith.addf %1762, %1765 : vector<8x32xf32>
    %1767 = vector.extract_strided_slice %1751 {offsets = [4, 0], sizes = [8, 32], strides = [1, 1]} : vector<12x32xf32> to vector<8x32xf32>
    %1768 = vector.extract_strided_slice %1747 {offsets = [128, 0], sizes = [32, 32], strides = [1, 1]} : vector<160x32xf32> to vector<32x32xf32>
    %cst_623 = arith.constant dense<0.000000e+00> : vector<8x32xf32>
    %1769 = tpu.matmul %1767, %1768, %cst_623 {dimension_numbers = #tpu.dot_dimension_numbers<[1], [0], [0], [1], [0, 0, 1, 1], [], []>} : vector<8x32xf32>, vector<32x32xf32>, vector<8x32xf32> -> vector<8x32xf32>
    %1770 = arith.addf %1766, %1769 : vector<8x32xf32>
    %1771 = vector.broadcast %1748 : vector<1x32xf32> to vector<8x32xf32>
    %1772 = arith.mulf %1770, %1771 : vector<8x32xf32>
    %1773 = vector.broadcast %1749 : vector<1x32xf32> to vector<8x32xf32>
    %1774 = arith.addf %1772, %1773 : vector<8x32xf32>
    %1775 = math.tanh %1774 : vector<8x32xf32>
    %c0_624 = arith.constant 0 : index
    %c0_625 = arith.constant 0 : index
    %1776 = vector.load %arg49[%c0_624, %c0_625] : memref<160x32xf32, #tpu.memory_space<vmem>>, vector<160x32xf32>
    %c0_626 = arith.constant 0 : index
    %c0_627 = arith.constant 0 : index
    %1777 = vector.load %arg50[%c0_626, %c0_627] : memref<1x32xf32, #tpu.memory_space<vmem>>, vector<1x32xf32>
    %c0_628 = arith.constant 0 : index
    %c0_629 = arith.constant 0 : index
    %1778 = vector.load %arg51[%c0_628, %c0_629] : memref<1x32xf32, #tpu.memory_space<vmem>>, vector<1x32xf32>
    %cst_630 = arith.constant 0.000000e+00 : f32
    %1779 = vector.broadcast %cst_630 : f32 to vector<2x32xf32>
    %1780 = tpu.concatenate %1779, %1775, %1779 in 0 : vector<2x32xf32>, vector<8x32xf32>, vector<2x32xf32> -> vector<12x32xf32>
    %1781 = vector.extract_strided_slice %1780 {offsets = [0, 0], sizes = [8, 32], strides = [1, 1]} : vector<12x32xf32> to vector<8x32xf32>
    %1782 = vector.extract_strided_slice %1776 {offsets = [0, 0], sizes = [32, 32], strides = [1, 1]} : vector<160x32xf32> to vector<32x32xf32>
    %cst_631 = arith.constant dense<0.000000e+00> : vector<8x32xf32>
    %1783 = tpu.matmul %1781, %1782, %cst_631 {dimension_numbers = #tpu.dot_dimension_numbers<[1], [0], [0], [1], [0, 0, 1, 1], [], []>} : vector<8x32xf32>, vector<32x32xf32>, vector<8x32xf32> -> vector<8x32xf32>
    %1784 = vector.extract_strided_slice %1780 {offsets = [1, 0], sizes = [8, 32], strides = [1, 1]} : vector<12x32xf32> to vector<8x32xf32>
    %1785 = vector.extract_strided_slice %1776 {offsets = [32, 0], sizes = [32, 32], strides = [1, 1]} : vector<160x32xf32> to vector<32x32xf32>
    %cst_632 = arith.constant dense<0.000000e+00> : vector<8x32xf32>
    %1786 = tpu.matmul %1784, %1785, %cst_632 {dimension_numbers = #tpu.dot_dimension_numbers<[1], [0], [0], [1], [0, 0, 1, 1], [], []>} : vector<8x32xf32>, vector<32x32xf32>, vector<8x32xf32> -> vector<8x32xf32>
    %1787 = arith.addf %1783, %1786 : vector<8x32xf32>
    %1788 = vector.extract_strided_slice %1780 {offsets = [2, 0], sizes = [8, 32], strides = [1, 1]} : vector<12x32xf32> to vector<8x32xf32>
    %1789 = vector.extract_strided_slice %1776 {offsets = [64, 0], sizes = [32, 32], strides = [1, 1]} : vector<160x32xf32> to vector<32x32xf32>
    %cst_633 = arith.constant dense<0.000000e+00> : vector<8x32xf32>
    %1790 = tpu.matmul %1788, %1789, %cst_633 {dimension_numbers = #tpu.dot_dimension_numbers<[1], [0], [0], [1], [0, 0, 1, 1], [], []>} : vector<8x32xf32>, vector<32x32xf32>, vector<8x32xf32> -> vector<8x32xf32>
    %1791 = arith.addf %1787, %1790 : vector<8x32xf32>
    %1792 = vector.extract_strided_slice %1780 {offsets = [3, 0], sizes = [8, 32], strides = [1, 1]} : vector<12x32xf32> to vector<8x32xf32>
    %1793 = vector.extract_strided_slice %1776 {offsets = [96, 0], sizes = [32, 32], strides = [1, 1]} : vector<160x32xf32> to vector<32x32xf32>
    %cst_634 = arith.constant dense<0.000000e+00> : vector<8x32xf32>
    %1794 = tpu.matmul %1792, %1793, %cst_634 {dimension_numbers = #tpu.dot_dimension_numbers<[1], [0], [0], [1], [0, 0, 1, 1], [], []>} : vector<8x32xf32>, vector<32x32xf32>, vector<8x32xf32> -> vector<8x32xf32>
    %1795 = arith.addf %1791, %1794 : vector<8x32xf32>
    %1796 = vector.extract_strided_slice %1780 {offsets = [4, 0], sizes = [8, 32], strides = [1, 1]} : vector<12x32xf32> to vector<8x32xf32>
    %1797 = vector.extract_strided_slice %1776 {offsets = [128, 0], sizes = [32, 32], strides = [1, 1]} : vector<160x32xf32> to vector<32x32xf32>
    %cst_635 = arith.constant dense<0.000000e+00> : vector<8x32xf32>
    %1798 = tpu.matmul %1796, %1797, %cst_635 {dimension_numbers = #tpu.dot_dimension_numbers<[1], [0], [0], [1], [0, 0, 1, 1], [], []>} : vector<8x32xf32>, vector<32x32xf32>, vector<8x32xf32> -> vector<8x32xf32>
    %1799 = arith.addf %1795, %1798 : vector<8x32xf32>
    %1800 = vector.broadcast %1777 : vector<1x32xf32> to vector<8x32xf32>
    %1801 = arith.mulf %1799, %1800 : vector<8x32xf32>
    %1802 = vector.broadcast %1778 : vector<1x32xf32> to vector<8x32xf32>
    %1803 = arith.addf %1801, %1802 : vector<8x32xf32>
    %1804 = math.tanh %1803 : vector<8x32xf32>
    %c0_636 = arith.constant 0 : index
    %c0_637 = arith.constant 0 : index
    %1805 = vector.load %arg52[%c0_636, %c0_637] : memref<160x32xf32, #tpu.memory_space<vmem>>, vector<160x32xf32>
    %c0_638 = arith.constant 0 : index
    %c0_639 = arith.constant 0 : index
    %1806 = vector.load %arg53[%c0_638, %c0_639] : memref<1x32xf32, #tpu.memory_space<vmem>>, vector<1x32xf32>
    %c0_640 = arith.constant 0 : index
    %c0_641 = arith.constant 0 : index
    %1807 = vector.load %arg54[%c0_640, %c0_641] : memref<1x32xf32, #tpu.memory_space<vmem>>, vector<1x32xf32>
    %cst_642 = arith.constant 0.000000e+00 : f32
    %1808 = vector.broadcast %cst_642 : f32 to vector<2x32xf32>
    %1809 = tpu.concatenate %1808, %1804, %1808 in 0 : vector<2x32xf32>, vector<8x32xf32>, vector<2x32xf32> -> vector<12x32xf32>
    %1810 = vector.extract_strided_slice %1809 {offsets = [0, 0], sizes = [8, 32], strides = [1, 1]} : vector<12x32xf32> to vector<8x32xf32>
    %1811 = vector.extract_strided_slice %1805 {offsets = [0, 0], sizes = [32, 32], strides = [1, 1]} : vector<160x32xf32> to vector<32x32xf32>
    %cst_643 = arith.constant dense<0.000000e+00> : vector<8x32xf32>
    %1812 = tpu.matmul %1810, %1811, %cst_643 {dimension_numbers = #tpu.dot_dimension_numbers<[1], [0], [0], [1], [0, 0, 1, 1], [], []>} : vector<8x32xf32>, vector<32x32xf32>, vector<8x32xf32> -> vector<8x32xf32>
    %1813 = vector.extract_strided_slice %1809 {offsets = [1, 0], sizes = [8, 32], strides = [1, 1]} : vector<12x32xf32> to vector<8x32xf32>
    %1814 = vector.extract_strided_slice %1805 {offsets = [32, 0], sizes = [32, 32], strides = [1, 1]} : vector<160x32xf32> to vector<32x32xf32>
    %cst_644 = arith.constant dense<0.000000e+00> : vector<8x32xf32>
    %1815 = tpu.matmul %1813, %1814, %cst_644 {dimension_numbers = #tpu.dot_dimension_numbers<[1], [0], [0], [1], [0, 0, 1, 1], [], []>} : vector<8x32xf32>, vector<32x32xf32>, vector<8x32xf32> -> vector<8x32xf32>
    %1816 = arith.addf %1812, %1815 : vector<8x32xf32>
    %1817 = vector.extract_strided_slice %1809 {offsets = [2, 0], sizes = [8, 32], strides = [1, 1]} : vector<12x32xf32> to vector<8x32xf32>
    %1818 = vector.extract_strided_slice %1805 {offsets = [64, 0], sizes = [32, 32], strides = [1, 1]} : vector<160x32xf32> to vector<32x32xf32>
    %cst_645 = arith.constant dense<0.000000e+00> : vector<8x32xf32>
    %1819 = tpu.matmul %1817, %1818, %cst_645 {dimension_numbers = #tpu.dot_dimension_numbers<[1], [0], [0], [1], [0, 0, 1, 1], [], []>} : vector<8x32xf32>, vector<32x32xf32>, vector<8x32xf32> -> vector<8x32xf32>
    %1820 = arith.addf %1816, %1819 : vector<8x32xf32>
    %1821 = vector.extract_strided_slice %1809 {offsets = [3, 0], sizes = [8, 32], strides = [1, 1]} : vector<12x32xf32> to vector<8x32xf32>
    %1822 = vector.extract_strided_slice %1805 {offsets = [96, 0], sizes = [32, 32], strides = [1, 1]} : vector<160x32xf32> to vector<32x32xf32>
    %cst_646 = arith.constant dense<0.000000e+00> : vector<8x32xf32>
    %1823 = tpu.matmul %1821, %1822, %cst_646 {dimension_numbers = #tpu.dot_dimension_numbers<[1], [0], [0], [1], [0, 0, 1, 1], [], []>} : vector<8x32xf32>, vector<32x32xf32>, vector<8x32xf32> -> vector<8x32xf32>
    %1824 = arith.addf %1820, %1823 : vector<8x32xf32>
    %1825 = vector.extract_strided_slice %1809 {offsets = [4, 0], sizes = [8, 32], strides = [1, 1]} : vector<12x32xf32> to vector<8x32xf32>
    %1826 = vector.extract_strided_slice %1805 {offsets = [128, 0], sizes = [32, 32], strides = [1, 1]} : vector<160x32xf32> to vector<32x32xf32>
    %cst_647 = arith.constant dense<0.000000e+00> : vector<8x32xf32>
    %1827 = tpu.matmul %1825, %1826, %cst_647 {dimension_numbers = #tpu.dot_dimension_numbers<[1], [0], [0], [1], [0, 0, 1, 1], [], []>} : vector<8x32xf32>, vector<32x32xf32>, vector<8x32xf32> -> vector<8x32xf32>
    %1828 = arith.addf %1824, %1827 : vector<8x32xf32>
    %1829 = vector.broadcast %1806 : vector<1x32xf32> to vector<8x32xf32>
    %1830 = arith.mulf %1828, %1829 : vector<8x32xf32>
    %1831 = vector.broadcast %1807 : vector<1x32xf32> to vector<8x32xf32>
    %1832 = arith.addf %1830, %1831 : vector<8x32xf32>
    %c0_648 = arith.constant 0 : index
    %c0_649 = arith.constant 0 : index
    %1833 = vector.load %arg55[%c0_648, %c0_649] : memref<32x16xf32, #tpu.memory_space<vmem>>, vector<32x16xf32>
    %cst_650 = arith.constant dense<0.000000e+00> : vector<8x16xf32>
    %1834 = tpu.matmul %1832, %1833, %cst_650 {dimension_numbers = #tpu.dot_dimension_numbers<[1], [0], [0], [1], [0, 0, 1, 1], [], []>} : vector<8x32xf32>, vector<32x16xf32>, vector<8x16xf32> -> vector<8x16xf32>
    %c0_651 = arith.constant 0 : index
    %c0_652 = arith.constant 0 : index
    %1835 = vector.load %arg56[%c0_651, %c0_652] : memref<1x16xf32, #tpu.memory_space<vmem>>, vector<1x16xf32>
    %1836 = vector.broadcast %1835 : vector<1x16xf32> to vector<8x16xf32>
    %1837 = arith.addf %1834, %1836 : vector<8x16xf32>
    %1838 = arith.addf %1689, %1837 : vector<8x16xf32>
    %c0_653 = arith.constant 0 : index
    %c0_654 = arith.constant 0 : index
    %c16 = arith.constant 16 : index
    %1839 = vector.load %arg57[%c0_653, %c0_654, %c16] : memref<1x8x128xf32, #tpu.memory_space<vmem>>, vector<1x8x16xf32>
    %1840 = vector.shape_cast %1839 : vector<1x8x16xf32> to vector<8x16xf32>
    %1841 = vector.shape_cast %1838 : vector<8x16xf32> to vector<1x8x16xf32>
    tpu.vector_store %arg57[%c0_653, %c0_654, %c16], %1841 {strides = array<i32>} : memref<1x8x128xf32, #tpu.memory_space<vmem>>, vector<1x8x16xf32>,
    return
  }
  func.func @transform_0(%arg0: i32, %arg1: memref<2xi32, #tpu.memory_space<smem>>) -> (i32, i32, i32) {
    %c0_i32 = arith.constant 0 : i32
    %c0_i32_0 = arith.constant 0 : i32
    %c0_i32_1 = arith.constant 0 : i32
    return %arg0, %c0_i32, %c0_i32_0 : i32, i32, i32
  }
  func.func @transform_1(%arg0: i32, %arg1: memref<2xi32, #tpu.memory_space<smem>>) -> (i32, i32, i32) {
    %c0_i32 = arith.constant 0 : i32
    %c0_i32_0 = arith.constant 0 : i32
    %c0_i32_1 = arith.constant 0 : i32
    return %arg0, %c0_i32, %c0_i32_0 : i32, i32, i32
  }
  func.func @transform_2(%arg0: i32, %arg1: memref<2xi32, #tpu.memory_space<smem>>) -> (i32, i32) {
    %c0_i32 = arith.constant 0 : i32
    %c0_i32_0 = arith.constant 0 : i32
    %c0_i32_1 = arith.constant 0 : i32
    return %c0_i32, %c0_i32_0 : i32, i32
  }
  func.func @transform_3(%arg0: i32, %arg1: memref<2xi32, #tpu.memory_space<smem>>) -> (i32, i32) {
    %c0_i32 = arith.constant 0 : i32
    %c0_i32_0 = arith.constant 0 : i32
    %c0_i32_1 = arith.constant 0 : i32
    return %c0_i32, %c0_i32_0 : i32, i32
  }
  func.func @transform_4(%arg0: i32, %arg1: memref<2xi32, #tpu.memory_space<smem>>) -> (i32, i32) {
    %c0_i32 = arith.constant 0 : i32
    %c0_i32_0 = arith.constant 0 : i32
    %c0_i32_1 = arith.constant 0 : i32
    return %c0_i32, %c0_i32_0 : i32, i32
  }
  func.func @transform_5(%arg0: i32, %arg1: memref<2xi32, #tpu.memory_space<smem>>) -> (i32, i32) {
    %c0_i32 = arith.constant 0 : i32
    %c0_i32_0 = arith.constant 0 : i32
    %c0_i32_1 = arith.constant 0 : i32
    return %c0_i32, %c0_i32_0 : i32, i32
  }
  func.func @transform_6(%arg0: i32, %arg1: memref<2xi32, #tpu.memory_space<smem>>) -> (i32, i32) {
    %c0_i32 = arith.constant 0 : i32
    %c0_i32_0 = arith.constant 0 : i32
    %c0_i32_1 = arith.constant 0 : i32
    return %c0_i32, %c0_i32_0 : i32, i32
  }
  func.func @transform_7(%arg0: i32, %arg1: memref<2xi32, #tpu.memory_space<smem>>) -> (i32, i32) {
    %c0_i32 = arith.constant 0 : i32
    %c0_i32_0 = arith.constant 0 : i32
    %c0_i32_1 = arith.constant 0 : i32
    return %c0_i32, %c0_i32_0 : i32, i32
  }
  func.func @transform_8(%arg0: i32, %arg1: memref<2xi32, #tpu.memory_space<smem>>) -> (i32, i32) {
    %c0_i32 = arith.constant 0 : i32
    %c0_i32_0 = arith.constant 0 : i32
    %c0_i32_1 = arith.constant 0 : i32
    return %c0_i32, %c0_i32_0 : i32, i32
  }
  func.func @transform_9(%arg0: i32, %arg1: memref<2xi32, #tpu.memory_space<smem>>) -> (i32, i32) {
    %c0_i32 = arith.constant 0 : i32
    %c0_i32_0 = arith.constant 0 : i32
    %c0_i32_1 = arith.constant 0 : i32
    return %c0_i32, %c0_i32_0 : i32, i32
  }
  func.func @transform_10(%arg0: i32, %arg1: memref<2xi32, #tpu.memory_space<smem>>) -> (i32, i32) {
    %c0_i32 = arith.constant 0 : i32
    %c0_i32_0 = arith.constant 0 : i32
    %c0_i32_1 = arith.constant 0 : i32
    return %c0_i32, %c0_i32_0 : i32, i32
  }
  func.func @transform_11(%arg0: i32, %arg1: memref<2xi32, #tpu.memory_space<smem>>) -> (i32, i32) {
    %c0_i32 = arith.constant 0 : i32
    %c0_i32_0 = arith.constant 0 : i32
    %c0_i32_1 = arith.constant 0 : i32
    return %c0_i32, %c0_i32_0 : i32, i32
  }
  func.func @transform_12(%arg0: i32, %arg1: memref<2xi32, #tpu.memory_space<smem>>) -> (i32, i32) {
    %c0_i32 = arith.constant 0 : i32
    %c0_i32_0 = arith.constant 0 : i32
    %c0_i32_1 = arith.constant 0 : i32
    return %c0_i32, %c0_i32_0 : i32, i32
  }
  func.func @transform_13(%arg0: i32, %arg1: memref<2xi32, #tpu.memory_space<smem>>) -> (i32, i32) {
    %c0_i32 = arith.constant 0 : i32
    %c0_i32_0 = arith.constant 0 : i32
    %c0_i32_1 = arith.constant 0 : i32
    return %c0_i32, %c0_i32_0 : i32, i32
  }
  func.func @transform_14(%arg0: i32, %arg1: memref<2xi32, #tpu.memory_space<smem>>) -> (i32, i32) {
    %c0_i32 = arith.constant 0 : i32
    %c0_i32_0 = arith.constant 0 : i32
    %c0_i32_1 = arith.constant 0 : i32
    return %c0_i32, %c0_i32_0 : i32, i32
  }
  func.func @transform_15(%arg0: i32, %arg1: memref<2xi32, #tpu.memory_space<smem>>) -> (i32, i32) {
    %c0_i32 = arith.constant 0 : i32
    %c0_i32_0 = arith.constant 0 : i32
    %c0_i32_1 = arith.constant 0 : i32
    return %c0_i32, %c0_i32_0 : i32, i32
  }
  func.func @transform_16(%arg0: i32, %arg1: memref<2xi32, #tpu.memory_space<smem>>) -> (i32, i32) {
    %c0_i32 = arith.constant 0 : i32
    %c0_i32_0 = arith.constant 0 : i32
    %c0_i32_1 = arith.constant 0 : i32
    return %c0_i32, %c0_i32_0 : i32, i32
  }
  func.func @transform_17(%arg0: i32, %arg1: memref<2xi32, #tpu.memory_space<smem>>) -> (i32, i32) {
    %c0_i32 = arith.constant 0 : i32
    %c0_i32_0 = arith.constant 0 : i32
    %c0_i32_1 = arith.constant 0 : i32
    return %c0_i32, %c0_i32_0 : i32, i32
  }
  func.func @transform_18(%arg0: i32, %arg1: memref<2xi32, #tpu.memory_space<smem>>) -> (i32, i32) {
    %c0_i32 = arith.constant 0 : i32
    %c0_i32_0 = arith.constant 0 : i32
    %c0_i32_1 = arith.constant 0 : i32
    return %c0_i32, %c0_i32_0 : i32, i32
  }
  func.func @transform_19(%arg0: i32, %arg1: memref<2xi32, #tpu.memory_space<smem>>) -> (i32, i32) {
    %c0_i32 = arith.constant 0 : i32
    %c0_i32_0 = arith.constant 0 : i32
    %c0_i32_1 = arith.constant 0 : i32
    return %c0_i32, %c0_i32_0 : i32, i32
  }
  func.func @transform_20(%arg0: i32, %arg1: memref<2xi32, #tpu.memory_space<smem>>) -> (i32, i32) {
    %c0_i32 = arith.constant 0 : i32
    %c0_i32_0 = arith.constant 0 : i32
    %c0_i32_1 = arith.constant 0 : i32
    return %c0_i32, %c0_i32_0 : i32, i32
  }
  func.func @transform_21(%arg0: i32, %arg1: memref<2xi32, #tpu.memory_space<smem>>) -> (i32, i32) {
    %c0_i32 = arith.constant 0 : i32
    %c0_i32_0 = arith.constant 0 : i32
    %c0_i32_1 = arith.constant 0 : i32
    return %c0_i32, %c0_i32_0 : i32, i32
  }
  func.func @transform_22(%arg0: i32, %arg1: memref<2xi32, #tpu.memory_space<smem>>) -> (i32, i32) {
    %c0_i32 = arith.constant 0 : i32
    %c0_i32_0 = arith.constant 0 : i32
    %c0_i32_1 = arith.constant 0 : i32
    return %c0_i32, %c0_i32_0 : i32, i32
  }
  func.func @transform_23(%arg0: i32, %arg1: memref<2xi32, #tpu.memory_space<smem>>) -> (i32, i32) {
    %c0_i32 = arith.constant 0 : i32
    %c0_i32_0 = arith.constant 0 : i32
    %c0_i32_1 = arith.constant 0 : i32
    return %c0_i32, %c0_i32_0 : i32, i32
  }
  func.func @transform_24(%arg0: i32, %arg1: memref<2xi32, #tpu.memory_space<smem>>) -> (i32, i32) {
    %c0_i32 = arith.constant 0 : i32
    %c0_i32_0 = arith.constant 0 : i32
    %c0_i32_1 = arith.constant 0 : i32
    return %c0_i32, %c0_i32_0 : i32, i32
  }
  func.func @transform_25(%arg0: i32, %arg1: memref<2xi32, #tpu.memory_space<smem>>) -> (i32, i32) {
    %c0_i32 = arith.constant 0 : i32
    %c0_i32_0 = arith.constant 0 : i32
    %c0_i32_1 = arith.constant 0 : i32
    return %c0_i32, %c0_i32_0 : i32, i32
  }
  func.func @transform_26(%arg0: i32, %arg1: memref<2xi32, #tpu.memory_space<smem>>) -> (i32, i32) {
    %c0_i32 = arith.constant 0 : i32
    %c0_i32_0 = arith.constant 0 : i32
    %c0_i32_1 = arith.constant 0 : i32
    return %c0_i32, %c0_i32_0 : i32, i32
  }
  func.func @transform_27(%arg0: i32, %arg1: memref<2xi32, #tpu.memory_space<smem>>) -> (i32, i32) {
    %c0_i32 = arith.constant 0 : i32
    %c0_i32_0 = arith.constant 0 : i32
    %c0_i32_1 = arith.constant 0 : i32
    return %c0_i32, %c0_i32_0 : i32, i32
  }
  func.func @transform_28(%arg0: i32, %arg1: memref<2xi32, #tpu.memory_space<smem>>) -> (i32, i32) {
    %c0_i32 = arith.constant 0 : i32
    %c0_i32_0 = arith.constant 0 : i32
    %c0_i32_1 = arith.constant 0 : i32
    return %c0_i32, %c0_i32_0 : i32, i32
  }
  func.func @transform_29(%arg0: i32, %arg1: memref<2xi32, #tpu.memory_space<smem>>) -> (i32, i32) {
    %c0_i32 = arith.constant 0 : i32
    %c0_i32_0 = arith.constant 0 : i32
    %c0_i32_1 = arith.constant 0 : i32
    return %c0_i32, %c0_i32_0 : i32, i32
  }
  func.func @transform_30(%arg0: i32, %arg1: memref<2xi32, #tpu.memory_space<smem>>) -> (i32, i32) {
    %c0_i32 = arith.constant 0 : i32
    %c0_i32_0 = arith.constant 0 : i32
    %c0_i32_1 = arith.constant 0 : i32
    return %c0_i32, %c0_i32_0 : i32, i32
  }
  func.func @transform_31(%arg0: i32, %arg1: memref<2xi32, #tpu.memory_space<smem>>) -> (i32, i32) {
    %c0_i32 = arith.constant 0 : i32
    %c0_i32_0 = arith.constant 0 : i32
    %c0_i32_1 = arith.constant 0 : i32
    return %c0_i32, %c0_i32_0 : i32, i32
  }
  func.func @transform_32(%arg0: i32, %arg1: memref<2xi32, #tpu.memory_space<smem>>) -> (i32, i32) {
    %c0_i32 = arith.constant 0 : i32
    %c0_i32_0 = arith.constant 0 : i32
    %c0_i32_1 = arith.constant 0 : i32
    return %c0_i32, %c0_i32_0 : i32, i32
  }
  func.func @transform_33(%arg0: i32, %arg1: memref<2xi32, #tpu.memory_space<smem>>) -> (i32, i32) {
    %c0_i32 = arith.constant 0 : i32
    %c0_i32_0 = arith.constant 0 : i32
    %c0_i32_1 = arith.constant 0 : i32
    return %c0_i32, %c0_i32_0 : i32, i32
  }
  func.func @transform_34(%arg0: i32, %arg1: memref<2xi32, #tpu.memory_space<smem>>) -> (i32, i32) {
    %c0_i32 = arith.constant 0 : i32
    %c0_i32_0 = arith.constant 0 : i32
    %c0_i32_1 = arith.constant 0 : i32
    return %c0_i32, %c0_i32_0 : i32, i32
  }
  func.func @transform_35(%arg0: i32, %arg1: memref<2xi32, #tpu.memory_space<smem>>) -> (i32, i32) {
    %c0_i32 = arith.constant 0 : i32
    %c0_i32_0 = arith.constant 0 : i32
    %c0_i32_1 = arith.constant 0 : i32
    return %c0_i32, %c0_i32_0 : i32, i32
  }
  func.func @transform_36(%arg0: i32, %arg1: memref<2xi32, #tpu.memory_space<smem>>) -> (i32, i32) {
    %c0_i32 = arith.constant 0 : i32
    %c0_i32_0 = arith.constant 0 : i32
    %c0_i32_1 = arith.constant 0 : i32
    return %c0_i32, %c0_i32_0 : i32, i32
  }
  func.func @transform_37(%arg0: i32, %arg1: memref<2xi32, #tpu.memory_space<smem>>) -> (i32, i32) {
    %c0_i32 = arith.constant 0 : i32
    %c0_i32_0 = arith.constant 0 : i32
    %c0_i32_1 = arith.constant 0 : i32
    return %c0_i32, %c0_i32_0 : i32, i32
  }
  func.func @transform_38(%arg0: i32, %arg1: memref<2xi32, #tpu.memory_space<smem>>) -> (i32, i32) {
    %c0_i32 = arith.constant 0 : i32
    %c0_i32_0 = arith.constant 0 : i32
    %c0_i32_1 = arith.constant 0 : i32
    return %c0_i32, %c0_i32_0 : i32, i32
  }
  func.func @transform_39(%arg0: i32, %arg1: memref<2xi32, #tpu.memory_space<smem>>) -> (i32, i32) {
    %c0_i32 = arith.constant 0 : i32
    %c0_i32_0 = arith.constant 0 : i32
    %c0_i32_1 = arith.constant 0 : i32
    return %c0_i32, %c0_i32_0 : i32, i32
  }
  func.func @transform_40(%arg0: i32, %arg1: memref<2xi32, #tpu.memory_space<smem>>) -> (i32, i32) {
    %c0_i32 = arith.constant 0 : i32
    %c0_i32_0 = arith.constant 0 : i32
    %c0_i32_1 = arith.constant 0 : i32
    return %c0_i32, %c0_i32_0 : i32, i32
  }
  func.func @transform_41(%arg0: i32, %arg1: memref<2xi32, #tpu.memory_space<smem>>) -> (i32, i32) {
    %c0_i32 = arith.constant 0 : i32
    %c0_i32_0 = arith.constant 0 : i32
    %c0_i32_1 = arith.constant 0 : i32
    return %c0_i32, %c0_i32_0 : i32, i32
  }
  func.func @transform_42(%arg0: i32, %arg1: memref<2xi32, #tpu.memory_space<smem>>) -> (i32, i32) {
    %c0_i32 = arith.constant 0 : i32
    %c0_i32_0 = arith.constant 0 : i32
    %c0_i32_1 = arith.constant 0 : i32
    return %c0_i32, %c0_i32_0 : i32, i32
  }
  func.func @transform_43(%arg0: i32, %arg1: memref<2xi32, #tpu.memory_space<smem>>) -> (i32, i32) {
    %c0_i32 = arith.constant 0 : i32
    %c0_i32_0 = arith.constant 0 : i32
    %c0_i32_1 = arith.constant 0 : i32
    return %c0_i32, %c0_i32_0 : i32, i32
  }
  func.func @transform_44(%arg0: i32, %arg1: memref<2xi32, #tpu.memory_space<smem>>) -> (i32, i32) {
    %c0_i32 = arith.constant 0 : i32
    %c0_i32_0 = arith.constant 0 : i32
    %c0_i32_1 = arith.constant 0 : i32
    return %c0_i32, %c0_i32_0 : i32, i32
  }
  func.func @transform_45(%arg0: i32, %arg1: memref<2xi32, #tpu.memory_space<smem>>) -> (i32, i32) {
    %c0_i32 = arith.constant 0 : i32
    %c0_i32_0 = arith.constant 0 : i32
    %c0_i32_1 = arith.constant 0 : i32
    return %c0_i32, %c0_i32_0 : i32, i32
  }
  func.func @transform_46(%arg0: i32, %arg1: memref<2xi32, #tpu.memory_space<smem>>) -> (i32, i32) {
    %c0_i32 = arith.constant 0 : i32
    %c0_i32_0 = arith.constant 0 : i32
    %c0_i32_1 = arith.constant 0 : i32
    return %c0_i32, %c0_i32_0 : i32, i32
  }
  func.func @transform_47(%arg0: i32, %arg1: memref<2xi32, #tpu.memory_space<smem>>) -> (i32, i32) {
    %c0_i32 = arith.constant 0 : i32
    %c0_i32_0 = arith.constant 0 : i32
    %c0_i32_1 = arith.constant 0 : i32
    return %c0_i32, %c0_i32_0 : i32, i32
  }
  func.func @transform_48(%arg0: i32, %arg1: memref<2xi32, #tpu.memory_space<smem>>) -> (i32, i32) {
    %c0_i32 = arith.constant 0 : i32
    %c0_i32_0 = arith.constant 0 : i32
    %c0_i32_1 = arith.constant 0 : i32
    return %c0_i32, %c0_i32_0 : i32, i32
  }
  func.func @transform_49(%arg0: i32, %arg1: memref<2xi32, #tpu.memory_space<smem>>) -> (i32, i32) {
    %c0_i32 = arith.constant 0 : i32
    %c0_i32_0 = arith.constant 0 : i32
    %c0_i32_1 = arith.constant 0 : i32
    return %c0_i32, %c0_i32_0 : i32, i32
  }
  func.func @transform_50(%arg0: i32, %arg1: memref<2xi32, #tpu.memory_space<smem>>) -> (i32, i32) {
    %c0_i32 = arith.constant 0 : i32
    %c0_i32_0 = arith.constant 0 : i32
    %c0_i32_1 = arith.constant 0 : i32
    return %c0_i32, %c0_i32_0 : i32, i32
  }
  func.func @transform_51(%arg0: i32, %arg1: memref<2xi32, #tpu.memory_space<smem>>) -> (i32, i32) {
    %c0_i32 = arith.constant 0 : i32
    %c0_i32_0 = arith.constant 0 : i32
    %c0_i32_1 = arith.constant 0 : i32
    return %c0_i32, %c0_i32_0 : i32, i32
  }
  func.func @transform_52(%arg0: i32, %arg1: memref<2xi32, #tpu.memory_space<smem>>) -> (i32, i32) {
    %c0_i32 = arith.constant 0 : i32
    %c0_i32_0 = arith.constant 0 : i32
    %c0_i32_1 = arith.constant 0 : i32
    return %c0_i32, %c0_i32_0 : i32, i32
  }
  func.func @transform_53(%arg0: i32, %arg1: memref<2xi32, #tpu.memory_space<smem>>) -> (i32, i32) {
    %c0_i32 = arith.constant 0 : i32
    %c0_i32_0 = arith.constant 0 : i32
    %c0_i32_1 = arith.constant 0 : i32
    return %c0_i32, %c0_i32_0 : i32, i32
  }
  func.func @transform_54(%arg0: i32, %arg1: memref<2xi32, #tpu.memory_space<smem>>) -> (i32, i32) {
    %c0_i32 = arith.constant 0 : i32
    %c0_i32_0 = arith.constant 0 : i32
    %c0_i32_1 = arith.constant 0 : i32
    return %c0_i32, %c0_i32_0 : i32, i32
  }
  func.func @transform_55(%arg0: i32, %arg1: memref<2xi32, #tpu.memory_space<smem>>) -> (i32, i32, i32) {
    %c0_i32 = arith.constant 0 : i32
    %c0_i32_0 = arith.constant 0 : i32
    %c0_i32_1 = arith.constant 0 : i32
    return %arg0, %c0_i32, %c0_i32_0 : i32, i32, i32
  }
}

</mosaic_0001>

<bundles_post_ra>
// kernel: tacotron2_forward.1
= control target key start
LH: loop header
LB: loop body
LE: loop exit
PB: predicated region body
PF: predicated region fallthrough
CT: control target
= control target key end

     0   :  { %s19964_s6 = smov 1   ;;  %s19965_s10 = smov 2   ;;  %s22880_s0 = inlined_call_operand.smem [shape: u32[57], index: -1, kind: input, shape index: {}] }
   0x1   :  { %s20046_s5 = sld [smem:[%s22880_s0]]   ;;  %s19966_s14 = smov 3  }
   0x2   :  { %s20051_s9 = sld [smem:[%s22880_s0 + %s19964_s6]]   ;;  %s19967_s18 = smov 4  }
   0x3   :  { %s20056_s13 = sld [smem:[%s22880_s0 + %s19965_s10]]   ;;  %s19968_s22 = smov 5  }
   0x4   :  { %s20061_s17 = sld [smem:[%s22880_s0 + %s19966_s14]]   ;;  %s19969_s26 = smov 6  }
   0x5   :  { %s20066_s21 = sld [smem:[%s22880_s0 + %s19967_s18]]   ;;  %s19970_s30 = smov 7  }
   0x6   :  { %s20071_s25 = sld [smem:[%s22880_s0 + %s19968_s22]]   ;;  %s19971_s4 = smov 8  }
   0x7   :  { %s20076_s29 = sld [smem:[%s22880_s0 + %s19969_s26]]   ;;  %s19972_s10 = smov 9  }
   0x8   :  { %22945 = sst [smem:[#allocation27_spill]] %s20051_s9  ;;  %s19973_s15 = smov 10  }
   0x9   :  { %22946 = sst [smem:[#allocation28_spill]] %s20056_s13  ;;  %s19974_s20 = smov 11  }
   0xa   :  { %s20081_s3 = sld [smem:[%s22880_s0 + %s19970_s30]]   ;;  %s19975_s26 = smov 12  }
   0xb   :  { %s20086_s8 = sld [smem:[%s22880_s0 + %s19971_s4]]   ;;  %s19976_s1 = smov 13  }
   0xc   :  { %s20091_s14 = sld [smem:[%s22880_s0 + %s19972_s10]]   ;;  %s19977_s7 = smov 14  }
   0xd   :  { %s20096_s19 = sld [smem:[%s22880_s0 + %s19973_s15]]   ;;  %s19978_s15 = smov 15  }
   0xe   :  { %s20101_s24 = sld [smem:[%s22880_s0 + %s19974_s20]]   ;;  %s19979_s22 = smov 16  }
   0xf   :  { %s20106_s30 = sld [smem:[%s22880_s0 + %s19975_s26]]   ;;  %s19980_s28 = smov 17  }
  0x10   :  { %22947 = sst [smem:[#allocation29_spill]] %s20081_s3 }
  0x11   :  { %22948 = sst [smem:[#allocation30_spill]] %s20086_s8 }
  0x12   :  { %22949 = sst [smem:[#allocation31_spill]] %s20091_s14 }
  0x13   :  { %s20111_s6 = sld [smem:[%s22880_s0 + %s19976_s1]]  }
  0x14   :  { %22950 = sst [smem:[#allocation32_spill]] %s20101_s24 }
  0x15   :  { %22951 = sst [smem:[#allocation33_spill]] %s20106_s30 }
  0x16   :  { %s20116_s12 = sld [smem:[%s22880_s0 + %s19977_s7]]   ;;  %s19981_s7 = smov 18  }
  0x17   :  { %s20121_s20 = sld [smem:[%s22880_s0 + %s19978_s15]]   ;;  %s19982_s15 = smov 19  }
  0x18   :  { %s20126_s27 = sld [smem:[%s22880_s0 + %s19979_s22]]   ;;  %s19983_s22 = smov 20  }
  0x19   :  { %22952 = sst [smem:[#allocation34_spill]] %s20111_s6 }
  0x1a   :  { %s20131_s4 = sld [smem:[%s22880_s0 + %s19980_s28]]   ;;  %s19984_s28 = smov 21  }
  0x1b   :  { %s20136_s13 = sld [smem:[%s22880_s0 + %s19981_s7]]   ;;  %s19985_s7 = smov 22  }
  0x1c   :  { %22953 = sst [smem:[#allocation35_spill]] %s20116_s12  ;;  %s118_s12 = sshll.u32 %s20046_s5, 4  ;;  %s119_s12 = int_to_ptr.vmem [resolvable:$true] %s118_s12 }
  0x1d   :  { %22954 = sst [smem:[#allocation36_spill]] %s20121_s20  ;;  %p19703_p1 = scmp.lt.s32.totalorder %s119_s12, %s119_s12 }
  0x1e   :  { %22955 = sst [smem:[#allocation37_spill]] %s20126_s27 }
  0x1f   :  { %s20141_s20 = sld [smem:[%s22880_s0 + %s19982_s15]]   ;;  %s19986_s15 = smov 23  }
  0x20   :  { %22956 = sst [smem:[#allocation38_spill]] %s20131_s4  ;;  %s20018_s4 = smov 55  }
  0x21   :  { %22957 = sst [smem:[#allocation39_spill]] %s20136_s13 }
  0x22   :  { %s20146_s27 = sld [smem:[%s22880_s0 + %s19983_s22]]   ;;  %s19987_s22 = smov 24  }
  0x23   :  { %s20151_s30 = sld [smem:[%s22880_s0 + %s19984_s28]]   ;;  %s19988_s28 = smov 25  }
  0x24   :  { %s20156_s13 = sld [smem:[%s22880_s0 + %s19985_s7]]   ;;  %s19989_s7 = smov 26  }
  0x25   :  { %22958 = sst [smem:[#allocation40_spill]] %s20141_s20 }
  0x26   :  { %s20161_s20 = sld [smem:[%s22880_s0 + %s19986_s15]]   ;;  %s19990_s15 = smov 27  }
  0x28   :  { %22959 = sst [smem:[#allocation41_spill]] %s20146_s27 }
  0x29   :  { %22960 = sst [smem:[#allocation42_spill]] %s20151_s30 }
  0x2a   :  { %22961 = sst [smem:[#allocation43_spill]] %s20156_s13 }
  0x2b   :  { %s20166_s27 = sld [smem:[%s22880_s0 + %s19987_s22]]   ;;  %s19991_s22 = smov 28  }
  0x2c   :  { %22962 = sst [smem:[#allocation44_spill]] %s20161_s20 }
  0x2d   :  { %s20171_s30 = sld [smem:[%s22880_s0 + %s19988_s28]]   ;;  %s19992_s28 = smov 29  }
  0x2e   :  { %s20176_s13 = sld [smem:[%s22880_s0 + %s19989_s7]]   ;;  %s19993_s7 = smov 30  }
  0x2f   :  { %s20181_s20 = sld [smem:[%s22880_s0 + %s19990_s15]]   ;;  %s19994_s15 = smov 31  }
  0x31   :  { %22963 = sst [smem:[#allocation45_spill]] %s20166_s27 }
  0x32   :  { %s20186_s27 = sld [smem:[%s22880_s0 + %s19991_s22]]   ;;  %s19995_s22 = smov 32  }
  0x33   :  { %22964 = sst [smem:[#allocation46_spill]] %s20171_s30 }
  0x34   :  { %22965 = sst [smem:[#allocation47_spill]] %s20176_s13 }
  0x35   :  { %22966 = sst [smem:[#allocation48_spill]] %s20181_s20 }
  0x36   :  { %s20191_s30 = sld [smem:[%s22880_s0 + %s19992_s28]]   ;;  %s19996_s28 = smov 33  }
  0x37   :  { %s20196_s13 = sld [smem:[%s22880_s0 + %s19993_s7]]   ;;  %s19997_s7 = smov 34  }
  0x38   :  { %22967 = sst [smem:[#allocation49_spill]] %s20186_s27 }
  0x39   :  { %s20201_s20 = sld [smem:[%s22880_s0 + %s19994_s15]]   ;;  %s19998_s15 = smov 35  }
  0x3a   :  { %s20206_s27 = sld [smem:[%s22880_s0 + %s19995_s22]]   ;;  %s19999_s22 = smov 36  }
  0x3c   :  { %22968 = sst [smem:[#allocation50_spill]] %s20191_s30 }
  0x3d   :  { %22969 = sst [smem:[#allocation51_spill]] %s20196_s13 }
  0x3e   :  { %s20211_s30 = sld [smem:[%s22880_s0 + %s19996_s28]]   ;;  %s20000_s28 = smov 37  }
  0x3f   :  { %22970 = sst [smem:[#allocation52_spill]] %s20201_s20 }
  0x40   :  { %22971 = sst [smem:[#allocation53_spill]] %s20206_s27 }
  0x41   :  { %s20216_s13 = sld [smem:[%s22880_s0 + %s19997_s7]]   ;;  %s20001_s7 = smov 38  }
  0x42   :  { %s20221_s20 = sld [smem:[%s22880_s0 + %s19998_s15]]   ;;  %s20002_s15 = smov 39  }
  0x43   :  { %s20226_s27 = sld [smem:[%s22880_s0 + %s19999_s22]]   ;;  %s20003_s22 = smov 40  }
  0x44   :  { %22972 = sst [smem:[#allocation54_spill]] %s20211_s30 }
  0x45   :  { %s20231_s30 = sld [smem:[%s22880_s0 + %s20000_s28]]   ;;  %s20004_s28 = smov 41  }
  0x47   :  { %22973 = sst [smem:[#allocation55_spill]] %s20216_s13 }
  0x48   :  { %22974 = sst [smem:[#allocation56_spill]] %s20221_s20 }
  0x49   :  { %22975 = sst [smem:[#allocation57_spill]] %s20226_s27 }
  0x4a   :  { %s20236_s13 = sld [smem:[%s22880_s0 + %s20001_s7]]   ;;  %s20005_s7 = smov 42  }
  0x4b   :  { %22976 = sst [smem:[#allocation58_spill]] %s20231_s30 }
  0x4c   :  { %s20241_s20 = sld [smem:[%s22880_s0 + %s20002_s15]]   ;;  %s20006_s15 = smov 43  }
  0x4d   :  { %s20246_s27 = sld [smem:[%s22880_s0 + %s20003_s22]]   ;;  %s20007_s22 = smov 44  }
  0x4e   :  { %s20251_s30 = sld [smem:[%s22880_s0 + %s20004_s28]]   ;;  %s20008_s28 = smov 45  }
  0x50   :  { %22977 = sst [smem:[#allocation59_spill]] %s20236_s13 }
  0x51   :  { %s20256_s13 = sld [smem:[%s22880_s0 + %s20005_s7]]   ;;  %s20009_s7 = smov 46  }
  0x52   :  { %22978 = sst [smem:[#allocation60_spill]] %s20241_s20 }
  0x53   :  { %22979 = sst [smem:[#allocation61_spill]] %s20246_s27 }
  0x54   :  { %22980 = sst [smem:[#allocation62_spill]] %s20251_s30 }
  0x55   :  { %s20261_s20 = sld [smem:[%s22880_s0 + %s20006_s15]]   ;;  %s20010_s15 = smov 47  }
  0x56   :  { %s20266_s27 = sld [smem:[%s22880_s0 + %s20007_s22]]   ;;  %s20011_s22 = smov 48  }
  0x57   :  { %22981 = sst [smem:[#allocation63_spill]] %s20256_s13 }
  0x58   :  { %s20271_s30 = sld [smem:[%s22880_s0 + %s20008_s28]]   ;;  %s20012_s28 = smov 49  }
  0x59   :  { %s20276_s13 = sld [smem:[%s22880_s0 + %s20009_s7]]   ;;  %s20013_s7 = smov 50  }
  0x5a   :  { %s20286_s24 = sld [smem:[%s22880_s0 + %s20011_s22]]   ;;  %s20015_s22 = smov 52  }
  0x5b   :  { %22982 = sst [smem:[#allocation64_spill]] %s20261_s20 }
  0x5c   :  { %s20281_s20 = sld [smem:[%s22880_s0 + %s20010_s15]]   ;;  %s20014_s15 = smov 51  }
  0x5d   :  { %s20291_s10 = sld [smem:[%s22880_s0 + %s20012_s28]]   ;;  %s20016_s28 = smov 53  }
  0x5e   :  { %22983 = sst [smem:[#allocation65_spill]] %s20271_s30  ;;  %s20017_s30 = smov 54  }
  0x5f   :  { %22984 = sst [smem:[#allocation66_spill]] %s20276_s13 }
  0x60   :  { %22985 = sst [smem:[#allocation67_spill]] %s20286_s24  ;;  %s20019_s24 = smov 56  }
  0x61   :  { %s20296_s16 = sld [smem:[%s22880_s0 + %s20013_s7]]  }
  0x62   :  { %s20301_s23 = sld [smem:[%s22880_s0 + %s20014_s15]]  }
  0x63   :  { %22986 = sst [smem:[#allocation68_spill]] %s20291_s10 }
  0x64   :  { %s20306_s1 = sld [smem:[%s22880_s0 + %s20015_s22]]  }
  0x65   :  { %s20311_s14 = sld [smem:[%s22880_s0 + %s20016_s28]]   ;;  %s19698_s28 = scalar_lea.vmem %s119_s12, 16 }
  0x66   :  { %s20316_s8 = sld [smem:[%s22880_s0 + %s20017_s30]]   ;;  %p19699_p0 = scmp.ne.s32.totalorder %s119_s12, %s19698_s28 }
  0x67   :  { %s20326_s6 = sld [smem:[%s22880_s0 + %s20019_s24]]   ;;  %p19704_p2 = scmp.lt.s32.totalorder %s19698_s28, %s19698_s28 }
  0x68   :  { %22987 = sst [smem:[#allocation69_spill]] %s20301_s23 }
  0x69   :  { %s20321_s23 = sld [smem:[%s22880_s0 + %s20018_s4]]   ;;  %p19705_p3 = por %p19704_p2, %p19703_p1 }
  0x6a   :  { %22988 = sst [smem:[#allocation70_spill]] %s20306_s1 }
  0x6b   :  { %22989 = sst [smem:[#allocation71_spill]] %s20311_s14  ;;  %p19706_p4 = pnand %p19705_p3, %p19699_p0 }
  0x6d   :  { %19709 = shalt.err (!%p19706_p4)  }
  0x6e   :  { %s20020_s2 = smov [#allocation7]  }
  0x6f   :  { %121 = dma.vmem_to_smem %s119_s12, 16, %s20020_s2, [#allocation6] }
  0x70   :  { %19938 = dma.done.wait [#allocation6], 16 }
  0x71   :  { %19939 = vsyncadd [#allocation6], 4294967280 }
  0x72   :  { %123 = sfence }
  0x73   :  { %124 = vsyncpa [#allocation9], 0 }
  0x74   :  { %125 = vsyncpa [#allocation11], 0 }
  0x75   :  { %126 = vsyncpa [#allocation14], 0 }
  0x76   :  { %127 = vsyncpa [#allocation17], 0 }
  0x77   :  { %128 = vsyncpa [#allocation20], 0  ;;  %s20329_s0 = smov 0  }
  0x78 LB: > { %s22990_s14 = sld [smem:[#allocation71_spill]]  ;;  %s22991_s13 = sld [smem:[#allocation66_spill]]  ;;  %s19962_s0 = sphi %s20329_s0, %s134_s0  }
  0x79   : > { %s22992_s10 = sld [smem:[#allocation68_spill]]  ;;  %s22993_s3 = sld [smem:[#allocation29_spill]] }
  0x7a   : > { %s22994_s1 = sld [smem:[#allocation70_spill]]  ;;  %s20021_s5 = smov [#allocation10]  }
  0x7b   : > { %s1480_s30 = sshll.u32 %s20021_s5, 4  ;;  %s20335_s7 = sadd.s32 4294967295, %s19962_s0   ;;  %s20340_s30 = int_to_ptr.vmem [resolvable:$true] %s1480_s30 }
  0x7c   : > { %p15632_p5 = scmp.ge.s32.totalorder %s19962_s0, 1  ;;  %p1330_p6 = scmp.lt.s32.totalorder %s19962_s0, 3 }
  0x7d   : > { %p22909_p7 = scmp.eq.s32.totalorder %s20335_s7, 0  ;;  %s20022_s4 = smov [#allocation13]  }
  0x7e   : > { %p20342_p8 = pnand %p15632_p5, %p1330_p6  ;;  %s1505_s15 = sshll.u32 %s20022_s4, 4  ;;  %s20348_s15 = int_to_ptr.vmem [resolvable:$true] %s1505_s15 }
  0x7f   : > { %s20023_s18 = smov [#allocation16]   ;;  %s20024_s26 = smov [#allocation8]  }
  0x80   : > { %s22995_s11 = scalar_select %p20342_p8, 1, 0 }
  0x81   : > { %p19245_p9 = pneg %p20342_p8  ;;  %s1530_s24 = sshll.u32 %s20023_s18, 4  ;;  %s20356_s24 = int_to_ptr.vmem [resolvable:$true] %s1530_s24 }
  0x82   : > { %s1466_s12 = sshll.u32 %s20024_s26, 4  ;;  %s19710_s28 = scalar_lea.hbm %s22991_s13, 16  ;;  %s20358_s12 = int_to_ptr.vmem [resolvable:$true] %s1466_s12 }
  0x83   : > { %p20352_p10 = pnand %p22909_p7, %p19245_p9  ;;  %p19711_p11 = scmp.ne.s32.totalorder %s22991_s13, %s19710_s28 }
  0x84   : > { %p19717_p1 = scmp.lt.u32.totalorder %s19710_s28, %s22991_s13 }
  0x85   : > { %p20364_p12 = pneg %p20352_p10 }
  0x87   : > { %p19713_p13 = pnand %p20364_p12, %p19711_p11 }
  0x89   : > { %p19714_p0 = pneg %p19713_p13 }
  0x8b   : > { %p19719_p2 = pnand %p19717_p1, %p19714_p0 }
  0x8d   : > { %19722 = shalt.err (!%p19719_p2)
}
  0x8e   : > { %s19723_s5 = scalar_lea.vmem %s20340_s30, 16  ;;  %s19730_s4 = scalar_lea.vmem %s20340_s30, 32 }
  0x8f   : > { %p19724_p3 = scmp.ne.s32.totalorder %s20340_s30, %s19723_s5  ;;  %p19731_p6 = scmp.lt.s32.totalorder %s20340_s30, %s20340_s30 }
  0x90   : > { %p19732_p9 = scmp.lt.s32.totalorder %s19730_s4, %s19723_s5 }
  0x91   : > { %p19726_p4 = pnand %p19724_p3, %p20364_p12 }
  0x92   : > { %p19733_p7 = por %p19732_p9, %p19731_p6 }
  0x93   : > { %p19727_p5 = pneg %p19726_p4 }
  0x95   : > { %p19734_p11 = pnand %p19733_p7, %p19727_p5 }
  0x97   : > { %19737 = shalt.err (!%p19734_p11)
}
  0x98   : > { %19251 = dma.hbm_to_vmem [thread:$0]  (!%p20352_p10), %s22991_s13, 16, %s20340_s30, [#allocation11]  }
  0x99   : > { %s19738_s18 = scalar_lea.hbm %s22992_s10, 16 }
  0x9a   : > { %p19739_p13 = scmp.ne.s32.totalorder %s22992_s10, %s19738_s18  ;;  %p19745_p2 = scmp.lt.u32.totalorder %s19738_s18, %s22992_s10 }
  0x9c   : > { %p19741_p0 = pnand %p19739_p13, %p20364_p12 }
  0x9e   : > { %p19742_p1 = pneg %p19741_p0 }
  0xa0   : > { %p19747_p3 = pnand %p19745_p2, %p19742_p1 }
  0xa2   : > { %19750 = shalt.err (!%p19747_p3)
}
  0xa3   : > { %s19751_s26 = scalar_lea.vmem %s20348_s15, 16  ;;  %s19758_s28 = scalar_lea.vmem %s20348_s15, 32 }
  0xa4   : > { %p19752_p7 = scmp.ne.s32.totalorder %s20348_s15, %s19751_s26  ;;  %p19759_p6 = scmp.lt.s32.totalorder %s20348_s15, %s20348_s15 }
  0xa5   : > { %p19760_p9 = scmp.lt.s32.totalorder %s19758_s28, %s19751_s26 }
  0xa6   : > { %p19754_p4 = pnand %p19752_p7, %p20364_p12 }
  0xa7   : > { %p19761_p11 = por %p19760_p9, %p19759_p6 }
  0xa8   : > { %p19755_p5 = pneg %p19754_p4 }
  0xaa   : > { %p19762_p13 = pnand %p19761_p11, %p19755_p5 }
  0xac   : > { %19765 = shalt.err (!%p19762_p13)
}
  0xad   : > { %19257 = dma.hbm_to_vmem [thread:$0]  (!%p20352_p10), %s22992_s10, 16, %s20348_s15, [#allocation14]  }
  0xae   : > { %s19766_s30 = scalar_lea.hbm %s22994_s1, 16 }
  0xaf   : > { %p19767_p0 = scmp.ne.s32.totalorder %s22994_s1, %s19766_s30  ;;  %p19773_p3 = scmp.lt.u32.totalorder %s19766_s30, %s22994_s1 }
  0xb1   : > { %p19769_p1 = pnand %p19767_p0, %p20364_p12 }
  0xb3   : > { %p19770_p2 = pneg %p19769_p1 }
  0xb5   : > { %p19775_p7 = pnand %p19773_p3, %p19770_p2 }
  0xb7   : > { %19778 = shalt.err (!%p19775_p7)
}
  0xb8   : > { %s19779_s5 = scalar_lea.vmem %s20356_s24, 16  ;;  %s19786_s4 = scalar_lea.vmem %s20356_s24, 32 }
  0xb9   : > { %p19780_p4 = scmp.ne.s32.totalorder %s20356_s24, %s19779_s5  ;;  %p19787_p9 = scmp.lt.s32.totalorder %s20356_s24, %s20356_s24 }
  0xba   : > { %p19788_p11 = scmp.lt.s32.totalorder %s19786_s4, %s19779_s5 }
  0xbb   : > { %p19782_p5 = pnand %p19780_p4, %p20364_p12 }
  0xbc   : > { %p19789_p13 = por %p19788_p11, %p19787_p9 }
  0xbd   : > { %p19783_p6 = pneg %p19782_p5 }
  0xbf   : > { %p19790_p0 = pnand %p19789_p13, %p19783_p6 }
  0xc1   : > { %19793 = shalt.err (!%p19790_p0)
}
  0xc2   : > { %19263 = dma.hbm_to_vmem [thread:$0]  (!%p20352_p10), %s22994_s1, 16, %s20356_s24, [#allocation17]  }
  0xc3   : > { %s19794_s15 = scalar_lea.hbm %s20266_s27, 16 }
  0xc4   : > { %p19795_p1 = scmp.ne.s32.totalorder %s20266_s27, %s19794_s15  ;;  %p19801_p7 = scmp.lt.u32.totalorder %s19794_s15, %s20266_s27 }
  0xc6   : > { %p19797_p2 = pnand %p19795_p1, %p20364_p12 }
  0xc8   : > { %p19798_p3 = pneg %p19797_p2 }
  0xca   : > { %p19803_p4 = pnand %p19801_p7, %p19798_p3 }
  0xcc   : > { %19806 = shalt.err (!%p19803_p4)
}
  0xcd   : > { %s19807_s18 = scalar_lea.vmem %s20358_s12, 16  ;;  %s19814_s26 = scalar_lea.vmem %s20358_s12, 32 }
  0xce   : > { %p19808_p5 = scmp.ne.s32.totalorder %s20358_s12, %s19807_s18  ;;  %p19815_p11 = scmp.lt.s32.totalorder %s20358_s12, %s20358_s12 }
  0xcf   : > { %p19816_p13 = scmp.lt.s32.totalorder %s19814_s26, %s19807_s18 }
  0xd0   : > { %p19810_p6 = pnand %p19808_p5, %p20364_p12 }
  0xd1   : > { %p19817_p0 = por %p19816_p13, %p19815_p11 }
  0xd2   : > { %p19811_p9 = pneg %p19810_p6 }
  0xd4   : > { %p19818_p1 = pnand %p19817_p0, %p19811_p9 }
  0xd6   : > { %19821 = shalt.err (!%p19818_p1)
}
  0xd7   : > { %19248 = dma.hbm_to_vmem [thread:$0]  (!%p20352_p10), %s20266_s27, 16, %s20358_s12, [#allocation9]  }
  0xd8   : > { %s20025_s24 = smov [#allocation12]   ;;  %s20026_s30 = smov [#allocation15]  }
  0xd9   : > { %s1491_s28 = sshll.u32 %s20025_s24, 4  ;;  %s1516_s5 = sshll.u32 %s20026_s30, 4  ;;  %s1492_s28 = int_to_ptr.vmem [resolvable:$true] %s1491_s28  ;;  %s1517_s5 = int_to_ptr.vmem [resolvable:$true] %s1516_s5 }
  0xda   : > { %s19822_s4 = scalar_lea.hbm %s20281_s20, 16 }
  0xdb   : > { %p19823_p2 = scmp.ne.s32.totalorder %s20281_s20, %s19822_s4  ;;  %p19829_p4 = scmp.lt.u32.totalorder %s19822_s4, %s20281_s20 }
  0xdd   : > { %p19825_p3 = pnand %p19823_p2, %p20364_p12 }
  0xdf   : > { %p19826_p7 = pneg %p19825_p3 }
  0xe1   : > { %p19831_p5 = pnand %p19829_p4, %p19826_p7 }
  0xe3   : > { %19834 = shalt.err (!%p19831_p5)
}
  0xe4   : > { %s19835_s15 = scalar_lea.vmem %s1492_s28, 16  ;;  %s19842_s12 = scalar_lea.vmem %s1492_s28, 32 }
  0xe5   : > { %p19836_p6 = scmp.ne.s32.totalorder %s1492_s28, %s19835_s15  ;;  %p19843_p13 = scmp.lt.s32.totalorder %s1492_s28, %s1492_s28 }
  0xe6   : > { %p19844_p0 = scmp.lt.s32.totalorder %s19842_s12, %s19835_s15 }
  0xe7   : > { %p19838_p9 = pnand %p19836_p6, %p20364_p12 }
  0xe8   : > { %p19845_p1 = por %p19844_p0, %p19843_p13 }
  0xe9   : > { %p19839_p11 = pneg %p19838_p9 }
  0xeb   : > { %p19846_p8 = pnand %p19845_p1, %p19839_p11 }
  0xed   : > { %19849 = shalt.err (!%p19846_p8)
}
  0xee   : > { %19254 = dma.hbm_to_vmem [thread:$0]  (!%p20352_p10), %s20281_s20, 16, %s1492_s28, [#allocation11]  }
  0xef   : > { %s19850_s18 = scalar_lea.hbm %s20296_s16, 16 }
  0xf0   : > { %p19851_p2 = scmp.ne.s32.totalorder %s20296_s16, %s19850_s18  ;;  %p19857_p4 = scmp.lt.u32.totalorder %s19850_s18, %s20296_s16 }
  0xf2   : > { %p19853_p3 = pnand %p19851_p2, %p20364_p12 }
  0xf4   : > { %p19854_p7 = pneg %p19853_p3 }
  0xf6   : > { %p19859_p5 = pnand %p19857_p4, %p19854_p7 }
  0xf8   : > { %19862 = shalt.err (!%p19859_p5)
}
  0xf9   : > { %s19863_s26 = scalar_lea.vmem %s1517_s5, 16  ;;  %s19870_s24 = scalar_lea.vmem %s1517_s5, 32 }
  0xfa   : > { %p19864_p8 = scmp.ne.s32.totalorder %s1517_s5, %s19863_s26  ;;  %p19871_p11 = scmp.lt.s32.totalorder %s1517_s5, %s1517_s5 }
  0xfb   : > { %p19872_p13 = scmp.lt.s32.totalorder %s19870_s24, %s19863_s26 }
  0xfc   : > { %p19866_p6 = pnand %p19864_p8, %p20364_p12 }
  0xfd   : > { %p19873_p0 = por %p19872_p13, %p19871_p11 }
  0xfe   : > { %p19867_p9 = pneg %p19866_p6 }
 0x100   : > { %p19874_p1 = pnand %p19873_p0, %p19867_p9 }
 0x102   : > { %19877 = shalt.err (!%p19874_p1)
}
 0x103   : > { %19260 = dma.hbm_to_vmem [thread:$0]  (!%p20352_p10), %s20296_s16, 16, %s1517_s5, [#allocation14]  }
 0x104   : > { %s20027_s28 = smov [#allocation18]   ;;  %s20028_s4 = smov [#allocation19]  }
 0x105   : > { %s1541_s30 = sshll.u32 %s20027_s28, 4  ;;  %s1555_s15 = sshll.u32 %s20028_s4, 4  ;;  %s1542_s30 = int_to_ptr.vmem [resolvable:$true] %s1541_s30  ;;  %s1556_s15 = int_to_ptr.vmem [resolvable:$true] %s1555_s15 }
 0x106   : > { %s19878_s12 = scalar_lea.hbm %s22990_s14, 16 }
 0x107   : > { %p19879_p2 = scmp.ne.s32.totalorder %s22990_s14, %s19878_s12  ;;  %p19885_p4 = scmp.lt.u32.totalorder %s19878_s12, %s22990_s14 }
 0x109   : > { %p19881_p3 = pnand %p19879_p2, %p20364_p12 }
 0x10b   : > { %p19882_p7 = pneg %p19881_p3 }
 0x10d   : > { %p19887_p5 = pnand %p19885_p4, %p19882_p7 }
 0x10f   : > { %19890 = shalt.err (!%p19887_p5)
}
 0x110   : > { %s19891_s18 = scalar_lea.vmem %s1542_s30, 16  ;;  %s19898_s5 = scalar_lea.vmem %s1542_s30, 32 }
 0x111   : > { %p19892_p8 = scmp.ne.s32.totalorder %s1542_s30, %s19891_s18  ;;  %p19899_p11 = scmp.lt.s32.totalorder %s1542_s30, %s1542_s30 }
 0x112   : > { %p19900_p13 = scmp.lt.s32.totalorder %s19898_s5, %s19891_s18 }
 0x113   : > { %p19894_p6 = pnand %p19892_p8, %p20364_p12 }
 0x114   : > { %p19901_p0 = por %p19900_p13, %p19899_p11 }
 0x115   : > { %p19895_p9 = pneg %p19894_p6 }
 0x117   : > { %p19902_p1 = pnand %p19901_p0, %p19895_p9 }
 0x119   : > { %19905 = shalt.err (!%p19902_p1)
}
 0x11a   : > { %19266 = dma.hbm_to_vmem [thread:$0]  (!%p20352_p10), %s22990_s14, 16, %s1542_s30, [#allocation17]  }
 0x11b   : > { %s19906_s26 = scalar_lea.hbm %s20321_s23, 16 }
 0x11c   : > { %p19907_p2 = scmp.ne.s32.totalorder %s20321_s23, %s19906_s26  ;;  %p19913_p4 = scmp.lt.u32.totalorder %s19906_s26, %s20321_s23 }
 0x11e   : > { %p19909_p3 = pnand %p19907_p2, %p20364_p12 }
 0x120   : > { %p19910_p7 = pneg %p19909_p3 }
 0x122   : > { %p19915_p5 = pnand %p19913_p4, %p19910_p7 }
 0x124   : > { %19918 = shalt.err (!%p19915_p5)
}
 0x125   : > { %s19919_s24 = scalar_lea.vmem %s1556_s15, 16  ;;  %s19926_s28 = scalar_lea.vmem %s1556_s15, 32 }
 0x126   : > { %p19920_p8 = scmp.ne.s32.totalorder %s1556_s15, %s19919_s24  ;;  %p19927_p11 = scmp.lt.s32.totalorder %s1556_s15, %s1556_s15 }
 0x127   : > { %p19928_p13 = scmp.lt.s32.totalorder %s19926_s28, %s19919_s24 }
 0x128   : > { %p19922_p6 = pnand %p19920_p8, %p20364_p12 }
 0x129   : > { %p19929_p0 = por %p19928_p13, %p19927_p11 }
 0x12a   : > { %p19923_p9 = pneg %p19922_p6 }
 0x12c   : > { %p19930_p1 = pnand %p19929_p0, %p19923_p9 }
 0x12e   : > { %19933 = shalt.err (!%p19930_p1)
}
 0x12f   : > { %19269 = dma.hbm_to_vmem [thread:$0]  (!%p20352_p10), %s20321_s23, 16, %s1556_s15, [#allocation20]  }
 0x130   : > { %p22998_p2 = scmp.ne.s32.totalorder %s22995_s11, 0 }
 0x131   : > { %p22999_p3 = scmp.eq.s32.totalorder (!%p22998_p2), %s20335_s7, 0 }
 0x132   : > { %1582 = sbr.rel (%p22998_p2) target bundleno = 25696 (0x6460), region = 240 }
 0x139   : > { %19941 = dma.done.wait (%p22999_p3), [#allocation9], 16   ;;  %p23000_p7 = pmov %p22999_p3 }
 0x13a   : > { %p23001_p12 = pmov %p22999_p3 }
 0x13b   : > { %19943 = vsyncadd (%p23000_p7), [#allocation9], 4294967280 }
 0x13c   : > { %19945 = dma.done.wait (%p23001_p12), [#allocation11], 32   ;;  %p23002_p4 = pmov %p22999_p3 }
 0x13d   : > { %p23003_p5 = pmov %p22999_p3 }
 0x13e   : > { %19947 = vsyncadd (%p23002_p4), [#allocation11], 4294967264 }
 0x13f   : > { %19949 = dma.done.wait (%p23003_p5), [#allocation14], 32   ;;  %p23004_p10 = pmov %p22999_p3 }
 0x140   : > { %p23005_p8 = pmov %p22999_p3 }
 0x141   : > { %19951 = vsyncadd (%p23004_p10), [#allocation14], 4294967264 }
 0x142   : > { %19953 = dma.done.wait (%p23005_p8), [#allocation17], 32   ;;  %p23006_p6 = pmov %p22999_p3 }
 0x143   : > { %p23007_p9 = pmov %p22999_p3 }
 0x144   : > { %19955 = vsyncadd (%p23006_p6), [#allocation17], 4294967264 }
 0x145   : > { %19957 = dma.done.wait (%p23007_p9), [#allocation20], 16   ;;  %p23008_p11 = pmov %p22999_p3 }
 0x146   : > { %s23009_s9 = sld [smem:[#allocation27_spill]]  ;;  %p1740_p13 = scmp.lt.s32.totalorder %s20335_s7, 1  ;;  %v20029_v0 = vmov 0   ;;  %v20030_v1 = vmov 0.0|0.0   ;;  %v1762_v3 = vld [vmem:[%s20061_s17] sm:$0xff]  ;;  %v1763_v4 = vld [vmem:[%s20061_s17 + $0x8] sm:$0xff]  ;;  %v1754_v14 = vlaneseq }
 0x147   : > { %19959 = vsyncadd (%p23008_p11), [#allocation20], 4294967280  ;;  %19368 = vset.pattern.permute.xlu0 %v20029_v0  ;;  %18257 = vmatprep.subr.bf16.mxu0 %v20030_v1  ;;  %v18258_v5 = vpack.c.bf16 %v1763_v4, %v1762_v3  ;;  %v1764_v6 = vld [vmem:[%s20061_s17 + $0x10] sm:$0xff]  ;;  %v1765_v7 = vld [vmem:[%s20061_s17 + $0x18] sm:$0xff]  ;;  %vm20031_vm0 = vmmov 0   ;;  %v20032_v8 = vmov 0.0  }
 0x148   : > { %s1741_s11 = scalar_select %p1740_p13, %s20335_s7, 1  ;;  %18263 = vmatprep.subr.bf16.mxu1 %v20030_v1  ;;  %19369 = vset.pattern.permute.xlu1 %v20029_v0  ;;  %v18261_v9 = vpack.c.bf16 %v1765_v7, %v1764_v6  ;;  %v1845_v10 = vld [vmem:[%s20066_s21 + $0x20] sm:$0xff]  ;;  %v1846_v11 = vld [vmem:[%s20066_s21 + $0x28] sm:$0xff]  ;;  %v1755_v15 = vand.u32 127, %v1754_v14  ;;  %vm1767_vm1 = vcmask 326656   ;;  %v1847_v18 = vld [vmem:[%s20066_s21 + $0x30] sm:$0xff] }
 0x149   : > { %16626 = vmatprep.mubr.msk.f32.mxu0 %vm20031_vm0, %v20032_v8  ;;  %16637 = vmatprep.mubr.msk.f32.mxu1 %vm20031_vm0, %v20032_v8  ;;  %v18264_v12 = vpack.c.bf16 %v1846_v11, %v1845_v10  ;;  %v1766_v13 = vld [vmem:[%s20061_s17 + $0x20] sm:$0xff]  ;;  %v1848_v19 = vld [vmem:[%s20066_s21 + $0x38] sm:$0xff]  ;;  %vm1866_vm3 = vcmask 1041408   ;;  %v1842_v25 = vld [vmem:[%s20066_s21 + $0x8] sm:$0xff]  ;;  %vm1871_vm4 = vcmask 1046528   ;;  %vm1875_vm5 = vcmask 261120  }
 0x14a   : > { %s20496_s22 = sshll.u32 %s1741_s11, 3  ;;  %18259 = vmatpush3.bf16.msra.mxu0 %v18258_v5  ;;  %v18267_v20 = vpack.c.bf16 %v1848_v19, %v1847_v18  ;;  %v1841_v24 = vld [vmem:[%s20066_s21] sm:$0xff]  ;;  %v1843_v31 = vld [vmem:[%s20066_s21 + $0x10] sm:$0xff]  ;;  %v1844_v32 = vld [vmem:[%s20066_s21 + $0x18] sm:$0xff]  ;;  %vm2020_vm6 = vcmask 1045504   ;;  %vm2097_vm7 = vcmask 1044480  }
 0x14b   : > { %18260 = vmatprep.subr.bf16.mxu0 %v20030_v1  ;;  %18265 = vmatpush3.bf16.msra.mxu1 %v18264_v12  ;;  %v18270_v30 = vpack.c.bf16 %v1842_v25, %v1841_v24  ;;  %v18273_v34 = vpack.c.bf16 %v1844_v32, %v1843_v31  ;;  %v1849_v35 = vld [vmem:[%s20066_s21 + $0x40] sm:$0xff]  ;;  %v1850_v36 = vld [vmem:[%s20066_s21 + $0x48] sm:$0xff]  ;;  %v1851_v38 = vld [vmem:[%s20066_s21 + $0x50] sm:$0xff]  ;;  %vm2174_vm8 = vcmask 1043456   ;;  %s23010_s30 = sld [smem:[#allocation34_spill]]  ;;  %s23011_s4 = sld [smem:[#allocation30_spill]] }
 0x14c   : > { %s1743_s2 = scalar_lea.vmem %s23009_s9, %s20496_s22  ;;  %18266 = vmatprep.subr.bf16.mxu1 %v20030_v1  ;;  %v18276_v37 = vpack.c.bf16 %v1850_v36, %v1849_v35  ;;  %v1852_v39 = vld [vmem:[%s20066_s21 + $0x58] sm:$0xff]  ;;  %v1853_v41 = vld [vmem:[%s20066_s21 + $0x60] sm:$0xff]  ;;  %v1854_v42 = vld [vmem:[%s20066_s21 + $0x68] sm:$0xff]  ;;  %s23012_s15 = sld [smem:[#allocation31_spill]]  ;;  %vm3105_vm9 = vcmask 130048   ;;  %vm3108_vm10 = vcmask 122880  }
 0x14d   : > { %v1753_v2 = vld [vmem:[%s1743_s2] sm:$0xff]  ;;  %v18279_v40 = vpack.c.bf16 %v1852_v39, %v1851_v38  ;;  %v18282_v45 = vpack.c.bf16 %v1854_v42, %v1853_v41  ;;  %v1855_v46 = vld [vmem:[%s20066_s21 + $0x70] sm:$0xff]  ;;  %v1856_v47 = vld [vmem:[%s20066_s21 + $0x78] sm:$0xff]  ;;  %s23013_s12 = sld [smem:[#allocation35_spill]]  ;;  %s23014_s18 = sld [smem:[#allocation38_spill]]  ;;  %3106 = vst.msk [vmem:[#allocation3] sm:$0xff] %vm3105_vm9, %v20032_v8 }
 0x14e   : > { %1757 = vperm.xlu0 %19368, %v1753_v2   ;;  %18262 = vmatpush3.bf16.msra.mxu0 %v18261_v9  ;;  %v18285_v49 = vpack.c.bf16 %v1856_v47, %v1855_v46  ;;  %v1857_v50 = vld [vmem:[%s20066_s21 + $0x80] sm:$0xff]  ;;  %v1858_v51 = vld [vmem:[%s20066_s21 + $0x88] sm:$0xff]  ;;  %v1859_v55 = vld [vmem:[%s20066_s21 + $0x90] sm:$0xff]  ;;  %s23015_s5 = sld [smem:[#allocation32_spill]]  ;;  %s23016_s26 = sld [smem:[#allocation33_spill]]  ;;  %3107 = vst.msk [vmem:[#allocation4] sm:$0xff] %vm3105_vm9, %v20032_v8 }
 0x14f   : > { %16624 = vmatprep.subr.mxu0 %v20032_v8  ;;  %18268 = vmatpush3.bf16.msra.mxu1 %v18267_v20  ;;  %v18288_v54 = vpack.c.bf16 %v1858_v51, %v1857_v50  ;;  %v1860_v56 = vld [vmem:[%s20066_s21 + $0x98] sm:$0xff]  ;;  %v2270_v62 = vld [vmem:[%s22993_s3 + $0x20] sm:$0xff]  ;;  %v2271_v63 = vld [vmem:[%s22993_s3 + $0x28] sm:$0xff]  ;;  %s23017_s24 = sld [smem:[#allocation37_spill]]  ;;  %s23018_s11 = sld [smem:[#allocation36_spill]] }
 0x150   : > { %18269 = vmatprep.subr.bf16.mxu1 %v20030_v1  ;;  %v18291_v58 = vpack.c.bf16 %v1860_v56, %v1859_v55  ;;  %v18294_v0 = vpack.c.bf16 %v2271_v63, %v2270_v62  ;;  %v2272_v2 = vld [vmem:[%s22993_s3 + $0x30] sm:$0xff]  ;;  %v2273_v3 = vld [vmem:[%s22993_s3 + $0x38] sm:$0xff]  ;;  %v15661_v5 = vld [vmem:[%s20071_s25] ss:$0 sm:$0xff]  ;;  %s20715_s28 = sld [smem:[#allocation7 + %s20335_s7]] }
 0x151   : > { %v18297_v4 = vpack.c.bf16 %v2273_v3, %v2272_v2  ;;  %v15662_v6 = vld [vmem:[%s20076_s29] ss:$0 sm:$0xff]  ;;  %v2281_v38 = vld [vmem:[%s22993_s3 + $0x78] sm:$0xff]  ;;  %v2283_v42 = vld [vmem:[%s22993_s3 + $0x88] sm:$0xff]  ;;  %s23039_s9 = sld [smem:[#allocation40_spill]] }
 0x152   : > { %16625 = vmatpush3.msra.mxu0 %v1766_v13  ;;  %v2278_v32 = vld [vmem:[%s22993_s3 + $0x60] sm:$0xff]  ;;  %v2284_v46 = vld [vmem:[%s22993_s3 + $0x90] sm:$0xff]  ;;  %v2285_v47 = vld [vmem:[%s22993_s3 + $0x98] sm:$0xff] }
 0x153   : > { %18293 = vmatprep.subr.bf16.mxu0 %v20030_v1  ;;  %v2282_v41 = vld [vmem:[%s22993_s3 + $0x80] sm:$0xff]  ;;  %v2691_v56 = vld [vmem:[%s20096_s19 + $0x30] sm:$0xff] }
 0x154   : > { %v15668_v62 = vld [vmem:[%s23011_s4] ss:$0 sm:$0xff] }
 0x155   : > { %v15669_v63 = vld [vmem:[%s23012_s15] ss:$0 sm:$0xff]  ;;  %s23019_s15 = sld [smem:[#allocation39_spill]] }
 0x156   : > { %p3124_p0 = scmp.gt.s32.totalorder %s20715_s28, 0  ;;  %s22911_s7 = sadd.s32 4294967295, %s20715_s28 }
 0x157   : > { %p3487_p1 = scmp.gt.s32.totalorder %s20715_s28, 1  ;;  %p3855_p2 = scmp.gt.s32.totalorder %s20715_s28, 2 }
 0x158   : > { %s3307_s2 = scalar_select %p3124_p0, %s22911_s7, 0 }
 0x159   : > { %s22912_s7 = smov 80   ;;  %p4226_p3 = scmp.gt.s32.totalorder %s20715_s28, 3 }
 0x15a   : > { %s3308_s4 = scalar_lea.vmem [#allocation2], %s3307_s2  ;;  %s22914_s2 = smov 32  }
 0x15b   : > { %p4597_p7 = scmp.gt.s32.totalorder %s20715_s28, 4  ;;  %p4968_p12 = scmp.gt.s32.totalorder %s20715_s28, 5 }
 0x15c   : > { %p5339_p4 = scmp.gt.s32.totalorder %s20715_s28, 6  ;;  %p5710_p5 = scmp.gt.s32.totalorder %s20715_s28, 7 }
 0x15d   : > { %s23048_s10 = sadd.s32 4294967291, %s20715_s28 }
 0x15e   : > { %s23087_s10 = smov (!%p4597_p7, %s23048_s10), 8 }
 0x15f   : > { %s5884_s13 = scalar_select %p5710_p5, 1, 0 }
 0x1cd   : > { %v1758_v16 = vpop.permute.xlu0 %1757 }
 0x1ce   : > { %vm1759_vm2 = vcmp.eq.s32.totalorder %v1755_v15, %v1758_v16  ;;  %v2266_v15 = vld [vmem:[%s22993_s3] sm:$0xff]  ;;  %v2267_v16 = vld [vmem:[%s22993_s3 + $0x8] sm:$0xff] }
 0x1cf   : > { %v15654_v17 = vsel %vm1759_vm2, 1.0, %v20032_v8 }
 0x1d0   : > { %16627 = vmatmul.mubr.msk.f32.vlgmr.msra.gmra.mrb[0].mxu0 %vm1767_vm1, %v15654_v17 }
 0x1d1   : > { %16692 = vmatprep.mubr.msk.f32.mxu0 %vm20031_vm0, %v20032_v8  ;;  %18295 = vmatpush3.bf16.msra.mxu0 %v18294_v0 }
 0x1d2   : > { %18296 = vmatprep.subr.bf16.mxu0 %v20030_v1 }
 0x1d5   : > { %18298 = vmatpush3.bf16.msra.mxu0 %v18297_v4 }
 0x1d6   : > { %18299 = vmatprep.subr.bf16.mxu0 %v20030_v1 }
 0x2a3   : > { %v1837_v21 = vpop.f32.mrb[0].mxu0 }
 0x2a4   : > { %v1864_v22 = vrot.slane %v1837_v21, 6  ;;  %v16628_v23 = vpop.f32.mrb[1].mxu0  ;;  %v18300_v21 = vpack.c.bf16 %v2267_v16, %v2266_v15  ;;  %v2687_v16 = vld [vmem:[%s20096_s19 + $0x10] sm:$0xff] }
 0x2a5   : > { %v2269_v23 = vld [vmem:[%s22993_s3 + $0x18] sm:$0xff] }
 0x2a6   : > { %v20525_v26 = vsel %vm1866_vm3, 0.0, %v1864_v22  ;;  %v20528_v27 = vsel %vm1866_vm3, %v1864_v22, 0.0  ;;  %v2268_v22 = vld [vmem:[%s22993_s3 + $0x10] sm:$0xff] }
 0x2a7   : > { %v1873_v28 = vrot.slane %v20528_v27, 1  ;;  %v1872_v29 = vrot.slane %v20525_v26, 1  ;;  %v2021_v43 = vrot.slane %v20525_v26, 2  ;;  %v2022_v44 = vrot.slane %v20528_v27, 2 }
 0x2a8   : > { %v2098_v52 = vrot.slane %v20525_v26, 3  ;;  %v2099_v53 = vrot.slane %v20528_v27, 3  ;;  %v2175_v59 = vrot.slane %v20525_v26, 4  ;;  %v2176_v60 = vrot.slane %v20528_v27, 4  ;;  %v2275_v27 = vld [vmem:[%s22993_s3 + $0x48] sm:$0xff] }
 0x2a9   : > { %v1874_v33 = vsel %vm1871_vm4, %v1872_v29, %v1873_v28  ;;  %v2023_v48 = vsel %vm2020_vm6, %v2021_v43, %v2022_v44  ;;  %v18303_v25 = vpack.c.bf16 %v2269_v23, %v2268_v22  ;;  %v2276_v29 = vld [vmem:[%s22993_s3 + $0x50] sm:$0xff] }
 0x2aa   : > { %16638 = vmatmul.mubr.msk.f32.vlgmr.msra.gmra.mrb[0].mxu1 %vm1875_vm5, %v1874_v33  ;;  %v2100_v57 = vsel %vm2097_vm7, %v2098_v52, %v2099_v53  ;;  %v2177_v61 = vsel %vm2174_vm8, %v2175_v59, %v2176_v60  ;;  %v2279_v33 = vld [vmem:[%s22993_s3 + $0x68] sm:$0xff]  ;;  %v2689_v53 = vld [vmem:[%s20096_s19 + $0x20] sm:$0xff]  ;;  %v2695_v23 = vld [vmem:[%s20096_s19 + $0x50] sm:$0xff] }
 0x2ab   : > { %18271 = vmatpush3.bf16.msra.mxu1 %v18270_v30  ;;  %16648 = vmatprep.mubr.msk.f32.mxu1 %vm20031_vm0, %v20032_v8  ;;  %v2277_v30 = vld [vmem:[%s22993_s3 + $0x58] sm:$0xff]  ;;  %v18312_v36 = vpack.c.bf16 %v2279_v33, %v2278_v32  ;;  %v3110_v59 = vld [vmem:[%s23010_s30] sm:$0xff]  ;;  %v3111_v60 = vld [vmem:[%s23010_s30 + $0x8] sm:$0xff] }
 0x2ac   : > { %18272 = vmatprep.subr.bf16.mxu1 %v20030_v1  ;;  %v18309_v31 = vpack.c.bf16 %v2277_v30, %v2276_v29  ;;  %v2700_v32 = vld [vmem:[%s20096_s19 + $0x78] sm:$0xff] }
 0x2af   : > { %18274 = vmatpush3.bf16.msra.mxu1 %v18273_v34 }
 0x2b0   : > { %18275 = vmatprep.subr.bf16.mxu1 %v20030_v1 }
 0x2b2   : > { %16649 = vmatmul.mubr.msk.f32.vlgmr.msra.gmra.mrb[0].mxu1 %vm1875_vm5, %v20525_v26  ;;  %v2274_v26 = vld [vmem:[%s22993_s3 + $0x40] sm:$0xff] }
 0x2b3   : > { %18277 = vmatpush3.bf16.msra.mxu1 %v18276_v37  ;;  %16659 = vmatprep.mubr.msk.f32.mxu1 %vm20031_vm0, %v20032_v8  ;;  %v18306_v28 = vpack.c.bf16 %v2275_v27, %v2274_v26  ;;  %v2280_v37 = vld [vmem:[%s22993_s3 + $0x70] sm:$0xff]  ;;  %v2697_v26 = vld [vmem:[%s20096_s19 + $0x60] sm:$0xff]  ;;  %v2698_v27 = vld [vmem:[%s20096_s19 + $0x68] sm:$0xff] }
 0x2b4   : > { %18278 = vmatprep.subr.bf16.mxu1 %v20030_v1  ;;  %v18342_v30 = vpack.c.bf16 %v2698_v27, %v2697_v26 }
 0x2b7   : > { %18280 = vmatpush3.bf16.msra.mxu1 %v18279_v40  ;;  %v18315_v40 = vpack.c.bf16 %v2281_v38, %v2280_v37 }
 0x2b8   : > { %18281 = vmatprep.subr.bf16.mxu1 %v20030_v1 }
 0x2ba   : > { %16660 = vmatmul.mubr.msk.f32.vlgmr.msra.gmra.mrb[0].mxu1 %vm1875_vm5, %v2023_v48 }
 0x2bb   : > { %18283 = vmatpush3.bf16.msra.mxu1 %v18282_v45  ;;  %16670 = vmatprep.mubr.msk.f32.mxu1 %vm20031_vm0, %v20032_v8  ;;  %v18318_v45 = vpack.c.bf16 %v2283_v42, %v2282_v41  ;;  %v2704_v41 = vld [vmem:[%s20096_s19 + $0x98] sm:$0xff] }
 0x2bc   : > { %18284 = vmatprep.subr.bf16.mxu1 %v20030_v1 }
 0x2bf   : > { %18286 = vmatpush3.bf16.msra.mxu1 %v18285_v49  ;;  %v18321_v49 = vpack.c.bf16 %v2285_v47, %v2284_v46  ;;  %v3112_v47 = vld [vmem:[%s23010_s30 + $0x10] sm:$0xff] }
 0x2c0   : > { %18287 = vmatprep.subr.bf16.mxu1 %v20030_v1 }
 0x2c2   : > { %16671 = vmatmul.mubr.msk.f32.vlgmr.msra.gmra.mrb[0].mxu1 %vm1875_vm5, %v2100_v57  ;;  %v2692_v57 = vld [vmem:[%s20096_s19 + $0x38] sm:$0xff] }
 0x2c3   : > { %18289 = vmatpush3.bf16.msra.mxu1 %v18288_v54  ;;  %16681 = vmatprep.mubr.msk.f32.mxu1 %vm20031_vm0, %v20032_v8  ;;  %v2690_v54 = vld [vmem:[%s20096_s19 + $0x28] sm:$0xff] }
 0x2c4   : > { %18290 = vmatprep.subr.bf16.mxu1 %v20030_v1  ;;  %v18324_v55 = vpack.c.bf16 %v2690_v54, %v2689_v53  ;;  %v3121_v53 = vld [vmem:[%s23014_s18] sm:$0xff]  ;;  %v3122_v54 = vld [vmem:[%s23014_s18 + $0x8] sm:$0xff] }
 0x2c7   : > { %18292 = vmatpush3.bf16.msra.mxu1 %v18291_v58  ;;  %v18327_v58 = vpack.c.bf16 %v2692_v57, %v2691_v56  ;;  %v15675_v56 = vld [vmem:[%s23015_s5] ss:$0 sm:$0xff]  ;;  %s22919_s5 = smov 96  }
 0x2c8   : > { %18323 = vmatprep.subr.bf16.mxu1 %v20030_v1  ;;  %v15676_v57 = vld [vmem:[%s23016_s26] ss:$0 sm:$0xff]  ;;  %s22917_s26 = smov 16  }
 0x2ca   : > { %16682 = vmatmul.mubr.msk.f32.vlgmr.msra.gmra.mrb[0].mxu1 %vm1875_vm5, %v2177_v61  ;;  %v20641_v61 = vpack.c.bf16 %v3111_v60, %v3110_v59 }
 0x2cb   : > { %16747 = vmatprep.mubr.msk.f32.mxu1 %vm20031_vm0, %v20032_v8  ;;  %18325 = vmatpush3.bf16.msra.mxu1 %v18324_v55  ;;  %v20706_v55 = vpack.c.bf16 %v3122_v54, %v3121_v53 }
 0x2cc   : > { %18326 = vmatprep.subr.bf16.mxu1 %v20030_v1 }
 0x2cf   : > { %18328 = vmatpush3.bf16.msra.mxu1 %v18327_v58 }
 0x2d0   : > { %18329 = vmatprep.subr.bf16.mxu1 %v20030_v1 }
 0x39d   : > { %v2246_v7 = vpop.f32.mrb[0].mxu1 }
 0x39e   : > { %v2257_v9 = vmul.f32 %v15661_v5, %v2246_v7  ;;  %v16683_v10 = vpop.f32.mrb[1].mxu1  ;;  %v2685_v7 = vld [vmem:[%s20096_s19] sm:$0xff] }
 0x3a0   : > { %v2264_v11 = vadd.f32 %v15662_v6, %v2257_v9  ;;  %v2686_v9 = vld [vmem:[%s20096_s19 + $0x8] sm:$0xff] }
 0x3a1   : > { %v18330_v15 = vpack.c.bf16 %v2686_v9, %v2685_v7 }
 0x3a2   : > { %v2265_v12 = vmax.f32 %v2264_v11, 0.0 }
 0x3a4   : > { %v2289_v13 = vrot.slane %v2265_v12, 6 }
 0x3a6   : > { %v2291_v17 = vsel %vm1866_vm3, 0.0, %v2289_v13  ;;  %v2292_v18 = vsel %vm1866_vm3, %v2289_v13, 0.0 }
 0x3a7   : > { %v2296_v19 = vrot.slane %v2292_v18, 1  ;;  %v2295_v20 = vrot.slane %v2291_v17, 1  ;;  %v2443_v34 = vrot.slane %v2292_v18, 2  ;;  %v2442_v35 = vrot.slane %v2291_v17, 2 }
 0x3a8   : > { %v2519_v43 = vrot.slane %v2292_v18, 3  ;;  %v2518_v44 = vrot.slane %v2291_v17, 3  ;;  %v2595_v50 = vrot.slane %v2292_v18, 4  ;;  %v2594_v51 = vrot.slane %v2291_v17, 4 }
 0x3a9   : > { %v2297_v24 = vsel %vm1871_vm4, %v2295_v20, %v2296_v19  ;;  %v2444_v39 = vsel %vm2020_vm6, %v2442_v35, %v2443_v34  ;;  %v2693_v20 = vld [vmem:[%s20096_s19 + $0x40] sm:$0xff] }
 0x3aa   : > { %16693 = vmatmul.mubr.msk.f32.vlgmr.msra.gmra.mrb[2].mxu0 %vm1875_vm5, %v2297_v24  ;;  %v2520_v48 = vsel %vm2097_vm7, %v2518_v44, %v2519_v43  ;;  %v2596_v52 = vsel %vm2174_vm8, %v2594_v51, %v2595_v50  ;;  %v2696_v24 = vld [vmem:[%s20096_s19 + $0x58] sm:$0xff]  ;;  %v2701_v35 = vld [vmem:[%s20096_s19 + $0x80] sm:$0xff]  ;;  %v3115_v51 = vld [vmem:[%s23013_s12 + $0x8] sm:$0xff] }
 0x3ab   : > { %18301 = vmatpush3.bf16.msra.mxu0 %v18300_v21  ;;  %16703 = vmatprep.mubr.msk.f32.mxu0 %vm20031_vm0, %v20032_v8  ;;  %v2694_v21 = vld [vmem:[%s20096_s19 + $0x48] sm:$0xff]  ;;  %v3114_v50 = vld [vmem:[%s23013_s12] sm:$0xff] }
 0x3ac   : > { %18302 = vmatprep.subr.bf16.mxu0 %v20030_v1  ;;  %v18336_v22 = vpack.c.bf16 %v2694_v21, %v2693_v20 }
 0x3af   : > { %18304 = vmatpush3.bf16.msra.mxu0 %v18303_v25  ;;  %v18339_v25 = vpack.c.bf16 %v2696_v24, %v2695_v23 }
 0x3b0   : > { %18305 = vmatprep.subr.bf16.mxu0 %v20030_v1 }
 0x3b2   : > { %16704 = vmatmul.mubr.msk.f32.vlgmr.msra.gmra.mrb[2].mxu0 %vm1875_vm5, %v2291_v17  ;;  %v2688_v17 = vld [vmem:[%s20096_s19 + $0x18] sm:$0xff] }
 0x3b3   : > { %18307 = vmatpush3.bf16.msra.mxu0 %v18306_v28  ;;  %16714 = vmatprep.mubr.msk.f32.mxu0 %vm20031_vm0, %v20032_v8  ;;  %v18333_v19 = vpack.c.bf16 %v2688_v17, %v2687_v16 }
 0x3b4   : > { %18308 = vmatprep.subr.bf16.mxu0 %v20030_v1 }
 0x3b7   : > { %18310 = vmatpush3.bf16.msra.mxu0 %v18309_v31  ;;  %v2699_v31 = vld [vmem:[%s20096_s19 + $0x70] sm:$0xff] }
 0x3b8   : > { %18311 = vmatprep.subr.bf16.mxu0 %v20030_v1  ;;  %v18345_v34 = vpack.c.bf16 %v2700_v32, %v2699_v31 }
 0x3ba   : > { %16715 = vmatmul.mubr.msk.f32.vlgmr.msra.gmra.mrb[2].mxu0 %vm1875_vm5, %v2444_v39 }
 0x3bb   : > { %18313 = vmatpush3.bf16.msra.mxu0 %v18312_v36  ;;  %16725 = vmatprep.mubr.msk.f32.mxu0 %vm20031_vm0, %v20032_v8  ;;  %v2702_v36 = vld [vmem:[%s20096_s19 + $0x88] sm:$0xff] }
 0x3bc   : > { %18314 = vmatprep.subr.bf16.mxu0 %v20030_v1  ;;  %v18348_v39 = vpack.c.bf16 %v2702_v36, %v2701_v35 }
 0x3bf   : > { %18316 = vmatpush3.bf16.msra.mxu0 %v18315_v40  ;;  %v2703_v40 = vld [vmem:[%s20096_s19 + $0x90] sm:$0xff] }
 0x3c0   : > { %18317 = vmatprep.subr.bf16.mxu0 %v20030_v1  ;;  %v18351_v43 = vpack.c.bf16 %v2704_v41, %v2703_v40 }
 0x3c2   : > { %16726 = vmatmul.mubr.msk.f32.vlgmr.msra.gmra.mrb[2].mxu0 %vm1875_vm5, %v2520_v48  ;;  %v3113_v48 = vld [vmem:[%s23010_s30 + $0x18] sm:$0xff] }
 0x3c3   : > { %18319 = vmatpush3.bf16.msra.mxu0 %v18318_v45  ;;  %16736 = vmatprep.mubr.msk.f32.mxu0 %vm20031_vm0, %v20032_v8 }
 0x3c4   : > { %18320 = vmatprep.subr.bf16.mxu0 %v20030_v1 }
 0x3c7   : > { %18322 = vmatpush3.bf16.msra.mxu0 %v18321_v49  ;;  %v20694_v49 = vpack.c.bf16 %v3113_v48, %v3112_v47 }
 0x3c8   : > { %18356 = vmatprep.subr.bf16.mxu0 %v20030_v1 }
 0x3ca   : > { %16737 = vmatmul.mubr.msk.f32.vlgmr.msra.gmra.mrb[2].mxu0 %vm1875_vm5, %v2596_v52  ;;  %v20698_v52 = vpack.c.bf16 %v3115_v51, %v3114_v50 }
 0x3cb   : > { %16809 = vmatprep.mubr.msk.f32.mxu0 %vm20031_vm0, %v20032_v8  ;;  %18358 = vmatpush3.bf16.msra.mxu0 %v20641_v61 }
 0x3cc   : > { %18359 = vmatprep.subr.bf16.mxu0 %v20030_v1 }
 0x3cf   : > { %18361 = vmatpush3.bf16.msra.mxu0 %v20694_v49 }
 0x3d0   : > { %18362 = vmatprep.subr.bf16.mxu0 %v20030_v1 }
 0x49d   : > { %v2665_v0 = vpop.f32.mrb[2].mxu0 }
 0x49e   : > { %v2676_v2 = vmul.f32 %v15668_v62, %v2665_v0  ;;  %v16738_v3 = vpop.f32.mrb[3].mxu0  ;;  %v3117_v0 = vld [vmem:[%s23017_s24] sm:$0xff] }
 0x4a0   : > { %v2683_v4 = vadd.f32 %v15669_v63, %v2676_v2  ;;  %v3118_v2 = vld [vmem:[%s23017_s24 + $0x8] sm:$0xff] }
 0x4a1   : > { %v20730_v3 = vpack.c.bf16 %v3118_v2, %v3117_v0 }
 0x4a2   : > { %v2684_v5 = vmax.f32 %v2683_v4, 0.0  ;;  %v3119_v4 = vld [vmem:[%s23017_s24 + $0x10] sm:$0xff] }
 0x4a4   : > { %v2708_v6 = vrot.slane %v2684_v5, 6  ;;  %v3120_v5 = vld [vmem:[%s23017_s24 + $0x18] sm:$0xff] }
 0x4a6   : > { %v2710_v10 = vsel %vm1866_vm3, 0.0, %v2708_v6  ;;  %v2711_v11 = vsel %vm1866_vm3, %v2708_v6, 0.0  ;;  %v20742_v6 = vpack.c.bf16 %v3120_v5, %v3119_v4 }
 0x4a7   : > { %v2715_v12 = vrot.slane %v2711_v11, 1  ;;  %v2714_v13 = vrot.slane %v2710_v10, 1  ;;  %v2862_v28 = vrot.slane %v2711_v11, 2  ;;  %v2861_v29 = vrot.slane %v2710_v10, 2 }
 0x4a8   : > { %v2938_v37 = vrot.slane %v2711_v11, 3  ;;  %v2937_v38 = vrot.slane %v2710_v10, 3  ;;  %v3014_v44 = vrot.slane %v2711_v11, 4  ;;  %v3013_v45 = vrot.slane %v2710_v10, 4  ;;  %v20755_v11 = vld [vmem:[%s23018_s11] sm:$0x1] }
 0x4a9   : > { %v2716_v18 = vsel %vm1871_vm4, %v2714_v13, %v2715_v12  ;;  %v2863_v33 = vsel %vm2020_vm6, %v2861_v29, %v2862_v28 }
 0x4aa   : > { %16748 = vmatmul.mubr.msk.f32.vlgmr.msra.gmra.mrb[2].mxu1 %vm1875_vm5, %v2716_v18  ;;  %v2939_v42 = vsel %vm2097_vm7, %v2937_v38, %v2938_v37  ;;  %v3015_v46 = vsel %vm2174_vm8, %v3013_v45, %v3014_v44 }
 0x4ab   : > { %18331 = vmatpush3.bf16.msra.mxu1 %v18330_v15  ;;  %16758 = vmatprep.mubr.msk.f32.mxu1 %vm20031_vm0, %v20032_v8 }
 0x4ac   : > { %18332 = vmatprep.subr.bf16.mxu1 %v20030_v1 }
 0x4af   : > { %18334 = vmatpush3.bf16.msra.mxu1 %v18333_v19  ;;  %v20759_v19 = vld [vmem:[%s23019_s15] sm:$0x1] }
 0x4b0   : > { %18335 = vmatprep.subr.bf16.mxu1 %v20030_v1 }
 0x4b2   : > { %16759 = vmatmul.mubr.msk.f32.vlgmr.msra.gmra.mrb[2].mxu1 %vm1875_vm5, %v2710_v10 }
 0x4b3   : > { %18337 = vmatpush3.bf16.msra.mxu1 %v18336_v22  ;;  %16769 = vmatprep.mubr.msk.f32.mxu1 %vm20031_vm0, %v20032_v8 }
 0x4b4   : > { %18338 = vmatprep.subr.bf16.mxu1 %v20030_v1 }
 0x4b7   : > { %18340 = vmatpush3.bf16.msra.mxu1 %v18339_v25 }
 0x4b8   : > { %18341 = vmatprep.subr.bf16.mxu1 %v20030_v1 }
 0x4ba   : > { %16770 = vmatmul.mubr.msk.f32.vlgmr.msra.gmra.mrb[2].mxu1 %vm1875_vm5, %v2863_v33 }
 0x4bb   : > { %18343 = vmatpush3.bf16.msra.mxu1 %v18342_v30  ;;  %16780 = vmatprep.mubr.msk.f32.mxu1 %vm20031_vm0, %v20032_v8 }
 0x4bc   : > { %18344 = vmatprep.subr.bf16.mxu1 %v20030_v1 }
 0x4bf   : > { %18346 = vmatpush3.bf16.msra.mxu1 %v18345_v34 }
 0x4c0   : > { %18347 = vmatprep.subr.bf16.mxu1 %v20030_v1 }
 0x4c2   : > { %16781 = vmatmul.mubr.msk.f32.vlgmr.msra.gmra.mrb[2].mxu1 %vm1875_vm5, %v2939_v42 }
 0x4c3   : > { %18349 = vmatpush3.bf16.msra.mxu1 %v18348_v39  ;;  %16791 = vmatprep.mubr.msk.f32.mxu1 %vm20031_vm0, %v20032_v8 }
 0x4c4   : > { %18350 = vmatprep.subr.bf16.mxu1 %v20030_v1 }
 0x4c7   : > { %18352 = vmatpush3.bf16.msra.mxu1 %v18351_v43 }
 0x4c8   : > { %18353 = vmatprep.subr.bf16.mxu1 %v20030_v1 }
 0x4ca   : > { %16792 = vmatmul.mubr.msk.f32.vlgmr.msra.gmra.mrb[2].mxu1 %vm1875_vm5, %v3015_v46 }
 0x4cb   : > { %16798 = vmatprep.mubr.msk.f32.mxu1 %vm20031_vm0, %v20032_v8  ;;  %18355 = vmatpush3.bf16.msra.mxu1 %v20698_v52 }
 0x4cc   : > { %18380 = vmatprep.subr.bf16.mxu1 %v20030_v1 }
 0x4ce   : > { %16799 = vmatmul.mubr.f32.vlgmr.msra.gmra.mrb[4].mxu1 %v20032_v8 }
 0x4cf   : > { %18382 = vmatpush3.bf16.msra.mxu1 %v20706_v55  ;;  %16852 = vmatprep.mubr.msk.f32.mxu1 %vm20031_vm0, %v20032_v8 }
 0x4d0   : > { %18383 = vmatprep.subr.bf16.mxu1 %v20030_v1 }
 0x59d   : > { %v3084_v58 = vpop.f32.mrb[2].mxu1 }
 0x59e   : > { %v3095_v59 = vmul.f32 %v15675_v56, %v3084_v58  ;;  %v16793_v60 = vpop.f32.mrb[3].mxu1 }
 0x5a0   : > { %v3102_v62 = vadd.f32 %v15676_v57, %v3095_v59 }
 0x5a1   : > { %v3194_v9 = vpop.f32.mrb[4].mxu1 }
 0x5a2   : > { %v20718_v63 = vmax.f32 %v3102_v62, 0.0  ;;  %v16800_v10 = vpop.f32.mrb[5].mxu1 }
 0x5a4   : > { %3104 = vst.msk [vmem:[#allocation2] sm:$0xff] %vm1875_vm5, %v20718_v63  ;;  %16810 = vmatmul.mubr.msk.f32.vlgmr.msra.gmra.mrb[4].mxu0 %vm1875_vm5, %v20718_v63  ;;  %v3560_v58 = vrot.slane %v20718_v63, 1 }
 0x5a5   : > { %18364 = vmatpush3.bf16.msra.mxu0 %v20706_v55  ;;  %16816 = vmatprep.mubr.msk.f32.mxu0 %vm20031_vm0, %v20032_v8 }
 0x5a6   : > { %18365 = vmatprep.subr.bf16.mxu0 %v20030_v1 }
 0x5a8   : > { %16817 = vmatmul.mubr.f32.vlgmr.msra.gmra.mrb[6].mxu0 %v20032_v8 }
 0x5a9   : > { %18367 = vmatpush3.bf16.msra.mxu0 %v20730_v3  ;;  %16827 = vmatprep.mubr.msk.f32.mxu0 %vm20031_vm0, %v20032_v8 }
 0x5aa   : > { %18368 = vmatprep.subr.bf16.mxu0 %v20030_v1 }
 0x5ab   : > { %v3309_v7 = vld [vmem:[%s3308_s4] sm:$0x1]  ;;  %s3296_s4 = scalar_select %p3124_p0, 1, 0 }
 0x5ad   : > { %18370 = vmatpush3.bf16.msra.mxu0 %v20742_v6  ;;  %v3297_v46 = vstv %s3296_s4  ;;  %s22916_s4 = sadd.s32 4294967294, %s20715_s28 }
 0x5ae   : > { %18371 = vmatprep.subr.bf16.mxu0 %v20030_v1  ;;  %vm20780_vm11 = vcmp.eq.s32.totalorder %v3297_v46, 1 }
 0x5b0   : > { %16828 = vmatmul.mubr.msk.f32.vlgmr.msra.gmra.mrb[8].mxu0 %vm1875_vm5, %v3309_v7 }
 0x5b1   : > { %18373 = vmatpush3.bf16.msra.mxu0 %v20698_v52  ;;  %16834 = vmatprep.mubr.msk.f32.mxu0 %vm20031_vm0, %v20032_v8 }
 0x5b2   : > { %18374 = vmatprep.subr.bf16.mxu0 %v20030_v1 }
 0x677   : > { %v3267_v12 = vpop.f32.mrb[4].mxu0 }
 0x678   : > { %v3268_v13 = vadd.f32 %v3267_v12, %v3194_v9  ;;  %v16811_v15 = vpop.f32.mrb[5].mxu0 }
 0x67a   : > { %v3271_v16 = vadd.f32 %v3268_v13, %v20755_v11 }
 0x67b   : > { %v3376_v17 = vpop.f32.mrb[6].mxu0 }
 0x67c   : > { %19370 = vtanh.f32 %v3271_v16  ;;  %v16818_v18 = vpop.f32.mrb[7].mxu0  ;;  %v15678_v26 = vmul.f32 -1.442695, %v3271_v16 }
 0x683   : > { %v3449_v20 = vpop.f32.mrb[8].mxu0 }
 0x684   : > { %v3450_v21 = vadd.f32 %v3449_v20, %v3376_v17  ;;  %v16829_v22 = vpop.f32.mrb[9].mxu0 }
 0x686   : > { %v19371_v23 = vpop.eup %19370  ;;  %v3453_v24 = vadd.f32 %v3450_v21, %v20759_v19 }
 0x687   : > { %3281 = vrot.lane.b32.xlu1 %v19371_v23, %s22919_s5 }
 0x688   : > { %19372 = vtanh.f32 %v3453_v24  ;;  %v15681_v27 = vmul.f32 -1.442695, %v3453_v24 }
 0x689   : > { %19374 = vpow2.f32 %v15678_v26 }
 0x68a   : > { %19376 = vpow2.f32 %v15681_v27 }
 0x692   : > { %v19373_v25 = vpop.eup %19372 }
 0x693   : > { %3463 = vrot.lane.b32.xlu0 %v19373_v25, %s22919_s5  ;;  %v19375_v28 = vpop.eup %19374 }
 0x694   : > { %v3275_v29 = vadd.f32 1.0, %v19375_v28  ;;  %v19377_v30 = vpop.eup %19376 }
 0x695   : > { %v3457_v31 = vadd.f32 1.0, %v19377_v30 }
 0x696   : > { %19378 = vrcp.f32 %v3275_v29 }
 0x697   : > { %19380 = vrcp.f32 %v3457_v31 }
 0x6a0   : > { %v19379_v32 = vpop.eup %19378 }
 0x6a1   : > { %v19381_v35 = vpop.eup %19380  ;;  %v3279_v38 = vmul.f32 0.0, %v19379_v32 }
 0x6a2   : > { %v3461_v41 = vmul.f32 0.0, %v19381_v35 }
 0x6f9   : > { %v3282_v33 = vpop.permute.xlu1 %3281 }
 0x6fa   : > { %v3284_v34 = vmul.f32 %v19379_v32, %v3282_v33 }
 0x6fc   : > { %3286 = vrot.lane.b32.xlu0 %v3284_v34, %s22917_s26 }
 0x705   : > { %v3464_v36 = vpop.permute.xlu0 %3463 }
 0x706   : > { %v3466_v37 = vmul.f32 %v19381_v35, %v3464_v36 }
 0x708   : > { %3468 = vrot.lane.b32.xlu1 %v3466_v37, %s22917_s26 }
 0x76e   : > { %v3287_v39 = vpop.permute.xlu0 %3286 }
 0x76f   : > { %v20766_v40 = vadd.f32 %v3287_v39, %v3279_v38 }
 0x771   : > { %19382 = vtanh.f32 %v20766_v40 }
 0x77a   : > { %v3469_v42 = vpop.permute.xlu1 %3468 }
 0x77b   : > { %v19383_v43 = vpop.eup %19382  ;;  %v20769_v44 = vadd.f32 %v3469_v42, %v3461_v41 }
 0x77c   : > { %3292 = vrot.lane.b32.xlu0 %v19383_v43, %s22914_s2 }
 0x77d   : > { %19384 = vtanh.f32 %v20769_v44  ;;  %v20849_v36 = vsel %vm20780_vm11, %v20769_v44, 0.0 }
 0x787   : > { %v19385_v45 = vpop.eup %19384 }
 0x788   : > { %3474 = vrot.lane.b32.xlu1 %v19385_v45, %s22914_s2 }
 0x7ee   : > { %v3293_v47 = vpop.permute.xlu0 %3292 }
 0x7ef   : > { %v3295_v48 = vmul.f32 %v19379_v32, %v3293_v47  ;;  %v20840_v32 = vsel %vm20780_vm11, %v20766_v40, 0.0 }
 0x7f1   : > { %v20786_v51 = vsel %vm20780_vm11, %v3295_v48, 0.0 }
 0x7f2   : > { %3302 = vrot.lane.b32.xlu0 %v20786_v51, %s22912_s7 }
 0x7fa   : > { %v3475_v53 = vpop.permute.xlu1 %3474 }
 0x7fb   : > { %v20790_v54 = vmul.f32 %v19381_v35, %v3475_v53 }
 0x7fd   : > { %v20795_v56 = vsel %vm20780_vm11, %v20790_v54, 0.0 }
 0x7fe   : > { %3674 = vrot.lane.b32.xlu1 %v20795_v56, %s22912_s7  ;;  %s3670_s7 = scalar_select %p3487_p1, %s22916_s4, 0 }
 0x7ff   : > { %s23025_s4 = smov 80  }
 0x800   : > { %s3671_s2 = scalar_lea.vmem [#allocation2], %s3670_s7  ;;  %s23022_s7 = smov 32  }
 0x801   : > { %v3672_v60 = vld [vmem:[%s3671_s2] sm:$0x1]  ;;  %s3658_s2 = scalar_select %p3487_p1, 1, 0 }
 0x803   : > { %v3659_v42 = vstv %s3658_s2  ;;  %s22921_s2 = sadd.s32 4294967293, %s20715_s28 }
 0x804   : > { %vm20861_vm12 = vcmp.eq.s32.totalorder %v3659_v42, 1 }
 0x864   : > { %v3303_v57 = vpop.permute.xlu0 %3302 }
 0x865   : > { %3305 = vst.msk [vmem:[#allocation3] sm:$0x1] %vm3108_vm10, %v3303_v57  ;;  %16835 = vmatmul.mubr.msk.f32.vlgmr.msra.gmra.mrb[10].mxu0 %vm3105_vm9, %v3303_v57 }
 0x866   : > { %18376 = vmatpush3.bf16.msra.mxu0 %v20641_v61  ;;  %16845 = vmatprep.mubr.msk.f32.mxu0 %vm20031_vm0, %v20032_v8 }
 0x867   : > { %18377 = vmatprep.subr.bf16.mxu0 %v20030_v1 }
 0x86a   : > { %18379 = vmatpush3.bf16.msra.mxu0 %v20694_v49 }
 0x86b   : > { %18389 = vmatprep.subr.bf16.mxu0 %v20030_v1 }
 0x86d   : > { %16846 = vmatmul.mubr.msk.f32.vlgmr.msra.gmra.mrb[12].mxu0 %vm1875_vm5, %v3560_v58 }
 0x86e   : > { %18391 = vmatpush3.bf16.msra.mxu0 %v20698_v52  ;;  %16870 = vmatprep.mubr.msk.f32.mxu0 %vm20031_vm0, %v20032_v8 }
 0x86f   : > { %18392 = vmatprep.subr.bf16.mxu0 %v20030_v1 }
 0x870   : > { %v3675_v59 = vpop.permute.xlu1 %3674 }
 0x871   : > { %16853 = vmatmul.mubr.msk.f32.vlgmr.msra.gmra.mrb[6].mxu1 %vm3105_vm9, %v3675_v59 }
 0x872   : > { %18385 = vmatpush3.bf16.msra.mxu1 %v20730_v3  ;;  %16863 = vmatprep.mubr.msk.f32.mxu1 %vm20031_vm0, %v20032_v8 }
 0x873   : > { %18386 = vmatprep.subr.bf16.mxu1 %v20030_v1 }
 0x876   : > { %18388 = vmatpush3.bf16.msra.mxu1 %v20742_v6 }
 0x877   : > { %18398 = vmatprep.subr.bf16.mxu1 %v20030_v1 }
 0x879   : > { %16864 = vmatmul.mubr.msk.f32.vlgmr.msra.gmra.mrb[8].mxu1 %vm1875_vm5, %v3672_v60 }
 0x87a   : > { %18400 = vmatpush3.bf16.msra.mxu1 %v20706_v55  ;;  %16888 = vmatprep.mubr.msk.f32.mxu1 %vm20031_vm0, %v20032_v8 }
 0x87b   : > { %18401 = vmatprep.subr.bf16.mxu1 %v20030_v1 }
 0x938   : > { %v3556_v62 = vpop.f32.mrb[10].mxu0 }
 0x939   : > { %v16836_v0 = vpop.f32.mrb[11].mxu0 }
 0x940   : > { %v3629_v2 = vpop.f32.mrb[12].mxu0 }
 0x941   : > { %v3630_v4 = vadd.f32 %v3629_v2, %v3556_v62  ;;  %v16847_v5 = vpop.f32.mrb[13].mxu0 }
 0x943   : > { %v3633_v7 = vadd.f32 %v3630_v4, %v20755_v11 }
 0x944   : > { %v3744_v9 = vpop.f32.mrb[6].mxu1 }
 0x945   : > { %19386 = vtanh.f32 %v3633_v7  ;;  %v16854_v10 = vpop.f32.mrb[7].mxu1  ;;  %v15684_v20 = vmul.f32 -1.442695, %v3633_v7 }
 0x94c   : > { %v3817_v12 = vpop.f32.mrb[8].mxu1 }
 0x94d   : > { %v3818_v13 = vadd.f32 %v3817_v12, %v3744_v9  ;;  %v16865_v15 = vpop.f32.mrb[9].mxu1 }
 0x94f   : > { %v19387_v16 = vpop.eup %19386  ;;  %v3821_v17 = vadd.f32 %v3818_v13, %v20759_v19 }
 0x950   : > { %3643 = vrot.lane.b32.xlu0 %v19387_v16, %s22919_s5 }
 0x951   : > { %19388 = vtanh.f32 %v3821_v17  ;;  %v15688_v21 = vmul.f32 -1.442695, %v3821_v17 }
 0x952   : > { %19390 = vpow2.f32 %v15684_v20 }
 0x953   : > { %19392 = vpow2.f32 %v15688_v21 }
 0x95b   : > { %v19389_v18 = vpop.eup %19388 }
 0x95c   : > { %3831 = vrot.lane.b32.xlu1 %v19389_v18, %s22919_s5  ;;  %v19391_v22 = vpop.eup %19390 }
 0x95d   : > { %v3637_v23 = vadd.f32 1.0, %v19391_v22  ;;  %v19393_v24 = vpop.eup %19392 }
 0x95e   : > { %v3825_v25 = vadd.f32 1.0, %v19393_v24 }
 0x95f   : > { %19394 = vrcp.f32 %v3637_v23 }
 0x960   : > { %19396 = vrcp.f32 %v3825_v25 }
 0x969   : > { %v19395_v26 = vpop.eup %19394 }
 0x96a   : > { %v19397_v29 = vpop.eup %19396  ;;  %v3641_v33 = vmul.f32 %v19395_v26, %v20840_v32 }
 0x96b   : > { %v3829_v37 = vmul.f32 %v19397_v29, %v20849_v36 }
 0x9c2   : > { %v3644_v27 = vpop.permute.xlu0 %3643 }
 0x9c3   : > { %v3646_v28 = vmul.f32 %v19395_v26, %v3644_v27 }
 0x9c5   : > { %3648 = vrot.lane.b32.xlu0 %v3646_v28, %s22917_s26 }
 0x9ce   : > { %v3832_v30 = vpop.permute.xlu1 %3831 }
 0x9cf   : > { %v3834_v31 = vmul.f32 %v19397_v29, %v3832_v30 }
 0x9d1   : > { %3836 = vrot.lane.b32.xlu1 %v3834_v31, %s22917_s26  ;;  %s4041_s26 = scalar_select %p3855_p2, %s22921_s2, 0 }
 0x9d2   : > { %s4029_s2 = scalar_select %p3855_p2, 1, 0 }
 0x9d3   : > { %s4042_s5 = scalar_lea.vmem [#allocation2], %s4041_s26  ;;  %s23027_s26 = smov 16  }
 0x9d4   : > { %v4043_v57 = vld [vmem:[%s4042_s5] sm:$0x1]  ;;  %s23026_s5 = smov 96  }
 0xa37   : > { %v3649_v34 = vpop.permute.xlu0 %3648 }
 0xa38   : > { %v20843_v35 = vadd.f32 %v3649_v34, %v3641_v33 }
 0xa3a   : > { %19398 = vtanh.f32 %v20843_v35 }
 0xa43   : > { %v3837_v38 = vpop.permute.xlu1 %3836 }
 0xa44   : > { %v19399_v39 = vpop.eup %19398  ;;  %v20852_v41 = vadd.f32 %v3837_v38, %v3829_v37 }
 0xa45   : > { %3654 = vrot.lane.b32.xlu0 %v19399_v39, %s23022_s7 }
 0xa46   : > { %19400 = vtanh.f32 %v20852_v41  ;;  %v20934_v34 = vsel %vm20861_vm12, %v20852_v41, %v20849_v36 }
 0xa50   : > { %v19401_v40 = vpop.eup %19400 }
 0xa51   : > { %3842 = vrot.lane.b32.xlu1 %v19401_v40, %s23022_s7 }
 0xab7   : > { %v3655_v43 = vpop.permute.xlu0 %3654 }
 0xab8   : > { %v20859_v45 = vmul.f32 %v19395_v26, %v3655_v43 }
 0xaba   : > { %v20869_v46 = vsel %vm20861_vm12, %v20859_v45, %v20786_v51  ;;  %v3931_v51 = vrot.slane %v20718_v63, 2 }
 0xabb   : > { %3857 = vrot.lane.b32.xlu0 %v20869_v46, %s23025_s4 }
 0xac3   : > { %v3843_v47 = vpop.permute.xlu1 %3842 }
 0xac4   : > { %v20873_v48 = vmul.f32 %v19397_v29, %v3843_v47  ;;  %v20924_v29 = vsel %vm20861_vm12, %v20843_v35, %v20840_v32  ;;  %v4030_v35 = vstv %s4029_s2  ;;  %s22924_s2 = sadd.s32 4294967292, %s20715_s28 }
 0xac5   : > { %vm20946_vm13 = vcmp.eq.s32.totalorder %v4030_v35, 1  ;;  %s4412_s1 = scalar_select %p4226_p3, %s22924_s2, 0 }
 0xac6   : > { %v20879_v50 = vsel %vm20861_vm12, %v20873_v48, %v20795_v56 }
 0xac7   : > { %4045 = vrot.lane.b32.xlu1 %v20879_v50, %s23025_s4  ;;  %s4413_s3 = scalar_lea.vmem [#allocation2], %s4412_s1  ;;  %s22925_s1 = sadd.s32 4294967291, %s20715_s28 }
 0xb2d   : > { %v3858_v53 = vpop.permute.xlu0 %3857 }
 0xb2e   : > { %16871 = vmatmul.mubr.msk.f32.vlgmr.msra.gmra.mrb[14].mxu0 %vm3105_vm9, %v3858_v53 }
 0xb2f   : > { %18394 = vmatpush3.bf16.msra.mxu0 %v20641_v61  ;;  %16881 = vmatprep.mubr.msk.f32.mxu0 %vm20031_vm0, %v20032_v8 }
 0xb30   : > { %18395 = vmatprep.subr.bf16.mxu0 %v20030_v1 }
 0xb33   : > { %18397 = vmatpush3.bf16.msra.mxu0 %v20694_v49 }
 0xb34   : > { %18407 = vmatprep.subr.bf16.mxu0 %v20030_v1 }
 0xb36   : > { %16882 = vmatmul.mubr.msk.f32.vlgmr.msra.gmra.mrb[16].mxu0 %vm1875_vm5, %v3931_v51 }
 0xb37   : > { %18409 = vmatpush3.bf16.msra.mxu0 %v20698_v52  ;;  %16906 = vmatprep.mubr.msk.f32.mxu0 %vm20031_vm0, %v20032_v8 }
 0xb38   : > { %18410 = vmatprep.subr.bf16.mxu0 %v20030_v1 }
 0xb39   : > { %v4046_v56 = vpop.permute.xlu1 %4045 }
 0xb3a   : > { %16889 = vmatmul.mubr.msk.f32.vlgmr.msra.gmra.mrb[10].mxu1 %vm3105_vm9, %v4046_v56 }
 0xb3b   : > { %18403 = vmatpush3.bf16.msra.mxu1 %v20730_v3  ;;  %16899 = vmatprep.mubr.msk.f32.mxu1 %vm20031_vm0, %v20032_v8 }
 0xb3c   : > { %18404 = vmatprep.subr.bf16.mxu1 %v20030_v1 }
 0xb3f   : > { %18406 = vmatpush3.bf16.msra.mxu1 %v20742_v6 }
 0xb40   : > { %18416 = vmatprep.subr.bf16.mxu1 %v20030_v1 }
 0xb42   : > { %16900 = vmatmul.mubr.msk.f32.vlgmr.msra.gmra.mrb[12].mxu1 %vm1875_vm5, %v4043_v57  ;;  %v4414_v57 = vld [vmem:[%s4413_s3] sm:$0x1]  ;;  %s4400_s3 = scalar_select %p4226_p3, 1, 0 }
 0xb43   : > { %18418 = vmatpush3.bf16.msra.mxu1 %v20706_v55  ;;  %16924 = vmatprep.mubr.msk.f32.mxu1 %vm20031_vm0, %v20032_v8 }
 0xb44   : > { %18419 = vmatprep.subr.bf16.mxu1 %v20030_v1 }
 0xc01   : > { %v3927_v58 = vpop.f32.mrb[14].mxu0 }
 0xc02   : > { %v16872_v59 = vpop.f32.mrb[15].mxu0 }
 0xc09   : > { %v4000_v60 = vpop.f32.mrb[16].mxu0 }
 0xc0a   : > { %v4001_v62 = vadd.f32 %v4000_v60, %v3927_v58  ;;  %v16883_v0 = vpop.f32.mrb[17].mxu0 }
 0xc0c   : > { %v4004_v2 = vadd.f32 %v4001_v62, %v20755_v11 }
 0xc0d   : > { %v4115_v4 = vpop.f32.mrb[10].mxu1 }
 0xc0e   : > { %19402 = vtanh.f32 %v4004_v2  ;;  %v16890_v5 = vpop.f32.mrb[11].mxu1  ;;  %v15691_v16 = vmul.f32 -1.442695, %v4004_v2 }
 0xc15   : > { %v4188_v7 = vpop.f32.mrb[12].mxu1 }
 0xc16   : > { %v4189_v9 = vadd.f32 %v4188_v7, %v4115_v4  ;;  %v16901_v10 = vpop.f32.mrb[13].mxu1 }
 0xc18   : > { %v19403_v12 = vpop.eup %19402  ;;  %v4192_v13 = vadd.f32 %v4189_v9, %v20759_v19 }
 0xc19   : > { %4014 = vrot.lane.b32.xlu0 %v19403_v12, %s23026_s5 }
 0xc1a   : > { %19404 = vtanh.f32 %v4192_v13  ;;  %v15695_v17 = vmul.f32 -1.442695, %v4192_v13 }
 0xc1b   : > { %19406 = vpow2.f32 %v15691_v16 }
 0xc1c   : > { %19408 = vpow2.f32 %v15695_v17 }
 0xc24   : > { %v19405_v15 = vpop.eup %19404 }
 0xc25   : > { %4202 = vrot.lane.b32.xlu1 %v19405_v15, %s23026_s5  ;;  %v19407_v18 = vpop.eup %19406 }
 0xc26   : > { %v4008_v20 = vadd.f32 1.0, %v19407_v18  ;;  %v19409_v21 = vpop.eup %19408 }
 0xc27   : > { %v4196_v22 = vadd.f32 1.0, %v19409_v21 }
 0xc28   : > { %19410 = vrcp.f32 %v4008_v20 }
 0xc29   : > { %19412 = vrcp.f32 %v4196_v22 }
 0xc32   : > { %v19411_v23 = vpop.eup %19410 }
 0xc33   : > { %v19413_v26 = vpop.eup %19412  ;;  %v4012_v30 = vmul.f32 %v19411_v23, %v20924_v29 }
 0xc34   : > { %v4200_v37 = vmul.f32 %v19413_v26, %v20934_v34 }
 0xc8b   : > { %v4015_v24 = vpop.permute.xlu0 %4014 }
 0xc8c   : > { %v4017_v25 = vmul.f32 %v19411_v23, %v4015_v24 }
 0xc8e   : > { %4019 = vrot.lane.b32.xlu0 %v4017_v25, %s23027_s26 }
 0xc97   : > { %v4203_v27 = vpop.permute.xlu1 %4202 }
 0xc98   : > { %v4205_v28 = vmul.f32 %v19413_v26, %v4203_v27 }
 0xc9a   : > { %4207 = vrot.lane.b32.xlu1 %v4205_v28, %s23027_s26 }
 0xd00   : > { %v4020_v31 = vpop.permute.xlu0 %4019 }
 0xd01   : > { %v20927_v33 = vadd.f32 %v4020_v31, %v4012_v30 }
 0xd03   : > { %19414 = vtanh.f32 %v20927_v33  ;;  %v21009_v30 = vsel %vm20946_vm13, %v20927_v33, %v20924_v29  ;;  %v4401_v33 = vstv %s4400_s3  ;;  %s4783_s3 = scalar_select %p4597_p7, %s22925_s1, 0 }
 0xd04   : > { %vm21031_vm14 = vcmp.eq.s32.totalorder %v4401_v33, 1 }
 0xd05   : > { %s4784_s2 = scalar_lea.vmem [#allocation2], %s4783_s3  ;;  %s22926_s3 = sadd.s32 4294967290, %s20715_s28 }
 0xd0c   : > { %v4208_v38 = vpop.permute.xlu1 %4207 }
 0xd0d   : > { %v19415_v39 = vpop.eup %19414  ;;  %v20937_v40 = vadd.f32 %v4208_v38, %v4200_v37 }
 0xd0e   : > { %4025 = vrot.lane.b32.xlu0 %v19415_v39, %s23022_s7 }
 0xd0f   : > { %19416 = vtanh.f32 %v20937_v40  ;;  %v21019_v39 = vsel %vm20946_vm13, %v20937_v40, %v20934_v34 }
 0xd19   : > { %v19417_v32 = vpop.eup %19416 }
 0xd1a   : > { %4213 = vrot.lane.b32.xlu1 %v19417_v32, %s23022_s7 }
 0xd80   : > { %v4026_v42 = vpop.permute.xlu0 %4025 }
 0xd81   : > { %v20944_v43 = vmul.f32 %v19411_v23, %v4026_v42 }
 0xd83   : > { %v20954_v41 = vsel %vm20946_vm13, %v20944_v43, %v20869_v46  ;;  %v4302_v46 = vrot.slane %v20718_v63, 3 }
 0xd84   : > { %4228 = vrot.lane.b32.xlu0 %v20954_v41, %s23025_s4 }
 0xd8c   : > { %v4214_v47 = vpop.permute.xlu1 %4213 }
 0xd8d   : > { %v20958_v53 = vmul.f32 %v19413_v26, %v4214_v47 }
 0xd8f   : > { %v20964_v51 = vsel %vm20946_vm13, %v20958_v53, %v20879_v50 }
 0xd90   : > { %4416 = vrot.lane.b32.xlu1 %v20964_v51, %s23025_s4 }
 0xdf6   : > { %v4229_v56 = vpop.permute.xlu0 %4228 }
 0xdf7   : > { %16907 = vmatmul.mubr.msk.f32.vlgmr.msra.gmra.mrb[18].mxu0 %vm3105_vm9, %v4229_v56 }
 0xdf8   : > { %18412 = vmatpush3.bf16.msra.mxu0 %v20641_v61  ;;  %16917 = vmatprep.mubr.msk.f32.mxu0 %vm20031_vm0, %v20032_v8 }
 0xdf9   : > { %18413 = vmatprep.subr.bf16.mxu0 %v20030_v1 }
 0xdfc   : > { %18415 = vmatpush3.bf16.msra.mxu0 %v20694_v49 }
 0xdfd   : > { %18425 = vmatprep.subr.bf16.mxu0 %v20030_v1 }
 0xdff   : > { %16918 = vmatmul.mubr.msk.f32.vlgmr.msra.gmra.mrb[20].mxu0 %vm1875_vm5, %v4302_v46 }
 0xe00   : > { %18427 = vmatpush3.bf16.msra.mxu0 %v20698_v52  ;;  %16942 = vmatprep.mubr.msk.f32.mxu0 %vm20031_vm0, %v20032_v8 }
 0xe01   : > { %18428 = vmatprep.subr.bf16.mxu0 %v20030_v1 }
 0xe02   : > { %v4417_v50 = vpop.permute.xlu1 %4416 }
 0xe03   : > { %16925 = vmatmul.mubr.msk.f32.vlgmr.msra.gmra.mrb[14].mxu1 %vm3105_vm9, %v4417_v50 }
 0xe04   : > { %18421 = vmatpush3.bf16.msra.mxu1 %v20730_v3  ;;  %16935 = vmatprep.mubr.msk.f32.mxu1 %vm20031_vm0, %v20032_v8 }
 0xe05   : > { %18422 = vmatprep.subr.bf16.mxu1 %v20030_v1 }
 0xe08   : > { %18424 = vmatpush3.bf16.msra.mxu1 %v20742_v6 }
 0xe09   : > { %18434 = vmatprep.subr.bf16.mxu1 %v20030_v1 }
 0xe0b   : > { %16936 = vmatmul.mubr.msk.f32.vlgmr.msra.gmra.mrb[16].mxu1 %vm1875_vm5, %v4414_v57 }
 0xe0c   : > { %18436 = vmatpush3.bf16.msra.mxu1 %v20706_v55  ;;  %16960 = vmatprep.mubr.msk.f32.mxu1 %vm20031_vm0, %v20032_v8 }
 0xe0d   : > { %18437 = vmatprep.subr.bf16.mxu1 %v20030_v1 }
 0xeca   : > { %v4298_v58 = vpop.f32.mrb[18].mxu0 }
 0xecb   : > { %v16908_v59 = vpop.f32.mrb[19].mxu0 }
 0xed2   : > { %v4371_v60 = vpop.f32.mrb[20].mxu0 }
 0xed3   : > { %v4372_v62 = vadd.f32 %v4371_v60, %v4298_v58  ;;  %v16919_v0 = vpop.f32.mrb[21].mxu0  ;;  %v4785_v60 = vld [vmem:[%s4784_s2] sm:$0x1]  ;;  %s4771_s2 = scalar_select %p4597_p7, 1, 0 }
 0xed5   : > { %v4375_v2 = vadd.f32 %v4372_v62, %v20755_v11 }
 0xed6   : > { %v4486_v4 = vpop.f32.mrb[14].mxu1 }
 0xed7   : > { %19418 = vtanh.f32 %v4375_v2  ;;  %v16926_v5 = vpop.f32.mrb[15].mxu1  ;;  %v15698_v16 = vmul.f32 -1.442695, %v4375_v2 }
 0xede   : > { %v4559_v7 = vpop.f32.mrb[16].mxu1 }
 0xedf   : > { %v4560_v9 = vadd.f32 %v4559_v7, %v4486_v4  ;;  %v16937_v10 = vpop.f32.mrb[17].mxu1 }
 0xee1   : > { %v19419_v12 = vpop.eup %19418  ;;  %v4563_v13 = vadd.f32 %v4560_v9, %v20759_v19 }
 0xee2   : > { %4385 = vrot.lane.b32.xlu0 %v19419_v12, %s23026_s5 }
 0xee3   : > { %19420 = vtanh.f32 %v4563_v13  ;;  %v15702_v17 = vmul.f32 -1.442695, %v4563_v13 }
 0xee4   : > { %19422 = vpow2.f32 %v15698_v16 }
 0xee5   : > { %19424 = vpow2.f32 %v15702_v17 }
 0xeed   : > { %v19421_v15 = vpop.eup %19420 }
 0xeee   : > { %4573 = vrot.lane.b32.xlu1 %v19421_v15, %s23026_s5  ;;  %v19423_v18 = vpop.eup %19422 }
 0xeef   : > { %v4379_v20 = vadd.f32 1.0, %v19423_v18  ;;  %v19425_v21 = vpop.eup %19424 }
 0xef0   : > { %v4567_v22 = vadd.f32 1.0, %v19425_v21 }
 0xef1   : > { %19426 = vrcp.f32 %v4379_v20 }
 0xef2   : > { %19428 = vrcp.f32 %v4567_v22 }
 0xefb   : > { %v19427_v23 = vpop.eup %19426 }
 0xefc   : > { %v19429_v26 = vpop.eup %19428  ;;  %v4383_v31 = vmul.f32 %v19427_v23, %v21009_v30 }
 0xefd   : > { %v4571_v32 = vmul.f32 %v19429_v26, %v21019_v39 }
 0xf54   : > { %v4386_v24 = vpop.permute.xlu0 %4385 }
 0xf55   : > { %v4388_v25 = vmul.f32 %v19427_v23, %v4386_v24 }
 0xf57   : > { %4390 = vrot.lane.b32.xlu0 %v4388_v25, %s23027_s26 }
 0xf60   : > { %v4574_v27 = vpop.permute.xlu1 %4573 }
 0xf61   : > { %v4576_v28 = vmul.f32 %v19429_v26, %v4574_v27 }
 0xf63   : > { %4578 = vrot.lane.b32.xlu1 %v4576_v28, %s23027_s26 }
 0xfc9   : > { %v4391_v37 = vpop.permute.xlu0 %4390 }
 0xfca   : > { %v21012_v38 = vadd.f32 %v4391_v37, %v4383_v31 }
 0xfcc   : > { %19430 = vtanh.f32 %v21012_v38 }
 0xfd5   : > { %v4579_v35 = vpop.permute.xlu1 %4578 }
 0xfd6   : > { %v19431_v42 = vpop.eup %19430  ;;  %v21022_v47 = vadd.f32 %v4579_v35, %v4571_v32  ;;  %v21094_v35 = vsel %vm21031_vm14, %v21012_v38, %v21009_v30  ;;  %v4772_v38 = vstv %s4771_s2  ;;  %s5154_s2 = scalar_select %p4968_p12, %s22926_s3, 0 }
 0xfd7   : > { %4396 = vrot.lane.b32.xlu0 %v19431_v42, %s23022_s7  ;;  %vm21116_vm15 = vcmp.eq.s32.totalorder %v4772_v38, 1 }
 0xfd8   : > { %19432 = vtanh.f32 %v21022_v47  ;;  %s5155_s1 = scalar_lea.vmem [#allocation2], %s5154_s2  ;;  %s22927_s2 = sadd.s32 4294967289, %s20715_s28 }
 0xfe2   : > { %v19433_v29 = vpop.eup %19432 }
 0xfe3   : > { %4584 = vrot.lane.b32.xlu1 %v19433_v29, %s23022_s7 }
0x1049   : > { %v4397_v56 = vpop.permute.xlu0 %4396 }
0x104a   : > { %v21029_v46 = vmul.f32 %v19427_v23, %v4397_v56  ;;  %v21104_v56 = vsel %vm21031_vm14, %v21022_v47, %v21019_v39 }
0x104c   : > { %v21039_v40 = vsel %vm21031_vm14, %v21029_v46, %v20954_v41  ;;  %v4673_v41 = vrot.slane %v20718_v63, 4 }
0x104d   : > { %4599 = vrot.lane.b32.xlu0 %v21039_v40, %s23025_s4 }
0x1055   : > { %v4585_v50 = vpop.permute.xlu1 %4584 }
0x1056   : > { %v21043_v57 = vmul.f32 %v19429_v26, %v4585_v50 }
0x1058   : > { %v21049_v58 = vsel %vm21031_vm14, %v21043_v57, %v20964_v51 }
0x1059   : > { %4787 = vrot.lane.b32.xlu1 %v21049_v58, %s23025_s4 }
0x10bf   : > { %v4600_v59 = vpop.permute.xlu0 %4599 }
0x10c0   : > { %16943 = vmatmul.mubr.msk.f32.vlgmr.msra.gmra.mrb[22].mxu0 %vm3105_vm9, %v4600_v59 }
0x10c1   : > { %18430 = vmatpush3.bf16.msra.mxu0 %v20641_v61  ;;  %16953 = vmatprep.mubr.msk.f32.mxu0 %vm20031_vm0, %v20032_v8 }
0x10c2   : > { %18431 = vmatprep.subr.bf16.mxu0 %v20030_v1 }
0x10c5   : > { %18433 = vmatpush3.bf16.msra.mxu0 %v20694_v49 }
0x10c6   : > { %18443 = vmatprep.subr.bf16.mxu0 %v20030_v1 }
0x10c8   : > { %16954 = vmatmul.mubr.msk.f32.vlgmr.msra.gmra.mrb[24].mxu0 %vm1875_vm5, %v4673_v41 }
0x10c9   : > { %18445 = vmatpush3.bf16.msra.mxu0 %v20698_v52  ;;  %16978 = vmatprep.mubr.msk.f32.mxu0 %vm20031_vm0, %v20032_v8 }
0x10ca   : > { %18446 = vmatprep.subr.bf16.mxu0 %v20030_v1 }
0x10cb   : > { %v4788_v51 = vpop.permute.xlu1 %4787 }
0x10cc   : > { %16961 = vmatmul.mubr.msk.f32.vlgmr.msra.gmra.mrb[18].mxu1 %vm3105_vm9, %v4788_v51 }
0x10cd   : > { %18439 = vmatpush3.bf16.msra.mxu1 %v20730_v3  ;;  %16971 = vmatprep.mubr.msk.f32.mxu1 %vm20031_vm0, %v20032_v8 }
0x10ce   : > { %18440 = vmatprep.subr.bf16.mxu1 %v20030_v1 }
0x10d1   : > { %18442 = vmatpush3.bf16.msra.mxu1 %v20742_v6 }
0x10d2   : > { %18452 = vmatprep.subr.bf16.mxu1 %v20030_v1 }
0x10d4   : > { %16972 = vmatmul.mubr.msk.f32.vlgmr.msra.gmra.mrb[20].mxu1 %vm1875_vm5, %v4785_v60 }
0x10d5   : > { %18454 = vmatpush3.bf16.msra.mxu1 %v20706_v55  ;;  %16996 = vmatprep.mubr.msk.f32.mxu1 %vm20031_vm0, %v20032_v8 }
0x10d6   : > { %18455 = vmatprep.subr.bf16.mxu1 %v20030_v1 }
0x1193   : > { %v4669_v62 = vpop.f32.mrb[22].mxu0 }
0x1194   : > { %v16944_v0 = vpop.f32.mrb[23].mxu0 }
0x119b   : > { %v4742_v2 = vpop.f32.mrb[24].mxu0 }
0x119c   : > { %v4743_v4 = vadd.f32 %v4742_v2, %v4669_v62  ;;  %v16955_v5 = vpop.f32.mrb[25].mxu0 }
0x119e   : > { %v4746_v7 = vadd.f32 %v4743_v4, %v20755_v11 }
0x119f   : > { %v4857_v9 = vpop.f32.mrb[18].mxu1 }
0x11a0   : > { %19434 = vtanh.f32 %v4746_v7  ;;  %v16962_v10 = vpop.f32.mrb[19].mxu1  ;;  %v15705_v20 = vmul.f32 -1.442695, %v4746_v7  ;;  %v5156_v7 = vld [vmem:[%s5155_s1] sm:$0x1] }
0x11a1   : > { %s5142_s1 = scalar_select %p4968_p12, 1, 0 }
0x11a7   : > { %v4930_v12 = vpop.f32.mrb[20].mxu1 }
0x11a8   : > { %v4931_v13 = vadd.f32 %v4930_v12, %v4857_v9  ;;  %v16973_v15 = vpop.f32.mrb[21].mxu1 }
0x11aa   : > { %v19435_v16 = vpop.eup %19434  ;;  %v4934_v17 = vadd.f32 %v4931_v13, %v20759_v19 }
0x11ab   : > { %4756 = vrot.lane.b32.xlu0 %v19435_v16, %s23026_s5 }
0x11ac   : > { %19436 = vtanh.f32 %v4934_v17  ;;  %v15709_v21 = vmul.f32 -1.442695, %v4934_v17 }
0x11ad   : > { %19438 = vpow2.f32 %v15705_v20 }
0x11ae   : > { %19440 = vpow2.f32 %v15709_v21 }
0x11b6   : > { %v19437_v18 = vpop.eup %19436 }
0x11b7   : > { %4944 = vrot.lane.b32.xlu1 %v19437_v18, %s23026_s5  ;;  %v19439_v22 = vpop.eup %19438 }
0x11b8   : > { %v4750_v23 = vadd.f32 1.0, %v19439_v22  ;;  %v19441_v24 = vpop.eup %19440 }
0x11b9   : > { %v4938_v25 = vadd.f32 1.0, %v19441_v24 }
0x11ba   : > { %19442 = vrcp.f32 %v4750_v23 }
0x11bb   : > { %19444 = vrcp.f32 %v4938_v25 }
0x11c4   : > { %v19443_v26 = vpop.eup %19442 }
0x11c5   : > { %v19445_v31 = vpop.eup %19444  ;;  %v4754_v42 = vmul.f32 %v19443_v26, %v21094_v35 }
0x11c6   : > { %v4942_v50 = vmul.f32 %v19445_v31, %v21104_v56 }
0x121d   : > { %v4757_v27 = vpop.permute.xlu0 %4756 }
0x121e   : > { %v4759_v28 = vmul.f32 %v19443_v26, %v4757_v27 }
0x1220   : > { %4761 = vrot.lane.b32.xlu0 %v4759_v28, %s23027_s26 }
0x1229   : > { %v4945_v37 = vpop.permute.xlu1 %4944 }
0x122a   : > { %v4947_v32 = vmul.f32 %v19445_v31, %v4945_v37 }
0x122c   : > { %4949 = vrot.lane.b32.xlu1 %v4947_v32, %s23027_s26 }
0x1292   : > { %v4762_v29 = vpop.permute.xlu0 %4761 }
0x1293   : > { %v21097_v33 = vadd.f32 %v4762_v29, %v4754_v42 }
0x1295   : > { %19446 = vtanh.f32 %v21097_v33 }
0x129e   : > { %v4950_v59 = vpop.permute.xlu1 %4949 }
0x129f   : > { %v19447_v41 = vpop.eup %19446  ;;  %v21107_v51 = vadd.f32 %v4950_v59, %v4942_v50 }
0x12a0   : > { %4767 = vrot.lane.b32.xlu0 %v19447_v41, %s23022_s7  ;;  %v21179_v41 = vsel %vm21116_vm15, %v21097_v33, %v21094_v35  ;;  %v5143_v33 = vstv %s5142_s1  ;;  %s5525_s1 = scalar_select %p5339_p4, %s22927_s2, 0 }
0x12a1   : > { %19448 = vtanh.f32 %v21107_v51  ;;  %vm21201_vm1 = vcmp.eq.s32.totalorder %v5143_v33, 1 }
0x12a2   : > { %s5526_s3 = scalar_lea.vmem [#allocation2], %s5525_s1  ;;  %s22928_s1 = sadd.s32 4294967288, %s20715_s28 }
0x12ab   : > { %v19449_v30 = vpop.eup %19448 }
0x12ac   : > { %4955 = vrot.lane.b32.xlu1 %v19449_v30, %s23022_s7 }
0x1312   : > { %v4768_v60 = vpop.permute.xlu0 %4767 }
0x1313   : > { %v21114_v62 = vmul.f32 %v19443_v26, %v4768_v60 }
0x1315   : > { %v21124_v47 = vsel %vm21116_vm15, %v21114_v62, %v21039_v40  ;;  %v5044_v40 = vrot.slane %v20718_v63, 5  ;;  %v4776_v36 = vsel %vm21116_vm15, %v21114_v62, 0.0 }
0x1316   : > { %4970 = vrot.lane.b32.xlu0 %v21124_v47, %s23025_s4 }
0x131e   : > { %v4956_v0 = vpop.permute.xlu1 %4955 }
0x131f   : > { %v21128_v2 = vmul.f32 %v19445_v31, %v4956_v0  ;;  %v21189_v0 = vsel %vm21116_vm15, %v21107_v51, %v21104_v56 }
0x1321   : > { %v21134_v4 = vsel %vm21116_vm15, %v21128_v2, %v21049_v58 }
0x1322   : > { %5158 = vrot.lane.b32.xlu1 %v21134_v4, %s23025_s4 }
0x1388   : > { %v4971_v5 = vpop.permute.xlu0 %4970 }
0x1389   : > { %16979 = vmatmul.mubr.msk.f32.vlgmr.msra.gmra.mrb[26].mxu0 %vm3105_vm9, %v4971_v5 }
0x138a   : > { %18448 = vmatpush3.bf16.msra.mxu0 %v20641_v61  ;;  %16989 = vmatprep.mubr.msk.f32.mxu0 %vm20031_vm0, %v20032_v8 }
0x138b   : > { %18449 = vmatprep.subr.bf16.mxu0 %v20030_v1 }
0x138e   : > { %18451 = vmatpush3.bf16.msra.mxu0 %v20694_v49 }
0x138f   : > { %18461 = vmatprep.subr.bf16.mxu0 %v20030_v1 }
0x1391   : > { %16990 = vmatmul.mubr.msk.f32.vlgmr.msra.gmra.mrb[28].mxu0 %vm1875_vm5, %v5044_v40 }
0x1392   : > { %18463 = vmatpush3.bf16.msra.mxu0 %v20698_v52  ;;  %17014 = vmatprep.mubr.msk.f32.mxu0 %vm20031_vm0, %v20032_v8 }
0x1393   : > { %18464 = vmatprep.subr.bf16.mxu0 %v20030_v1 }
0x1394   : > { %v5159_v58 = vpop.permute.xlu1 %5158 }
0x1395   : > { %16997 = vmatmul.mubr.msk.f32.vlgmr.msra.gmra.mrb[22].mxu1 %vm3105_vm9, %v5159_v58 }
0x1396   : > { %18457 = vmatpush3.bf16.msra.mxu1 %v20730_v3  ;;  %17007 = vmatprep.mubr.msk.f32.mxu1 %vm20031_vm0, %v20032_v8 }
0x1397   : > { %18458 = vmatprep.subr.bf16.mxu1 %v20030_v1 }
0x139a   : > { %18460 = vmatpush3.bf16.msra.mxu1 %v20742_v6 }
0x139b   : > { %18470 = vmatprep.subr.bf16.mxu1 %v20030_v1 }
0x139d   : > { %17008 = vmatmul.mubr.msk.f32.vlgmr.msra.gmra.mrb[24].mxu1 %vm1875_vm5, %v5156_v7 }
0x139e   : > { %18472 = vmatpush3.bf16.msra.mxu1 %v20706_v55  ;;  %17032 = vmatprep.mubr.msk.f32.mxu1 %vm20031_vm0, %v20032_v8 }
0x139f   : > { %18473 = vmatprep.subr.bf16.mxu1 %v20030_v1 }
0x145c   : > { %v5040_v9 = vpop.f32.mrb[26].mxu0 }
0x145d   : > { %v16980_v10 = vpop.f32.mrb[27].mxu0 }
0x1464   : > { %v5113_v12 = vpop.f32.mrb[28].mxu0 }
0x1465   : > { %v5114_v13 = vadd.f32 %v5113_v12, %v5040_v9  ;;  %v16991_v15 = vpop.f32.mrb[29].mxu0 }
0x1467   : > { %v5117_v16 = vadd.f32 %v5114_v13, %v20755_v11 }
0x1468   : > { %v5228_v17 = vpop.f32.mrb[22].mxu1 }
0x1469   : > { %19450 = vtanh.f32 %v5117_v16  ;;  %v16998_v18 = vpop.f32.mrb[23].mxu1  ;;  %v15712_v26 = vmul.f32 -1.442695, %v5117_v16 }
0x1470   : > { %v5301_v20 = vpop.f32.mrb[24].mxu1 }
0x1471   : > { %v5302_v21 = vadd.f32 %v5301_v20, %v5228_v17  ;;  %v17009_v22 = vpop.f32.mrb[25].mxu1 }
0x1473   : > { %v19451_v23 = vpop.eup %19450  ;;  %v5305_v24 = vadd.f32 %v5302_v21, %v20759_v19 }
0x1474   : > { %5127 = vrot.lane.b32.xlu0 %v19451_v23, %s23026_s5  ;;  %v21255_v23 = vld [vmem:[%s23018_s11] sm:$0x1]  ;;  %s23049_s11 = sadd.s32 4294967290, %s20715_s28 }
0x1475   : > { %19452 = vtanh.f32 %v5305_v24  ;;  %v15716_v27 = vmul.f32 -1.442695, %v5305_v24  ;;  %s23089_s11 = smov (!%p4968_p12, %s23049_s11), 8 }
0x1476   : > { %19454 = vpow2.f32 %v15712_v26 }
0x1477   : > { %19456 = vpow2.f32 %v15716_v27 }
0x147f   : > { %v19453_v25 = vpop.eup %19452 }
0x1480   : > { %5315 = vrot.lane.b32.xlu1 %v19453_v25, %s23026_s5  ;;  %v19455_v28 = vpop.eup %19454 }
0x1481   : > { %v5121_v11 = vadd.f32 1.0, %v19455_v28  ;;  %v19457_v31 = vpop.eup %19456 }
0x1482   : > { %v5309_v37 = vadd.f32 1.0, %v19457_v31  ;;  %v21259_v31 = vld [vmem:[%s23019_s15] sm:$0x1] }
0x1483   : > { %19458 = vrcp.f32 %v5121_v11 }
0x1484   : > { %19460 = vrcp.f32 %v5309_v37 }
0x148d   : > { %v19459_v32 = vpop.eup %19458 }
0x148e   : > { %v19461_v19 = vpop.eup %19460  ;;  %v5125_v30 = vmul.f32 %v19459_v32, %v21179_v41 }
0x148f   : > { %v5313_v5 = vmul.f32 %v19461_v19, %v21189_v0 }
0x14e6   : > { %v5128_v42 = vpop.permute.xlu0 %5127 }
0x14e7   : > { %v5130_v29 = vmul.f32 %v19459_v32, %v5128_v42 }
0x14e9   : > { %5132 = vrot.lane.b32.xlu0 %v5130_v29, %s23027_s26 }
0x14f2   : > { %v5316_v50 = vpop.permute.xlu1 %5315 }
0x14f3   : > { %v5318_v59 = vmul.f32 %v19461_v19, %v5316_v50 }
0x14f5   : > { %5320 = vrot.lane.b32.xlu1 %v5318_v59, %s23027_s26 }
0x155b   : > { %v5133_v38 = vpop.permute.xlu0 %5132 }
0x155c   : > { %v21182_v60 = vadd.f32 %v5133_v38, %v5125_v30 }
0x155e   : > { %19462 = vtanh.f32 %v21182_v60 }
0x1567   : > { %v5321_v40 = vpop.permute.xlu1 %5320 }
0x1568   : > { %v19463_v58 = vpop.eup %19462  ;;  %v21192_v7 = vadd.f32 %v5321_v40, %v5313_v5 }
0x1569   : > { %5138 = vrot.lane.b32.xlu0 %v19463_v58, %s23022_s7 }
0x156a   : > { %19464 = vtanh.f32 %v21192_v7 }
0x1574   : > { %v19465_v35 = vpop.eup %19464 }
0x1575   : > { %5326 = vrot.lane.b32.xlu1 %v19465_v35, %s23022_s7 }
0x15db   : > { %v5139_v9 = vpop.permute.xlu0 %5138 }
0x15dc   : > { %v21199_v10 = vmul.f32 %v19459_v32, %v5139_v9  ;;  %v21270_v9 = vsel %vm21201_vm1, %v21182_v60, %v21179_v41 }
0x15de   : > { %v21209_v51 = vsel %vm21201_vm1, %v21199_v10, %v21124_v47  ;;  %v5415_v47 = vrot.slane %v20718_v63, 6  ;;  %v5147_v44 = vsel %vm21201_vm1, %v21199_v10, 0.0 }
0x15df   : > { %5341 = vrot.lane.b32.xlu0 %v21209_v51, %s23025_s4 }
0x15e7   : > { %v5327_v12 = vpop.permute.xlu1 %5326 }
0x15e8   : > { %v21213_v13 = vmul.f32 %v19461_v19, %v5327_v12 }
0x15ea   : > { %v21219_v15 = vsel %vm21201_vm1, %v21213_v13, %v21134_v4 }
0x15eb   : > { %5529 = vrot.lane.b32.xlu1 %v21219_v15, %s23025_s4 }
0x1651   : > { %v5342_v16 = vpop.permute.xlu0 %5341 }
0x1652   : > { %17015 = vmatmul.mubr.msk.f32.vlgmr.msra.gmra.mrb[30].mxu0 %vm3105_vm9, %v5342_v16 }
0x1653   : > { %18466 = vmatpush3.bf16.msra.mxu0 %v20641_v61  ;;  %17025 = vmatprep.mubr.msk.f32.mxu0 %vm20031_vm0, %v20032_v8 }
0x1654   : > { %18467 = vmatprep.subr.bf16.mxu0 %v20030_v1 }
0x1657   : > { %18469 = vmatpush3.bf16.msra.mxu0 %v20694_v49 }
0x1658   : > { %18479 = vmatprep.subr.bf16.mxu0 %v20030_v1 }
0x165a   : > { %17026 = vmatmul.mubr.msk.f32.vlgmr.msra.gmra.mrb[32].mxu0 %vm1875_vm5, %v5415_v47 }
0x165b   : > { %18481 = vmatpush3.bf16.msra.mxu0 %v20698_v52  ;;  %17050 = vmatprep.mubr.msk.f32.mxu0 %vm20031_vm0, %v20032_v8  ;;  %v5527_v52 = vld [vmem:[%s5526_s3] sm:$0x1]  ;;  %s5513_s3 = scalar_select %p5339_p4, 1, 0 }
0x165c   : > { %18482 = vmatprep.subr.bf16.mxu0 %v20030_v1 }
0x165d   : > { %v5530_v4 = vpop.permute.xlu1 %5529  ;;  %v5514_v60 = vstv %s5513_s3  ;;  %s5894_s3 = scalar_select %p5710_p5, %s22928_s1, 0 }
0x165e   : > { %17033 = vmatmul.mubr.msk.f32.vlgmr.msra.gmra.mrb[26].mxu1 %vm3105_vm9, %v5530_v4  ;;  %v21280_v4 = vsel %vm21201_vm1, %v21192_v7, %v21189_v0  ;;  %vm21292_vm2 = vcmp.eq.s32.totalorder %v5514_v60, 1  ;;  %s23038_s1 = sld [smem:[#allocation28_spill]] }
0x165f   : > { %18475 = vmatpush3.bf16.msra.mxu1 %v20730_v3  ;;  %17043 = vmatprep.mubr.msk.f32.mxu1 %vm20031_vm0, %v20032_v8  ;;  %s5895_s2 = scalar_lea.vmem [#allocation2], %s5894_s3 }
0x1660   : > { %18476 = vmatprep.subr.bf16.mxu1 %v20030_v1 }
0x1663   : > { %18478 = vmatpush3.bf16.msra.mxu1 %v20742_v6 }
0x1664   : > { %18488 = vmatprep.subr.bf16.mxu1 %v20030_v1 }
0x1666   : > { %17044 = vmatmul.mubr.msk.f32.vlgmr.msra.gmra.mrb[28].mxu1 %vm1875_vm5, %v5527_v52 }
0x1667   : > { %18490 = vmatpush3.bf16.msra.mxu1 %v20706_v55  ;;  %17068 = vmatprep.mubr.msk.f32.mxu1 %vm20031_vm0, %v20032_v8 }
0x1668   : > { %18491 = vmatprep.subr.bf16.mxu1 %v20030_v1 }
0x1725   : > { %v5411_v17 = vpop.f32.mrb[30].mxu0 }
0x1726   : > { %v17016_v18 = vpop.f32.mrb[31].mxu0 }
0x172d   : > { %v5484_v20 = vpop.f32.mrb[32].mxu0 }
0x172e   : > { %v5485_v21 = vadd.f32 %v5484_v20, %v5411_v17  ;;  %v17027_v22 = vpop.f32.mrb[33].mxu0 }
0x1730   : > { %v5488_v24 = vadd.f32 %v21255_v23, %v5485_v21 }
0x1731   : > { %v5599_v25 = vpop.f32.mrb[26].mxu1 }
0x1732   : > { %19466 = vtanh.f32 %v5488_v24  ;;  %v17034_v26 = vpop.f32.mrb[27].mxu1  ;;  %v15719_v42 = vmul.f32 -1.442695, %v5488_v24 }
0x1739   : > { %v5672_v27 = vpop.f32.mrb[28].mxu1 }
0x173a   : > { %v5673_v55 = vadd.f32 %v5672_v27, %v5599_v25  ;;  %v17045_v28 = vpop.f32.mrb[29].mxu1 }
0x173c   : > { %v19467_v11 = vpop.eup %19466  ;;  %v5676_v37 = vadd.f32 %v21259_v31, %v5673_v55 }
0x173d   : > { %5498 = vrot.lane.b32.xlu0 %v19467_v11, %s23026_s5 }
0x173e   : > { %19468 = vtanh.f32 %v5676_v37  ;;  %v15723_v29 = vmul.f32 -1.442695, %v5676_v37 }
0x173f   : > { %19470 = vpow2.f32 %v15719_v42 }
0x1740   : > { %19472 = vpow2.f32 %v15723_v29 }
0x1748   : > { %v19469_v32 = vpop.eup %19468 }
0x1749   : > { %5686 = vrot.lane.b32.xlu1 %v19469_v32, %s23026_s5  ;;  %v19471_v19 = vpop.eup %19470 }
0x174a   : > { %v5492_v50 = vadd.f32 1.0, %v19471_v19  ;;  %v19473_v59 = vpop.eup %19472 }
0x174b   : > { %v5680_v30 = vadd.f32 1.0, %v19473_v59  ;;  %v6085_v59 = vld [vmem:[%s23039_s9] sm:$0xff] }
0x174c   : > { %19474 = vrcp.f32 %v5492_v50 }
0x174d   : > { %19476 = vrcp.f32 %v5680_v30  ;;  %v6086_v30 = vld [vmem:[%s23039_s9 + $0x8] sm:$0xff]  ;;  %s23047_s9 = sadd.s32 4294967292, %s20715_s28 }
0x174e   : > { %s23085_s9 = smov (!%p4226_p3, %s23047_s9), 8 }
0x1756   : > { %v19475_v38 = vpop.eup %19474 }
0x1757   : > { %v19477_v58 = vpop.eup %19476  ;;  %v5496_v12 = vmul.f32 %v19475_v38, %v21270_v9 }
0x1758   : > { %v5684_v52 = vmul.f32 %v19477_v58, %v21280_v4 }
0x17af   : > { %v5499_v5 = vpop.permute.xlu0 %5498 }
0x17b0   : > { %v5501_v40 = vmul.f32 %v19475_v38, %v5499_v5 }
0x17b2   : > { %5503 = vrot.lane.b32.xlu0 %v5501_v40, %s23027_s26 }
0x17bb   : > { %v5687_v35 = vpop.permute.xlu1 %5686 }
0x17bc   : > { %v5689_v33 = vmul.f32 %v19477_v58, %v5687_v35 }
0x17be   : > { %5691 = vrot.lane.b32.xlu1 %v5689_v33, %s23027_s26 }
0x1824   : > { %v5504_v16 = vpop.permute.xlu0 %5503 }
0x1825   : > { %v21273_v47 = vadd.f32 %v5504_v16, %v5496_v12 }
0x1827   : > { %19478 = vtanh.f32 %v21273_v47 }
0x1830   : > { %v5692_v17 = vpop.permute.xlu1 %5691 }
0x1831   : > { %v19479_v18 = vpop.eup %19478  ;;  %v21283_v20 = vadd.f32 %v5692_v17, %v5684_v52 }
0x1832   : > { %5509 = vrot.lane.b32.xlu0 %v19479_v18, %s23022_s7 }
0x1833   : > { %19480 = vtanh.f32 %v21283_v20 }
0x183d   : > { %v19481_v41 = vpop.eup %19480 }
0x183e   : > { %5697 = vrot.lane.b32.xlu1 %v19481_v41, %s23022_s7 }
0x18a4   : > { %v5510_v21 = vpop.permute.xlu0 %5509 }
0x18a5   : > { %v21290_v22 = vmul.f32 %v19475_v38, %v5510_v21  ;;  %v18498_v38 = vpack.c.bf16 %v6086_v30, %v6085_v59 }
0x18a7   : > { %v5516_v7 = vsel %vm21292_vm2, %v21290_v22, %v21209_v51  ;;  %v5786_v51 = vrot.slane %v20718_v63, 7  ;;  %v5518_v62 = vsel %vm21292_vm2, %v21290_v22, 0.0 }
0x18a8   : > { %5712 = vrot.lane.b32.xlu0 %v5516_v7, %s23025_s4 }
0x18b0   : > { %v5698_v24 = vpop.permute.xlu1 %5697 }
0x18b1   : > { %v21301_v25 = vmul.f32 %v19477_v58, %v5698_v24 }
0x18b3   : > { %v5701_v26 = vsel %vm21292_vm2, %v21301_v25, %v21219_v15 }
0x18b4   : > { %5898 = vrot.lane.b32.xlu1 %v5701_v26, %s23025_s4 }
0x191a   : > { %v5713_v27 = vpop.permute.xlu0 %5712 }
0x191b   : > { %17051 = vmatmul.mubr.msk.f32.vlgmr.msra.gmra.mrb[34].mxu0 %vm3105_vm9, %v5713_v27 }
0x191c   : > { %18484 = vmatpush3.bf16.msra.mxu0 %v20641_v61  ;;  %17061 = vmatprep.mubr.msk.f32.mxu0 %vm20031_vm0, %v20032_v8  ;;  %v5896_v61 = vld [vmem:[%s5895_s2] sm:$0x1]  ;;  %s1747_s2 = scalar_lea.vmem %s23038_s1, %s20496_s22  ;;  %s23041_s1 = sld [smem:[#allocation42_spill]] }
0x191d   : > { %18485 = vmatprep.subr.bf16.mxu0 %v20030_v1  ;;  %v6084_v5 = vld [vmem:[%s1747_s2] sm:$0xff]  ;;  %s23042_s2 = sld [smem:[#allocation41_spill]] }
0x1920   : > { %18487 = vmatpush3.bf16.msra.mxu0 %v20694_v49 }
0x1921   : > { %18497 = vmatprep.subr.bf16.mxu0 %v20030_v1 }
0x1923   : > { %17062 = vmatmul.mubr.msk.f32.vlgmr.msra.gmra.mrb[36].mxu0 %vm1875_vm5, %v5786_v51 }
0x1924   : > { %17086 = vmatprep.mubr.msk.f32.mxu0 %vm20031_vm0, %v20032_v8  ;;  %18499 = vmatpush3.bf16.msra.mxu0 %v18498_v38  ;;  %v4034_v38 = vsel %vm20946_vm13, %v20944_v43, 0.0 }
0x1925   : > { %18500 = vmatprep.subr.bf16.mxu0 %v20030_v1 }
0x1926   : > { %v5899_v15 = vpop.permute.xlu1 %5898 }
0x1927   : > { %17069 = vmatmul.mubr.msk.f32.vlgmr.msra.gmra.mrb[30].mxu1 %vm3105_vm9, %v5899_v15  ;;  %17087 = vmatmul.mubr.msk.f32.vlgmr.msra.gmra.mrb[38].mxu0 %vm3105_vm9, %v6084_v5 }
0x1928   : > { %18493 = vmatpush3.bf16.msra.mxu1 %v20730_v3  ;;  %17079 = vmatprep.mubr.msk.f32.mxu1 %vm20031_vm0, %v20032_v8 }
0x1929   : > { %18494 = vmatprep.subr.bf16.mxu1 %v20030_v1  ;;  %17097 = vmatprep.mubr.msk.f32.mxu0 %vm20031_vm0, %v20032_v8 }
0x192c   : > { %18496 = vmatpush3.bf16.msra.mxu1 %v20742_v6 }
0x192d   : > { %18506 = vmatprep.subr.bf16.mxu1 %v20030_v1 }
0x192f   : > { %17080 = vmatmul.mubr.msk.f32.vlgmr.msra.gmra.mrb[32].mxu1 %vm1875_vm5, %v5896_v61 }
0x1930   : > { %17108 = vmatprep.mubr.msk.f32.mxu1 %vm20031_vm0, %v20032_v8 }
0x19ee   : > { %v5782_v49 = vpop.f32.mrb[34].mxu0 }
0x19ef   : > { %v17052_v63 = vpop.f32.mrb[35].mxu0 }
0x19f6   : > { %v5855_v3 = vpop.f32.mrb[36].mxu0 }
0x19f7   : > { %v5856_v55 = vadd.f32 %v5855_v3, %v5782_v49  ;;  %v17063_v28 = vpop.f32.mrb[37].mxu0  ;;  %v6170_v3 = vld [vmem:[%s23041_s1 + $0x10] sm:$0xff] }
0x19f8   : > { %v3663_v28 = vsel %vm20861_vm12, %v20859_v45, 0.0  ;;  %vm6343_vm12 = vcmask 3072  }
0x19f9   : > { %v5859_v6 = vadd.f32 %v21255_v23, %v5856_v55  ;;  %6344 = vst.msk [vmem:[#allocation5 + $0x8] sm:$0xf] %vm6343_vm12, %v20032_v8 }
0x19fa   : > { %v5968_v11 = vpop.f32.mrb[30].mxu1 }
0x19fb   : > { %19482 = vtanh.f32 %v5859_v6  ;;  %v17070_v37 = vpop.f32.mrb[31].mxu1 }
0x1a02   : > { %v6041_v32 = vpop.f32.mrb[32].mxu1 }
0x1a03   : > { %v6042_v42 = vadd.f32 %v6041_v32, %v5968_v11  ;;  %v17081_v29 = vpop.f32.mrb[33].mxu1 }
0x1a05   : > { %v19483_v19 = vpop.eup %19482  ;;  %v6045_v50 = vadd.f32 %v21259_v31, %v6042_v42  ;;  %v15726_v31 = vmul.f32 -1.442695, %v5859_v6 }
0x1a06   : > { %5869 = vrot.lane.b32.xlu0 %v19483_v19, %s23026_s5 }
0x1a07   : > { %19484 = vtanh.f32 %v6045_v50  ;;  %v15730_v40 = vmul.f32 -1.442695, %v6045_v50 }
0x1a08   : > { %19486 = vpow2.f32 %v15726_v31 }
0x1a09   : > { %19488 = vpow2.f32 %v15730_v40  ;;  %v5885_v40 = vstv %s5884_s13 }
0x1a0a   : > { %vm5886_vm11 = vcmp.eq.s32.totalorder %v5885_v40, 1 }
0x1a11   : > { %v19485_v23 = vpop.eup %19484 }
0x1a12   : > { %6055 = vrot.lane.b32.xlu1 %v19485_v23, %s23026_s5  ;;  %v19487_v58 = vpop.eup %19486  ;;  %s23040_s5 = sadd.s32 4294967295, %s20715_s28 }
0x1a13   : > { %v5863_v35 = vadd.f32 1.0, %v19487_v58  ;;  %v19489_v33 = vpop.eup %19488  ;;  %s23079_s5 = smov (!%p3124_p0, %s23040_s5), 8 }
0x1a14   : > { %v6049_v12 = vadd.f32 1.0, %v19489_v33  ;;  %s3485_s3 = scalar_lea.vmem [#allocation4], %s23079_s5  ;;  %s23043_s5 = sld [smem:[#allocation44_spill]] }
0x1a15   : > { %19490 = vrcp.f32 %v5863_v35 }
0x1a16   : > { %19492 = vrcp.f32 %v6049_v12 }
0x1a1a   : > { %v6253_v10 = vld [vmem:[%s23043_s5] sm:$0xff]  ;;  %v6254_v56 = vld [vmem:[%s23043_s5 + $0x8] sm:$0xff]  ;;  %v6255_v29 = vld [vmem:[%s23043_s5 + $0x10] sm:$0xff] }
0x1a1b   : > { %v18507_v32 = vpack.c.bf16 %v6254_v56, %v6253_v10  ;;  %v6256_v19 = vld [vmem:[%s23043_s5 + $0x18] sm:$0xff] }
0x1a1c   : > { %v18510_v5 = vpack.c.bf16 %v6256_v19, %v6255_v29 }
0x1a1d   : > { %18508 = vmatpush3.bf16.msra.mxu1 %v18507_v32 }
0x1a1e   : > { %18509 = vmatprep.subr.bf16.mxu1 %v20030_v1 }
0x1a1f   : > { %v21347_v16 = vpop.eup %19490 }
0x1a20   : > { %v19493_v18 = vpop.eup %19492 }
0x1a21   : > { %18511 = vmatpush3.bf16.msra.mxu1 %v18510_v5 }
0x1a22   : > { %18518 = vmatprep.subr.bf16.mxu1 %v20030_v1 }
0x1a78   : > { %v5870_v52 = vpop.permute.xlu0 %5869 }
0x1a79   : > { %v5872_v17 = vmul.f32 %v21347_v16, %v5870_v52 }
0x1a7b   : > { %5874 = vrot.lane.b32.xlu0 %v5872_v17, %s23027_s26 }
0x1a7f   : > { %3482 = vrot.lane.b32.xlu0 %v20790_v54, %s23025_s4  ;;  %v5702_v54 = vsel %vm21292_vm2, %v21283_v20, %v21280_v4  ;;  %v6168_v4 = vld [vmem:[%s23041_s1] sm:$0xff]  ;;  %v6169_v20 = vld [vmem:[%s23041_s1 + $0x8] sm:$0xff] }
0x1a80   : > { %v18501_v15 = vpack.c.bf16 %v6169_v20, %v6168_v4 }
0x1a82   : > { %18502 = vmatpush3.bf16.msra.mxu0 %v18501_v15 }
0x1a83   : > { %4221 = vrot.lane.b32.xlu0 %v20958_v53, %s23025_s4  ;;  %v6053_v53 = vmul.f32 %v19493_v18, %v5702_v54  ;;  %18503 = vmatprep.subr.bf16.mxu0 %v20030_v1 }
0x1a84   : > { %v6056_v41 = vpop.permute.xlu1 %6055 }
0x1a85   : > { %v6058_v60 = vmul.f32 %v19493_v18, %v6056_v41 }
0x1a87   : > { %6060 = vrot.lane.b32.xlu1 %v6058_v60, %s23027_s26  ;;  %4963 = vrot.lane.b32.xlu0 %v21128_v2, %s23025_s4 }
0x1a8b   : > { %5334 = vrot.lane.b32.xlu0 %v21213_v13, %s23025_s4  ;;  %v5517_v13 = vsel %vm21292_vm2, %v21273_v47, %v21270_v9  ;;  %v15731_v9 = vld [vmem:[%s23042_s2] ss:$0 sm:$0xff]  ;;  %v6163_v47 = vpop.f32.mrb[38].mxu0  ;;  %s23045_s2 = sadd.s32 4294967294, %s20715_s28 }
0x1a8c   : > { %v5867_v26 = vmul.f32 %v21347_v16, %v5517_v13  ;;  %v6164_v49 = vadd.f32 %v15731_v9, %v6163_v47  ;;  %v17088_v63 = vpop.f32.mrb[39].mxu0  ;;  %s23081_s2 = smov (!%p3487_p1, %s23045_s2), 8 }
0x1a8d   : > { %s3853_s12 = scalar_lea.vmem [#allocation4], %s23081_s2  ;;  %s5337_s2 = scalar_lea.vmem [#allocation4], %s23089_s11 }
0x1a8e   : > { %v6167_v55 = vmax.f32 %v6164_v49, 0.0 }
0x1aed   : > { %v5875_v21 = vpop.permute.xlu0 %5874 }
0x1aee   : > { %v5877_v27 = vadd.f32 %v5875_v21, %v5867_v26 }
0x1af1   : > { %v3483_v7 = vpop.permute.xlu0 %3482 }
0x1af2   : > { %3486 = vst.msk [vmem:[%s3485_s3] sm:$0x1] %vm3108_vm10, %v3483_v7  ;;  %s23044_s3 = sld [smem:[#allocation47_spill]] }
0x1af5   : > { %v4222_v45 = vpop.permute.xlu0 %4221 }
0x1af8   : > { %v6349_v6 = vld [vmem:[%s23044_s3] sm:$0xff]  ;;  %v6350_v42 = vld [vmem:[%s23044_s3 + $0x8] sm:$0xff]  ;;  %v6351_v59 = vld [vmem:[%s23044_s3 + $0x10] sm:$0xff] }
0x1af9   : > { %v6061_v2 = vpop.permute.xlu1 %6060  ;;  %v4964_v11 = vpop.permute.xlu0 %4963  ;;  %v21440_v50 = vpack.c.bf16 %v6350_v42, %v6349_v6  ;;  %v6352_v30 = vld [vmem:[%s23044_s3 + $0x18] sm:$0xff]  ;;  %s21766_s3 = scalar_lea.vmem %s20326_s6, %s20496_s22  ;;  %s23070_s22 = sld [smem:[#allocation60_spill]] }
0x1afa   : > { %v6063_v24 = vadd.f32 %v6061_v2, %v6053_v53  ;;  %v21450_v23 = vpack.c.bf16 %v6352_v30, %v6351_v59 }
0x1afc   : > { %19494 = vtanh.f32 %v6063_v24 }
0x1afd   : > { %19496 = vtanh.f32 %v5877_v27  ;;  %v5335_v43 = vpop.permute.xlu0 %5334 }
0x1b06   : > { %v19495_v51 = vpop.eup %19494 }
0x1b07   : > { %6066 = vrot.lane.b32.xlu1 %v19495_v51, %s23022_s7  ;;  %v19497_v61 = vpop.eup %19496 }
0x1b0b   : > { %3850 = vrot.lane.b32.xlu1 %v20873_v48, %s23025_s4  ;;  %v6171_v48 = vld [vmem:[%s23041_s1 + $0x18] sm:$0xff]  ;;  %s23046_s1 = sadd.s32 4294967293, %s20715_s28 }
0x1b0c   : > { %s23083_s1 = smov (!%p3855_p2, %s23046_s1), 8 }
0x1b0d   : > { %s4224_s14 = scalar_lea.vmem [#allocation4], %s23083_s1  ;;  %s4966_s1 = scalar_lea.vmem [#allocation4], %s23087_s10 }
0x1b0e   : > { %s23052_s10 = sadd.s32 4294967288, %s20715_s28 }
0x1b0f   : > { %4592 = vrot.lane.b32.xlu1 %v21043_v57, %s23025_s4  ;;  %v18504_v57 = vpack.c.bf16 %v6171_v48, %v6170_v3  ;;  %s23093_s10 = smov (!%p5710_p5, %s23052_s10), 8 }
0x1b10   : > { %s6075_s11 = scalar_lea.vmem [#allocation4], %s23093_s10  ;;  %s23058_s10 = sld [smem:[#allocation52_spill]] }
0x1b11   : > { %18505 = vmatpush3.bf16.msra.mxu0 %v18504_v57 }
0x1b12   : > { %18512 = vmatprep.subr.bf16.mxu0 %v20030_v1 }
0x1b13   : > { %5880 = vrot.lane.b32.xlu1 %v19497_v61, %s23022_s7 }
0x1b14   : > { %17098 = vmatmul.mubr.msk.f32.vlgmr.msra.gmra.mrb[40].mxu0 %vm1875_vm5, %v6167_v55 }
0x1b15   : > { %17119 = vmatprep.mubr.msk.f32.mxu0 %vm20031_vm0, %v20032_v8  ;;  %18514 = vmatpush3.bf16.msra.mxu0 %v21440_v50 }
0x1b16   : > { %18515 = vmatprep.subr.bf16.mxu0 %v20030_v1 }
0x1b17   : > { %5705 = vrot.lane.b32.xlu1 %v21301_v25, %s23025_s4  ;;  %v4405_v25 = vsel %vm21031_vm14, %v21029_v46, 0.0 }
0x1b19   : > { %18517 = vmatpush3.bf16.msra.mxu0 %v21450_v23 }
0x1b1a   : > { %18524 = vmatprep.subr.bf16.mxu0 %v20030_v1 }
0x1b1b   : > { %3665 = vrot.lane.b32.xlu1 %v3663_v28, %s23025_s4 }
0x1b1c   : > { %17120 = vmatmul.mubr.f32.vlgmr.msra.gmra.mrb[42].mxu0 %v20032_v8 }
0x1b1d   : > { %17141 = vmatprep.mubr.msk.f32.mxu0 %vm20031_vm0, %v20032_v8 }
0x1b1f   : > { %4407 = vrot.lane.b32.xlu1 %v4405_v25, %s23025_s4 }
0x1b23   : > { %5149 = vrot.lane.b32.xlu1 %v5147_v44, %s23025_s4 }
0x1b79   : > { %v6067_v34 = vpop.permute.xlu1 %6066 }
0x1b7a   : > { %v6069_v46 = vmul.f32 %v19493_v18, %v6067_v34 }
0x1b7c   : > { %6072 = vrot.lane.b32.xlu0 %v6069_v46, %s23025_s4 }
0x1b7d   : > { %v3851_v37 = vpop.permute.xlu1 %3850 }
0x1b7e   : > { %3854 = vst.msk [vmem:[%s3853_s12] sm:$0x1] %vm3108_vm10, %v3851_v37  ;;  %s4595_s12 = scalar_lea.vmem [#allocation4], %s23085_s9  ;;  %s23051_s9 = sld [smem:[#allocation48_spill]] }
0x1b7f   : > { %4225 = vst.msk [vmem:[%s4224_s14] sm:$0x1] %vm3108_vm10, %v4222_v45  ;;  %s23050_s14 = sadd.s32 4294967289, %s20715_s28 }
0x1b80   : > { %4036 = vrot.lane.b32.xlu0 %v4034_v38, %s23025_s4  ;;  %s23091_s14 = smov (!%p5339_p4, %s23050_s14), 8 }
0x1b81   : > { %v4593_v31 = vpop.permute.xlu1 %4592  ;;  %s5708_s13 = scalar_lea.vmem [#allocation4], %s23091_s14  ;;  %s23055_s14 = sld [smem:[#allocation49_spill]] }
0x1b82   : > { %4596 = vst.msk [vmem:[%s4595_s12] sm:$0x1] %vm3108_vm10, %v4593_v31  ;;  %s23054_s12 = sld [smem:[#allocation43_spill]] }
0x1b83   : > { %4967 = vst.msk [vmem:[%s4966_s1] sm:$0x1] %vm3108_vm10, %v4964_v11  ;;  %s23056_s1 = sld [smem:[#allocation51_spill]] }
0x1b84   : > { %4778 = vrot.lane.b32.xlu0 %v4776_v36, %s23025_s4  ;;  %5338 = vst.msk [vmem:[%s5337_s2] sm:$0x1] %vm3108_vm10, %v5335_v43  ;;  %v6354_v52 = vld [vmem:[%s23051_s9 + $0x8] sm:$0xff]  ;;  %v6355_v21 = vld [vmem:[%s23051_s9 + $0x10] sm:$0xff]  ;;  %s22936_s2 = smov 64  }
0x1b85   : > { %v5881_v58 = vpop.permute.xlu1 %5880  ;;  %v6356_v7 = vld [vmem:[%s23051_s9 + $0x18] sm:$0xff] }
0x1b86   : > { %v5883_v35 = vmul.f32 %v21347_v16, %v5881_v58  ;;  %v6353_v16 = vld [vmem:[%s23051_s9] sm:$0xff]  ;;  %v21497_v54 = vpack.c.bf16 %v6356_v7, %v6355_v21 }
0x1b87   : > { %v21490_v17 = vpack.c.bf16 %v6354_v52, %v6353_v16  ;;  %v21538_v56 = vld [vmem:[%s23055_s14] sm:$0x1] }
0x1b88   : > { %5520 = vrot.lane.b32.xlu0 %v5518_v62, %s23025_s4  ;;  %v5887_v39 = vsel %vm5886_vm11, %v5883_v35, 0.0  ;;  %v15733_v20 = vld [vmem:[%s23054_s12] ss:$0 sm:$0xff]  ;;  %s23060_s12 = sld [smem:[#allocation53_spill]] }
0x1b89   : > { %5889 = vrot.lane.b32.xlu1 %v5887_v39, %s23025_s4  ;;  %v5706_v33 = vpop.permute.xlu1 %5705  ;;  %18526 = vmatpush3.bf16.msra.mxu0 %v21490_v17  ;;  %s23053_s4 = sld [smem:[#allocation46_spill]]  ;;  %v6362_v40 = vld [vmem:[%s23056_s1] sm:$0xff]  ;;  %v6363_v43 = vld [vmem:[%s23056_s1 + $0x8] sm:$0xff]  ;;  %v6364_v62 = vld [vmem:[%s23056_s1 + $0x10] sm:$0xff] }
0x1b8a   : > { %5709 = vst.msk [vmem:[%s5708_s13] sm:$0x1] %vm3108_vm10, %v5706_v33  ;;  %18527 = vmatprep.subr.bf16.mxu0 %v20030_v1  ;;  %s23057_s13 = sld [smem:[#allocation50_spill]]  ;;  %v21549_v58 = vpack.c.bf16 %v6363_v43, %v6362_v40  ;;  %v6365_v39 = vld [vmem:[%s23056_s1 + $0x18] sm:$0xff]  ;;  %s23062_s1 = sld [smem:[#allocation56_spill]] }
0x1b8d   : > { %v3666_v0 = vpop.permute.xlu1 %3665  ;;  %18529 = vmatpush3.bf16.msra.mxu0 %v21497_v54 }
0x1b8e   : > { %3668 = vst.msk [vmem:[#allocation3 + $0x1] sm:$0x1] %vm3108_vm10, %v3666_v0  ;;  %18536 = vmatprep.subr.bf16.mxu0 %v20030_v1  ;;  %v6369_v40 = vld [vmem:[%s23060_s12 + $0x10] sm:$0xff]  ;;  %v6370_v43 = vld [vmem:[%s23060_s12 + $0x18] sm:$0xff] }
0x1b8f   : > { %v6345_v27 = vld [vmem:[%s23053_s4] sm:$0xff]  ;;  %v6346_v51 = vld [vmem:[%s23053_s4 + $0x8] sm:$0xff]  ;;  %v6347_v9 = vld [vmem:[%s23053_s4 + $0x10] sm:$0xff] }
0x1b90   : > { %17142 = vmatmul.mubr.f32.vlgmr.msra.gmra.mrb[44].mxu0 %v20032_v8  ;;  %v21511_v4 = vpack.c.bf16 %v6346_v51, %v6345_v27  ;;  %v6348_v47 = vld [vmem:[%s23053_s4 + $0x18] sm:$0xff]  ;;  %v6358_v36 = vld [vmem:[%s23057_s13] sm:$0xff]  ;;  %v6359_v35 = vld [vmem:[%s23057_s13 + $0x8] sm:$0xff]  ;;  %s23069_s4 = smov 64  }
0x1b91   : > { %v4408_v22 = vpop.permute.xlu1 %4407  ;;  %17163 = vmatprep.mubr.msk.f32.mxu0 %vm20031_vm0, %v20032_v8  ;;  %v21522_v3 = vpack.c.bf16 %v6348_v47, %v6347_v9  ;;  %v21554_v33 = vpack.c.bf16 %v6359_v35, %v6358_v36  ;;  %v6360_v0 = vld [vmem:[%s23057_s13 + $0x10] sm:$0xff]  ;;  %v21618_v35 = vpack.c.bf16 %v6370_v43, %v6369_v40 }
0x1b92   : > { %4410 = vst.msk [vmem:[#allocation3 + $0x3] sm:$0x1] %vm3108_vm10, %v4408_v22  ;;  %v6361_v22 = vld [vmem:[%s23057_s13 + $0x18] sm:$0xff] }
0x1b93   : > { %18538 = vmatpush3.bf16.msra.mxu0 %v21554_v33  ;;  %v21563_v16 = vpack.c.bf16 %v6361_v22, %v6360_v0 }
0x1b94   : > { %18539 = vmatprep.subr.bf16.mxu0 %v20030_v1 }
0x1b95   : > { %v5150_v12 = vpop.permute.xlu1 %5149 }
0x1b96   : > { %5152 = vst.msk [vmem:[#allocation3 + $0x5] sm:$0x1] %vm3108_vm10, %v5150_v12  ;;  %v21559_v12 = vpack.c.bf16 %v6365_v39, %v6364_v62 }
0x1b97   : > { %18541 = vmatpush3.bf16.msra.mxu0 %v21563_v16 }
0x1b98   : > { %18554 = vmatprep.subr.bf16.mxu0 %v20030_v1 }
0x1be7   : > { %v6248_v18 = vpop.f32.mrb[40].mxu0 }
0x1be8   : > { %v17099_v41 = vpop.f32.mrb[41].mxu0  ;;  %v6249_v63 = vadd.f32 %v15733_v20, %v6248_v18 }
0x1bea   : > { %v21527_v48 = vmax.f32 %v6249_v63, 0.0 }
0x1bee   : > { %v6073_v60 = vpop.permute.xlu0 %6072 }
0x1bef   : > { %6076 = vst.msk [vmem:[%s6075_s11] sm:$0x1] %vm3108_vm10, %v6073_v60  ;;  %v6481_v57 = vpop.f32.mrb[42].mxu0  ;;  %s23059_s11 = sld [smem:[#allocation54_spill]] }
0x1bf0   : > { %v17121_v55 = vpop.f32.mrb[43].mxu0 }
0x1bf2   : > { %v4037_v53 = vpop.permute.xlu0 %4036 }
0x1bf3   : > { %4039 = vst.msk [vmem:[#allocation3 + $0x2] sm:$0x1] %vm3108_vm10, %v4037_v53  ;;  %v21582_v53 = vld [vmem:[%s23058_s10] sm:$0x1] }
0x1bf6   : > { %v4779_v2 = vpop.permute.xlu0 %4778  ;;  %v6078_v24 = vld [vmem:[#allocation4] sm:$0xff] }
0x1bf7   : > { %4781 = vst.msk [vmem:[#allocation3 + $0x4] sm:$0x1] %vm3108_vm10, %v4779_v2  ;;  %6080 = vrot.lane.b32.xlu0 %v6078_v24, %s23027_s26 }
0x1bfa   : > { %v5521_v13 = vpop.permute.xlu0 %5520 }
0x1bfb   : > { %5523 = vst.msk [vmem:[#allocation3 + $0x6] sm:$0x1] %vm3108_vm10, %v5521_v13  ;;  %v5890_v26 = vpop.permute.xlu1 %5889 }
0x1bfc   : > { %5892 = vst.msk [vmem:[#allocation3 + $0x7] sm:$0x1] %vm3108_vm10, %v5890_v26  ;;  %vm6341_vm10 = vcmask 7168  }
0x1bfd   : > { %6342 = vst.msk [vmem:[#allocation5] sm:$0xff] %vm6341_vm10, %v20032_v8 }
0x1c03   : > { %v6077_v61 = vld [vmem:[#allocation3] sm:$0xff] }
0x1c63   : > { %v6624_v28 = vpop.f32.mrb[44].mxu0 }
0x1c64   : > { %v17143_v25 = vpop.f32.mrb[45].mxu0 }
0x1c65   : > { %v6372_v25 = vld [vmem:[%s23059_s11 + $0x8] sm:$0xff] }
0x1c69   : > { %v6081_v15 = vpop.permute.xlu0 %6080 }
0x1c6a   : > { %v21517_v49 = vsel %vm3105_vm9, %v6077_v61, %v6081_v15 }
0x1c6b   : > { %17109 = vmatmul.mubr.msk.f32.vlgmr.msra.gmra.mrb[34].mxu1 %vm1875_vm5, %v21517_v49 }
0x1c6c   : > { %18520 = vmatpush3.bf16.msra.mxu1 %v21511_v4  ;;  %17130 = vmatprep.mubr.msk.f32.mxu1 %vm20031_vm0, %v20032_v8 }
0x1c6d   : > { %18521 = vmatprep.subr.bf16.mxu1 %v20030_v1 }
0x1c70   : > { %18523 = vmatpush3.bf16.msra.mxu1 %v21522_v3 }
0x1c71   : > { %18530 = vmatprep.subr.bf16.mxu1 %v20030_v1 }
0x1c73   : > { %17131 = vmatmul.mubr.msk.f32.vlgmr.msra.gmra.mrb[36].mxu1 %vm1875_vm5, %v21527_v48 }
0x1c74   : > { %17152 = vmatprep.mubr.msk.f32.mxu1 %vm20031_vm0, %v20032_v8  ;;  %18532 = vmatpush3.bf16.msra.mxu1 %v21549_v58 }
0x1c75   : > { %18533 = vmatprep.subr.bf16.mxu1 %v20030_v1 }
0x1c78   : > { %18535 = vmatpush3.bf16.msra.mxu1 %v21559_v12 }
0x1c79   : > { %18542 = vmatprep.subr.bf16.mxu1 %v20030_v1 }
0x1c7b   : > { %17153 = vmatmul.mubr.f32.vlgmr.msra.gmra.mrb[38].mxu1 %v20032_v8 }
0x1c7c   : > { %17174 = vmatprep.mubr.msk.f32.mxu1 %vm20031_vm0, %v20032_v8 }
0x1d3e   : > { %v21535_v44 = vpop.f32.mrb[34].mxu1 }
0x1d3f   : > { %v17110_v45 = vpop.f32.mrb[35].mxu1 }
0x1d46   : > { %v6554_v34 = vpop.f32.mrb[36].mxu1 }
0x1d47   : > { %v6555_v46 = vadd.f32 %v6554_v34, %v6481_v57  ;;  %v17132_v10 = vpop.f32.mrb[37].mxu1  ;;  %v6373_v34 = vld [vmem:[%s23059_s11 + $0x10] sm:$0xff] }
0x1d49   : > { %v6628_v6 = vadd.f32 %v6624_v28, %v6555_v46  ;;  %v6371_v28 = vld [vmem:[%s23059_s11] sm:$0xff]  ;;  %v6374_v46 = vld [vmem:[%s23059_s11 + $0x18] sm:$0xff] }
0x1d4a   : > { %v21595_v45 = vpack.c.bf16 %v6372_v25, %v6371_v28 }
0x1d4b   : > { %v6629_v11 = vadd.f32 %v6628_v6, %v21538_v56  ;;  %v21601_v6 = vpack.c.bf16 %v6374_v46, %v6373_v34  ;;  %v6338_v46 = vshrl.u32 %v1754_v14, 7 }
0x1d4c   : > { %18544 = vmatpush3.bf16.msra.mxu1 %v21595_v45 }
0x1d4d   : > { %19498 = vtanh.f32 %v6629_v11  ;;  %v15743_v32 = vmul.f32 -1.442695, %v6629_v11  ;;  %v6969_v11 = vld [vmem:[#allocation5] sm:$0xff]  ;;  %18545 = vmatprep.subr.bf16.mxu1 %v20030_v1 }
0x1d4e   : > { %v6720_v60 = vpop.f32.mrb[38].mxu1 }
0x1d4f   : > { %19500 = vpow2.f32 %v15743_v32  ;;  %v17154_v21 = vpop.f32.mrb[39].mxu1  ;;  %v7000_v32 = vld [vmem:[#allocation5 + $0x4] sm:$0xff] }
0x1d50   : > { %18547 = vmatpush3.bf16.msra.mxu1 %v21601_v6  ;;  %v6376_v21 = vld [vmem:[%s23062_s1 + $0x8] sm:$0xff] }
0x1d51   : > { %18548 = vmatprep.subr.bf16.mxu1 %v20030_v1 }
0x1d57   : > { %v19499_v37 = vpop.eup %19498 }
0x1d58   : > { %6639 = vrot.lane.b32.xlu1 %v19499_v37, %s22936_s2  ;;  %v21605_v37 = vld [vmem:[#allocation5 + $0x2] sm:$0xff] }
0x1d59   : > { %v19501_v42 = vpop.eup %19500 }
0x1d5a   : > { %v6633_v29 = vadd.f32 1.0, %v19501_v42 }
0x1d5c   : > { %19502 = vrcp.f32 %v6633_v29 }
0x1d66   : > { %v19503_v19 = vpop.eup %19502 }
0x1d67   : > { %v6637_v38 = vmul.f32 0.0, %v19503_v19 }
0x1dca   : > { %v6640_v59 = vpop.permute.xlu1 %6639 }
0x1dcb   : > { %v6642_v30 = vmul.f32 %v19503_v19, %v6640_v59  ;;  %v6992_v59 = vld [vmem:[#allocation5 + $0x3] sm:$0xff] }
0x1dcd   : > { %6644 = vrot.lane.b32.xlu0 %v6642_v30, %s23022_s7  ;;  %v6367_v30 = vld [vmem:[%s23060_s12] sm:$0xff] }
0x1e3f   : > { %v6645_v5 = vpop.permute.xlu0 %6644 }
0x1e40   : > { %v21543_v31 = vadd.f32 %v6645_v5, %v6637_v38  ;;  %v6368_v38 = vld [vmem:[%s23060_s12 + $0x8] sm:$0xff] }
0x1e41   : > { %v21612_v5 = vpack.c.bf16 %v6368_v38, %v6367_v30 }
0x1e42   : > { %19504 = vtanh.f32 %v21543_v31 }
0x1e4c   : > { %v19505_v52 = vpop.eup %19504 }
0x1e4d   : > { %6650 = vrot.lane.b32.xlu1 %v19505_v52, %s22936_s2 }
0x1ebf   : > { %v6651_v18 = vpop.permute.xlu1 %6650 }
0x1ec0   : > { %v6653_v41 = vmul.f32 %v19503_v19, %v6651_v18  ;;  %v6976_v19 = vld [vmem:[#allocation5 + $0x1] sm:$0xff] }
0x1ec2   : > { %6725 = vrot.lane.b32.xlu0 %v6653_v41, %s23022_s7  ;;  %v7338_v41 = vrot.slane %v21527_v48, 1 }
0x1f34   : > { %v21575_v7 = vpop.permute.xlu0 %6725 }
0x1f35   : > { %17164 = vmatmul.mubr.msk.f32.vlgmr.msra.gmra.mrb[46].mxu0 %vm1875_vm5, %v21575_v7 }
0x1f36   : > { %17196 = vmatprep.mubr.msk.f32.mxu0 %vm20031_vm0, %v20032_v8 }
0x2008   : > { %v6795_v2 = vpop.f32.mrb[46].mxu0 }
0x2009   : > { %v6796_v24 = vadd.f32 %v6795_v2, %v6720_v60  ;;  %v17165_v13 = vpop.f32.mrb[47].mxu0  ;;  %v6375_v60 = vld [vmem:[%s23062_s1] sm:$0xff]  ;;  %v6377_v2 = vld [vmem:[%s23062_s1 + $0x10] sm:$0xff] }
0x200a   : > { %v6378_v13 = vld [vmem:[%s23062_s1 + $0x18] sm:$0xff]  ;;  %s23064_s1 = sld [smem:[#allocation45_spill]] }
0x200b   : > { %v6799_v26 = vadd.f32 %v6796_v24, %v21582_v53  ;;  %v21666_v24 = vpack.c.bf16 %v6376_v21, %v6375_v60 }
0x200d   : > { %19506 = vtanh.f32 %v6799_v26  ;;  %v15745_v51 = vmul.f32 -1.442695, %v6799_v26  ;;  %18556 = vmatpush3.bf16.msra.mxu0 %v21666_v24  ;;  %v21670_v26 = vpack.c.bf16 %v6378_v13, %v6377_v2  ;;  %v6339_v13 = vstv %s20715_s28  ;;  %s23067_s28 = sld [smem:[#allocation58_spill]] }
0x200e   : > { %18557 = vmatprep.subr.bf16.mxu0 %v20030_v1  ;;  %vm21714_vm13 = vcmp.lt.s32.totalorder %v6338_v46, %v6339_v13 }
0x200f   : > { %19508 = vpow2.f32 %v15745_v51 }
0x2010   : > { %v15735_v30 = vld [vmem:[%s23064_s1] ss:$0 sm:$0xff]  ;;  %s23068_s1 = sld [smem:[#allocation59_spill]] }
0x2011   : > { %18559 = vmatpush3.bf16.msra.mxu0 %v21670_v26  ;;  %v21701_v14 = vadd.f32 %v15735_v30, %v21535_v44 }
0x2012   : > { %18560 = vmatprep.subr.bf16.mxu0 %v20030_v1 }
0x2013   : > { %v6384_v13 = vld [vmem:[%s23067_s28 + $0x8] sm:$0xff] }
0x2017   : > { %v19507_v27 = vpop.eup %19506 }
0x2018   : > { %6809 = vrot.lane.b32.xlu1 %v19507_v27, %s22936_s2 }
0x2019   : > { %v19509_v20 = vpop.eup %19508 }
0x201a   : > { %v6803_v15 = vadd.f32 1.0, %v19509_v20 }
0x201c   : > { %19510 = vrcp.f32 %v6803_v15 }
0x2026   : > { %v19511_v61 = vpop.eup %19510 }
0x2027   : > { %v6807_v63 = vmul.f32 0.0, %v19511_v61 }
0x208a   : > { %v6810_v9 = vpop.permute.xlu1 %6809 }
0x208b   : > { %v6812_v47 = vmul.f32 %v19511_v61, %v6810_v9 }
0x208d   : > { %6814 = vrot.lane.b32.xlu0 %v6812_v47, %s23022_s7 }
0x20ff   : > { %v6815_v57 = vpop.permute.xlu0 %6814 }
0x2100   : > { %v21590_v55 = vadd.f32 %v6815_v57, %v6807_v63 }
0x2102   : > { %19512 = vtanh.f32 %v21590_v55 }
0x210c   : > { %v19513_v10 = vpop.eup %19512 }
0x210d   : > { %6820 = vrot.lane.b32.xlu1 %v19513_v10, %s22936_s2  ;;  %s23061_s2 = sld [smem:[#allocation57_spill]] }
0x2111   : > { %6972 = vperm.xlu1 %19369, %v6969_v11  }
0x2113   : > { %v6379_v62 = vld [vmem:[%s23061_s2] sm:$0xff]  ;;  %v6380_v39 = vld [vmem:[%s23061_s2 + $0x8] sm:$0xff]  ;;  %v6381_v22 = vld [vmem:[%s23061_s2 + $0x10] sm:$0xff] }
0x2114   : > { %v21626_v0 = vpack.c.bf16 %v6380_v39, %v6379_v62  ;;  %v6382_v52 = vld [vmem:[%s23061_s2 + $0x18] sm:$0xff]  ;;  %s23063_s2 = sld [smem:[#allocation55_spill]] }
0x2115   : > { %6987 = vperm.xlu1 %19369, %v21605_v37   ;;  %v21634_v18 = vpack.c.bf16 %v6382_v52, %v6381_v22 }
0x2119   : > { %7003 = vperm.xlu1 %19369, %v7000_v32  }
0x211a   : > { %v21676_v51 = vld [vmem:[%s23063_s2] ss:$0 sm:$0xff]  ;;  %v21679_v20 = vld [vmem:[%s23063_s2 + $0x1] ss:$0 sm:$0xff]  ;;  %v21684_v47 = vld [vmem:[%s23063_s2 + $0x2] ss:$0 sm:$0xff] }
0x211b   : > { %v21688_v25 = vld [vmem:[%s23063_s2 + $0x3] ss:$0 sm:$0xff]  ;;  %v21693_v32 = vld [vmem:[%s23063_s2 + $0x4] ss:$0 sm:$0xff] }
0x217f   : > { %v6821_v42 = vpop.permute.xlu1 %6820 }
0x2180   : > { %v6823_v29 = vmul.f32 %v19511_v61, %v6821_v42 }
0x2182   : > { %6825 = vrot.lane.b32.xlu0 %v6823_v29, %s23022_s7  ;;  %v21695_v29 = vsub.s32 0, %v6338_v46 }
0x2186   : > { %6979 = vperm.xlu0 %19368, %v6976_v19  }
0x218a   : > { %6995 = vperm.xlu0 %19368, %v6992_v59  }
0x2190   : > { %v6973_v27 = vpop.permute.xlu1 %6972 }
0x2191   : > { %v6975_v61 = vmul.f32 %v21676_v51, %v6973_v27 }
0x2194   : > { %v6988_v63 = vpop.permute.xlu1 %6987 }
0x2195   : > { %v6990_v28 = vmul.f32 %v21684_v47, %v6988_v63 }
0x2198   : > { %v7004_v42 = vpop.permute.xlu1 %7003 }
0x2199   : > { %v7006_v59 = vmul.f32 %v21693_v32, %v7004_v42 }
0x21f4   : > { %v6826_v36 = vpop.permute.xlu0 %6825 }
0x21f5   : > { %17175 = vmatmul.mubr.msk.f32.vlgmr.msra.gmra.mrb[40].mxu1 %vm1875_vm5, %v6826_v36 }
0x21f6   : > { %18550 = vmatpush3.bf16.msra.mxu1 %v21612_v5  ;;  %17185 = vmatprep.mubr.msk.f32.mxu1 %vm20031_vm0, %v20032_v8 }
0x21f7   : > { %18551 = vmatprep.subr.bf16.mxu1 %v20030_v1 }
0x21fa   : > { %18553 = vmatpush3.bf16.msra.mxu1 %v21618_v35 }
0x21fb   : > { %18566 = vmatprep.subr.bf16.mxu1 %v20030_v1 }
0x21fd   : > { %17186 = vmatmul.mubr.msk.f32.vlgmr.msra.gmra.mrb[40].mxu1 %vm1875_vm5, %v21575_v7 }
0x21fe   : > { %18568 = vmatpush3.bf16.msra.mxu1 %v21626_v0  ;;  %17218 = vmatprep.mubr.msk.f32.mxu1 %vm20031_vm0, %v20032_v8 }
0x21ff   : > { %18569 = vmatprep.subr.bf16.mxu1 %v20030_v1 }
0x2202   : > { %18571 = vmatpush3.bf16.msra.mxu1 %v21634_v18 }
0x2203   : > { %18578 = vmatprep.subr.bf16.mxu1 %v20030_v1 }
0x2205   : > { %17219 = vmatmul.mubr.msk.f32.vlgmr.msra.gmra.mrb[42].mxu1 %vm1875_vm5, %v6826_v36  ;;  %v6980_v15 = vpop.permute.xlu0 %6979 }
0x2206   : > { %18580 = vmatpush3.bf16.msra.mxu1 %v21511_v4  ;;  %17240 = vmatprep.mubr.msk.f32.mxu1 %vm20031_vm0, %v20032_v8  ;;  %v6982_v9 = vmul.f32 %v21679_v20, %v6980_v15 }
0x2207   : > { %18581 = vmatprep.subr.bf16.mxu1 %v20030_v1 }
0x2208   : > { %v6983_v57 = vadd.f32 %v6982_v9, %v6975_v61 }
0x2209   : > { %v6996_v34 = vpop.permute.xlu0 %6995 }
0x220a   : > { %18583 = vmatpush3.bf16.msra.mxu1 %v21522_v3  ;;  %v6991_v10 = vadd.f32 %v6990_v28, %v6983_v57  ;;  %v6998_v11 = vmul.f32 %v21688_v25, %v6996_v34 }
0x220b   : > { %18590 = vmatprep.subr.bf16.mxu1 %v20030_v1 }
0x220c   : > { %v6999_v19 = vadd.f32 %v6998_v11, %v6991_v10 }
0x220d   : > { %17241 = vmatmul.mubr.msk.f32.vlgmr.msra.gmra.mrb[44].mxu1 %vm1875_vm5, %v7338_v41 }
0x220e   : > { %18592 = vmatpush3.bf16.msra.mxu1 %v21549_v58  ;;  %17262 = vmatprep.mubr.msk.f32.mxu1 %vm20031_vm0, %v20032_v8  ;;  %v7007_v40 = vadd.f32 %v7006_v59, %v6999_v19 }
0x220f   : > { %18593 = vmatprep.subr.bf16.mxu1 %v20030_v1 }
0x2212   : > { %18595 = vmatpush3.bf16.msra.mxu1 %v21559_v12 }
0x2213   : > { %18602 = vmatprep.subr.bf16.mxu1 %v20030_v1 }
0x2215   : > { %17263 = vmatmul.mubr.msk.f32.vlgmr.msra.gmra.mrb[46].mxu1 %vm1875_vm5, %v6826_v36 }
0x2216   : > { %18604 = vmatpush3.bf16.msra.mxu1 %v21595_v45  ;;  %17284 = vmatprep.mubr.msk.f32.mxu1 %vm20031_vm0, %v20032_v8 }
0x2217   : > { %18605 = vmatprep.subr.bf16.mxu1 %v20030_v1 }
0x221a   : > { %18607 = vmatpush3.bf16.msra.mxu1 %v21601_v6 }
0x221b   : > { %18608 = vmatprep.subr.bf16.mxu1 %v20030_v1 }
0x22d0   : > { %v6965_v38 = vpop.f32.mrb[40].mxu1 }
0x22d1   : > { %v7011_v43 = vrot.slane %v6965_v38, %v21695_v29  ;;  %v17187_v36 = vpop.f32.mrb[41].mxu1 }
0x22d3   : > { %v7012_v62 = vadd.f32 %v7011_v43, %v7007_v40 }
0x22d5   : > { %v7013_v39 = vadd.f32 %v7012_v62, %v21701_v14 }
0x22d7   : > { %19514 = vtanh.f32 %v7013_v39 }
0x22d8   : > { %v21704_v22 = vpop.f32.mrb[42].mxu1 }
0x22d9   : > { %v17220_v52 = vpop.f32.mrb[43].mxu1 }
0x22e0   : > { %v21706_v41 = vpop.f32.mrb[44].mxu1 }
0x22e1   : > { %v19515_v60 = vpop.eup %19514  ;;  %v17242_v21 = vpop.f32.mrb[45].mxu1 }
0x22e2   : > { %17197 = vmatmul.mubr.msk.f32.vlgmr.msra.gmra.mrb[48].mxu0 %vm1875_vm5, %v19515_v60 }
0x22e3   : > { %17207 = vmatprep.mubr.msk.f32.mxu0 %vm20031_vm0, %v20032_v8 }
0x22e8   : > { %v21711_v2 = vpop.f32.mrb[46].mxu1 }
0x22e9   : > { %v17264_v44 = vpop.f32.mrb[47].mxu1 }
0x22ea   : > { %v6383_v44 = vld [vmem:[%s23067_s28] sm:$0xff] }
0x23b5   : > { %v7084_v15 = vpop.f32.mrb[48].mxu0 }
0x23b6   : > { %v7088_v61 = vsel %vm21714_vm13, %v7084_v15, -1e+30  ;;  %v17198_v9 = vpop.f32.mrb[49].mxu0  ;;  %v21726_v15 = vpack.c.bf16 %v6384_v13, %v6383_v44 }
0x23b7   : > { %v7089_v63 = vsel %vm6341_vm10, %v7088_v61, -inf  ;;  %v6386_v9 = vld [vmem:[%s23067_s28 + $0x18] sm:$0xff] }
0x23b8   : > { %v7090_v57 = vrot.slane %v7089_v63, 4  ;;  %18562 = vmatpush3.bf16.msra.mxu0 %v21726_v15 }
0x23b9   : > { %18563 = vmatprep.subr.bf16.mxu0 %v20030_v1 }
0x23ba   : > { %v7091_v28 = vmax.f32 %v7089_v63, %v7090_v57 }
0x23bc   : > { %v7092_v34 = vrot.slane %v7091_v28, 2 }
0x23be   : > { %v7093_v10 = vmax.f32 %v7091_v28, %v7092_v34 }
0x23c0   : > { %v7094_v11 = vrot.slane %v7093_v10, 1 }
0x23c2   : > { %v7095_v42 = vmax.f32 %v7093_v10, %v7094_v11 }
0x23c4   : > { %v7096_v19 = vsub.f32 %v7088_v61, %v7095_v42  ;;  %v6385_v61 = vld [vmem:[%s23067_s28 + $0x10] sm:$0xff] }
0x23c5   : > { %v21732_v63 = vpack.c.bf16 %v6386_v9, %v6385_v61 }
0x23c6   : > { %v7097_v59 = vmul.f32 1.442695, %v7096_v19 }
0x23c7   : > { %18565 = vmatpush3.bf16.msra.mxu0 %v21732_v63 }
0x23c8   : > { %19516 = vpow2.f32 %v7097_v59  ;;  %18572 = vmatprep.subr.bf16.mxu0 %v20030_v1 }
0x23d2   : > { %v19517_v46 = vpop.eup %19516 }
0x23d3   : > { %v7099_v30 = vsel %vm6341_vm10, %v19517_v46, 0.0 }
0x23d4   : > { %v7100_v38 = vrot.slane %v7099_v30, 4 }
0x23d6   : > { %v7101_v40 = vadd.f32 %v7100_v38, %v7099_v30 }
0x23d8   : > { %v7102_v43 = vrot.slane %v7101_v40, 2 }
0x23da   : > { %v7103_v36 = vadd.f32 %v7102_v43, %v7101_v40 }
0x23dc   : > { %v7104_v62 = vrot.slane %v7103_v36, 1 }
0x23de   : > { %v7105_v39 = vadd.f32 %v7104_v62, %v7103_v36 }
0x23e0   : > { %19518 = vrcp.f32 %v7105_v39 }
0x23ea   : > { %v19519_v52 = vpop.eup %19518 }
0x23eb   : > { %v7107_v60 = vmul.f32 %v19519_v52, %v19517_v46  ;;  %v21761_v46 = vld [vmem:[%s23068_s1] sm:$0x1] }
0x23ed   : > { %7110 = vperm.xlu0 %19368, %v7107_v60   ;;  %v7121_v21 = vadd.f32 %v7107_v60, %v21605_v37 }
0x23ef   : > { %7122 = vst.msk [vmem:[#allocation5 + $0x2] sm:$0xff] %vm6341_vm10, %v7121_v21 }
0x246c   : > { %v7111_v57 = vpop.permute.xlu0 %7110 }
0x246d   : > { %v7113_v37 = vmul.f32 %v7111_v57, %v21517_v49 }
0x246f   : > { %v7114_v28 = vsel %vm1875_vm5, %v7113_v37, 0.0 }
0x2470   : > { %v7115_v34 = vrot.slane %v7114_v28, 4 }
0x2472   : > { %v7116_v10 = vadd.f32 %v7115_v34, %v7114_v28 }
0x2474   : > { %v7117_v11 = vrot.slane %v7116_v10, 2 }
0x2476   : > { %v7118_v42 = vadd.f32 %v7117_v11, %v7116_v10 }
0x2478   : > { %v7119_v19 = vrot.slane %v7118_v42, 1 }
0x247a   : > { %v7120_v59 = vadd.f32 %v7119_v19, %v7118_v42 }
0x247c   : > { %17208 = vmatmul.mubr.msk.f32.vlgmr.msra.gmra.mrb[50].mxu0 %vm1875_vm5, %v7120_v59 }
0x247d   : > { %18574 = vmatpush3.bf16.msra.mxu0 %v21440_v50  ;;  %17229 = vmatprep.mubr.msk.f32.mxu0 %vm20031_vm0, %v20032_v8 }
0x247e   : > { %18575 = vmatprep.subr.bf16.mxu0 %v20030_v1 }
0x2481   : > { %18577 = vmatpush3.bf16.msra.mxu0 %v21450_v23 }
0x2482   : > { %18584 = vmatprep.subr.bf16.mxu0 %v20030_v1 }
0x2484   : > { %17230 = vmatmul.mubr.msk.f32.vlgmr.msra.gmra.mrb[52].mxu0 %vm1875_vm5, %v7120_v59 }
0x2485   : > { %18586 = vmatpush3.bf16.msra.mxu0 %v21490_v17  ;;  %17251 = vmatprep.mubr.msk.f32.mxu0 %vm20031_vm0, %v20032_v8 }
0x2486   : > { %18587 = vmatprep.subr.bf16.mxu0 %v20030_v1 }
0x2489   : > { %18589 = vmatpush3.bf16.msra.mxu0 %v21497_v54 }
0x248a   : > { %18596 = vmatprep.subr.bf16.mxu0 %v20030_v1 }
0x248c   : > { %17252 = vmatmul.mubr.msk.f32.vlgmr.msra.gmra.mrb[54].mxu0 %vm1875_vm5, %v21575_v7 }
0x248d   : > { %18598 = vmatpush3.bf16.msra.mxu0 %v21554_v33  ;;  %17273 = vmatprep.mubr.msk.f32.mxu0 %vm20031_vm0, %v20032_v8 }
0x248e   : > { %18599 = vmatprep.subr.bf16.mxu0 %v20030_v1 }
0x2491   : > { %18601 = vmatpush3.bf16.msra.mxu0 %v21563_v16 }
0x2492   : > { %18614 = vmatprep.subr.bf16.mxu0 %v20030_v1 }
0x254f   : > { %v7192_v30 = vpop.f32.mrb[50].mxu0 }
0x2550   : > { %v7263_v38 = vadd.f32 %v21704_v22, %v7192_v30  ;;  %v17209_v40 = vpop.f32.mrb[51].mxu0 }
0x2552   : > { %v7266_v7 = vadd.f32 %v7263_v38, %v21761_v46 }
0x2554   : > { %7267 = vst [vmem:[%s21766_s3] sm:$0x1] %v7266_v7 }
0x2557   : > { %v7334_v43 = vpop.f32.mrb[52].mxu0 }
0x2558   : > { %v7408_v36 = vadd.f32 %v21706_v41, %v7334_v43  ;;  %v17231_v62 = vpop.f32.mrb[53].mxu0 }
0x255f   : > { %v7477_v39 = vpop.f32.mrb[54].mxu0 }
0x2560   : > { %v7481_v52 = vadd.f32 %v7477_v39, %v7408_v36  ;;  %v17253_v60 = vpop.f32.mrb[55].mxu0 }
0x2562   : > { %v7482_v21 = vadd.f32 %v7481_v52, %v21538_v56 }
0x2564   : > { %19520 = vtanh.f32 %v7482_v21  ;;  %v15754_v22 = vmul.f32 -1.442695, %v7482_v21 }
0x2566   : > { %19522 = vpow2.f32 %v15754_v22  ;;  %v7822_v22 = vld [vmem:[#allocation5] sm:$0xff] }
0x256e   : > { %v19521_v44 = vpop.eup %19520 }
0x256f   : > { %7492 = vrot.lane.b32.xlu1 %v19521_v44, %s23069_s4 }
0x2570   : > { %v19523_v13 = vpop.eup %19522 }
0x2571   : > { %v7486_v61 = vadd.f32 1.0, %v19523_v13  ;;  %v21799_v13 = vld [vmem:[#allocation5 + $0x2] sm:$0xff] }
0x2573   : > { %19524 = vrcp.f32 %v7486_v61  ;;  %v7853_v61 = vld [vmem:[#allocation5 + $0x4] sm:$0xff] }
0x257d   : > { %v19525_v9 = vpop.eup %19524 }
0x257e   : > { %v7490_v41 = vmul.f32 %v19525_v9, %v21543_v31 }
0x25e1   : > { %v7493_v57 = vpop.permute.xlu1 %7492 }
0x25e2   : > { %v7495_v37 = vmul.f32 %v19525_v9, %v7493_v57 }
0x25e4   : > { %7497 = vrot.lane.b32.xlu0 %v7495_v37, %s23022_s7  ;;  %v7845_v37 = vld [vmem:[#allocation5 + $0x3] sm:$0xff] }
0x2656   : > { %v7498_v28 = vpop.permute.xlu0 %7497 }
0x2657   : > { %v21775_v34 = vadd.f32 %v7498_v28, %v7490_v41  ;;  %v8191_v28 = vrot.slane %v21527_v48, 2 }
0x2659   : > { %19526 = vtanh.f32 %v21775_v34 }
0x2663   : > { %v19527_v10 = vpop.eup %19526 }
0x2664   : > { %7503 = vrot.lane.b32.xlu1 %v19527_v10, %s23069_s4 }
0x26d6   : > { %v7504_v11 = vpop.permute.xlu1 %7503 }
0x26d7   : > { %v7506_v42 = vmul.f32 %v19525_v9, %v7504_v11 }
0x26d9   : > { %7578 = vrot.lane.b32.xlu0 %v7506_v42, %s23022_s7 }
0x274b   : > { %v21780_v19 = vpop.permute.xlu0 %7578 }
0x274c   : > { %17274 = vmatmul.mubr.msk.f32.vlgmr.msra.gmra.mrb[56].mxu0 %vm1875_vm5, %v21780_v19 }
0x274d   : > { %18616 = vmatpush3.bf16.msra.mxu0 %v21666_v24  ;;  %17306 = vmatprep.mubr.msk.f32.mxu0 %vm20031_vm0, %v20032_v8 }
0x274e   : > { %18617 = vmatprep.subr.bf16.mxu0 %v20030_v1 }
0x2751   : > { %18619 = vmatpush3.bf16.msra.mxu0 %v21670_v26 }
0x2752   : > { %18620 = vmatprep.subr.bf16.mxu0 %v20030_v1 }
0x281f   : > { %v7648_v31 = vpop.f32.mrb[56].mxu0 }
0x2820   : > { %v7649_v59 = vadd.f32 %v7648_v31, %v21711_v2  ;;  %v17275_v30 = vpop.f32.mrb[57].mxu0 }
0x2822   : > { %v7652_v38 = vadd.f32 %v7649_v59, %v21582_v53 }
0x2824   : > { %19528 = vtanh.f32 %v7652_v38  ;;  %v15757_v7 = vmul.f32 -1.442695, %v7652_v38 }
0x2826   : > { %19530 = vpow2.f32 %v15757_v7 }
0x282e   : > { %v19529_v40 = vpop.eup %19528 }
0x282f   : > { %7662 = vrot.lane.b32.xlu1 %v19529_v40, %s23069_s4 }
0x2830   : > { %v19531_v43 = vpop.eup %19530 }
0x2831   : > { %v7656_v36 = vadd.f32 1.0, %v19531_v43 }
0x2833   : > { %19532 = vrcp.f32 %v7656_v36 }
0x283d   : > { %v19533_v62 = vpop.eup %19532 }
0x283e   : > { %v7660_v60 = vmul.f32 %v19533_v62, %v21590_v55  ;;  %v7829_v55 = vld [vmem:[#allocation5 + $0x1] sm:$0xff] }
0x28a1   : > { %v7663_v39 = vpop.permute.xlu1 %7662 }
0x28a2   : > { %v7665_v52 = vmul.f32 %v19533_v62, %v7663_v39 }
0x28a4   : > { %7667 = vrot.lane.b32.xlu0 %v7665_v52, %s23022_s7 }
0x2916   : > { %v7668_v2 = vpop.permute.xlu0 %7667 }
0x2917   : > { %v21795_v21 = vadd.f32 %v7668_v2, %v7660_v60 }
0x2919   : > { %19534 = vtanh.f32 %v21795_v21 }
0x2923   : > { %v19535_v44 = vpop.eup %19534 }
0x2924   : > { %7673 = vrot.lane.b32.xlu1 %v19535_v44, %s23069_s4 }
0x2928   : > { %7825 = vperm.xlu1 %19369, %v7822_v22  }
0x292c   : > { %7840 = vperm.xlu1 %19369, %v21799_v13  }
0x2930   : > { %7856 = vperm.xlu1 %19369, %v7853_v61  }
0x2996   : > { %v7674_v9 = vpop.permute.xlu1 %7673 }
0x2997   : > { %v7676_v57 = vmul.f32 %v19533_v62, %v7674_v9 }
0x2999   : > { %7678 = vrot.lane.b32.xlu0 %v7676_v57, %s23022_s7 }
0x299d   : > { %7832 = vperm.xlu0 %19368, %v7829_v55  }
0x29a1   : > { %7848 = vperm.xlu0 %19368, %v7845_v37  }
0x29a7   : > { %v7826_v10 = vpop.permute.xlu1 %7825 }
0x29a8   : > { %v7828_v31 = vmul.f32 %v21676_v51, %v7826_v10 }
0x29ab   : > { %v7841_v59 = vpop.permute.xlu1 %7840 }
0x29ac   : > { %v7843_v40 = vmul.f32 %v21684_v47, %v7841_v59 }
0x29af   : > { %v7857_v36 = vpop.permute.xlu1 %7856 }
0x29b0   : > { %v7859_v39 = vmul.f32 %v21693_v32, %v7857_v36 }
0x2a0b   : > { %v7679_v41 = vpop.permute.xlu0 %7678 }
0x2a0c   : > { %17285 = vmatmul.mubr.msk.f32.vlgmr.msra.gmra.mrb[48].mxu1 %vm1875_vm5, %v7679_v41 }
0x2a0d   : > { %18610 = vmatpush3.bf16.msra.mxu1 %v21612_v5  ;;  %17295 = vmatprep.mubr.msk.f32.mxu1 %vm20031_vm0, %v20032_v8 }
0x2a0e   : > { %18611 = vmatprep.subr.bf16.mxu1 %v20030_v1 }
0x2a11   : > { %18613 = vmatpush3.bf16.msra.mxu1 %v21618_v35 }
0x2a12   : > { %18626 = vmatprep.subr.bf16.mxu1 %v20030_v1 }
0x2a14   : > { %17296 = vmatmul.mubr.msk.f32.vlgmr.msra.gmra.mrb[48].mxu1 %vm1875_vm5, %v21780_v19 }
0x2a15   : > { %18628 = vmatpush3.bf16.msra.mxu1 %v21626_v0  ;;  %17328 = vmatprep.mubr.msk.f32.mxu1 %vm20031_vm0, %v20032_v8 }
0x2a16   : > { %18629 = vmatprep.subr.bf16.mxu1 %v20030_v1 }
0x2a19   : > { %18631 = vmatpush3.bf16.msra.mxu1 %v21634_v18 }
0x2a1a   : > { %18638 = vmatprep.subr.bf16.mxu1 %v20030_v1 }
0x2a1c   : > { %17329 = vmatmul.mubr.msk.f32.vlgmr.msra.gmra.mrb[50].mxu1 %vm1875_vm5, %v7679_v41  ;;  %v7833_v11 = vpop.permute.xlu0 %7832 }
0x2a1d   : > { %18640 = vmatpush3.bf16.msra.mxu1 %v21511_v4  ;;  %17350 = vmatprep.mubr.msk.f32.mxu1 %vm20031_vm0, %v20032_v8  ;;  %v7835_v42 = vmul.f32 %v21679_v20, %v7833_v11 }
0x2a1e   : > { %18641 = vmatprep.subr.bf16.mxu1 %v20030_v1 }
0x2a1f   : > { %v7836_v30 = vadd.f32 %v7835_v42, %v7828_v31 }
0x2a20   : > { %v7849_v38 = vpop.permute.xlu0 %7848 }
0x2a21   : > { %18643 = vmatpush3.bf16.msra.mxu1 %v21522_v3  ;;  %v7844_v7 = vadd.f32 %v7843_v40, %v7836_v30  ;;  %v7851_v43 = vmul.f32 %v21688_v25, %v7849_v38 }
0x2a22   : > { %18650 = vmatprep.subr.bf16.mxu1 %v20030_v1 }
0x2a23   : > { %v7852_v62 = vadd.f32 %v7851_v43, %v7844_v7 }
0x2a24   : > { %17351 = vmatmul.mubr.msk.f32.vlgmr.msra.gmra.mrb[52].mxu1 %vm1875_vm5, %v8191_v28 }
0x2a25   : > { %18652 = vmatpush3.bf16.msra.mxu1 %v21549_v58  ;;  %17372 = vmatprep.mubr.msk.f32.mxu1 %vm20031_vm0, %v20032_v8  ;;  %v7860_v60 = vadd.f32 %v7859_v39, %v7852_v62 }
0x2a26   : > { %18653 = vmatprep.subr.bf16.mxu1 %v20030_v1 }
0x2a29   : > { %18655 = vmatpush3.bf16.msra.mxu1 %v21559_v12 }
0x2a2a   : > { %18662 = vmatprep.subr.bf16.mxu1 %v20030_v1 }
0x2a2c   : > { %17373 = vmatmul.mubr.msk.f32.vlgmr.msra.gmra.mrb[54].mxu1 %vm1875_vm5, %v7679_v41 }
0x2a2d   : > { %18664 = vmatpush3.bf16.msra.mxu1 %v21595_v45  ;;  %17394 = vmatprep.mubr.msk.f32.mxu1 %vm20031_vm0, %v20032_v8 }
0x2a2e   : > { %18665 = vmatprep.subr.bf16.mxu1 %v20030_v1 }
0x2a31   : > { %18667 = vmatpush3.bf16.msra.mxu1 %v21601_v6 }
0x2a32   : > { %18668 = vmatprep.subr.bf16.mxu1 %v20030_v1 }
0x2ae7   : > { %v7818_v52 = vpop.f32.mrb[48].mxu1 }
0x2ae8   : > { %v7864_v2 = vrot.slane %v7818_v52, %v21695_v29  ;;  %v17297_v44 = vpop.f32.mrb[49].mxu1 }
0x2aea   : > { %v7865_v22 = vadd.f32 %v7864_v2, %v7860_v60 }
0x2aec   : > { %v7866_v61 = vadd.f32 %v7865_v22, %v21701_v14 }
0x2aee   : > { %19536 = vtanh.f32 %v7866_v61 }
0x2aef   : > { %v21847_v9 = vpop.f32.mrb[50].mxu1 }
0x2af0   : > { %v17330_v57 = vpop.f32.mrb[51].mxu1 }
0x2af7   : > { %v21849_v55 = vpop.f32.mrb[52].mxu1 }
0x2af8   : > { %v19537_v37 = vpop.eup %19536  ;;  %v17352_v41 = vpop.f32.mrb[53].mxu1 }
0x2af9   : > { %17307 = vmatmul.mubr.msk.f32.vlgmr.msra.gmra.mrb[58].mxu0 %vm1875_vm5, %v19537_v37 }
0x2afa   : > { %18622 = vmatpush3.bf16.msra.mxu0 %v21726_v15  ;;  %17317 = vmatprep.mubr.msk.f32.mxu0 %vm20031_vm0, %v20032_v8 }
0x2afb   : > { %18623 = vmatprep.subr.bf16.mxu0 %v20030_v1 }
0x2afe   : > { %18625 = vmatpush3.bf16.msra.mxu0 %v21732_v63 }
0x2aff   : > { %v21857_v28 = vpop.f32.mrb[54].mxu1  ;;  %18632 = vmatprep.subr.bf16.mxu0 %v20030_v1 }
0x2b00   : > { %v17374_v10 = vpop.f32.mrb[55].mxu1 }
0x2bcc   : > { %v7937_v11 = vpop.f32.mrb[58].mxu0 }
0x2bcd   : > { %v7941_v42 = vsel %vm21714_vm13, %v7937_v11, -1e+30  ;;  %v17308_v31 = vpop.f32.mrb[59].mxu0 }
0x2bce   : > { %v7942_v59 = vsel %vm6341_vm10, %v7941_v42, -inf }
0x2bcf   : > { %v7943_v30 = vrot.slane %v7942_v59, 4 }
0x2bd1   : > { %v7944_v38 = vmax.f32 %v7942_v59, %v7943_v30 }
0x2bd3   : > { %v7945_v40 = vrot.slane %v7944_v38, 2 }
0x2bd5   : > { %v7946_v7 = vmax.f32 %v7944_v38, %v7945_v40 }
0x2bd7   : > { %v7947_v43 = vrot.slane %v7946_v7, 1 }
0x2bd9   : > { %v7948_v36 = vmax.f32 %v7946_v7, %v7947_v43 }
0x2bdb   : > { %v7949_v62 = vsub.f32 %v7941_v42, %v7948_v36 }
0x2bdd   : > { %v7950_v39 = vmul.f32 1.442695, %v7949_v62 }
0x2bdf   : > { %19538 = vpow2.f32 %v7950_v39 }
0x2be9   : > { %v19539_v52 = vpop.eup %19538 }
0x2bea   : > { %v7952_v60 = vsel %vm6341_vm10, %v19539_v52, 0.0 }
0x2beb   : > { %v7953_v2 = vrot.slane %v7952_v60, 4 }
0x2bed   : > { %v7954_v44 = vadd.f32 %v7953_v2, %v7952_v60 }
0x2bef   : > { %v7955_v22 = vrot.slane %v7954_v44, 2 }
0x2bf1   : > { %v7956_v61 = vadd.f32 %v7955_v22, %v7954_v44 }
0x2bf3   : > { %v7957_v57 = vrot.slane %v7956_v61, 1 }
0x2bf5   : > { %v7958_v37 = vadd.f32 %v7957_v57, %v7956_v61 }
0x2bf7   : > { %19540 = vrcp.f32 %v7958_v37 }
0x2c01   : > { %v19541_v41 = vpop.eup %19540 }
0x2c02   : > { %v7960_v10 = vmul.f32 %v19541_v41, %v19539_v52 }
0x2c04   : > { %7963 = vperm.xlu0 %19368, %v7960_v10   ;;  %v7974_v11 = vadd.f32 %v7960_v10, %v21799_v13 }
0x2c06   : > { %7975 = vst.msk [vmem:[#allocation5 + $0x2] sm:$0xff] %vm6341_vm10, %v7974_v11 }
0x2c83   : > { %v7964_v42 = vpop.permute.xlu0 %7963 }
0x2c84   : > { %v7966_v31 = vmul.f32 %v7964_v42, %v21517_v49 }
0x2c86   : > { %v7967_v59 = vsel %vm1875_vm5, %v7966_v31, 0.0 }
0x2c87   : > { %v7968_v30 = vrot.slane %v7967_v59, 4 }
0x2c89   : > { %v7969_v38 = vadd.f32 %v7968_v30, %v7967_v59 }
0x2c8b   : > { %v7970_v40 = vrot.slane %v7969_v38, 2 }
0x2c8d   : > { %v7971_v7 = vadd.f32 %v7970_v40, %v7969_v38 }
0x2c8f   : > { %v7972_v43 = vrot.slane %v7971_v7, 1 }
0x2c91   : > { %v7973_v36 = vadd.f32 %v7972_v43, %v7971_v7 }
0x2c93   : > { %17318 = vmatmul.mubr.msk.f32.vlgmr.msra.gmra.mrb[60].mxu0 %vm1875_vm5, %v7973_v36 }
0x2c94   : > { %18634 = vmatpush3.bf16.msra.mxu0 %v21440_v50  ;;  %17339 = vmatprep.mubr.msk.f32.mxu0 %vm20031_vm0, %v20032_v8 }
0x2c95   : > { %18635 = vmatprep.subr.bf16.mxu0 %v20030_v1 }
0x2c98   : > { %18637 = vmatpush3.bf16.msra.mxu0 %v21450_v23 }
0x2c99   : > { %18644 = vmatprep.subr.bf16.mxu0 %v20030_v1 }
0x2c9b   : > { %17340 = vmatmul.mubr.msk.f32.vlgmr.msra.gmra.mrb[62].mxu0 %vm1875_vm5, %v7973_v36 }
0x2c9c   : > { %18646 = vmatpush3.bf16.msra.mxu0 %v21490_v17  ;;  %17361 = vmatprep.mubr.msk.f32.mxu0 %vm20031_vm0, %v20032_v8 }
0x2c9d   : > { %18647 = vmatprep.subr.bf16.mxu0 %v20030_v1 }
0x2ca0   : > { %18649 = vmatpush3.bf16.msra.mxu0 %v21497_v54 }
0x2ca1   : > { %18656 = vmatprep.subr.bf16.mxu0 %v20030_v1 }
0x2ca3   : > { %17362 = vmatmul.mubr.msk.f32.vlgmr.msra.gmra.mrb[64].mxu0 %vm1875_vm5, %v21780_v19 }
0x2ca4   : > { %18658 = vmatpush3.bf16.msra.mxu0 %v21554_v33  ;;  %17383 = vmatprep.mubr.msk.f32.mxu0 %vm20031_vm0, %v20032_v8 }
0x2ca5   : > { %18659 = vmatprep.subr.bf16.mxu0 %v20030_v1 }
0x2ca8   : > { %18661 = vmatpush3.bf16.msra.mxu0 %v21563_v16 }
0x2ca9   : > { %18674 = vmatprep.subr.bf16.mxu0 %v20030_v1 }
0x2d66   : > { %v8045_v13 = vpop.f32.mrb[60].mxu0 }
0x2d67   : > { %v8116_v62 = vadd.f32 %v21847_v9, %v8045_v13  ;;  %v17319_v39 = vpop.f32.mrb[61].mxu0 }
0x2d69   : > { %v8119_v52 = vadd.f32 %v8116_v62, %v21761_v46 }
0x2d6b   : > { %8120 = vst [vmem:[%s21766_s3 + $0x1] sm:$0x1] %v8119_v52 }
0x2d6e   : > { %v8187_v60 = vpop.f32.mrb[62].mxu0 }
0x2d6f   : > { %v8261_v19 = vadd.f32 %v21849_v55, %v8187_v60  ;;  %v17341_v2 = vpop.f32.mrb[63].mxu0 }
0x2d76   : > { %v8330_v44 = vpop.f32.mrb[64].mxu0 }
0x2d77   : > { %v8334_v22 = vadd.f32 %v8330_v44, %v8261_v19  ;;  %v17363_v61 = vpop.f32.mrb[65].mxu0 }
0x2d79   : > { %v8335_v57 = vadd.f32 %v8334_v22, %v21538_v56 }
0x2d7b   : > { %19542 = vtanh.f32 %v8335_v57  ;;  %v15766_v41 = vmul.f32 -1.442695, %v8335_v57  ;;  %v8675_v57 = vld [vmem:[#allocation5] sm:$0xff] }
0x2d7d   : > { %19544 = vpow2.f32 %v15766_v41  ;;  %v8706_v41 = vld [vmem:[#allocation5 + $0x4] sm:$0xff] }
0x2d85   : > { %v19543_v37 = vpop.eup %19542 }
0x2d86   : > { %8345 = vrot.lane.b32.xlu1 %v19543_v37, %s23069_s4  ;;  %v21922_v37 = vld [vmem:[#allocation5 + $0x2] sm:$0xff] }
0x2d87   : > { %v19545_v9 = vpop.eup %19544 }
0x2d88   : > { %v8339_v10 = vadd.f32 1.0, %v19545_v9 }
0x2d8a   : > { %19546 = vrcp.f32 %v8339_v10 }
0x2d94   : > { %v19547_v11 = vpop.eup %19546 }
0x2d95   : > { %v8343_v55 = vmul.f32 %v19547_v11, %v21775_v34 }
0x2df8   : > { %v8346_v42 = vpop.permute.xlu1 %8345 }
0x2df9   : > { %v8348_v31 = vmul.f32 %v19547_v11, %v8346_v42 }
0x2dfb   : > { %8350 = vrot.lane.b32.xlu0 %v8348_v31, %s23022_s7  ;;  %v9044_v31 = vrot.slane %v21527_v48, 3 }
0x2e6d   : > { %v8351_v59 = vpop.permute.xlu0 %8350 }
0x2e6e   : > { %v21898_v30 = vadd.f32 %v8351_v59, %v8343_v55 }
0x2e70   : > { %19548 = vtanh.f32 %v21898_v30 }
0x2e7a   : > { %v19549_v56 = vpop.eup %19548 }
0x2e7b   : > { %8356 = vrot.lane.b32.xlu1 %v19549_v56, %s23069_s4 }
0x2eed   : > { %v8357_v38 = vpop.permute.xlu1 %8356 }
0x2eee   : > { %v8359_v40 = vmul.f32 %v19547_v11, %v8357_v38  ;;  %v8698_v11 = vld [vmem:[#allocation5 + $0x3] sm:$0xff] }
0x2ef0   : > { %8431 = vrot.lane.b32.xlu0 %v8359_v40, %s23022_s7 }
0x2f62   : > { %v21903_v7 = vpop.permute.xlu0 %8431 }
0x2f63   : > { %17384 = vmatmul.mubr.msk.f32.vlgmr.msra.gmra.mrb[66].mxu0 %vm1875_vm5, %v21903_v7 }
0x2f64   : > { %18676 = vmatpush3.bf16.msra.mxu0 %v21666_v24  ;;  %17416 = vmatprep.mubr.msk.f32.mxu0 %vm20031_vm0, %v20032_v8 }
0x2f65   : > { %18677 = vmatprep.subr.bf16.mxu0 %v20030_v1 }
0x2f68   : > { %18679 = vmatpush3.bf16.msra.mxu0 %v21670_v26 }
0x2f69   : > { %18680 = vmatprep.subr.bf16.mxu0 %v20030_v1 }
0x3036   : > { %v8501_v34 = vpop.f32.mrb[66].mxu0 }
0x3037   : > { %v8502_v43 = vadd.f32 %v8501_v34, %v21857_v28  ;;  %v17385_v36 = vpop.f32.mrb[67].mxu0 }
0x3039   : > { %v8505_v13 = vadd.f32 %v8502_v43, %v21582_v53 }
0x303b   : > { %19550 = vtanh.f32 %v8505_v13  ;;  %v15769_v39 = vmul.f32 -1.442695, %v8505_v13 }
0x303d   : > { %19552 = vpow2.f32 %v15769_v39 }
0x3045   : > { %v19551_v62 = vpop.eup %19550 }
0x3046   : > { %8515 = vrot.lane.b32.xlu1 %v19551_v62, %s23069_s4 }
0x3047   : > { %v19553_v52 = vpop.eup %19552 }
0x3048   : > { %v8509_v60 = vadd.f32 1.0, %v19553_v52 }
0x304a   : > { %19554 = vrcp.f32 %v8509_v60 }
0x3054   : > { %v19555_v19 = vpop.eup %19554 }
0x3055   : > { %v8513_v22 = vmul.f32 %v19555_v19, %v21795_v21  ;;  %v8682_v21 = vld [vmem:[#allocation5 + $0x1] sm:$0xff] }
0x30b8   : > { %v8516_v2 = vpop.permute.xlu1 %8515 }
0x30b9   : > { %v8518_v44 = vmul.f32 %v19555_v19, %v8516_v2 }
0x30bb   : > { %8520 = vrot.lane.b32.xlu0 %v8518_v44, %s23022_s7 }
0x312d   : > { %v8521_v28 = vpop.permute.xlu0 %8520 }
0x312e   : > { %v21918_v61 = vadd.f32 %v8521_v28, %v8513_v22 }
0x3130   : > { %19556 = vtanh.f32 %v21918_v61 }
0x313a   : > { %v19557_v53 = vpop.eup %19556 }
0x313b   : > { %8526 = vrot.lane.b32.xlu1 %v19557_v53, %s23069_s4 }
0x313f   : > { %8678 = vperm.xlu1 %19369, %v8675_v57  }
0x3143   : > { %8693 = vperm.xlu1 %19369, %v21922_v37  }
0x3147   : > { %8709 = vperm.xlu1 %19369, %v8706_v41  }
0x31ad   : > { %v8527_v9 = vpop.permute.xlu1 %8526 }
0x31ae   : > { %v8529_v10 = vmul.f32 %v19555_v19, %v8527_v9 }
0x31b0   : > { %8531 = vrot.lane.b32.xlu0 %v8529_v10, %s23022_s7 }
0x31b4   : > { %8685 = vperm.xlu0 %19368, %v8682_v21  }
0x31b8   : > { %8701 = vperm.xlu0 %19368, %v8698_v11  }
0x31be   : > { %v8679_v55 = vpop.permute.xlu1 %8678 }
0x31bf   : > { %v8681_v38 = vmul.f32 %v21676_v51, %v8679_v55 }
0x31c2   : > { %v8694_v40 = vpop.permute.xlu1 %8693 }
0x31c3   : > { %v8696_v36 = vmul.f32 %v21684_v47, %v8694_v40 }
0x31c6   : > { %v8710_v39 = vpop.permute.xlu1 %8709 }
0x31c7   : > { %v8712_v60 = vmul.f32 %v21693_v32, %v8710_v39 }
0x3222   : > { %v8532_v42 = vpop.permute.xlu0 %8531 }
0x3223   : > { %17395 = vmatmul.mubr.msk.f32.vlgmr.msra.gmra.mrb[56].mxu1 %vm1875_vm5, %v8532_v42 }
0x3224   : > { %18670 = vmatpush3.bf16.msra.mxu1 %v21612_v5  ;;  %17405 = vmatprep.mubr.msk.f32.mxu1 %vm20031_vm0, %v20032_v8 }
0x3225   : > { %18671 = vmatprep.subr.bf16.mxu1 %v20030_v1 }
0x3228   : > { %18673 = vmatpush3.bf16.msra.mxu1 %v21618_v35 }
0x3229   : > { %18686 = vmatprep.subr.bf16.mxu1 %v20030_v1 }
0x322b   : > { %17406 = vmatmul.mubr.msk.f32.vlgmr.msra.gmra.mrb[56].mxu1 %vm1875_vm5, %v21903_v7 }
0x322c   : > { %18688 = vmatpush3.bf16.msra.mxu1 %v21626_v0  ;;  %17438 = vmatprep.mubr.msk.f32.mxu1 %vm20031_vm0, %v20032_v8 }
0x322d   : > { %18689 = vmatprep.subr.bf16.mxu1 %v20030_v1 }
0x3230   : > { %18691 = vmatpush3.bf16.msra.mxu1 %v21634_v18 }
0x3231   : > { %18698 = vmatprep.subr.bf16.mxu1 %v20030_v1 }
0x3233   : > { %17439 = vmatmul.mubr.msk.f32.vlgmr.msra.gmra.mrb[58].mxu1 %vm1875_vm5, %v8532_v42  ;;  %v8686_v59 = vpop.permute.xlu0 %8685 }
0x3234   : > { %18700 = vmatpush3.bf16.msra.mxu1 %v21511_v4  ;;  %17460 = vmatprep.mubr.msk.f32.mxu1 %vm20031_vm0, %v20032_v8  ;;  %v8688_v56 = vmul.f32 %v21679_v20, %v8686_v59 }
0x3235   : > { %18701 = vmatprep.subr.bf16.mxu1 %v20030_v1 }
0x3236   : > { %v8689_v34 = vadd.f32 %v8688_v56, %v8681_v38 }
0x3237   : > { %v8702_v43 = vpop.permute.xlu0 %8701 }
0x3238   : > { %18703 = vmatpush3.bf16.msra.mxu1 %v21522_v3  ;;  %v8697_v13 = vadd.f32 %v8696_v36, %v8689_v34  ;;  %v8704_v62 = vmul.f32 %v21688_v25, %v8702_v43 }
0x3239   : > { %18710 = vmatprep.subr.bf16.mxu1 %v20030_v1 }
0x323a   : > { %v8705_v52 = vadd.f32 %v8704_v62, %v8697_v13 }
0x323b   : > { %17461 = vmatmul.mubr.msk.f32.vlgmr.msra.gmra.mrb[60].mxu1 %vm1875_vm5, %v9044_v31 }
0x323c   : > { %18712 = vmatpush3.bf16.msra.mxu1 %v21549_v58  ;;  %17482 = vmatprep.mubr.msk.f32.mxu1 %vm20031_vm0, %v20032_v8  ;;  %v8713_v2 = vadd.f32 %v8712_v60, %v8705_v52 }
0x323d   : > { %18713 = vmatprep.subr.bf16.mxu1 %v20030_v1 }
0x3240   : > { %18715 = vmatpush3.bf16.msra.mxu1 %v21559_v12 }
0x3241   : > { %18722 = vmatprep.subr.bf16.mxu1 %v20030_v1 }
0x3243   : > { %17483 = vmatmul.mubr.msk.f32.vlgmr.msra.gmra.mrb[62].mxu1 %vm1875_vm5, %v8532_v42 }
0x3244   : > { %18724 = vmatpush3.bf16.msra.mxu1 %v21595_v45  ;;  %17504 = vmatprep.mubr.msk.f32.mxu1 %vm20031_vm0, %v20032_v8 }
0x3245   : > { %18725 = vmatprep.subr.bf16.mxu1 %v20030_v1 }
0x3248   : > { %18727 = vmatpush3.bf16.msra.mxu1 %v21601_v6 }
0x3249   : > { %18728 = vmatprep.subr.bf16.mxu1 %v20030_v1 }
0x32fe   : > { %v8671_v19 = vpop.f32.mrb[56].mxu1 }
0x32ff   : > { %v8717_v44 = vrot.slane %v8671_v19, %v21695_v29  ;;  %v17407_v22 = vpop.f32.mrb[57].mxu1 }
0x3301   : > { %v8718_v20 = vadd.f32 %v8717_v44, %v8713_v2 }
0x3303   : > { %v8719_v51 = vadd.f32 %v8718_v20, %v21701_v14 }
0x3305   : > { %19558 = vtanh.f32 %v8719_v51 }
0x3306   : > { %v21970_v28 = vpop.f32.mrb[58].mxu1 }
0x3307   : > { %v17440_v53 = vpop.f32.mrb[59].mxu1 }
0x330e   : > { %v21972_v47 = vpop.f32.mrb[60].mxu1 }
0x330f   : > { %v19559_v57 = vpop.eup %19558  ;;  %v17462_v25 = vpop.f32.mrb[61].mxu1 }
0x3310   : > { %17417 = vmatmul.mubr.msk.f32.vlgmr.msra.gmra.mrb[68].mxu0 %vm1875_vm5, %v19559_v57 }
0x3311   : > { %18682 = vmatpush3.bf16.msra.mxu0 %v21726_v15  ;;  %17427 = vmatprep.mubr.msk.f32.mxu0 %vm20031_vm0, %v20032_v8 }
0x3312   : > { %18683 = vmatprep.subr.bf16.mxu0 %v20030_v1 }
0x3315   : > { %18685 = vmatpush3.bf16.msra.mxu0 %v21732_v63 }
0x3316   : > { %v21980_v32 = vpop.f32.mrb[62].mxu1  ;;  %18692 = vmatprep.subr.bf16.mxu0 %v20030_v1 }
0x3317   : > { %v17484_v41 = vpop.f32.mrb[63].mxu1 }
0x33e3   : > { %v8790_v9 = vpop.f32.mrb[68].mxu0 }
0x33e4   : > { %v8794_v10 = vsel %vm21714_vm13, %v8790_v9, -1e+30  ;;  %v17418_v21 = vpop.f32.mrb[69].mxu0 }
0x33e5   : > { %v8795_v11 = vsel %vm6341_vm10, %v8794_v10, -inf }
0x33e6   : > { %v8796_v42 = vrot.slane %v8795_v11, 4 }
0x33e8   : > { %v8797_v31 = vmax.f32 %v8795_v11, %v8796_v42 }
0x33ea   : > { %v8798_v55 = vrot.slane %v8797_v31, 2 }
0x33ec   : > { %v8799_v59 = vmax.f32 %v8797_v31, %v8798_v55 }
0x33ee   : > { %v8800_v56 = vrot.slane %v8799_v59, 1 }
0x33f0   : > { %v8801_v38 = vmax.f32 %v8799_v59, %v8800_v56 }
0x33f2   : > { %v8802_v40 = vsub.f32 %v8794_v10, %v8801_v38 }
0x33f4   : > { %v8803_v34 = vmul.f32 1.442695, %v8802_v40 }
0x33f6   : > { %19560 = vpow2.f32 %v8803_v34  ;;  %v22018_v34 = vld [vmem:[%s23055_s14] sm:$0x1] }
0x3400   : > { %v19561_v43 = vpop.eup %19560 }
0x3401   : > { %v8805_v36 = vsel %vm6341_vm10, %v19561_v43, 0.0 }
0x3402   : > { %v8806_v13 = vrot.slane %v8805_v36, 4 }
0x3404   : > { %v8807_v62 = vadd.f32 %v8806_v13, %v8805_v36 }
0x3406   : > { %v8808_v39 = vrot.slane %v8807_v62, 2 }
0x3408   : > { %v8809_v52 = vadd.f32 %v8808_v39, %v8807_v62 }
0x340a   : > { %v8810_v60 = vrot.slane %v8809_v52, 1 }
0x340c   : > { %v8811_v19 = vadd.f32 %v8810_v60, %v8809_v52 }
0x340e   : > { %19562 = vrcp.f32 %v8811_v19 }
0x3418   : > { %v19563_v2 = vpop.eup %19562 }
0x3419   : > { %v8813_v44 = vmul.f32 %v19563_v2, %v19561_v43 }
0x341b   : > { %8816 = vperm.xlu0 %19368, %v8813_v44   ;;  %v8827_v22 = vadd.f32 %v8813_v44, %v21922_v37 }
0x341d   : > { %8828 = vst.msk [vmem:[#allocation5 + $0x2] sm:$0xff] %vm6341_vm10, %v8827_v22 }
0x349a   : > { %v8817_v20 = vpop.permute.xlu0 %8816 }
0x349b   : > { %v8819_v51 = vmul.f32 %v8817_v20, %v21517_v49 }
0x349d   : > { %v8820_v53 = vsel %vm1875_vm5, %v8819_v51, 0.0 }
0x349e   : > { %v8821_v57 = vrot.slane %v8820_v53, 4 }
0x34a0   : > { %v8822_v25 = vadd.f32 %v8821_v57, %v8820_v53  ;;  %v22041_v57 = vld [vmem:[%s23058_s10] sm:$0x1] }
0x34a2   : > { %v8823_v41 = vrot.slane %v8822_v25, 2 }
0x34a4   : > { %v8824_v9 = vadd.f32 %v8823_v41, %v8822_v25 }
0x34a6   : > { %v8825_v10 = vrot.slane %v8824_v9, 1 }
0x34a8   : > { %v8826_v21 = vadd.f32 %v8825_v10, %v8824_v9 }
0x34aa   : > { %17428 = vmatmul.mubr.msk.f32.vlgmr.msra.gmra.mrb[70].mxu0 %vm1875_vm5, %v8826_v21 }
0x34ab   : > { %18694 = vmatpush3.bf16.msra.mxu0 %v21440_v50  ;;  %17449 = vmatprep.mubr.msk.f32.mxu0 %vm20031_vm0, %v20032_v8 }
0x34ac   : > { %18695 = vmatprep.subr.bf16.mxu0 %v20030_v1 }
0x34af   : > { %18697 = vmatpush3.bf16.msra.mxu0 %v21450_v23 }
0x34b0   : > { %18704 = vmatprep.subr.bf16.mxu0 %v20030_v1 }
0x34b2   : > { %17450 = vmatmul.mubr.msk.f32.vlgmr.msra.gmra.mrb[72].mxu0 %vm1875_vm5, %v8826_v21 }
0x34b3   : > { %18706 = vmatpush3.bf16.msra.mxu0 %v21490_v17  ;;  %17471 = vmatprep.mubr.msk.f32.mxu0 %vm20031_vm0, %v20032_v8 }
0x34b4   : > { %18707 = vmatprep.subr.bf16.mxu0 %v20030_v1 }
0x34b7   : > { %18709 = vmatpush3.bf16.msra.mxu0 %v21497_v54 }
0x34b8   : > { %18716 = vmatprep.subr.bf16.mxu0 %v20030_v1 }
0x34ba   : > { %17472 = vmatmul.mubr.msk.f32.vlgmr.msra.gmra.mrb[74].mxu0 %vm1875_vm5, %v21903_v7 }
0x34bb   : > { %18718 = vmatpush3.bf16.msra.mxu0 %v21554_v33  ;;  %17493 = vmatprep.mubr.msk.f32.mxu0 %vm20031_vm0, %v20032_v8 }
0x34bc   : > { %18719 = vmatprep.subr.bf16.mxu0 %v20030_v1 }
0x34bf   : > { %18721 = vmatpush3.bf16.msra.mxu0 %v21563_v16 }
0x34c0   : > { %18734 = vmatprep.subr.bf16.mxu0 %v20030_v1 }
0x357d   : > { %v8898_v37 = vpop.f32.mrb[70].mxu0 }
0x357e   : > { %v8969_v11 = vadd.f32 %v21970_v28, %v8898_v37  ;;  %v17429_v42 = vpop.f32.mrb[71].mxu0 }
0x3580   : > { %v8972_v31 = vadd.f32 %v8969_v11, %v21761_v46 }
0x3582   : > { %8973 = vst [vmem:[%s21766_s3 + $0x2] sm:$0x1] %v8972_v31 }
0x3585   : > { %v9040_v7 = vpop.f32.mrb[72].mxu0 }
0x3586   : > { %v9114_v55 = vadd.f32 %v21972_v47, %v9040_v7  ;;  %v17451_v59 = vpop.f32.mrb[73].mxu0 }
0x3587   : > { %v9528_v59 = vld [vmem:[#allocation5] sm:$0xff] }
0x358d   : > { %v9183_v56 = vpop.f32.mrb[74].mxu0 }
0x358e   : > { %v9187_v38 = vadd.f32 %v9183_v56, %v9114_v55  ;;  %v17473_v40 = vpop.f32.mrb[75].mxu0  ;;  %v22051_v56 = vld [vmem:[#allocation5 + $0x2] sm:$0xff] }
0x3590   : > { %v9188_v43 = vadd.f32 %v22018_v34, %v9187_v38  ;;  %v9559_v38 = vld [vmem:[#allocation5 + $0x4] sm:$0xff] }
0x3592   : > { %19564 = vtanh.f32 %v9188_v43  ;;  %v15778_v28 = vmul.f32 -1.442695, %v9188_v43 }
0x3594   : > { %19566 = vpow2.f32 %v15778_v28 }
0x359c   : > { %v19565_v36 = vpop.eup %19564 }
0x359d   : > { %9198 = vrot.lane.b32.xlu1 %v19565_v36, %s23069_s4  ;;  %v9551_v36 = vld [vmem:[#allocation5 + $0x3] sm:$0xff] }
0x359e   : > { %v19567_v13 = vpop.eup %19566 }
0x359f   : > { %v9192_v46 = vadd.f32 1.0, %v19567_v13  ;;  %v9897_v13 = vrot.slane %v21527_v48, 4 }
0x35a1   : > { %19568 = vrcp.f32 %v9192_v46 }
0x35ab   : > { %v19569_v62 = vpop.eup %19568 }
0x35ac   : > { %v9196_v52 = vmul.f32 %v19569_v62, %v21898_v30 }
0x360f   : > { %v9199_v39 = vpop.permute.xlu1 %9198 }
0x3610   : > { %v9201_v47 = vmul.f32 %v19569_v62, %v9199_v39  ;;  %v22093_v39 = vld [vmem:[%s23063_s2 + $0x1] ss:$0 sm:$0xff] }
0x3612   : > { %9203 = vrot.lane.b32.xlu0 %v9201_v47, %s23022_s7 }
0x3684   : > { %v9204_v60 = vpop.permute.xlu0 %9203 }
0x3685   : > { %v22024_v19 = vadd.f32 %v9204_v60, %v9196_v52  ;;  %v22097_v52 = vld [vmem:[%s23063_s2] ss:$0 sm:$0xff] }
0x3687   : > { %19570 = vtanh.f32 %v22024_v19 }
0x3691   : > { %v19571_v2 = vpop.eup %19570 }
0x3692   : > { %9209 = vrot.lane.b32.xlu1 %v19571_v2, %s23069_s4 }
0x3704   : > { %v9210_v44 = vpop.permute.xlu1 %9209 }
0x3705   : > { %v9212_v22 = vmul.f32 %v19569_v62, %v9210_v44 }
0x3707   : > { %9284 = vrot.lane.b32.xlu0 %v9212_v22, %s23022_s7 }
0x3779   : > { %v22029_v20 = vpop.permute.xlu0 %9284 }
0x377a   : > { %17494 = vmatmul.mubr.msk.f32.vlgmr.msra.gmra.mrb[76].mxu0 %vm1875_vm5, %v22029_v20 }
0x377b   : > { %18736 = vmatpush3.bf16.msra.mxu0 %v21666_v24  ;;  %17526 = vmatprep.mubr.msk.f32.mxu0 %vm20031_vm0, %v20032_v8 }
0x377c   : > { %18737 = vmatprep.subr.bf16.mxu0 %v20030_v1 }
0x377f   : > { %18739 = vmatpush3.bf16.msra.mxu0 %v21670_v26 }
0x3780   : > { %18740 = vmatprep.subr.bf16.mxu0 %v20030_v1 }
0x384d   : > { %v9354_v30 = vpop.f32.mrb[76].mxu0 }
0x384e   : > { %v9355_v51 = vadd.f32 %v9354_v30, %v21980_v32  ;;  %v17495_v53 = vpop.f32.mrb[77].mxu0  ;;  %v22101_v30 = vld [vmem:[%s23063_s2 + $0x2] ss:$0 sm:$0xff] }
0x3850   : > { %v9358_v25 = vadd.f32 %v22041_v57, %v9355_v51 }
0x3852   : > { %19572 = vtanh.f32 %v9358_v25  ;;  %v15781_v9 = vmul.f32 -1.442695, %v9358_v25  ;;  %v22105_v25 = vld [vmem:[%s23063_s2 + $0x3] ss:$0 sm:$0xff] }
0x3854   : > { %19574 = vpow2.f32 %v15781_v9 }
0x385c   : > { %v19573_v41 = vpop.eup %19572 }
0x385d   : > { %9368 = vrot.lane.b32.xlu1 %v19573_v41, %s23069_s4 }
0x385e   : > { %v19575_v10 = vpop.eup %19574 }
0x385f   : > { %v9362_v21 = vadd.f32 1.0, %v19575_v10 }
0x3861   : > { %19576 = vrcp.f32 %v9362_v21  ;;  %v22109_v21 = vld [vmem:[%s23063_s2 + $0x4] ss:$0 sm:$0xff] }
0x386b   : > { %v19577_v37 = vpop.eup %19576 }
0x386c   : > { %v9366_v32 = vmul.f32 %v19577_v37, %v21918_v61  ;;  %v9535_v61 = vld [vmem:[#allocation5 + $0x1] sm:$0xff] }
0x38cf   : > { %v9369_v11 = vpop.permute.xlu1 %9368 }
0x38d0   : > { %v9371_v42 = vmul.f32 %v19577_v37, %v9369_v11 }
0x38d2   : > { %9373 = vrot.lane.b32.xlu0 %v9371_v42, %s23022_s7 }
0x3944   : > { %v9374_v31 = vpop.permute.xlu0 %9373 }
0x3945   : > { %v22047_v7 = vadd.f32 %v9374_v31, %v9366_v32 }
0x3947   : > { %19578 = vtanh.f32 %v22047_v7 }
0x3951   : > { %v19579_v55 = vpop.eup %19578 }
0x3952   : > { %9379 = vrot.lane.b32.xlu1 %v19579_v55, %s23069_s4 }
0x3956   : > { %9531 = vperm.xlu1 %19369, %v9528_v59  }
0x395a   : > { %9546 = vperm.xlu1 %19369, %v22051_v56  }
0x395e   : > { %9562 = vperm.xlu1 %19369, %v9559_v38  }
0x39c4   : > { %v9380_v40 = vpop.permute.xlu1 %9379 }
0x39c5   : > { %v9382_v43 = vmul.f32 %v19577_v37, %v9380_v40 }
0x39c7   : > { %9384 = vrot.lane.b32.xlu0 %v9382_v43, %s23022_s7 }
0x39cb   : > { %9538 = vperm.xlu0 %19368, %v9535_v61  }
0x39cf   : > { %9554 = vperm.xlu0 %19368, %v9551_v36  }
0x39d5   : > { %v9532_v46 = vpop.permute.xlu1 %9531 }
0x39d6   : > { %v9534_v60 = vmul.f32 %v22097_v52, %v9532_v46 }
0x39d9   : > { %v9547_v2 = vpop.permute.xlu1 %9546 }
0x39da   : > { %v9549_v51 = vmul.f32 %v22101_v30, %v9547_v2 }
0x39dd   : > { %v9563_v9 = vpop.permute.xlu1 %9562 }
0x39de   : > { %v9565_v37 = vmul.f32 %v22109_v21, %v9563_v9 }
0x3a39   : > { %v9385_v28 = vpop.permute.xlu0 %9384 }
0x3a3a   : > { %17505 = vmatmul.mubr.msk.f32.vlgmr.msra.gmra.mrb[64].mxu1 %vm1875_vm5, %v9385_v28 }
0x3a3b   : > { %18730 = vmatpush3.bf16.msra.mxu1 %v21612_v5  ;;  %17515 = vmatprep.mubr.msk.f32.mxu1 %vm20031_vm0, %v20032_v8 }
0x3a3c   : > { %18731 = vmatprep.subr.bf16.mxu1 %v20030_v1 }
0x3a3f   : > { %18733 = vmatpush3.bf16.msra.mxu1 %v21618_v35 }
0x3a40   : > { %18746 = vmatprep.subr.bf16.mxu1 %v20030_v1 }
0x3a42   : > { %17516 = vmatmul.mubr.msk.f32.vlgmr.msra.gmra.mrb[64].mxu1 %vm1875_vm5, %v22029_v20 }
0x3a43   : > { %18748 = vmatpush3.bf16.msra.mxu1 %v21626_v0  ;;  %17548 = vmatprep.mubr.msk.f32.mxu1 %vm20031_vm0, %v20032_v8 }
0x3a44   : > { %18749 = vmatprep.subr.bf16.mxu1 %v20030_v1 }
0x3a47   : > { %18751 = vmatpush3.bf16.msra.mxu1 %v21634_v18 }
0x3a48   : > { %18758 = vmatprep.subr.bf16.mxu1 %v20030_v1 }
0x3a4a   : > { %17549 = vmatmul.mubr.msk.f32.vlgmr.msra.gmra.mrb[66].mxu1 %vm1875_vm5, %v9385_v28  ;;  %v9539_v62 = vpop.permute.xlu0 %9538 }
0x3a4b   : > { %18760 = vmatpush3.bf16.msra.mxu1 %v21511_v4  ;;  %17570 = vmatprep.mubr.msk.f32.mxu1 %vm20031_vm0, %v20032_v8  ;;  %v9541_v47 = vmul.f32 %v22093_v39, %v9539_v62 }
0x3a4c   : > { %18761 = vmatprep.subr.bf16.mxu1 %v20030_v1 }
0x3a4d   : > { %v9542_v44 = vadd.f32 %v9541_v47, %v9534_v60 }
0x3a4e   : > { %v9555_v22 = vpop.permute.xlu0 %9554 }
0x3a4f   : > { %18763 = vmatpush3.bf16.msra.mxu1 %v21522_v3  ;;  %v9550_v53 = vadd.f32 %v9549_v51, %v9542_v44  ;;  %v9557_v41 = vmul.f32 %v22105_v25, %v9555_v22 }
0x3a50   : > { %18770 = vmatprep.subr.bf16.mxu1 %v20030_v1 }
0x3a51   : > { %v9558_v10 = vadd.f32 %v9557_v41, %v9550_v53 }
0x3a52   : > { %17571 = vmatmul.mubr.msk.f32.vlgmr.msra.gmra.mrb[68].mxu1 %vm1875_vm5, %v9897_v13 }
0x3a53   : > { %18772 = vmatpush3.bf16.msra.mxu1 %v21549_v58  ;;  %17592 = vmatprep.mubr.msk.f32.mxu1 %vm20031_vm0, %v20032_v8  ;;  %v9566_v42 = vadd.f32 %v9565_v37, %v9558_v10 }
0x3a54   : > { %18773 = vmatprep.subr.bf16.mxu1 %v20030_v1 }
0x3a57   : > { %18775 = vmatpush3.bf16.msra.mxu1 %v21559_v12 }
0x3a58   : > { %18782 = vmatprep.subr.bf16.mxu1 %v20030_v1 }
0x3a5a   : > { %17593 = vmatmul.mubr.msk.f32.vlgmr.msra.gmra.mrb[70].mxu1 %vm1875_vm5, %v9385_v28 }
0x3a5b   : > { %18784 = vmatpush3.bf16.msra.mxu1 %v21595_v45  ;;  %17614 = vmatprep.mubr.msk.f32.mxu1 %vm20031_vm0, %v20032_v8 }
0x3a5c   : > { %18785 = vmatprep.subr.bf16.mxu1 %v20030_v1 }
0x3a5f   : > { %18787 = vmatpush3.bf16.msra.mxu1 %v21601_v6 }
0x3a60   : > { %18788 = vmatprep.subr.bf16.mxu1 %v20030_v1 }
0x3b15   : > { %v9524_v11 = vpop.f32.mrb[64].mxu1 }
0x3b16   : > { %v9570_v32 = vrot.slane %v9524_v11, %v21695_v29  ;;  %v17517_v31 = vpop.f32.mrb[65].mxu1 }
0x3b18   : > { %v9571_v55 = vadd.f32 %v9570_v32, %v9566_v42 }
0x3b1a   : > { %v9572_v59 = vadd.f32 %v9571_v55, %v21701_v14 }
0x3b1c   : > { %19580 = vtanh.f32 %v9572_v59 }
0x3b1d   : > { %v22114_v38 = vpop.f32.mrb[66].mxu1 }
0x3b1e   : > { %v17550_v40 = vpop.f32.mrb[67].mxu1 }
0x3b25   : > { %v22116_v43 = vpop.f32.mrb[68].mxu1 }
0x3b26   : > { %v19581_v61 = vpop.eup %19580  ;;  %v17572_v36 = vpop.f32.mrb[69].mxu1 }
0x3b27   : > { %17527 = vmatmul.mubr.msk.f32.vlgmr.msra.gmra.mrb[78].mxu0 %vm1875_vm5, %v19581_v61 }
0x3b28   : > { %18742 = vmatpush3.bf16.msra.mxu0 %v21726_v15  ;;  %17537 = vmatprep.mubr.msk.f32.mxu0 %vm20031_vm0, %v20032_v8 }
0x3b29   : > { %18743 = vmatprep.subr.bf16.mxu0 %v20030_v1 }
0x3b2c   : > { %18745 = vmatpush3.bf16.msra.mxu0 %v21732_v63 }
0x3b2d   : > { %v22124_v28 = vpop.f32.mrb[70].mxu1  ;;  %18752 = vmatprep.subr.bf16.mxu0 %v20030_v1 }
0x3b2e   : > { %v17594_v13 = vpop.f32.mrb[71].mxu1 }
0x3bfa   : > { %v9643_v46 = vpop.f32.mrb[78].mxu0 }
0x3bfb   : > { %v9647_v62 = vsel %vm21714_vm13, %v9643_v46, -1e+30  ;;  %v17528_v47 = vpop.f32.mrb[79].mxu0 }
0x3bfc   : > { %v9648_v60 = vsel %vm6341_vm10, %v9647_v62, -inf }
0x3bfd   : > { %v9649_v2 = vrot.slane %v9648_v60, 4 }
0x3bff   : > { %v9650_v44 = vmax.f32 %v9648_v60, %v9649_v2 }
0x3c01   : > { %v9651_v22 = vrot.slane %v9650_v44, 2 }
0x3c03   : > { %v9652_v51 = vmax.f32 %v9650_v44, %v9651_v22 }
0x3c05   : > { %v9653_v53 = vrot.slane %v9652_v51, 1 }
0x3c07   : > { %v9654_v41 = vmax.f32 %v9652_v51, %v9653_v53 }
0x3c09   : > { %v9655_v9 = vsub.f32 %v9647_v62, %v9654_v41 }
0x3c0b   : > { %v9656_v10 = vmul.f32 1.442695, %v9655_v9 }
0x3c0d   : > { %19582 = vpow2.f32 %v9656_v10  ;;  %v22159_v10 = vld [vmem:[%s23068_s1] sm:$0x1] }
0x3c17   : > { %v19583_v37 = vpop.eup %19582 }
0x3c18   : > { %v9658_v11 = vsel %vm6341_vm10, %v19583_v37, 0.0 }
0x3c19   : > { %v9659_v42 = vrot.slane %v9658_v11, 4 }
0x3c1b   : > { %v9660_v32 = vadd.f32 %v9659_v42, %v9658_v11 }
0x3c1d   : > { %v9661_v31 = vrot.slane %v9660_v32, 2 }
0x3c1f   : > { %v9662_v55 = vadd.f32 %v9661_v31, %v9660_v32 }
0x3c21   : > { %v9663_v59 = vrot.slane %v9662_v55, 1 }
0x3c23   : > { %v9664_v40 = vadd.f32 %v9663_v59, %v9662_v55 }
0x3c25   : > { %19584 = vrcp.f32 %v9664_v40 }
0x3c2f   : > { %v19585_v61 = vpop.eup %19584 }
0x3c30   : > { %v9666_v36 = vmul.f32 %v19585_v61, %v19583_v37 }
0x3c32   : > { %9669 = vperm.xlu0 %19368, %v9666_v36   ;;  %v9680_v13 = vadd.f32 %v9666_v36, %v22051_v56 }
0x3c34   : > { %9681 = vst.msk [vmem:[#allocation5 + $0x2] sm:$0xff] %vm6341_vm10, %v9680_v13 }
0x3cb1   : > { %v9670_v46 = vpop.permute.xlu0 %9669 }
0x3cb2   : > { %v9672_v62 = vmul.f32 %v9670_v46, %v21517_v49 }
0x3cb4   : > { %v9673_v47 = vsel %vm1875_vm5, %v9672_v62, 0.0 }
0x3cb5   : > { %v9674_v60 = vrot.slane %v9673_v47, 4 }
0x3cb7   : > { %v9675_v2 = vadd.f32 %v9674_v60, %v9673_v47 }
0x3cb9   : > { %v9676_v44 = vrot.slane %v9675_v2, 2 }
0x3cbb   : > { %v9677_v22 = vadd.f32 %v9676_v44, %v9675_v2 }
0x3cbd   : > { %v9678_v51 = vrot.slane %v9677_v22, 1 }
0x3cbf   : > { %v9679_v53 = vadd.f32 %v9678_v51, %v9677_v22 }
0x3cc1   : > { %17538 = vmatmul.mubr.msk.f32.vlgmr.msra.gmra.mrb[80].mxu0 %vm1875_vm5, %v9679_v53 }
0x3cc2   : > { %18754 = vmatpush3.bf16.msra.mxu0 %v21440_v50  ;;  %17559 = vmatprep.mubr.msk.f32.mxu0 %vm20031_vm0, %v20032_v8 }
0x3cc3   : > { %18755 = vmatprep.subr.bf16.mxu0 %v20030_v1 }
0x3cc6   : > { %18757 = vmatpush3.bf16.msra.mxu0 %v21450_v23 }
0x3cc7   : > { %18764 = vmatprep.subr.bf16.mxu0 %v20030_v1 }
0x3cc9   : > { %17560 = vmatmul.mubr.msk.f32.vlgmr.msra.gmra.mrb[82].mxu0 %vm1875_vm5, %v9679_v53 }
0x3cca   : > { %18766 = vmatpush3.bf16.msra.mxu0 %v21490_v17  ;;  %17581 = vmatprep.mubr.msk.f32.mxu0 %vm20031_vm0, %v20032_v8 }
0x3ccb   : > { %18767 = vmatprep.subr.bf16.mxu0 %v20030_v1 }
0x3cce   : > { %18769 = vmatpush3.bf16.msra.mxu0 %v21497_v54 }
0x3ccf   : > { %18776 = vmatprep.subr.bf16.mxu0 %v20030_v1 }
0x3cd1   : > { %17582 = vmatmul.mubr.msk.f32.vlgmr.msra.gmra.mrb[84].mxu0 %vm1875_vm5, %v22029_v20 }
0x3cd2   : > { %18778 = vmatpush3.bf16.msra.mxu0 %v21554_v33  ;;  %17603 = vmatprep.mubr.msk.f32.mxu0 %vm20031_vm0, %v20032_v8 }
0x3cd3   : > { %18779 = vmatprep.subr.bf16.mxu0 %v20030_v1 }
0x3cd6   : > { %18781 = vmatpush3.bf16.msra.mxu0 %v21563_v16 }
0x3cd7   : > { %18794 = vmatprep.subr.bf16.mxu0 %v20030_v1 }
0x3d94   : > { %v9751_v56 = vpop.f32.mrb[80].mxu0 }
0x3d95   : > { %v9822_v41 = vadd.f32 %v22114_v38, %v9751_v56  ;;  %v17539_v9 = vpop.f32.mrb[81].mxu0 }
0x3d97   : > { %v9825_v37 = vadd.f32 %v22159_v10, %v9822_v41 }
0x3d99   : > { %9826 = vst [vmem:[%s21766_s3 + $0x3] sm:$0x1] %v9825_v37 }
0x3d9c   : > { %v9893_v20 = vpop.f32.mrb[82].mxu0 }
0x3d9d   : > { %v9967_v11 = vadd.f32 %v22116_v43, %v9893_v20  ;;  %v17561_v42 = vpop.f32.mrb[83].mxu0 }
0x3da4   : > { %v10036_v32 = vpop.f32.mrb[84].mxu0 }
0x3da5   : > { %v10040_v31 = vadd.f32 %v10036_v32, %v9967_v11  ;;  %v17583_v55 = vpop.f32.mrb[85].mxu0 }
0x3da7   : > { %v10041_v59 = vadd.f32 %v22018_v34, %v10040_v31 }
0x3da9   : > { %19586 = vtanh.f32 %v10041_v59  ;;  %v15790_v38 = vmul.f32 -1.442695, %v10041_v59 }
0x3dab   : > { %19588 = vpow2.f32 %v15790_v38  ;;  %v10381_v38 = vld [vmem:[#allocation5] sm:$0xff] }
0x3db3   : > { %v19587_v40 = vpop.eup %19586 }
0x3db4   : > { %10051 = vrot.lane.b32.xlu1 %v19587_v40, %s23069_s4 }
0x3db5   : > { %v19589_v61 = vpop.eup %19588 }
0x3db6   : > { %v10045_v36 = vadd.f32 1.0, %v19589_v61  ;;  %v22192_v61 = vld [vmem:[#allocation5 + $0x2] sm:$0xff] }
0x3db8   : > { %19590 = vrcp.f32 %v10045_v36  ;;  %v10412_v36 = vld [vmem:[#allocation5 + $0x4] sm:$0xff] }
0x3dc2   : > { %v19591_v13 = vpop.eup %19590 }
0x3dc3   : > { %v10049_v43 = vmul.f32 %v19591_v13, %v22024_v19 }
0x3e26   : > { %v10052_v46 = vpop.permute.xlu1 %10051 }
0x3e27   : > { %v10054_v62 = vmul.f32 %v19591_v13, %v10052_v46 }
0x3e29   : > { %10056 = vrot.lane.b32.xlu0 %v10054_v62, %s23022_s7  ;;  %v10404_v62 = vld [vmem:[#allocation5 + $0x3] sm:$0xff] }
0x3e9b   : > { %v10057_v47 = vpop.permute.xlu0 %10056 }
0x3e9c   : > { %v22168_v60 = vadd.f32 %v10057_v47, %v10049_v43  ;;  %v10750_v47 = vrot.slane %v21527_v48, 5 }
0x3e9e   : > { %19592 = vtanh.f32 %v22168_v60 }
0x3ea8   : > { %v19593_v2 = vpop.eup %19592 }
0x3ea9   : > { %10062 = vrot.lane.b32.xlu1 %v19593_v2, %s23069_s4 }
0x3f1b   : > { %v10063_v44 = vpop.permute.xlu1 %10062 }
0x3f1c   : > { %v10065_v22 = vmul.f32 %v19591_v13, %v10063_v44 }
0x3f1e   : > { %10137 = vrot.lane.b32.xlu0 %v10065_v22, %s23022_s7 }
0x3f90   : > { %v22173_v51 = vpop.permute.xlu0 %10137 }
0x3f91   : > { %17604 = vmatmul.mubr.msk.f32.vlgmr.msra.gmra.mrb[86].mxu0 %vm1875_vm5, %v22173_v51 }
0x3f92   : > { %18796 = vmatpush3.bf16.msra.mxu0 %v21666_v24  ;;  %17636 = vmatprep.mubr.msk.f32.mxu0 %vm20031_vm0, %v20032_v8 }
0x3f93   : > { %18797 = vmatprep.subr.bf16.mxu0 %v20030_v1 }
0x3f96   : > { %18799 = vmatpush3.bf16.msra.mxu0 %v21670_v26 }
0x3f97   : > { %18800 = vmatprep.subr.bf16.mxu0 %v20030_v1 }
0x4064   : > { %v10207_v19 = vpop.f32.mrb[86].mxu0 }
0x4065   : > { %v10208_v53 = vadd.f32 %v10207_v19, %v22124_v28  ;;  %v17605_v56 = vpop.f32.mrb[87].mxu0 }
0x4067   : > { %v10211_v41 = vadd.f32 %v22041_v57, %v10208_v53 }
0x4069   : > { %19594 = vtanh.f32 %v10211_v41  ;;  %v15793_v37 = vmul.f32 -1.442695, %v10211_v41 }
0x406b   : > { %19596 = vpow2.f32 %v15793_v37 }
0x4073   : > { %v19595_v9 = vpop.eup %19594 }
0x4074   : > { %10221 = vrot.lane.b32.xlu1 %v19595_v9, %s23069_s4 }
0x4075   : > { %v19597_v20 = vpop.eup %19596 }
0x4076   : > { %v10215_v11 = vadd.f32 1.0, %v19597_v20 }
0x4078   : > { %19598 = vrcp.f32 %v10215_v11 }
0x4082   : > { %v19599_v42 = vpop.eup %19598 }
0x4083   : > { %v10219_v55 = vmul.f32 %v19599_v42, %v22047_v7  ;;  %v10388_v7 = vld [vmem:[#allocation5 + $0x1] sm:$0xff] }
0x40e6   : > { %v10222_v32 = vpop.permute.xlu1 %10221 }
0x40e7   : > { %v10224_v31 = vmul.f32 %v19599_v42, %v10222_v32 }
0x40e9   : > { %10226 = vrot.lane.b32.xlu0 %v10224_v31, %s23022_s7 }
0x415b   : > { %v10227_v28 = vpop.permute.xlu0 %10226 }
0x415c   : > { %v22188_v59 = vadd.f32 %v10227_v28, %v10219_v55 }
0x415e   : > { %19600 = vtanh.f32 %v22188_v59 }
0x4168   : > { %v19601_v40 = vpop.eup %19600 }
0x4169   : > { %10232 = vrot.lane.b32.xlu1 %v19601_v40, %s23069_s4 }
0x416d   : > { %10384 = vperm.xlu1 %19369, %v10381_v38  }
0x4171   : > { %10399 = vperm.xlu1 %19369, %v22192_v61  }
0x4175   : > { %10415 = vperm.xlu1 %19369, %v10412_v36  }
0x41db   : > { %v10233_v13 = vpop.permute.xlu1 %10232 }
0x41dc   : > { %v10235_v46 = vmul.f32 %v19599_v42, %v10233_v13 }
0x41de   : > { %10237 = vrot.lane.b32.xlu0 %v10235_v46, %s23022_s7 }
0x41e2   : > { %10391 = vperm.xlu0 %19368, %v10388_v7  }
0x41e6   : > { %10407 = vperm.xlu0 %19368, %v10404_v62  }
0x41ec   : > { %v10385_v2 = vpop.permute.xlu1 %10384 }
0x41ed   : > { %v10387_v19 = vmul.f32 %v22097_v52, %v10385_v2 }
0x41f0   : > { %v10400_v53 = vpop.permute.xlu1 %10399 }
0x41f1   : > { %v10402_v9 = vmul.f32 %v22101_v30, %v10400_v53 }
0x41f4   : > { %v10416_v11 = vpop.permute.xlu1 %10415 }
0x41f5   : > { %v10418_v32 = vmul.f32 %v22109_v21, %v10416_v11 }
0x4250   : > { %v10238_v43 = vpop.permute.xlu0 %10237 }
0x4251   : > { %17615 = vmatmul.mubr.msk.f32.vlgmr.msra.gmra.mrb[72].mxu1 %vm1875_vm5, %v10238_v43 }
0x4252   : > { %18790 = vmatpush3.bf16.msra.mxu1 %v21612_v5  ;;  %17625 = vmatprep.mubr.msk.f32.mxu1 %vm20031_vm0, %v20032_v8 }
0x4253   : > { %18791 = vmatprep.subr.bf16.mxu1 %v20030_v1 }
0x4256   : > { %18793 = vmatpush3.bf16.msra.mxu1 %v21618_v35 }
0x4257   : > { %18806 = vmatprep.subr.bf16.mxu1 %v20030_v1 }
0x4259   : > { %17626 = vmatmul.mubr.msk.f32.vlgmr.msra.gmra.mrb[72].mxu1 %vm1875_vm5, %v22173_v51 }
0x425a   : > { %18808 = vmatpush3.bf16.msra.mxu1 %v21626_v0  ;;  %17658 = vmatprep.mubr.msk.f32.mxu1 %vm20031_vm0, %v20032_v8 }
0x425b   : > { %18809 = vmatprep.subr.bf16.mxu1 %v20030_v1 }
0x425e   : > { %18811 = vmatpush3.bf16.msra.mxu1 %v21634_v18 }
0x425f   : > { %18818 = vmatprep.subr.bf16.mxu1 %v20030_v1 }
0x4261   : > { %17659 = vmatmul.mubr.msk.f32.vlgmr.msra.gmra.mrb[74].mxu1 %vm1875_vm5, %v10238_v43  ;;  %v10392_v44 = vpop.permute.xlu0 %10391 }
0x4262   : > { %18820 = vmatpush3.bf16.msra.mxu1 %v21511_v4  ;;  %17680 = vmatprep.mubr.msk.f32.mxu1 %vm20031_vm0, %v20032_v8  ;;  %v10394_v22 = vmul.f32 %v22093_v39, %v10392_v44 }
0x4263   : > { %18821 = vmatprep.subr.bf16.mxu1 %v20030_v1 }
0x4264   : > { %v10395_v56 = vadd.f32 %v10394_v22, %v10387_v19 }
0x4265   : > { %v10408_v41 = vpop.permute.xlu0 %10407 }
0x4266   : > { %18823 = vmatpush3.bf16.msra.mxu1 %v21522_v3  ;;  %v10403_v37 = vadd.f32 %v10402_v9, %v10395_v56  ;;  %v10410_v20 = vmul.f32 %v22105_v25, %v10408_v41 }
0x4267   : > { %18830 = vmatprep.subr.bf16.mxu1 %v20030_v1 }
0x4268   : > { %v10411_v42 = vadd.f32 %v10410_v20, %v10403_v37 }
0x4269   : > { %17681 = vmatmul.mubr.msk.f32.vlgmr.msra.gmra.mrb[76].mxu1 %vm1875_vm5, %v10750_v47 }
0x426a   : > { %18832 = vmatpush3.bf16.msra.mxu1 %v21549_v58  ;;  %17702 = vmatprep.mubr.msk.f32.mxu1 %vm20031_vm0, %v20032_v8  ;;  %v10419_v55 = vadd.f32 %v10418_v32, %v10411_v42 }
0x426b   : > { %18833 = vmatprep.subr.bf16.mxu1 %v20030_v1 }
0x426e   : > { %18835 = vmatpush3.bf16.msra.mxu1 %v21559_v12 }
0x426f   : > { %18842 = vmatprep.subr.bf16.mxu1 %v20030_v1 }
0x4271   : > { %17703 = vmatmul.mubr.msk.f32.vlgmr.msra.gmra.mrb[78].mxu1 %vm1875_vm5, %v10238_v43 }
0x4272   : > { %18844 = vmatpush3.bf16.msra.mxu1 %v21595_v45  ;;  %17724 = vmatprep.mubr.msk.f32.mxu1 %vm20031_vm0, %v20032_v8 }
0x4273   : > { %18845 = vmatprep.subr.bf16.mxu1 %v20030_v1 }
0x4276   : > { %18847 = vmatpush3.bf16.msra.mxu1 %v21601_v6 }
0x4277   : > { %18848 = vmatprep.subr.bf16.mxu1 %v20030_v1 }
0x432c   : > { %v10377_v31 = vpop.f32.mrb[72].mxu1 }
0x432d   : > { %v10423_v28 = vrot.slane %v10377_v31, %v21695_v29  ;;  %v17627_v40 = vpop.f32.mrb[73].mxu1 }
0x432f   : > { %v10424_v38 = vadd.f32 %v10423_v28, %v10419_v55 }
0x4331   : > { %v10425_v36 = vadd.f32 %v10424_v38, %v21701_v14 }
0x4333   : > { %19602 = vtanh.f32 %v10425_v36 }
0x4334   : > { %v22240_v13 = vpop.f32.mrb[74].mxu1 }
0x4335   : > { %v17660_v46 = vpop.f32.mrb[75].mxu1 }
0x433c   : > { %v22242_v7 = vpop.f32.mrb[76].mxu1 }
0x433d   : > { %v19603_v62 = vpop.eup %19602  ;;  %v17682_v43 = vpop.f32.mrb[77].mxu1 }
0x433e   : > { %17637 = vmatmul.mubr.msk.f32.vlgmr.msra.gmra.mrb[88].mxu0 %vm1875_vm5, %v19603_v62 }
0x433f   : > { %18802 = vmatpush3.bf16.msra.mxu0 %v21726_v15  ;;  %17647 = vmatprep.mubr.msk.f32.mxu0 %vm20031_vm0, %v20032_v8 }
0x4340   : > { %18803 = vmatprep.subr.bf16.mxu0 %v20030_v1 }
0x4343   : > { %18805 = vmatpush3.bf16.msra.mxu0 %v21732_v63 }
0x4344   : > { %v22250_v47 = vpop.f32.mrb[78].mxu1  ;;  %18812 = vmatprep.subr.bf16.mxu0 %v20030_v1 }
0x4345   : > { %v17704_v2 = vpop.f32.mrb[79].mxu1 }
0x4411   : > { %v10496_v44 = vpop.f32.mrb[88].mxu0 }
0x4412   : > { %v10500_v22 = vsel %vm21714_vm13, %v10496_v44, -1e+30  ;;  %v17638_v19 = vpop.f32.mrb[89].mxu0 }
0x4413   : > { %v10501_v53 = vsel %vm6341_vm10, %v10500_v22, -inf }
0x4414   : > { %v10502_v56 = vrot.slane %v10501_v53, 4 }
0x4416   : > { %v10503_v41 = vmax.f32 %v10501_v53, %v10502_v56 }
0x4418   : > { %v10504_v9 = vrot.slane %v10503_v41, 2 }
0x441a   : > { %v10505_v37 = vmax.f32 %v10503_v41, %v10504_v9 }
0x441c   : > { %v10506_v20 = vrot.slane %v10505_v37, 1 }
0x441e   : > { %v10507_v11 = vmax.f32 %v10505_v37, %v10506_v20 }
0x4420   : > { %v10508_v42 = vsub.f32 %v10500_v22, %v10507_v11 }
0x4422   : > { %v10509_v32 = vmul.f32 1.442695, %v10508_v42 }
0x4424   : > { %19604 = vpow2.f32 %v10509_v32 }
0x442e   : > { %v19605_v31 = vpop.eup %19604 }
0x442f   : > { %v10511_v55 = vsel %vm6341_vm10, %v19605_v31, 0.0 }
0x4430   : > { %v10512_v28 = vrot.slane %v10511_v55, 4 }
0x4432   : > { %v10513_v40 = vadd.f32 %v10512_v28, %v10511_v55 }
0x4434   : > { %v10514_v38 = vrot.slane %v10513_v40, 2 }
0x4436   : > { %v10515_v36 = vadd.f32 %v10514_v38, %v10513_v40 }
0x4438   : > { %v10516_v46 = vrot.slane %v10515_v36, 1 }
0x443a   : > { %v10517_v62 = vadd.f32 %v10516_v46, %v10515_v36 }
0x443c   : > { %19606 = vrcp.f32 %v10517_v62 }
0x4446   : > { %v19607_v43 = vpop.eup %19606 }
0x4447   : > { %v10519_v2 = vmul.f32 %v19607_v43, %v19605_v31 }
0x4449   : > { %10522 = vperm.xlu0 %19368, %v10519_v2   ;;  %v10533_v44 = vadd.f32 %v10519_v2, %v22192_v61 }
0x444b   : > { %10534 = vst.msk [vmem:[#allocation5 + $0x2] sm:$0xff] %vm6341_vm10, %v10533_v44 }
0x44c8   : > { %v10523_v22 = vpop.permute.xlu0 %10522 }
0x44c9   : > { %v10525_v19 = vmul.f32 %v10523_v22, %v21517_v49 }
0x44cb   : > { %v10526_v53 = vsel %vm1875_vm5, %v10525_v19, 0.0 }
0x44cc   : > { %v10527_v56 = vrot.slane %v10526_v53, 4 }
0x44ce   : > { %v10528_v41 = vadd.f32 %v10527_v56, %v10526_v53 }
0x44d0   : > { %v10529_v9 = vrot.slane %v10528_v41, 2 }
0x44d2   : > { %v10530_v37 = vadd.f32 %v10529_v9, %v10528_v41 }
0x44d4   : > { %v10531_v20 = vrot.slane %v10530_v37, 1 }
0x44d6   : > { %v10532_v11 = vadd.f32 %v10531_v20, %v10530_v37 }
0x44d8   : > { %17648 = vmatmul.mubr.msk.f32.vlgmr.msra.gmra.mrb[90].mxu0 %vm1875_vm5, %v10532_v11 }
0x44d9   : > { %18814 = vmatpush3.bf16.msra.mxu0 %v21440_v50  ;;  %17669 = vmatprep.mubr.msk.f32.mxu0 %vm20031_vm0, %v20032_v8 }
0x44da   : > { %18815 = vmatprep.subr.bf16.mxu0 %v20030_v1 }
0x44dd   : > { %18817 = vmatpush3.bf16.msra.mxu0 %v21450_v23 }
0x44de   : > { %18824 = vmatprep.subr.bf16.mxu0 %v20030_v1 }
0x44e0   : > { %17670 = vmatmul.mubr.msk.f32.vlgmr.msra.gmra.mrb[92].mxu0 %vm1875_vm5, %v10532_v11 }
0x44e1   : > { %18826 = vmatpush3.bf16.msra.mxu0 %v21490_v17  ;;  %17691 = vmatprep.mubr.msk.f32.mxu0 %vm20031_vm0, %v20032_v8 }
0x44e2   : > { %18827 = vmatprep.subr.bf16.mxu0 %v20030_v1 }
0x44e5   : > { %18829 = vmatpush3.bf16.msra.mxu0 %v21497_v54 }
0x44e6   : > { %18836 = vmatprep.subr.bf16.mxu0 %v20030_v1 }
0x44e8   : > { %17692 = vmatmul.mubr.msk.f32.vlgmr.msra.gmra.mrb[94].mxu0 %vm1875_vm5, %v22173_v51 }
0x44e9   : > { %18838 = vmatpush3.bf16.msra.mxu0 %v21554_v33  ;;  %17713 = vmatprep.mubr.msk.f32.mxu0 %vm20031_vm0, %v20032_v8 }
0x44ea   : > { %18839 = vmatprep.subr.bf16.mxu0 %v20030_v1 }
0x44ed   : > { %18841 = vmatpush3.bf16.msra.mxu0 %v21563_v16 }
0x44ee   : > { %18854 = vmatprep.subr.bf16.mxu0 %v20030_v1 }
0x45ab   : > { %v10604_v61 = vpop.f32.mrb[90].mxu0 }
0x45ac   : > { %v10675_v42 = vadd.f32 %v22240_v13, %v10604_v61  ;;  %v17649_v32 = vpop.f32.mrb[91].mxu0 }
0x45ae   : > { %v10678_v31 = vadd.f32 %v22159_v10, %v10675_v42 }
0x45b0   : > { %10679 = vst [vmem:[%s21766_s3 + $0x4] sm:$0x1] %v10678_v31 }
0x45b3   : > { %v10746_v55 = vpop.f32.mrb[92].mxu0 }
0x45b4   : > { %v10820_v51 = vadd.f32 %v22242_v7, %v10746_v55  ;;  %v17671_v28 = vpop.f32.mrb[93].mxu0 }
0x45bb   : > { %v10889_v40 = vpop.f32.mrb[94].mxu0 }
0x45bc   : > { %v10893_v38 = vadd.f32 %v10889_v40, %v10820_v51  ;;  %v17693_v36 = vpop.f32.mrb[95].mxu0 }
0x45be   : > { %v10894_v46 = vadd.f32 %v22018_v34, %v10893_v38 }
0x45c0   : > { %19608 = vtanh.f32 %v10894_v46  ;;  %v15802_v43 = vmul.f32 -1.442695, %v10894_v46  ;;  %v11234_v46 = vld [vmem:[#allocation5] sm:$0xff] }
0x45c2   : > { %19610 = vpow2.f32 %v15802_v43  ;;  %v11265_v43 = vld [vmem:[#allocation5 + $0x4] sm:$0xff] }
0x45ca   : > { %v19609_v62 = vpop.eup %19608 }
0x45cb   : > { %10904 = vrot.lane.b32.xlu1 %v19609_v62, %s23069_s4  ;;  %v22315_v62 = vld [vmem:[#allocation5 + $0x2] sm:$0xff] }
0x45cc   : > { %v19611_v13 = vpop.eup %19610 }
0x45cd   : > { %v10898_v2 = vadd.f32 1.0, %v19611_v13 }
0x45cf   : > { %19612 = vrcp.f32 %v10898_v2 }
0x45d9   : > { %v19613_v44 = vpop.eup %19612 }
0x45da   : > { %v10902_v7 = vmul.f32 %v19613_v44, %v22168_v60 }
0x463d   : > { %v10905_v22 = vpop.permute.xlu1 %10904 }
0x463e   : > { %v10907_v19 = vmul.f32 %v19613_v44, %v10905_v22 }
0x4640   : > { %10909 = vrot.lane.b32.xlu0 %v10907_v19, %s23022_s7  ;;  %v11603_v19 = vrot.slane %v21527_v48, 6 }
0x46b2   : > { %v10910_v53 = vpop.permute.xlu0 %10909 }
0x46b3   : > { %v22291_v56 = vadd.f32 %v10910_v53, %v10902_v7 }
0x46b5   : > { %19614 = vtanh.f32 %v22291_v56 }
0x46bf   : > { %v19615_v34 = vpop.eup %19614 }
0x46c0   : > { %10915 = vrot.lane.b32.xlu1 %v19615_v34, %s23069_s4 }
0x4732   : > { %v10916_v41 = vpop.permute.xlu1 %10915 }
0x4733   : > { %v10918_v9 = vmul.f32 %v19613_v44, %v10916_v41  ;;  %v11257_v44 = vld [vmem:[#allocation5 + $0x3] sm:$0xff] }
0x4735   : > { %10990 = vrot.lane.b32.xlu0 %v10918_v9, %s23022_s7 }
0x47a7   : > { %v22296_v37 = vpop.permute.xlu0 %10990 }
0x47a8   : > { %17714 = vmatmul.mubr.msk.f32.vlgmr.msra.gmra.mrb[96].mxu0 %vm1875_vm5, %v22296_v37 }
0x47a9   : > { %18856 = vmatpush3.bf16.msra.mxu0 %v21666_v24  ;;  %17746 = vmatprep.mubr.msk.f32.mxu0 %vm20031_vm0, %v20032_v8 }
0x47aa   : > { %18857 = vmatprep.subr.bf16.mxu0 %v20030_v1 }
0x47ad   : > { %18859 = vmatpush3.bf16.msra.mxu0 %v21670_v26 }
0x47ae   : > { %18860 = vmatprep.subr.bf16.mxu0 %v20030_v1 }
0x487b   : > { %v11060_v60 = vpop.f32.mrb[96].mxu0 }
0x487c   : > { %v11061_v20 = vadd.f32 %v11060_v60, %v22250_v47  ;;  %v17715_v11 = vpop.f32.mrb[97].mxu0 }
0x487e   : > { %v11064_v61 = vadd.f32 %v22041_v57, %v11061_v20 }
0x4880   : > { %19616 = vtanh.f32 %v11064_v61  ;;  %v15805_v32 = vmul.f32 -1.442695, %v11064_v61 }
0x4882   : > { %19618 = vpow2.f32 %v15805_v32 }
0x488a   : > { %v19617_v42 = vpop.eup %19616 }
0x488b   : > { %11074 = vrot.lane.b32.xlu1 %v19617_v42, %s23069_s4 }
0x488c   : > { %v19619_v31 = vpop.eup %19618 }
0x488d   : > { %v11068_v55 = vadd.f32 1.0, %v19619_v31 }
0x488f   : > { %19620 = vrcp.f32 %v11068_v55 }
0x4899   : > { %v19621_v51 = vpop.eup %19620 }
0x489a   : > { %v11072_v38 = vmul.f32 %v19621_v51, %v22188_v59  ;;  %v11241_v59 = vld [vmem:[#allocation5 + $0x1] sm:$0xff] }
0x48fd   : > { %v11075_v28 = vpop.permute.xlu1 %11074 }
0x48fe   : > { %v11077_v40 = vmul.f32 %v19621_v51, %v11075_v28 }
0x4900   : > { %11079 = vrot.lane.b32.xlu0 %v11077_v40, %s23022_s7 }
0x4972   : > { %v11080_v47 = vpop.permute.xlu0 %11079 }
0x4973   : > { %v22311_v36 = vadd.f32 %v11080_v47, %v11072_v38 }
0x4975   : > { %19622 = vtanh.f32 %v22311_v36 }
0x497f   : > { %v19623_v57 = vpop.eup %19622 }
0x4980   : > { %11085 = vrot.lane.b32.xlu1 %v19623_v57, %s23069_s4 }
0x4984   : > { %11237 = vperm.xlu1 %19369, %v11234_v46  }
0x4988   : > { %11252 = vperm.xlu1 %19369, %v22315_v62  }
0x498c   : > { %11268 = vperm.xlu1 %19369, %v11265_v43  }
0x49f2   : > { %v11086_v13 = vpop.permute.xlu1 %11085 }
0x49f3   : > { %v11088_v2 = vmul.f32 %v19621_v51, %v11086_v13 }
0x49f5   : > { %11090 = vrot.lane.b32.xlu0 %v11088_v2, %s23022_s7 }
0x49f9   : > { %11244 = vperm.xlu0 %19368, %v11241_v59  }
0x49fd   : > { %11260 = vperm.xlu0 %19368, %v11257_v44  }
0x4a03   : > { %v11238_v7 = vpop.permute.xlu1 %11237 }
0x4a04   : > { %v11240_v41 = vmul.f32 %v22097_v52, %v11238_v7 }
0x4a07   : > { %v11253_v9 = vpop.permute.xlu1 %11252 }
0x4a08   : > { %v11255_v11 = vmul.f32 %v22101_v30, %v11253_v9 }
0x4a0b   : > { %v11269_v32 = vpop.permute.xlu1 %11268 }
0x4a0c   : > { %v11271_v55 = vmul.f32 %v22109_v21, %v11269_v32 }
0x4a67   : > { %v11091_v22 = vpop.permute.xlu0 %11090 }
0x4a68   : > { %17725 = vmatmul.mubr.msk.f32.vlgmr.msra.gmra.mrb[80].mxu1 %vm1875_vm5, %v11091_v22 }
0x4a69   : > { %18850 = vmatpush3.bf16.msra.mxu1 %v21612_v5  ;;  %17735 = vmatprep.mubr.msk.f32.mxu1 %vm20031_vm0, %v20032_v8 }
0x4a6a   : > { %18851 = vmatprep.subr.bf16.mxu1 %v20030_v1 }
0x4a6d   : > { %18853 = vmatpush3.bf16.msra.mxu1 %v21618_v35 }
0x4a6e   : > { %18866 = vmatprep.subr.bf16.mxu1 %v20030_v1 }
0x4a70   : > { %17736 = vmatmul.mubr.msk.f32.vlgmr.msra.gmra.mrb[80].mxu1 %vm1875_vm5, %v22296_v37 }
0x4a71   : > { %18868 = vmatpush3.bf16.msra.mxu1 %v21626_v0  ;;  %17768 = vmatprep.mubr.msk.f32.mxu1 %vm20031_vm0, %v20032_v8 }
0x4a72   : > { %18869 = vmatprep.subr.bf16.mxu1 %v20030_v1 }
0x4a75   : > { %18871 = vmatpush3.bf16.msra.mxu1 %v21634_v18 }
0x4a76   : > { %18878 = vmatprep.subr.bf16.mxu1 %v20030_v1 }
0x4a78   : > { %17769 = vmatmul.mubr.msk.f32.vlgmr.msra.gmra.mrb[82].mxu1 %vm1875_vm5, %v11091_v22  ;;  %v11245_v53 = vpop.permute.xlu0 %11244 }
0x4a79   : > { %18880 = vmatpush3.bf16.msra.mxu1 %v21511_v4  ;;  %17790 = vmatprep.mubr.msk.f32.mxu1 %vm20031_vm0, %v20032_v8  ;;  %v11247_v34 = vmul.f32 %v22093_v39, %v11245_v53 }
0x4a7a   : > { %18881 = vmatprep.subr.bf16.mxu1 %v20030_v1 }
0x4a7b   : > { %v11248_v60 = vadd.f32 %v11247_v34, %v11240_v41 }
0x4a7c   : > { %v11261_v20 = vpop.permute.xlu0 %11260 }
0x4a7d   : > { %18883 = vmatpush3.bf16.msra.mxu1 %v21522_v3  ;;  %v11256_v61 = vadd.f32 %v11255_v11, %v11248_v60  ;;  %v11263_v42 = vmul.f32 %v22105_v25, %v11261_v20 }
0x4a7e   : > { %18890 = vmatprep.subr.bf16.mxu1 %v20030_v1 }
0x4a7f   : > { %v11264_v31 = vadd.f32 %v11263_v42, %v11256_v61 }
0x4a80   : > { %17791 = vmatmul.mubr.msk.f32.vlgmr.msra.gmra.mrb[84].mxu1 %vm1875_vm5, %v11603_v19 }
0x4a81   : > { %18892 = vmatpush3.bf16.msra.mxu1 %v21549_v58  ;;  %17812 = vmatprep.mubr.msk.f32.mxu1 %vm20031_vm0, %v20032_v8  ;;  %v11272_v28 = vadd.f32 %v11271_v55, %v11264_v31 }
0x4a82   : > { %18893 = vmatprep.subr.bf16.mxu1 %v20030_v1 }
0x4a85   : > { %18895 = vmatpush3.bf16.msra.mxu1 %v21559_v12 }
0x4a86   : > { %18902 = vmatprep.subr.bf16.mxu1 %v20030_v1 }
0x4a88   : > { %17813 = vmatmul.mubr.msk.f32.vlgmr.msra.gmra.mrb[86].mxu1 %vm1875_vm5, %v11091_v22 }
0x4a89   : > { %18904 = vmatpush3.bf16.msra.mxu1 %v21595_v45  ;;  %17834 = vmatprep.mubr.msk.f32.mxu1 %vm20031_vm0, %v20032_v8 }
0x4a8a   : > { %18905 = vmatprep.subr.bf16.mxu1 %v20030_v1 }
0x4a8d   : > { %18907 = vmatpush3.bf16.msra.mxu1 %v21601_v6 }
0x4a8e   : > { %18908 = vmatprep.subr.bf16.mxu1 %v20030_v1 }
0x4b43   : > { %v11230_v51 = vpop.f32.mrb[80].mxu1 }
0x4b44   : > { %v11276_v40 = vrot.slane %v11230_v51, %v21695_v29  ;;  %v17737_v38 = vpop.f32.mrb[81].mxu1 }
0x4b46   : > { %v11277_v39 = vadd.f32 %v11276_v40, %v11272_v28 }
0x4b48   : > { %v11278_v52 = vadd.f32 %v11277_v39, %v21701_v14 }
0x4b4a   : > { %19624 = vtanh.f32 %v11278_v52 }
0x4b4b   : > { %v22363_v47 = vpop.f32.mrb[82].mxu1 }
0x4b4c   : > { %v17770_v57 = vpop.f32.mrb[83].mxu1 }
0x4b53   : > { %v22365_v30 = vpop.f32.mrb[84].mxu1 }
0x4b54   : > { %v19625_v46 = vpop.eup %19624  ;;  %v17792_v25 = vpop.f32.mrb[85].mxu1 }
0x4b55   : > { %17747 = vmatmul.mubr.msk.f32.vlgmr.msra.gmra.mrb[98].mxu0 %vm1875_vm5, %v19625_v46 }
0x4b56   : > { %18862 = vmatpush3.bf16.msra.mxu0 %v21726_v15  ;;  %17757 = vmatprep.mubr.msk.f32.mxu0 %vm20031_vm0, %v20032_v8 }
0x4b57   : > { %18863 = vmatprep.subr.bf16.mxu0 %v20030_v1 }
0x4b5a   : > { %18865 = vmatpush3.bf16.msra.mxu0 %v21732_v63 }
0x4b5b   : > { %v22373_v21 = vpop.f32.mrb[86].mxu1  ;;  %18872 = vmatprep.subr.bf16.mxu0 %v20030_v1 }
0x4b5c   : > { %v17814_v43 = vpop.f32.mrb[87].mxu1 }
0x4c28   : > { %v11349_v13 = vpop.f32.mrb[98].mxu0 }
0x4c29   : > { %v11353_v2 = vsel %vm21714_vm13, %v11349_v13, -1e+30  ;;  %v17748_v59 = vpop.f32.mrb[99].mxu0 }
0x4c2a   : > { %v11354_v44 = vsel %vm6341_vm10, %v11353_v2, -inf }
0x4c2b   : > { %v11355_v22 = vrot.slane %v11354_v44, 4 }
0x4c2d   : > { %v11356_v19 = vmax.f32 %v11354_v44, %v11355_v22 }
0x4c2f   : > { %v11357_v7 = vrot.slane %v11356_v19, 2 }
0x4c31   : > { %v11358_v53 = vmax.f32 %v11356_v19, %v11357_v7 }
0x4c33   : > { %v11359_v34 = vrot.slane %v11358_v53, 1 }
0x4c35   : > { %v11360_v41 = vmax.f32 %v11358_v53, %v11359_v34 }
0x4c37   : > { %v11361_v9 = vsub.f32 %v11353_v2, %v11360_v41 }
0x4c39   : > { %v11362_v60 = vmul.f32 1.442695, %v11361_v9 }
0x4c3b   : > { %19626 = vpow2.f32 %v11362_v60  ;;  %v22411_v60 = vld [vmem:[%s23055_s14] sm:$0x1] }
0x4c45   : > { %v19627_v20 = vpop.eup %19626 }
0x4c46   : > { %v11364_v11 = vsel %vm6341_vm10, %v19627_v20, 0.0 }
0x4c47   : > { %v11365_v61 = vrot.slane %v11364_v11, 4 }
0x4c49   : > { %v11366_v42 = vadd.f32 %v11365_v61, %v11364_v11 }
0x4c4b   : > { %v11367_v32 = vrot.slane %v11366_v42, 2 }
0x4c4d   : > { %v11368_v31 = vadd.f32 %v11367_v32, %v11366_v42 }
0x4c4f   : > { %v11369_v55 = vrot.slane %v11368_v31, 1 }
0x4c51   : > { %v11370_v51 = vadd.f32 %v11369_v55, %v11368_v31 }
0x4c53   : > { %19628 = vrcp.f32 %v11370_v51 }
0x4c5d   : > { %v19629_v28 = vpop.eup %19628 }
0x4c5e   : > { %v11372_v40 = vmul.f32 %v19629_v28, %v19627_v20 }
0x4c60   : > { %11375 = vperm.xlu0 %19368, %v11372_v40   ;;  %v11386_v38 = vadd.f32 %v11372_v40, %v22315_v62 }
0x4c62   : > { %11387 = vst.msk [vmem:[#allocation5 + $0x2] sm:$0xff] %vm6341_vm10, %v11386_v38 }
0x4cdf   : > { %v11376_v39 = vpop.permute.xlu0 %11375 }
0x4ce0   : > { %v11378_v52 = vmul.f32 %v11376_v39, %v21517_v49 }
0x4ce2   : > { %v11379_v57 = vsel %vm1875_vm5, %v11378_v52, 0.0 }
0x4ce3   : > { %v11380_v46 = vrot.slane %v11379_v57, 4 }
0x4ce5   : > { %v11381_v25 = vadd.f32 %v11380_v46, %v11379_v57  ;;  %v22434_v46 = vld [vmem:[%s23058_s10] sm:$0x1] }
0x4ce7   : > { %v11382_v43 = vrot.slane %v11381_v25, 2 }
0x4ce9   : > { %v11383_v13 = vadd.f32 %v11382_v43, %v11381_v25 }
0x4ceb   : > { %v11384_v2 = vrot.slane %v11383_v13, 1 }
0x4ced   : > { %v11385_v59 = vadd.f32 %v11384_v2, %v11383_v13 }
0x4cef   : > { %17758 = vmatmul.mubr.msk.f32.vlgmr.msra.gmra.mrb[100].mxu0 %vm1875_vm5, %v11385_v59 }
0x4cf0   : > { %18874 = vmatpush3.bf16.msra.mxu0 %v21440_v50  ;;  %17779 = vmatprep.mubr.msk.f32.mxu0 %vm20031_vm0, %v20032_v8 }
0x4cf1   : > { %18875 = vmatprep.subr.bf16.mxu0 %v20030_v1 }
0x4cf4   : > { %18877 = vmatpush3.bf16.msra.mxu0 %v21450_v23 }
0x4cf5   : > { %18884 = vmatprep.subr.bf16.mxu0 %v20030_v1 }
0x4cf7   : > { %17780 = vmatmul.mubr.msk.f32.vlgmr.msra.gmra.mrb[102].mxu0 %vm1875_vm5, %v11385_v59 }
0x4cf8   : > { %18886 = vmatpush3.bf16.msra.mxu0 %v21490_v17  ;;  %17801 = vmatprep.mubr.msk.f32.mxu0 %vm20031_vm0, %v20032_v8 }
0x4cf9   : > { %18887 = vmatprep.subr.bf16.mxu0 %v20030_v1 }
0x4cfc   : > { %18889 = vmatpush3.bf16.msra.mxu0 %v21497_v54 }
0x4cfd   : > { %18896 = vmatprep.subr.bf16.mxu0 %v20030_v1 }
0x4cff   : > { %17802 = vmatmul.mubr.msk.f32.vlgmr.msra.gmra.mrb[104].mxu0 %vm1875_vm5, %v22296_v37 }
0x4d00   : > { %18898 = vmatpush3.bf16.msra.mxu0 %v21554_v33  ;;  %17823 = vmatprep.mubr.msk.f32.mxu0 %vm20031_vm0, %v20032_v8 }
0x4d01   : > { %18899 = vmatprep.subr.bf16.mxu0 %v20030_v1 }
0x4d04   : > { %18901 = vmatpush3.bf16.msra.mxu0 %v21563_v16 }
0x4d05   : > { %18914 = vmatprep.subr.bf16.mxu0 %v20030_v1 }
0x4dc2   : > { %v11457_v62 = vpop.f32.mrb[100].mxu0 }
0x4dc3   : > { %v11528_v44 = vadd.f32 %v22363_v47, %v11457_v62  ;;  %v17759_v22 = vpop.f32.mrb[101].mxu0 }
0x4dc5   : > { %v11531_v19 = vadd.f32 %v22159_v10, %v11528_v44 }
0x4dc7   : > { %11532 = vst [vmem:[%s21766_s3 + $0x5] sm:$0x1] %v11531_v19 }
0x4dca   : > { %v11599_v37 = vpop.f32.mrb[102].mxu0 }
0x4dcb   : > { %v11673_v7 = vadd.f32 %v22365_v30, %v11599_v37  ;;  %v17781_v53 = vpop.f32.mrb[103].mxu0 }
0x4dcc   : > { %v12087_v53 = vld [vmem:[#allocation5] sm:$0xff] }
0x4dd2   : > { %v11742_v34 = vpop.f32.mrb[104].mxu0 }
0x4dd3   : > { %v11746_v41 = vadd.f32 %v11742_v34, %v11673_v7  ;;  %v17803_v9 = vpop.f32.mrb[105].mxu0  ;;  %v22444_v34 = vld [vmem:[#allocation5 + $0x2] sm:$0xff] }
0x4dd5   : > { %v11747_v20 = vadd.f32 %v22411_v60, %v11746_v41  ;;  %v12118_v41 = vld [vmem:[#allocation5 + $0x4] sm:$0xff] }
0x4dd7   : > { %19630 = vtanh.f32 %v11747_v20  ;;  %v15814_v47 = vmul.f32 -1.442695, %v11747_v20 }
0x4dd9   : > { %19632 = vpow2.f32 %v15814_v47 }
0x4de1   : > { %v19631_v11 = vpop.eup %19630 }
0x4de2   : > { %11757 = vrot.lane.b32.xlu1 %v19631_v11, %s23069_s4  ;;  %v12110_v11 = vld [vmem:[#allocation5 + $0x3] sm:$0xff] }
0x4de3   : > { %v19633_v61 = vpop.eup %19632 }
0x4de4   : > { %v11751_v10 = vadd.f32 1.0, %v19633_v61  ;;  %v12456_v61 = vrot.slane %v21527_v48, 7  ;;  %v22486_v48 = vld [vmem:[%s23063_s2 + $0x1] ss:$0 sm:$0xff] }
0x4de6   : > { %19634 = vrcp.f32 %v11751_v10 }
0x4df0   : > { %v19635_v42 = vpop.eup %19634 }
0x4df1   : > { %v11755_v31 = vmul.f32 %v19635_v42, %v22291_v56 }
0x4e54   : > { %v11758_v32 = vpop.permute.xlu1 %11757 }
0x4e55   : > { %v11760_v30 = vmul.f32 %v19635_v42, %v11758_v32 }
0x4e57   : > { %11762 = vrot.lane.b32.xlu0 %v11760_v30, %s23022_s7  ;;  %v22494_v30 = vld [vmem:[%s23063_s2 + $0x2] ss:$0 sm:$0xff] }
0x4ec9   : > { %v11763_v55 = vpop.permute.xlu0 %11762 }
0x4eca   : > { %v22417_v51 = vadd.f32 %v11763_v55, %v11755_v31  ;;  %v22498_v55 = vld [vmem:[%s23063_s2 + $0x3] ss:$0 sm:$0xff] }
0x4ecc   : > { %19636 = vtanh.f32 %v22417_v51 }
0x4ed6   : > { %v19637_v28 = vpop.eup %19636 }
0x4ed7   : > { %11768 = vrot.lane.b32.xlu1 %v19637_v28, %s23069_s4 }
0x4f49   : > { %v11769_v40 = vpop.permute.xlu1 %11768 }
0x4f4a   : > { %v11771_v38 = vmul.f32 %v19635_v42, %v11769_v40 }
0x4f4c   : > { %11843 = vrot.lane.b32.xlu0 %v11771_v38, %s23022_s7 }
0x4fbe   : > { %v22422_v39 = vpop.permute.xlu0 %11843 }
0x4fbf   : > { %17824 = vmatmul.mubr.msk.f32.vlgmr.msra.gmra.mrb[106].mxu0 %vm1875_vm5, %v22422_v39 }
0x4fc0   : > { %18916 = vmatpush3.bf16.msra.mxu0 %v21666_v24  ;;  %17856 = vmatprep.mubr.msk.f32.mxu0 %vm20031_vm0, %v20032_v8 }
0x4fc1   : > { %18917 = vmatprep.subr.bf16.mxu0 %v20030_v1 }
0x4fc4   : > { %18919 = vmatpush3.bf16.msra.mxu0 %v21670_v26 }
0x4fc5   : > { %18920 = vmatprep.subr.bf16.mxu0 %v20030_v1 }
0x5092   : > { %v11913_v56 = vpop.f32.mrb[106].mxu0 }
0x5093   : > { %v11914_v52 = vadd.f32 %v11913_v56, %v22373_v21  ;;  %v17825_v57 = vpop.f32.mrb[107].mxu0  ;;  %v22502_v56 = vld [vmem:[%s23063_s2 + $0x4] ss:$0 sm:$0xff] }
0x5095   : > { %v11917_v25 = vadd.f32 %v22434_v46, %v11914_v52 }
0x5097   : > { %19638 = vtanh.f32 %v11917_v25  ;;  %v15817_v13 = vmul.f32 -1.442695, %v11917_v25 }
0x5099   : > { %19640 = vpow2.f32 %v15817_v13 }
0x50a1   : > { %v19639_v43 = vpop.eup %19638 }
0x50a2   : > { %11927 = vrot.lane.b32.xlu1 %v19639_v43, %s23069_s4 }
0x50a3   : > { %v19641_v2 = vpop.eup %19640 }
0x50a4   : > { %v11921_v59 = vadd.f32 1.0, %v19641_v2 }
0x50a6   : > { %19642 = vrcp.f32 %v11921_v59 }
0x50b0   : > { %v19643_v62 = vpop.eup %19642 }
0x50b1   : > { %v11925_v21 = vmul.f32 %v19643_v62, %v22311_v36  ;;  %v12094_v36 = vld [vmem:[#allocation5 + $0x1] sm:$0xff] }
0x5114   : > { %v11928_v44 = vpop.permute.xlu1 %11927 }
0x5115   : > { %v11930_v22 = vmul.f32 %v19643_v62, %v11928_v44 }
0x5117   : > { %11932 = vrot.lane.b32.xlu0 %v11930_v22, %s23022_s7 }
0x5189   : > { %v11933_v19 = vpop.permute.xlu0 %11932 }
0x518a   : > { %v22440_v37 = vadd.f32 %v11933_v19, %v11925_v21 }
0x518c   : > { %19644 = vtanh.f32 %v22440_v37 }
0x5196   : > { %v19645_v7 = vpop.eup %19644 }
0x5197   : > { %11938 = vrot.lane.b32.xlu1 %v19645_v7, %s23069_s4 }
0x519b   : > { %12090 = vperm.xlu1 %19369, %v12087_v53  }
0x519f   : > { %12105 = vperm.xlu1 %19369, %v22444_v34  }
0x51a3   : > { %12121 = vperm.xlu1 %19369, %v12118_v41  }
0x5209   : > { %v11939_v9 = vpop.permute.xlu1 %11938 }
0x520a   : > { %v11941_v20 = vmul.f32 %v19643_v62, %v11939_v9 }
0x520c   : > { %11943 = vrot.lane.b32.xlu0 %v11941_v20, %s23022_s7 }
0x5210   : > { %12097 = vperm.xlu0 %19368, %v12094_v36  }
0x5214   : > { %12113 = vperm.xlu0 %19368, %v12110_v11  }
0x527e   : > { %v11944_v47 = vpop.permute.xlu0 %11943 }
0x527f   : > { %17835 = vmatmul.mubr.msk.f32.vlgmr.msra.gmra.mrb[88].mxu1 %vm1875_vm5, %v11944_v47 }
0x5280   : > { %18910 = vmatpush3.bf16.msra.mxu1 %v21612_v5  ;;  %17845 = vmatprep.mubr.msk.f32.mxu1 %vm20031_vm0, %v20032_v8 }
0x5281   : > { %18911 = vmatprep.subr.bf16.mxu1 %v20030_v1 }
0x5284   : > { %18913 = vmatpush3.bf16.msra.mxu1 %v21618_v35 }
0x5285   : > { %18926 = vmatprep.subr.bf16.mxu1 %v20030_v1 }
0x5287   : > { %17846 = vmatmul.mubr.msk.f32.vlgmr.msra.gmra.mrb[88].mxu1 %vm1875_vm5, %v22422_v39 }
0x5288   : > { %18928 = vmatpush3.bf16.msra.mxu1 %v21626_v0  ;;  %17878 = vmatprep.mubr.msk.f32.mxu1 %vm20031_vm0, %v20032_v8 }
0x5289   : > { %18929 = vmatprep.subr.bf16.mxu1 %v20030_v1 }
0x528c   : > { %18931 = vmatpush3.bf16.msra.mxu1 %v21634_v18 }
0x528d   : > { %18938 = vmatprep.subr.bf16.mxu1 %v20030_v1 }
0x528f   : > { %17879 = vmatmul.mubr.msk.f32.vlgmr.msra.gmra.mrb[90].mxu1 %vm1875_vm5, %v11944_v47 }
0x5290   : > { %18940 = vmatpush3.bf16.msra.mxu1 %v21511_v4  ;;  %17900 = vmatprep.mubr.msk.f32.mxu1 %vm20031_vm0, %v20032_v8  ;;  %v12091_v4 = vpop.permute.xlu1 %12090 }
0x5291   : > { %18941 = vmatprep.subr.bf16.mxu1 %v20030_v1 }
0x5294   : > { %18943 = vmatpush3.bf16.msra.mxu1 %v21522_v3  ;;  %v12098_v3 = vpop.permute.xlu0 %12097  ;;  %v12106_v10 = vpop.permute.xlu1 %12105 }
0x5295   : > { %18950 = vmatprep.subr.bf16.mxu1 %v20030_v1 }
0x5297   : > { %17901 = vmatmul.mubr.msk.f32.vlgmr.msra.gmra.mrb[92].mxu1 %vm1875_vm5, %v12456_v61 }
0x5298   : > { %18952 = vmatpush3.bf16.msra.mxu1 %v21549_v58  ;;  %17922 = vmatprep.mubr.msk.f32.mxu1 %vm20031_vm0, %v20032_v8  ;;  %v12100_v58 = vmul.f32 %v22486_v48, %v12098_v3  ;;  %v12114_v32 = vpop.permute.xlu0 %12113  ;;  %v12122_v40 = vpop.permute.xlu1 %12121 }
0x5299   : > { %18953 = vmatprep.subr.bf16.mxu1 %v20030_v1  ;;  %v12116_v28 = vmul.f32 %v22498_v55, %v12114_v32  ;;  %v12124_v52 = vmul.f32 %v22502_v56, %v12122_v40 }
0x529c   : > { %18955 = vmatpush3.bf16.msra.mxu1 %v21559_v12  ;;  %v22490_v12 = vld [vmem:[%s23063_s2] ss:$0 sm:$0xff] }
0x529d   : > { %18962 = vmatprep.subr.bf16.mxu1 %v20030_v1 }
0x529f   : > { %17923 = vmatmul.mubr.msk.f32.vlgmr.msra.gmra.mrb[94].mxu1 %vm1875_vm5, %v11944_v47 }
0x52a0   : > { %18964 = vmatpush3.bf16.msra.mxu1 %v21595_v45  ;;  %17944 = vmatprep.mubr.msk.f32.mxu1 %vm20031_vm0, %v20032_v8  ;;  %v12093_v45 = vmul.f32 %v22490_v12, %v12091_v4 }
0x52a1   : > { %18965 = vmatprep.subr.bf16.mxu1 %v20030_v1 }
0x52a2   : > { %v12101_v42 = vadd.f32 %v12100_v58, %v12093_v45 }
0x52a4   : > { %18967 = vmatpush3.bf16.msra.mxu1 %v21601_v6  ;;  %v12108_v6 = vmul.f32 %v22494_v30, %v12106_v10 }
0x52a5   : > { %18968 = vmatprep.subr.bf16.mxu1 %v20030_v1 }
0x52a6   : > { %v12109_v31 = vadd.f32 %v12108_v6, %v12101_v42 }
0x52a8   : > { %v12117_v38 = vadd.f32 %v12116_v28, %v12109_v31 }
0x52aa   : > { %v12125_v25 = vadd.f32 %v12124_v52, %v12117_v38 }
0x535a   : > { %v12083_v57 = vpop.f32.mrb[88].mxu1 }
0x535b   : > { %v12129_v43 = vrot.slane %v12083_v57, %v21695_v29  ;;  %v17847_v13 = vpop.f32.mrb[89].mxu1 }
0x535d   : > { %v12130_v2 = vadd.f32 %v12129_v43, %v12125_v25 }
0x535f   : > { %v12131_v59 = vadd.f32 %v12130_v2, %v21701_v14 }
0x5361   : > { %19646 = vtanh.f32 %v12131_v59 }
0x5362   : > { %v22507_v62 = vpop.f32.mrb[90].mxu1 }
0x5363   : > { %v17880_v44 = vpop.f32.mrb[91].mxu1 }
0x536a   : > { %v22509_v22 = vpop.f32.mrb[92].mxu1 }
0x536b   : > { %v19647_v21 = vpop.eup %19646  ;;  %v17902_v19 = vpop.f32.mrb[93].mxu1 }
0x536c   : > { %17857 = vmatmul.mubr.msk.f32.vlgmr.msra.gmra.mrb[108].mxu0 %vm1875_vm5, %v19647_v21 }
0x536d   : > { %18922 = vmatpush3.bf16.msra.mxu0 %v21726_v15  ;;  %17867 = vmatprep.mubr.msk.f32.mxu0 %vm20031_vm0, %v20032_v8 }
0x536e   : > { %18923 = vmatprep.subr.bf16.mxu0 %v20030_v1 }
0x5371   : > { %18925 = vmatpush3.bf16.msra.mxu0 %v21732_v63 }
0x5372   : > { %v22517_v7 = vpop.f32.mrb[94].mxu1  ;;  %18932 = vmatprep.subr.bf16.mxu0 %v20030_v1 }
0x5373   : > { %v17924_v53 = vpop.f32.mrb[95].mxu1 }
0x543f   : > { %v12202_v41 = vpop.f32.mrb[108].mxu0 }
0x5440   : > { %v12206_v9 = vsel %vm21714_vm13, %v12202_v41, -1e+30  ;;  %v17858_v20 = vpop.f32.mrb[109].mxu0 }
0x5441   : > { %v12207_v36 = vsel %vm6341_vm10, %v12206_v9, -inf }
0x5442   : > { %v12208_v11 = vrot.slane %v12207_v36, 4 }
0x5444   : > { %v12209_v47 = vmax.f32 %v12207_v36, %v12208_v11 }
0x5446   : > { %v12210_v61 = vrot.slane %v12209_v47, 2 }
0x5448   : > { %v12211_v4 = vmax.f32 %v12209_v47, %v12210_v61 }
0x544a   : > { %v12212_v3 = vrot.slane %v12211_v4, 1 }
0x544c   : > { %v12213_v58 = vmax.f32 %v12211_v4, %v12212_v3 }
0x544e   : > { %v12214_v45 = vsub.f32 %v12206_v9, %v12213_v58 }
0x5450   : > { %v12215_v10 = vmul.f32 1.442695, %v12214_v45 }
0x5452   : > { %19648 = vpow2.f32 %v12215_v10 }
0x545c   : > { %v19649_v42 = vpop.eup %19648 }
0x545d   : > { %v12217_v32 = vsel %vm6341_vm10, %v19649_v42, 0.0 }
0x545e   : > { %v12218_v6 = vrot.slane %v12217_v32, 4 }
0x5460   : > { %v12219_v31 = vadd.f32 %v12218_v6, %v12217_v32 }
0x5462   : > { %v12220_v28 = vrot.slane %v12219_v31, 2 }
0x5464   : > { %v12221_v40 = vadd.f32 %v12220_v28, %v12219_v31 }
0x5466   : > { %v12222_v38 = vrot.slane %v12221_v40, 1 }
0x5468   : > { %v12223_v52 = vadd.f32 %v12222_v38, %v12221_v40 }
0x546a   : > { %19650 = vrcp.f32 %v12223_v52 }
0x5474   : > { %v19651_v57 = vpop.eup %19650 }
0x5475   : > { %v12225_v25 = vmul.f32 %v19651_v57, %v19649_v42 }
0x5477   : > { %12228 = vperm.xlu0 %19368, %v12225_v25   ;;  %v12239_v43 = vadd.f32 %v12225_v25, %v22444_v34 }
0x5479   : > { %12240 = vst.msk [vmem:[#allocation5 + $0x2] sm:$0xff] %vm6341_vm10, %v12239_v43 }
0x54f6   : > { %v12229_v13 = vpop.permute.xlu0 %12228 }
0x54f7   : > { %v12231_v2 = vmul.f32 %v12229_v13, %v21517_v49 }
0x54f9   : > { %v12232_v59 = vsel %vm1875_vm5, %v12231_v2, 0.0 }
0x54fa   : > { %v12233_v44 = vrot.slane %v12232_v59, 4 }
0x54fc   : > { %v12234_v21 = vadd.f32 %v12233_v44, %v12232_v59 }
0x54fe   : > { %v12235_v19 = vrot.slane %v12234_v21, 2 }
0x5500   : > { %v12236_v53 = vadd.f32 %v12235_v19, %v12234_v21  ;;  %v12940_v21 = vld [vmem:[#allocation5] sm:$0xff] }
0x5501   : > { %v22576_v19 = vld [vmem:[#allocation5 + $0x2] sm:$0xff] }
0x5502   : > { %v12237_v41 = vrot.slane %v12236_v53, 1 }
0x5504   : > { %v12238_v9 = vadd.f32 %v12237_v41, %v12236_v53  ;;  %v12971_v53 = vld [vmem:[#allocation5 + $0x4] sm:$0xff] }
0x5506   : > { %17868 = vmatmul.mubr.msk.f32.vlgmr.msra.gmra.mrb[110].mxu0 %vm1875_vm5, %v12238_v9 }
0x5507   : > { %18934 = vmatpush3.bf16.msra.mxu0 %v21440_v50  ;;  %17889 = vmatprep.mubr.msk.f32.mxu0 %vm20031_vm0, %v20032_v8 }
0x5508   : > { %18935 = vmatprep.subr.bf16.mxu0 %v20030_v1 }
0x550b   : > { %18937 = vmatpush3.bf16.msra.mxu0 %v21450_v23 }
0x550c   : > { %18944 = vmatprep.subr.bf16.mxu0 %v20030_v1 }
0x550e   : > { %17890 = vmatmul.mubr.msk.f32.vlgmr.msra.gmra.mrb[112].mxu0 %vm1875_vm5, %v12238_v9 }
0x550f   : > { %18946 = vmatpush3.bf16.msra.mxu0 %v21490_v17  ;;  %17911 = vmatprep.mubr.msk.f32.mxu0 %vm20031_vm0, %v20032_v8 }
0x5510   : > { %18947 = vmatprep.subr.bf16.mxu0 %v20030_v1 }
0x5513   : > { %18949 = vmatpush3.bf16.msra.mxu0 %v21497_v54  ;;  %v22552_v54 = vld [vmem:[%s23068_s1] sm:$0x1]  ;;  %s23073_s1 = sld [smem:[#allocation62_spill]] }
0x5514   : > { %18956 = vmatprep.subr.bf16.mxu0 %v20030_v1 }
0x5516   : > { %17912 = vmatmul.mubr.msk.f32.vlgmr.msra.gmra.mrb[114].mxu0 %vm1875_vm5, %v22422_v39 }
0x5517   : > { %18958 = vmatpush3.bf16.msra.mxu0 %v21554_v33  ;;  %17933 = vmatprep.mubr.msk.f32.mxu0 %vm20031_vm0, %v20032_v8 }
0x5518   : > { %18959 = vmatprep.subr.bf16.mxu0 %v20030_v1 }
0x551b   : > { %18961 = vmatpush3.bf16.msra.mxu0 %v21563_v16 }
0x551c   : > { %18974 = vmatprep.subr.bf16.mxu0 %v20030_v1 }
0x55d9   : > { %v12310_v50 = vpop.f32.mrb[110].mxu0 }
0x55da   : > { %v12381_v23 = vadd.f32 %v22507_v62, %v12310_v50  ;;  %v17869_v17 = vpop.f32.mrb[111].mxu0  ;;  %v12947_v50 = vld [vmem:[#allocation5 + $0x1] sm:$0xff] }
0x55dc   : > { %v12384_v34 = vadd.f32 %v22552_v54, %v12381_v23 }
0x55de   : > { %12385 = vst [vmem:[%s21766_s3 + $0x6] sm:$0x1] %v12384_v34 }
0x55e1   : > { %v12452_v39 = vpop.f32.mrb[112].mxu0 }
0x55e2   : > { %v12526_v33 = vadd.f32 %v22509_v22, %v12452_v39  ;;  %v17891_v20 = vpop.f32.mrb[113].mxu0 }
0x55e9   : > { %v12595_v36 = vpop.f32.mrb[114].mxu0 }
0x55ea   : > { %v12599_v11 = vadd.f32 %v12595_v36, %v12526_v33  ;;  %v17913_v47 = vpop.f32.mrb[115].mxu0 }
0x55ec   : > { %v12600_v16 = vadd.f32 %v22411_v60, %v12599_v11 }
0x55ee   : > { %19652 = vtanh.f32 %v12600_v16  ;;  %v15826_v62 = vmul.f32 -1.442695, %v12600_v16 }
0x55f0   : > { %19654 = vpow2.f32 %v15826_v62 }
0x55f8   : > { %v19653_v61 = vpop.eup %19652 }
0x55f9   : > { %12610 = vrot.lane.b32.xlu1 %v19653_v61, %s23069_s4 }
0x55fa   : > { %v19655_v4 = vpop.eup %19654 }
0x55fb   : > { %v12604_v3 = vadd.f32 1.0, %v19655_v4 }
0x55fd   : > { %19656 = vrcp.f32 %v12604_v3 }
0x5607   : > { %v19657_v58 = vpop.eup %19656 }
0x5608   : > { %v12608_v22 = vmul.f32 %v19657_v58, %v22417_v51 }
0x566b   : > { %v12611_v45 = vpop.permute.xlu1 %12610 }
0x566c   : > { %v12613_v10 = vmul.f32 %v19657_v58, %v12611_v45 }
0x566e   : > { %12615 = vrot.lane.b32.xlu0 %v12613_v10, %s23022_s7 }
0x56e0   : > { %v12616_v42 = vpop.permute.xlu0 %12615 }
0x56e1   : > { %v12618_v32 = vadd.f32 %v12616_v42, %v12608_v22 }
0x56e3   : > { %19658 = vtanh.f32 %v12618_v32 }
0x56ed   : > { %v19659_v60 = vpop.eup %19658 }
0x56ee   : > { %12621 = vrot.lane.b32.xlu1 %v19659_v60, %s23069_s4 }
0x5760   : > { %v12622_v6 = vpop.permute.xlu1 %12621 }
0x5761   : > { %v12624_v31 = vmul.f32 %v19657_v58, %v12622_v6 }
0x5763   : > { %12696 = vrot.lane.b32.xlu0 %v12624_v31, %s23022_s7 }
0x57d5   : > { %v12697_v28 = vpop.permute.xlu0 %12696 }
0x57d6   : > { %17934 = vmatmul.mubr.msk.f32.vlgmr.msra.gmra.mrb[116].mxu0 %vm1875_vm5, %v12697_v28 }
0x57d7   : > { %18976 = vmatpush3.bf16.msra.mxu0 %v21666_v24  ;;  %17966 = vmatprep.mubr.msk.f32.mxu0 %vm20031_vm0, %v20032_v8 }
0x57d8   : > { %18977 = vmatprep.subr.bf16.mxu0 %v20030_v1 }
0x57db   : > { %18979 = vmatpush3.bf16.msra.mxu0 %v21670_v26 }
0x57dc   : > { %18980 = vmatprep.subr.bf16.mxu0 %v20030_v1 }
0x58a9   : > { %v12766_v51 = vpop.f32.mrb[116].mxu0 }
0x58aa   : > { %v12767_v40 = vadd.f32 %v12766_v51, %v22517_v7  ;;  %v17935_v38 = vpop.f32.mrb[117].mxu0 }
0x58ac   : > { %v12770_v52 = vadd.f32 %v22434_v46, %v12767_v40 }
0x58ae   : > { %19660 = vtanh.f32 %v12770_v52  ;;  %v15829_v24 = vmul.f32 -1.442695, %v12770_v52 }
0x58b0   : > { %19662 = vpow2.f32 %v15829_v24 }
0x58b8   : > { %v19661_v57 = vpop.eup %19660 }
0x58b9   : > { %12780 = vrot.lane.b32.xlu1 %v19661_v57, %s23069_s4 }
0x58ba   : > { %v19663_v25 = vpop.eup %19662 }
0x58bb   : > { %v12774_v43 = vadd.f32 1.0, %v19663_v25 }
0x58bd   : > { %19664 = vrcp.f32 %v12774_v43 }
0x58c7   : > { %v19665_v13 = vpop.eup %19664 }
0x58c8   : > { %v12778_v59 = vmul.f32 %v19665_v13, %v22440_v37  ;;  %v12963_v37 = vld [vmem:[#allocation5 + $0x3] sm:$0xff] }
0x592b   : > { %v12781_v2 = vpop.permute.xlu1 %12780 }
0x592c   : > { %v12783_v26 = vmul.f32 %v19665_v13, %v12781_v2 }
0x592e   : > { %12785 = vrot.lane.b32.xlu0 %v12783_v26, %s23022_s7 }
0x59a0   : > { %v12786_v7 = vpop.permute.xlu0 %12785 }
0x59a1   : > { %v12788_v44 = vadd.f32 %v12786_v7, %v12778_v59 }
0x59a3   : > { %19666 = vtanh.f32 %v12788_v44 }
0x59ad   : > { %v19667_v46 = vpop.eup %19666 }
0x59ae   : > { %12791 = vrot.lane.b32.xlu1 %v19667_v46, %s23069_s4  ;;  %s23072_s4 = sld [smem:[#allocation61_spill]] }
0x59b2   : > { %12943 = vperm.xlu1 %19369, %v12940_v21  }
0x59b6   : > { %12958 = vperm.xlu1 %19369, %v22576_v19  }
0x59ba   : > { %12974 = vperm.xlu1 %19369, %v12971_v53  }
0x5a20   : > { %v12792_v41 = vpop.permute.xlu1 %12791 }
0x5a21   : > { %v12794_v9 = vmul.f32 %v19665_v13, %v12792_v41  ;;  %v13243_v41 = vld [vmem:[%s23070_s22 + $0x18] sm:$0xff] }
0x5a23   : > { %12796 = vrot.lane.b32.xlu0 %v12794_v9, %s23022_s7  ;;  %s23071_s7 = sld [smem:[#allocation63_spill]] }
0x5a27   : > { %12950 = vperm.xlu0 %19368, %v12947_v50  }
0x5a2b   : > { %12966 = vperm.xlu0 %19368, %v12963_v37  }
0x5a95   : > { %v12797_v23 = vpop.permute.xlu0 %12796 }
0x5a96   : > { %17945 = vmatmul.mubr.msk.f32.vlgmr.msra.gmra.mrb[96].mxu1 %vm1875_vm5, %v12797_v23 }
0x5a97   : > { %18970 = vmatpush3.bf16.msra.mxu1 %v21612_v5  ;;  %17955 = vmatprep.mubr.msk.f32.mxu1 %vm20031_vm0, %v20032_v8  ;;  %v12944_v5 = vpop.permute.xlu1 %12943 }
0x5a98   : > { %18971 = vmatprep.subr.bf16.mxu1 %v20030_v1 }
0x5a9b   : > { %18973 = vmatpush3.bf16.msra.mxu1 %v21618_v35  ;;  %v12959_v34 = vpop.permute.xlu1 %12958 }
0x5a9c   : > { %18986 = vmatprep.subr.bf16.mxu1 %v20030_v1  ;;  %v12961_v20 = vmul.f32 %v22494_v30, %v12959_v34 }
0x5a9e   : > { %17956 = vmatmul.mubr.msk.f32.vlgmr.msra.gmra.mrb[96].mxu1 %vm1875_vm5, %v12697_v28 }
0x5a9f   : > { %18988 = vmatpush3.bf16.msra.mxu1 %v21626_v0  ;;  %17988 = vmatprep.mubr.msk.f32.mxu1 %vm20031_vm0, %v20032_v8  ;;  %v12946_v0 = vmul.f32 %v22490_v12, %v12944_v5  ;;  %v12975_v11 = vpop.permute.xlu1 %12974 }
0x5aa0   : > { %18989 = vmatprep.subr.bf16.mxu1 %v20030_v1  ;;  %v12977_v16 = vmul.f32 %v22502_v56, %v12975_v11  ;;  %v13245_v11 = vld [vmem:[%s23070_s22 + $0x28] sm:$0xff] }
0x5aa3   : > { %18991 = vmatpush3.bf16.msra.mxu1 %v21634_v18 }
0x5aa4   : > { %19007 = vmatprep.subr.bf16.mxu1 %v20030_v1 }
0x5aa6   : > { %17989 = vmatmul.mubr.msk.f32.vlgmr.msra.gmra.mrb[98].mxu1 %vm1875_vm5, %v12797_v23  ;;  %v12951_v35 = vpop.permute.xlu0 %12950 }
0x5aa7   : > { %18034 = vmatprep.mubr.msk.f32.mxu1 %vm20031_vm0, %v20032_v8  ;;  %v12953_v17 = vmul.f32 %v22486_v48, %v12951_v35 }
0x5aa9   : > { %v12954_v39 = vadd.f32 %v12953_v17, %v12946_v0  ;;  %v13240_v17 = vld [vmem:[%s23070_s22] sm:$0xff]  ;;  %v13241_v0 = vld [vmem:[%s23070_s22 + $0x8] sm:$0xff] }
0x5aaa   : > { %v12967_v33 = vpop.permute.xlu0 %12966 }
0x5aab   : > { %v12962_v36 = vadd.f32 %v12961_v20, %v12954_v39  ;;  %v12969_v18 = vmul.f32 %v22498_v55, %v12967_v33 }
0x5aad   : > { %v12970_v47 = vadd.f32 %v12969_v18, %v12962_v36  ;;  %v18996_v36 = vpack.c.bf16 %v13241_v0, %v13240_v17  ;;  %v13244_v18 = vld [vmem:[%s23070_s22 + $0x20] sm:$0xff]  ;;  %v13662_v17 = vld [vmem:[%s23071_s7 + $0x70] sm:$0xff]  ;;  %v13663_v0 = vld [vmem:[%s23071_s7 + $0x78] sm:$0xff] }
0x5aaf   : > { %v12978_v62 = vadd.f32 %v12977_v16, %v12970_v47  ;;  %v18999_v47 = vpack.c.bf16 %v13245_v11, %v13244_v18  ;;  %v13246_v16 = vld [vmem:[%s23070_s22 + $0x30] sm:$0xff] }
0x5ab0   : > { %v13666_v11 = vld [vmem:[%s23071_s7 + $0x90] sm:$0xff] }
0x5b71   : > { %v12936_v61 = vpop.f32.mrb[96].mxu1 }
0x5b72   : > { %v12982_v4 = vrot.slane %v12936_v61, %v21695_v29  ;;  %v17957_v3 = vpop.f32.mrb[97].mxu1  ;;  %v13247_v61 = vld [vmem:[%s23070_s22 + $0x38] sm:$0xff] }
0x5b73   : > { %v19002_v3 = vpack.c.bf16 %v13247_v61, %v13246_v16 }
0x5b74   : > { %v12983_v48 = vadd.f32 %v12982_v4, %v12978_v62 }
0x5b76   : > { %v12984_v12 = vadd.f32 %v12983_v48, %v21701_v14 }
0x5b78   : > { %19668 = vtanh.f32 %v12984_v12  ;;  %v13248_v12 = vld [vmem:[%s23070_s22 + $0x40] sm:$0xff] }
0x5b79   : > { %v13233_v58 = vpop.f32.mrb[98].mxu1 }
0x5b7a   : > { %v17990_v45 = vpop.f32.mrb[99].mxu1 }
0x5b82   : > { %v19669_v10 = vpop.eup %19668 }
0x5b83   : > { %17967 = vmatmul.mubr.msk.f32.vlgmr.msra.gmra.mrb[118].mxu0 %vm1875_vm5, %v19669_v10 }
0x5b84   : > { %18982 = vmatpush3.bf16.msra.mxu0 %v21726_v15  ;;  %17977 = vmatprep.mubr.msk.f32.mxu0 %vm20031_vm0, %v20032_v8 }
0x5b85   : > { %18983 = vmatprep.subr.bf16.mxu0 %v20030_v1 }
0x5b88   : > { %18985 = vmatpush3.bf16.msra.mxu0 %v21732_v63 }
0x5b89   : > { %18992 = vmatprep.subr.bf16.mxu0 %v20030_v1 }
0x5c56   : > { %v13055_v29 = vpop.f32.mrb[118].mxu0 }
0x5c57   : > { %v13059_v14 = vsel %vm21714_vm13, %v13055_v29, -1e+30  ;;  %v17968_v30 = vpop.f32.mrb[119].mxu0 }
0x5c58   : > { %v13060_v55 = vsel %vm6341_vm10, %v13059_v14, -inf }
0x5c59   : > { %v13061_v56 = vrot.slane %v13060_v55, 4 }
0x5c5b   : > { %v13062_v22 = vmax.f32 %v13060_v55, %v13061_v56 }
0x5c5d   : > { %v13063_v42 = vrot.slane %v13062_v22, 2 }
0x5c5f   : > { %v13064_v15 = vmax.f32 %v13062_v22, %v13063_v42  ;;  %v13652_v22 = vld [vmem:[%s23071_s7 + $0x20] sm:$0xff]  ;;  %v13653_v42 = vld [vmem:[%s23071_s7 + $0x28] sm:$0xff] }
0x5c61   : > { %v13065_v32 = vrot.slane %v13064_v15, 1 }
0x5c63   : > { %v13066_v60 = vmax.f32 %v13064_v15, %v13065_v32  ;;  %v19008_v15 = vpack.c.bf16 %v13653_v42, %v13652_v22  ;;  %v13654_v32 = vld [vmem:[%s23071_s7 + $0x30] sm:$0xff] }
0x5c65   : > { %v13067_v6 = vsub.f32 %v13059_v14, %v13066_v60  ;;  %19009 = vmatpush3.bf16.msra.mxu1 %v19008_v15  ;;  %v13655_v60 = vld [vmem:[%s23071_s7 + $0x38] sm:$0xff] }
0x5c66   : > { %19010 = vmatprep.subr.bf16.mxu1 %v20030_v1 }
0x5c67   : > { %v13068_v31 = vmul.f32 1.442695, %v13067_v6  ;;  %v19011_v6 = vpack.c.bf16 %v13655_v60, %v13654_v32 }
0x5c69   : > { %19670 = vpow2.f32 %v13068_v31  ;;  %19012 = vmatpush3.bf16.msra.mxu1 %v19011_v6  ;;  %v15840_v31 = vld [vmem:[%s23072_s4] ss:$0 sm:$0xff]  ;;  %s23075_s4 = sld [smem:[#allocation64_spill]] }
0x5c6a   : > { %19013 = vmatprep.subr.bf16.mxu1 %v20030_v1 }
0x5c73   : > { %v19671_v28 = vpop.eup %19670 }
0x5c74   : > { %v13070_v63 = vsel %vm6341_vm10, %v19671_v28, 0.0 }
0x5c75   : > { %v13071_v51 = vrot.slane %v13070_v63, 4 }
0x5c77   : > { %v13072_v40 = vadd.f32 %v13071_v51, %v13070_v63 }
0x5c79   : > { %v13073_v38 = vrot.slane %v13072_v40, 2 }
0x5c7b   : > { %v13074_v27 = vadd.f32 %v13073_v38, %v13072_v40 }
0x5c7d   : > { %v13075_v52 = vrot.slane %v13074_v27, 1 }
0x5c7f   : > { %v13076_v57 = vadd.f32 %v13075_v52, %v13074_v27  ;;  %v13648_v52 = vld [vmem:[%s23071_s7] sm:$0xff] }
0x5c81   : > { %19672 = vrcp.f32 %v13076_v57  ;;  %v13649_v57 = vld [vmem:[%s23071_s7 + $0x8] sm:$0xff] }
0x5c8b   : > { %v19673_v24 = vpop.eup %19672 }
0x5c8c   : > { %v13078_v25 = vmul.f32 %v19673_v24, %v19671_v28  ;;  %v15841_v28 = vld [vmem:[%s23073_s1] ss:$0 sm:$0xff]  ;;  %s23074_s1 = sld [smem:[#allocation65_spill]] }
0x5c8e   : > { %13081 = vperm.xlu0 %19368, %v13078_v25   ;;  %v13092_v43 = vadd.f32 %v13078_v25, %v22576_v19  ;;  %v13242_v19 = vld [vmem:[%s23070_s22 + $0x10] sm:$0xff] }
0x5c90   : > { %13093 = vst.msk [vmem:[#allocation5 + $0x2] sm:$0xff] %vm6341_vm10, %v13092_v43 }
0x5c92   : > { %v14067_v60 = vld [vmem:[%s23074_s1] sm:$0xff]  ;;  %v14068_v6 = vld [vmem:[%s23074_s1 + $0x8] sm:$0xff] }
0x5d0d   : > { %v13082_v13 = vpop.permute.xlu0 %13081 }
0x5d0e   : > { %v13084_v2 = vmul.f32 %v13082_v13, %v21517_v49  ;;  %v18993_v49 = vpack.c.bf16 %v13243_v41, %v13242_v19  ;;  %v13658_v19 = vld [vmem:[%s23071_s7 + $0x50] sm:$0xff]  ;;  %v13659_v41 = vld [vmem:[%s23071_s7 + $0x58] sm:$0xff] }
0x5d10   : > { %v13085_v26 = vsel %vm1875_vm5, %v13084_v2, 0.0  ;;  %v19014_v2 = vpack.c.bf16 %v13649_v57, %v13648_v52 }
0x5d11   : > { %v13086_v59 = vrot.slane %v13085_v26, 4 }
0x5d13   : > { %v13087_v7 = vadd.f32 %v13086_v59, %v13085_v26  ;;  %v13650_v26 = vld [vmem:[%s23071_s7 + $0x10] sm:$0xff]  ;;  %v13651_v59 = vld [vmem:[%s23071_s7 + $0x18] sm:$0xff] }
0x5d15   : > { %v13088_v44 = vrot.slane %v13087_v7, 2 }
0x5d17   : > { %v13089_v46 = vadd.f32 %v13088_v44, %v13087_v7  ;;  %v19017_v44 = vpack.c.bf16 %v13651_v59, %v13650_v26  ;;  %v14079_v59 = vld [vmem:[%s23074_s1 + $0x60] sm:$0xff] }
0x5d19   : > { %v13090_v21 = vrot.slane %v13089_v46, 1 }
0x5d1b   : > { %v13091_v53 = vadd.f32 %v13090_v21, %v13089_v46  ;;  %v13656_v46 = vld [vmem:[%s23071_s7 + $0x40] sm:$0xff]  ;;  %v13657_v21 = vld [vmem:[%s23071_s7 + $0x48] sm:$0xff] }
0x5d1d   : > { %17978 = vmatmul.mubr.msk.f32.vlgmr.msra.gmra.mrb[120].mxu0 %vm1875_vm5, %v13091_v53  ;;  %v19020_v53 = vpack.c.bf16 %v13657_v21, %v13656_v46 }
0x5d1e   : > { %17995 = vmatprep.mubr.msk.f32.mxu0 %vm20031_vm0, %v20032_v8  ;;  %18994 = vmatpush3.bf16.msra.mxu0 %v18993_v49  ;;  %v19023_v49 = vpack.c.bf16 %v13659_v41, %v13658_v19  ;;  %v14082_v19 = vld [vmem:[%s23074_s1 + $0x78] sm:$0xff] }
0x5d1f   : > { %18995 = vmatprep.subr.bf16.mxu0 %v20030_v1 }
0x5df0   : > { %v13163_v9 = vpop.f32.mrb[120].mxu0 }
0x5df1   : > { %v13234_v50 = vadd.f32 %v13233_v58, %v13163_v9  ;;  %v17979_v37 = vpop.f32.mrb[121].mxu0  ;;  %v13249_v58 = vld [vmem:[%s23070_s22 + $0x48] sm:$0xff]  ;;  %v13660_v9 = vld [vmem:[%s23071_s7 + $0x60] sm:$0xff] }
0x5df2   : > { %v19005_v29 = vpack.c.bf16 %v13249_v58, %v13248_v12  ;;  %v14072_v12 = vld [vmem:[%s23074_s1 + $0x28] sm:$0xff] }
0x5df3   : > { %v13237_v23 = vadd.f32 %v22552_v54, %v13234_v50  ;;  %v13661_v50 = vld [vmem:[%s23071_s7 + $0x68] sm:$0xff] }
0x5df5   : > { %13238 = vst [vmem:[%s21766_s3 + $0x7] sm:$0x1] %v13237_v23 }
0x5dfc   : > { %v22628_v5 = vld [vmem:[%s21766_s3] sm:$0xff] }
0x5dfd   : > { %v13253_v35 = vrot.slane %v22628_v5, 6 }
0x5dff   : > { %v13255_v34 = vsel %vm1866_vm3, 0.0, %v13253_v35  ;;  %v13256_v39 = vsel %vm1866_vm3, %v13253_v35, 0.0  ;;  %v19026_v35 = vpack.c.bf16 %v13661_v50, %v13660_v9  ;;  %v14083_v9 = vld [vmem:[%s23074_s1 + $0x80] sm:$0xff]  ;;  %v14084_v50 = vld [vmem:[%s23074_s1 + $0x88] sm:$0xff] }
0x5e00   : > { %v13259_v33 = vrot.slane %v13255_v34, 1  ;;  %v13260_v20 = vrot.slane %v13256_v39, 1  ;;  %v13406_v62 = vrot.slane %v13255_v34, 2  ;;  %v13407_v4 = vrot.slane %v13256_v39, 2 }
0x5e01   : > { %v13482_v45 = vrot.slane %v13255_v34, 3  ;;  %v13483_v10 = vrot.slane %v13256_v39, 3  ;;  %v13558_v30 = vrot.slane %v13255_v34, 4  ;;  %v13559_v55 = vrot.slane %v13256_v39, 4 }
0x5e02   : > { %v13261_v54 = vsel %vm1871_vm4, %v13259_v33, %v13260_v20  ;;  %v13408_v48 = vsel %vm2020_vm6, %v13406_v62, %v13407_v4  ;;  %v19029_v39 = vpack.c.bf16 %v13663_v0, %v13662_v17  ;;  %v13664_v33 = vld [vmem:[%s23071_s7 + $0x80] sm:$0xff]  ;;  %v13665_v20 = vld [vmem:[%s23071_s7 + $0x88] sm:$0xff]  ;;  %v14085_v17 = vld [vmem:[%s23074_s1 + $0x90] sm:$0xff] }
0x5e03   : > { %17996 = vmatmul.mubr.msk.f32.vlgmr.msra.gmra.mrb[122].mxu0 %vm3105_vm9, %v13261_v54  ;;  %v13484_v14 = vsel %vm2097_vm7, %v13482_v45, %v13483_v10  ;;  %v13560_v56 = vsel %vm2174_vm8, %v13558_v30, %v13559_v55  ;;  %v19032_v18 = vpack.c.bf16 %v13665_v20, %v13664_v33  ;;  %v14073_v45 = vld [vmem:[%s23074_s1 + $0x30] sm:$0xff]  ;;  %v14074_v10 = vld [vmem:[%s23074_s1 + $0x38] sm:$0xff] }
0x5e04   : > { %18997 = vmatpush3.bf16.msra.mxu0 %v18996_v36  ;;  %18002 = vmatprep.mubr.msk.f32.mxu0 %vm20031_vm0, %v20032_v8  ;;  %v15848_v30 = vld [vmem:[#allocation8] ss:$0 sm:$0xff]  ;;  %v14086_v0 = vld [vmem:[%s23074_s1 + $0x98] sm:$0xff] }
0x5e05   : > { %18998 = vmatprep.subr.bf16.mxu0 %v20030_v1 }
0x5e0b   : > { %18003 = vmatmul.mubr.msk.f32.vlgmr.msra.gmra.mrb[122].mxu0 %vm3105_vm9, %v13255_v34 }
0x5e0c   : > { %19000 = vmatpush3.bf16.msra.mxu0 %v18999_v47  ;;  %18009 = vmatprep.mubr.msk.f32.mxu0 %vm20031_vm0, %v20032_v8  ;;  %v13667_v47 = vld [vmem:[%s23071_s7 + $0x98] sm:$0xff] }
0x5e0d   : > { %19001 = vmatprep.subr.bf16.mxu0 %v20030_v1  ;;  %v19035_v61 = vpack.c.bf16 %v13667_v47, %v13666_v11 }
0x5e13   : > { %18010 = vmatmul.mubr.msk.f32.vlgmr.msra.gmra.mrb[122].mxu0 %vm3105_vm9, %v13408_v48  ;;  %v14071_v48 = vld [vmem:[%s23074_s1 + $0x20] sm:$0xff] }
0x5e14   : > { %19003 = vmatpush3.bf16.msra.mxu0 %v19002_v3  ;;  %18016 = vmatprep.mubr.msk.f32.mxu0 %vm20031_vm0, %v20032_v8  ;;  %v19038_v58 = vpack.c.bf16 %v14072_v12, %v14071_v48 }
0x5e15   : > { %19004 = vmatprep.subr.bf16.mxu0 %v20030_v1 }
0x5e1b   : > { %18017 = vmatmul.mubr.msk.f32.vlgmr.msra.gmra.mrb[122].mxu0 %vm3105_vm9, %v13484_v14  ;;  %v15847_v14 = vld [vmem:[%s23075_s4] ss:$0 sm:$0xff]  ;;  %s23076_s4 = sld [smem:[#allocation67_spill]] }
0x5e1c   : > { %19006 = vmatpush3.bf16.msra.mxu0 %v19005_v29  ;;  %18023 = vmatprep.mubr.msk.f32.mxu0 %vm20031_vm0, %v20032_v8  ;;  %v19041_v29 = vpack.c.bf16 %v14074_v10, %v14073_v45 }
0x5e1d   : > { %19037 = vmatprep.subr.bf16.mxu0 %v20030_v1 }
0x5e21   : > { %v14492_v47 = vld [vmem:[%s23076_s4 + $0x30] sm:$0xff] }
0x5e23   : > { %18024 = vmatmul.mubr.msk.f32.vlgmr.msra.gmra.mrb[122].mxu0 %vm3105_vm9, %v13560_v56 }
0x5e24   : > { %18089 = vmatprep.mubr.msk.f32.mxu0 %vm20031_vm0, %v20032_v8  ;;  %19039 = vmatpush3.bf16.msra.mxu0 %v19038_v58 }
0x5e25   : > { %19040 = vmatprep.subr.bf16.mxu0 %v20030_v1 }
0x5e28   : > { %19042 = vmatpush3.bf16.msra.mxu0 %v19041_v29  ;;  %v14486_v29 = vld [vmem:[%s23076_s4] sm:$0xff] }
0x5e29   : > { %19043 = vmatprep.subr.bf16.mxu0 %v20030_v1 }
0x5ef6   : > { %v13629_v63 = vpop.f32.mrb[122].mxu0 }
0x5ef7   : > { %v13640_v51 = vmul.f32 %v15840_v31, %v13629_v63  ;;  %v18025_v40 = vpop.f32.mrb[123].mxu0 }
0x5ef8   : > { %v19044_v40 = vpack.c.bf16 %v14068_v6, %v14067_v60 }
0x5ef9   : > { %v13647_v38 = vadd.f32 %v15841_v28, %v13640_v51 }
0x5efb   : > { %v13671_v27 = vrot.slane %v13647_v38, 6  ;;  %v14069_v38 = vld [vmem:[%s23074_s1 + $0x10] sm:$0xff] }
0x5efd   : > { %v13673_v24 = vsel %vm1866_vm3, 0.0, %v13671_v27  ;;  %v13674_v25 = vsel %vm1866_vm3, %v13671_v27, 0.0  ;;  %v14070_v27 = vld [vmem:[%s23074_s1 + $0x18] sm:$0xff] }
0x5efe   : > { %v13678_v43 = vrot.slane %v13674_v25, 1  ;;  %v13677_v13 = vrot.slane %v13673_v24, 1  ;;  %v13825_v37 = vrot.slane %v13674_v25, 2  ;;  %v13824_v23 = vrot.slane %v13673_v24, 2 }
0x5eff   : > { %v13901_v36 = vrot.slane %v13674_v25, 3  ;;  %v13900_v54 = vrot.slane %v13673_v24, 3  ;;  %v13977_v62 = vrot.slane %v13674_v25, 4  ;;  %v13976_v4 = vrot.slane %v13673_v24, 4  ;;  %v14076_v25 = vld [vmem:[%s23074_s1 + $0x48] sm:$0xff] }
0x5f00   : > { %v13679_v7 = vsel %vm1871_vm4, %v13677_v13, %v13678_v43  ;;  %v13826_v34 = vsel %vm2020_vm6, %v13824_v23, %v13825_v37  ;;  %v19047_v57 = vpack.c.bf16 %v14070_v27, %v14069_v38  ;;  %v14077_v13 = vld [vmem:[%s23074_s1 + $0x50] sm:$0xff]  ;;  %v14498_v27 = vld [vmem:[%s23076_s4 + $0x60] sm:$0xff] }
0x5f01   : > { %18035 = vmatmul.mubr.msk.f32.vlgmr.msra.gmra.mrb[100].mxu1 %vm1875_vm5, %v13679_v7  ;;  %v13902_v16 = vsel %vm2097_vm7, %v13900_v54, %v13901_v36  ;;  %v13978_v3 = vsel %vm2174_vm8, %v13976_v4, %v13977_v62  ;;  %v14080_v7 = vld [vmem:[%s23074_s1 + $0x68] sm:$0xff]  ;;  %v14490_v54 = vld [vmem:[%s23076_s4 + $0x20] sm:$0xff]  ;;  %v15854_v62 = vld [vmem:[#allocation10] ss:$0 sm:$0xff] }
0x5f02   : > { %19015 = vmatpush3.bf16.msra.mxu1 %v19014_v2  ;;  %18045 = vmatprep.mubr.msk.f32.mxu1 %vm20031_vm0, %v20032_v8  ;;  %v14078_v2 = vld [vmem:[%s23074_s1 + $0x58] sm:$0xff]  ;;  %v19056_v21 = vpack.c.bf16 %v14080_v7, %v14079_v59  ;;  %v15855_v4 = vld [vmem:[#allocation12] ss:$0 sm:$0xff]  ;;  %v14502_v59 = vld [vmem:[%s23076_s4 + $0x80] sm:$0xff] }
0x5f03   : > { %19016 = vmatprep.subr.bf16.mxu1 %v20030_v1  ;;  %v19053_v26 = vpack.c.bf16 %v14078_v2, %v14077_v13  ;;  %v14501_v13 = vld [vmem:[%s23076_s4 + $0x78] sm:$0xff]  ;;  %v14503_v7 = vld [vmem:[%s23076_s4 + $0x88] sm:$0xff] }
0x5f06   : > { %19018 = vmatpush3.bf16.msra.mxu1 %v19017_v44 }
0x5f07   : > { %19019 = vmatprep.subr.bf16.mxu1 %v20030_v1 }
0x5f09   : > { %18046 = vmatmul.mubr.msk.f32.vlgmr.msra.gmra.mrb[100].mxu1 %vm1875_vm5, %v13673_v24  ;;  %v14075_v24 = vld [vmem:[%s23074_s1 + $0x40] sm:$0xff] }
0x5f0a   : > { %19021 = vmatpush3.bf16.msra.mxu1 %v19020_v53  ;;  %18056 = vmatprep.mubr.msk.f32.mxu1 %vm20031_vm0, %v20032_v8  ;;  %v19050_v43 = vpack.c.bf16 %v14076_v25, %v14075_v24  ;;  %v14081_v53 = vld [vmem:[%s23074_s1 + $0x70] sm:$0xff]  ;;  %s23077_s1 = sld [smem:[#allocation69_spill]] }
0x5f0b   : > { %19022 = vmatprep.subr.bf16.mxu1 %v20030_v1 }
0x5f0e   : > { %19024 = vmatpush3.bf16.msra.mxu1 %v19023_v49  ;;  %v19059_v49 = vpack.c.bf16 %v14082_v19, %v14081_v53  ;;  %v14504_v53 = vld [vmem:[%s23076_s4 + $0x90] sm:$0xff]  ;;  %v14505_v19 = vld [vmem:[%s23076_s4 + $0x98] sm:$0xff] }
0x5f0f   : > { %19025 = vmatprep.subr.bf16.mxu1 %v20030_v1 }
0x5f11   : > { %18057 = vmatmul.mubr.msk.f32.vlgmr.msra.gmra.mrb[100].mxu1 %vm1875_vm5, %v13826_v34 }
0x5f12   : > { %19027 = vmatpush3.bf16.msra.mxu1 %v19026_v35  ;;  %18067 = vmatprep.mubr.msk.f32.mxu1 %vm20031_vm0, %v20032_v8  ;;  %v19062_v35 = vpack.c.bf16 %v14084_v50, %v14083_v9 }
0x5f13   : > { %19028 = vmatprep.subr.bf16.mxu1 %v20030_v1 }
0x5f16   : > { %19030 = vmatpush3.bf16.msra.mxu1 %v19029_v39  ;;  %v19065_v39 = vpack.c.bf16 %v14086_v0, %v14085_v17  ;;  %v14911_v0 = vld [vmem:[%s23077_s1 + $0x30] sm:$0xff] }
0x5f17   : > { %19031 = vmatprep.subr.bf16.mxu1 %v20030_v1 }
0x5f19   : > { %18068 = vmatmul.mubr.msk.f32.vlgmr.msra.gmra.mrb[100].mxu1 %vm1875_vm5, %v13902_v16  ;;  %v14493_v16 = vld [vmem:[%s23076_s4 + $0x38] sm:$0xff] }
0x5f1a   : > { %19033 = vmatpush3.bf16.msra.mxu1 %v19032_v18  ;;  %18078 = vmatprep.mubr.msk.f32.mxu1 %vm20031_vm0, %v20032_v8  ;;  %v14491_v18 = vld [vmem:[%s23076_s4 + $0x28] sm:$0xff] }
0x5f1b   : > { %19034 = vmatprep.subr.bf16.mxu1 %v20030_v1  ;;  %v19068_v11 = vpack.c.bf16 %v14491_v18, %v14490_v54  ;;  %v15861_v54 = vld [vmem:[#allocation13] ss:$0 sm:$0xff]  ;;  %v15862_v18 = vld [vmem:[#allocation15] ss:$0 sm:$0xff] }
0x5f1e   : > { %19036 = vmatpush3.bf16.msra.mxu1 %v19035_v61  ;;  %v19071_v61 = vpack.c.bf16 %v14493_v16, %v14492_v47 }
0x5f1f   : > { %19067 = vmatprep.subr.bf16.mxu1 %v20030_v1 }
0x5f21   : > { %18079 = vmatmul.mubr.msk.f32.vlgmr.msra.gmra.mrb[100].mxu1 %vm1875_vm5, %v13978_v3 }
0x5f22   : > { %18144 = vmatprep.mubr.msk.f32.mxu1 %vm20031_vm0, %v20032_v8  ;;  %19069 = vmatpush3.bf16.msra.mxu1 %v19068_v11 }
0x5f23   : > { %19070 = vmatprep.subr.bf16.mxu1 %v20030_v1 }
0x5f26   : > { %19072 = vmatpush3.bf16.msra.mxu1 %v19071_v61 }
0x5f27   : > { %19073 = vmatprep.subr.bf16.mxu1 %v20030_v1 }
0x5ff4   : > { %v14047_v55 = vpop.f32.mrb[100].mxu1 }
0x5ff5   : > { %v14058_v56 = vmul.f32 %v15847_v14, %v14047_v55  ;;  %v18080_v22 = vpop.f32.mrb[101].mxu1  ;;  %v14487_v14 = vld [vmem:[%s23076_s4 + $0x8] sm:$0xff] }
0x5ff7   : > { %v14065_v42 = vadd.f32 %v15848_v30, %v14058_v56 }
0x5ff9   : > { %19674 = vtanh.f32 %v14065_v42  ;;  %v19074_v42 = vpack.c.bf16 %v14487_v14, %v14486_v29  ;;  %v14907_v14 = vld [vmem:[%s23077_s1 + $0x10] sm:$0xff] }
0x6003   : > { %v19675_v15 = vpop.eup %19674 }
0x6004   : > { %v14090_v32 = vrot.slane %v19675_v15, 6  ;;  %v14488_v15 = vld [vmem:[%s23076_s4 + $0x10] sm:$0xff] }
0x6006   : > { %v14092_v31 = vsel %vm1866_vm3, 0.0, %v14090_v32  ;;  %v14093_v28 = vsel %vm1866_vm3, %v14090_v32, 0.0  ;;  %v14489_v32 = vld [vmem:[%s23076_s4 + $0x18] sm:$0xff] }
0x6007   : > { %v14096_v63 = vrot.slane %v14092_v31, 1  ;;  %v14097_v51 = vrot.slane %v14093_v28, 1  ;;  %v14243_v44 = vrot.slane %v14092_v31, 2  ;;  %v14244_v46 = vrot.slane %v14093_v28, 2 }
0x6008   : > { %v14319_v37 = vrot.slane %v14092_v31, 3  ;;  %v14320_v23 = vrot.slane %v14093_v28, 3  ;;  %v14395_v33 = vrot.slane %v14092_v31, 4  ;;  %v14396_v20 = vrot.slane %v14093_v28, 4  ;;  %v14495_v28 = vld [vmem:[%s23076_s4 + $0x48] sm:$0xff] }
0x6009   : > { %v14098_v52 = vsel %vm1871_vm4, %v14096_v63, %v14097_v51  ;;  %v14245_v41 = vsel %vm2020_vm6, %v14243_v44, %v14244_v46  ;;  %v19077_v6 = vpack.c.bf16 %v14489_v32, %v14488_v15  ;;  %v14496_v51 = vld [vmem:[%s23076_s4 + $0x50] sm:$0xff] }
0x600a   : > { %18090 = vmatmul.mubr.msk.f32.vlgmr.msra.gmra.mrb[124].mxu0 %vm1875_vm5, %v14098_v52  ;;  %v14321_v34 = vsel %vm2097_vm7, %v14319_v37, %v14320_v23  ;;  %v14397_v36 = vsel %vm2174_vm8, %v14395_v33, %v14396_v20  ;;  %v14499_v52 = vld [vmem:[%s23076_s4 + $0x68] sm:$0xff]  ;;  %v14909_v23 = vld [vmem:[%s23077_s1 + $0x20] sm:$0xff]  ;;  %v14915_v32 = vld [vmem:[%s23077_s1 + $0x50] sm:$0xff] }
0x600b   : > { %19045 = vmatpush3.bf16.msra.mxu0 %v19044_v40  ;;  %18100 = vmatprep.mubr.msk.f32.mxu0 %vm20031_vm0, %v20032_v8  ;;  %v14497_v40 = vld [vmem:[%s23076_s4 + $0x58] sm:$0xff]  ;;  %v19086_v25 = vpack.c.bf16 %v14499_v52, %v14498_v27  ;;  %v15323_v33 = vld [vmem:[%s20316_s8] sm:$0xff]  ;;  %v15324_v20 = vld [vmem:[%s20316_s8 + $0x8] sm:$0xff] }
0x600c   : > { %19046 = vmatprep.subr.bf16.mxu0 %v20030_v1  ;;  %v19083_v38 = vpack.c.bf16 %v14497_v40, %v14496_v51  ;;  %v14920_v27 = vld [vmem:[%s23077_s1 + $0x78] sm:$0xff] }
0x600f   : > { %19048 = vmatpush3.bf16.msra.mxu0 %v19047_v57 }
0x6010   : > { %19049 = vmatprep.subr.bf16.mxu0 %v20030_v1 }
0x6012   : > { %18101 = vmatmul.mubr.msk.f32.vlgmr.msra.gmra.mrb[124].mxu0 %vm1875_vm5, %v14092_v31  ;;  %v14494_v31 = vld [vmem:[%s23076_s4 + $0x40] sm:$0xff] }
0x6013   : > { %19051 = vmatpush3.bf16.msra.mxu0 %v19050_v43  ;;  %18111 = vmatprep.mubr.msk.f32.mxu0 %vm20031_vm0, %v20032_v8  ;;  %v19080_v63 = vpack.c.bf16 %v14495_v28, %v14494_v31  ;;  %v14500_v43 = vld [vmem:[%s23076_s4 + $0x70] sm:$0xff]  ;;  %v14917_v31 = vld [vmem:[%s23077_s1 + $0x60] sm:$0xff]  ;;  %v14918_v28 = vld [vmem:[%s23077_s1 + $0x68] sm:$0xff] }
0x6014   : > { %19052 = vmatprep.subr.bf16.mxu0 %v20030_v1  ;;  %v19116_v40 = vpack.c.bf16 %v14918_v28, %v14917_v31 }
0x6017   : > { %19054 = vmatpush3.bf16.msra.mxu0 %v19053_v26  ;;  %v19089_v26 = vpack.c.bf16 %v14501_v13, %v14500_v43 }
0x6018   : > { %19055 = vmatprep.subr.bf16.mxu0 %v20030_v1 }
0x601a   : > { %18112 = vmatmul.mubr.msk.f32.vlgmr.msra.gmra.mrb[124].mxu0 %vm1875_vm5, %v14245_v41 }
0x601b   : > { %19057 = vmatpush3.bf16.msra.mxu0 %v19056_v21  ;;  %18122 = vmatprep.mubr.msk.f32.mxu0 %vm20031_vm0, %v20032_v8  ;;  %v19092_v21 = vpack.c.bf16 %v14503_v7, %v14502_v59  ;;  %v14924_v59 = vld [vmem:[%s23077_s1 + $0x98] sm:$0xff] }
0x601c   : > { %19058 = vmatprep.subr.bf16.mxu0 %v20030_v1 }
0x601f   : > { %19060 = vmatpush3.bf16.msra.mxu0 %v19059_v49  ;;  %v19095_v49 = vpack.c.bf16 %v14505_v19, %v14504_v53  ;;  %v15325_v19 = vld [vmem:[%s20316_s8 + $0x10] sm:$0xff] }
0x6020   : > { %19061 = vmatprep.subr.bf16.mxu0 %v20030_v1 }
0x6022   : > { %18123 = vmatmul.mubr.msk.f32.vlgmr.msra.gmra.mrb[124].mxu0 %vm1875_vm5, %v14321_v34  ;;  %v14912_v34 = vld [vmem:[%s23077_s1 + $0x38] sm:$0xff] }
0x6023   : > { %19063 = vmatpush3.bf16.msra.mxu0 %v19062_v35  ;;  %18133 = vmatprep.mubr.msk.f32.mxu0 %vm20031_vm0, %v20032_v8  ;;  %v14910_v35 = vld [vmem:[%s23077_s1 + $0x28] sm:$0xff] }
0x6024   : > { %19064 = vmatprep.subr.bf16.mxu0 %v20030_v1  ;;  %v19098_v17 = vpack.c.bf16 %v14910_v35, %v14909_v23 }
0x6027   : > { %19066 = vmatpush3.bf16.msra.mxu0 %v19065_v39  ;;  %v19101_v39 = vpack.c.bf16 %v14912_v34, %v14911_v0 }
0x6028   : > { %19097 = vmatprep.subr.bf16.mxu0 %v20030_v1 }
0x602a   : > { %18134 = vmatmul.mubr.msk.f32.vlgmr.msra.gmra.mrb[124].mxu0 %vm1875_vm5, %v14397_v36  ;;  %v19128_v36 = vpack.c.bf16 %v15324_v20, %v15323_v33 }
0x602b   : > { %18199 = vmatprep.mubr.msk.f32.mxu0 %vm20031_vm0, %v20032_v8  ;;  %19099 = vmatpush3.bf16.msra.mxu0 %v19098_v17 }
0x602c   : > { %19100 = vmatprep.subr.bf16.mxu0 %v20030_v1 }
0x602f   : > { %19102 = vmatpush3.bf16.msra.mxu0 %v19101_v39 }
0x6030   : > { %19103 = vmatprep.subr.bf16.mxu0 %v20030_v1 }
0x60fd   : > { %v14466_v3 = vpop.f32.mrb[124].mxu0 }
0x60fe   : > { %v14477_v48 = vmul.f32 %v15854_v62, %v14466_v3  ;;  %v18135_v12 = vpop.f32.mrb[125].mxu0  ;;  %v14905_v3 = vld [vmem:[%s23077_s1] sm:$0xff] }
0x6100   : > { %v14484_v58 = vadd.f32 %v15855_v4, %v14477_v48  ;;  %v14906_v48 = vld [vmem:[%s23077_s1 + $0x8] sm:$0xff] }
0x6101   : > { %v19104_v29 = vpack.c.bf16 %v14906_v48, %v14905_v3 }
0x6102   : > { %19676 = vtanh.f32 %v14484_v58 }
0x610c   : > { %v19677_v45 = vpop.eup %19676 }
0x610d   : > { %v14509_v10 = vrot.slane %v19677_v45, 6 }
0x610f   : > { %v14511_v30 = vsel %vm1866_vm3, 0.0, %v14509_v10  ;;  %v14512_v55 = vsel %vm1866_vm3, %v14509_v10, 0.0 }
0x6110   : > { %v14515_v56 = vrot.slane %v14511_v30, 1  ;;  %v14516_v22 = vrot.slane %v14512_v55, 1  ;;  %v14662_v57 = vrot.slane %v14511_v30, 2  ;;  %v14663_v24 = vrot.slane %v14512_v55, 2 }
0x6111   : > { %v14738_v44 = vrot.slane %v14511_v30, 3  ;;  %v14739_v46 = vrot.slane %v14512_v55, 3  ;;  %v14814_v9 = vrot.slane %v14511_v30, 4  ;;  %v14815_v50 = vrot.slane %v14512_v55, 4 }
0x6112   : > { %v14517_v60 = vsel %vm1871_vm4, %v14515_v56, %v14516_v22  ;;  %v14664_v2 = vsel %vm2020_vm6, %v14662_v57, %v14663_v24  ;;  %v14913_v22 = vld [vmem:[%s23077_s1 + $0x40] sm:$0xff] }
0x6113   : > { %18145 = vmatmul.mubr.msk.f32.vlgmr.msra.gmra.mrb[102].mxu1 %vm1875_vm5, %v14517_v60  ;;  %v14740_v41 = vsel %vm2097_vm7, %v14738_v44, %v14739_v46  ;;  %v14816_v37 = vsel %vm2174_vm8, %v14814_v9, %v14815_v50  ;;  %v14916_v60 = vld [vmem:[%s23077_s1 + $0x58] sm:$0xff]  ;;  %v14921_v24 = vld [vmem:[%s23077_s1 + $0x80] sm:$0xff] }
0x6114   : > { %19075 = vmatpush3.bf16.msra.mxu1 %v19074_v42  ;;  %18155 = vmatprep.mubr.msk.f32.mxu1 %vm20031_vm0, %v20032_v8  ;;  %v14914_v42 = vld [vmem:[%s23077_s1 + $0x48] sm:$0xff]  ;;  %v15868_v9 = vld [vmem:[#allocation16] ss:$0 sm:$0xff]  ;;  %v15869_v50 = vld [vmem:[#allocation18] ss:$0 sm:$0xff] }
0x6115   : > { %19076 = vmatprep.subr.bf16.mxu1 %v20030_v1  ;;  %v19110_v15 = vpack.c.bf16 %v14914_v42, %v14913_v22 }
0x6118   : > { %19078 = vmatpush3.bf16.msra.mxu1 %v19077_v6  ;;  %v19113_v6 = vpack.c.bf16 %v14916_v60, %v14915_v32 }
0x6119   : > { %19079 = vmatprep.subr.bf16.mxu1 %v20030_v1 }
0x611b   : > { %18156 = vmatmul.mubr.msk.f32.vlgmr.msra.gmra.mrb[102].mxu1 %vm1875_vm5, %v14511_v30  ;;  %v14908_v30 = vld [vmem:[%s23077_s1 + $0x18] sm:$0xff] }
0x611c   : > { %19081 = vmatpush3.bf16.msra.mxu1 %v19080_v63  ;;  %18166 = vmatprep.mubr.msk.f32.mxu1 %vm20031_vm0, %v20032_v8  ;;  %v19107_v56 = vpack.c.bf16 %v14908_v30, %v14907_v14 }
0x611d   : > { %19082 = vmatprep.subr.bf16.mxu1 %v20030_v1 }
0x6120   : > { %19084 = vmatpush3.bf16.msra.mxu1 %v19083_v38  ;;  %v14919_v38 = vld [vmem:[%s23077_s1 + $0x70] sm:$0xff] }
0x6121   : > { %19085 = vmatprep.subr.bf16.mxu1 %v20030_v1  ;;  %v19119_v57 = vpack.c.bf16 %v14920_v27, %v14919_v38 }
0x6123   : > { %18167 = vmatmul.mubr.msk.f32.vlgmr.msra.gmra.mrb[102].mxu1 %vm1875_vm5, %v14664_v2 }
0x6124   : > { %19087 = vmatpush3.bf16.msra.mxu1 %v19086_v25  ;;  %18177 = vmatprep.mubr.msk.f32.mxu1 %vm20031_vm0, %v20032_v8  ;;  %v14922_v25 = vld [vmem:[%s23077_s1 + $0x88] sm:$0xff] }
0x6125   : > { %19088 = vmatprep.subr.bf16.mxu1 %v20030_v1  ;;  %v19122_v2 = vpack.c.bf16 %v14922_v25, %v14921_v24 }
0x6128   : > { %19090 = vmatpush3.bf16.msra.mxu1 %v19089_v26  ;;  %v14923_v26 = vld [vmem:[%s23077_s1 + $0x90] sm:$0xff] }
0x6129   : > { %19091 = vmatprep.subr.bf16.mxu1 %v20030_v1  ;;  %v19125_v44 = vpack.c.bf16 %v14924_v59, %v14923_v26 }
0x612b   : > { %18178 = vmatmul.mubr.msk.f32.vlgmr.msra.gmra.mrb[102].mxu1 %vm1875_vm5, %v14740_v41  ;;  %v15326_v41 = vld [vmem:[%s20316_s8 + $0x18] sm:$0xff] }
0x612c   : > { %19093 = vmatpush3.bf16.msra.mxu1 %v19092_v21  ;;  %18188 = vmatprep.mubr.msk.f32.mxu1 %vm20031_vm0, %v20032_v8 }
0x612d   : > { %19094 = vmatprep.subr.bf16.mxu1 %v20030_v1 }
0x6130   : > { %19096 = vmatpush3.bf16.msra.mxu1 %v19095_v49  ;;  %v19131_v49 = vpack.c.bf16 %v15326_v41, %v15325_v19 }
0x6131   : > { %19127 = vmatprep.subr.bf16.mxu1 %v20030_v1 }
0x6133   : > { %18189 = vmatmul.mubr.msk.f32.vlgmr.msra.gmra.mrb[102].mxu1 %vm1875_vm5, %v14816_v37 }
0x6134   : > { %18254 = vmatprep.mubr.msk.f32.mxu1 %vm20031_vm0, %v20032_v8  ;;  %19129 = vmatpush3.bf16.msra.mxu1 %v19128_v36 }
0x6135   : > { %19130 = vmatprep.subr.bf16.mxu1 %v20030_v1 }
0x6138   : > { %19132 = vmatpush3.bf16.msra.mxu1 %v19131_v49 }
0x6206   : > { %v14885_v11 = vpop.f32.mrb[102].mxu1 }
0x6207   : > { %v14896_v47 = vmul.f32 %v15861_v54, %v14885_v11  ;;  %v18190_v16 = vpop.f32.mrb[103].mxu1 }
0x6209   : > { %v14903_v61 = vadd.f32 %v15862_v18, %v14896_v47 }
0x620b   : > { %19678 = vtanh.f32 %v14903_v61 }
0x6215   : > { %v19679_v62 = vpop.eup %19678 }
0x6216   : > { %v14928_v4 = vrot.slane %v19679_v62, 6 }
0x6218   : > { %v14930_v12 = vsel %vm1866_vm3, 0.0, %v14928_v4  ;;  %v14931_v58 = vsel %vm1866_vm3, %v14928_v4, 0.0 }
0x6219   : > { %v14934_v45 = vrot.slane %v14930_v12, 1  ;;  %v14935_v10 = vrot.slane %v14931_v58, 1  ;;  %v15081_v63 = vrot.slane %v14930_v12, 2  ;;  %v15082_v51 = vrot.slane %v14931_v58, 2 }
0x621a   : > { %v15157_v43 = vrot.slane %v14930_v12, 3  ;;  %v15158_v13 = vrot.slane %v14931_v58, 3  ;;  %v15233_v46 = vrot.slane %v14930_v12, 4  ;;  %v15234_v21 = vrot.slane %v14931_v58, 4 }
0x621b   : > { %v14936_v55 = vsel %vm1871_vm4, %v14934_v45, %v14935_v10  ;;  %v15083_v52 = vsel %vm2020_vm6, %v15081_v63, %v15082_v51 }
0x621c   : > { %18200 = vmatmul.mubr.msk.f32.vlgmr.msra.gmra.mrb[126].mxu0 %vm1875_vm5, %v14936_v55  ;;  %v15159_v7 = vsel %vm2097_vm7, %v15157_v43, %v15158_v13  ;;  %v15235_v53 = vsel %vm2174_vm8, %v15233_v46, %v15234_v21 }
0x621d   : > { %19105 = vmatpush3.bf16.msra.mxu0 %v19104_v29  ;;  %18210 = vmatprep.mubr.msk.f32.mxu0 %vm20031_vm0, %v20032_v8 }
0x621e   : > { %19106 = vmatprep.subr.bf16.mxu0 %v20030_v1 }
0x6221   : > { %19108 = vmatpush3.bf16.msra.mxu0 %v19107_v56 }
0x6222   : > { %19109 = vmatprep.subr.bf16.mxu0 %v20030_v1 }
0x6224   : > { %18211 = vmatmul.mubr.msk.f32.vlgmr.msra.gmra.mrb[126].mxu0 %vm1875_vm5, %v14930_v12 }
0x6225   : > { %19111 = vmatpush3.bf16.msra.mxu0 %v19110_v15  ;;  %18221 = vmatprep.mubr.msk.f32.mxu0 %vm20031_vm0, %v20032_v8 }
0x6226   : > { %19112 = vmatprep.subr.bf16.mxu0 %v20030_v1 }
0x6229   : > { %19114 = vmatpush3.bf16.msra.mxu0 %v19113_v6 }
0x622a   : > { %19115 = vmatprep.subr.bf16.mxu0 %v20030_v1 }
0x622c   : > { %18222 = vmatmul.mubr.msk.f32.vlgmr.msra.gmra.mrb[126].mxu0 %vm1875_vm5, %v15083_v52 }
0x622d   : > { %19117 = vmatpush3.bf16.msra.mxu0 %v19116_v40  ;;  %18232 = vmatprep.mubr.msk.f32.mxu0 %vm20031_vm0, %v20032_v8 }
0x622e   : > { %19118 = vmatprep.subr.bf16.mxu0 %v20030_v1 }
0x6231   : > { %19120 = vmatpush3.bf16.msra.mxu0 %v19119_v57 }
0x6232   : > { %19121 = vmatprep.subr.bf16.mxu0 %v20030_v1 }
0x6234   : > { %18233 = vmatmul.mubr.msk.f32.vlgmr.msra.gmra.mrb[126].mxu0 %vm1875_vm5, %v15159_v7 }
0x6235   : > { %19123 = vmatpush3.bf16.msra.mxu0 %v19122_v2  ;;  %18243 = vmatprep.mubr.msk.f32.mxu0 %vm20031_vm0, %v20032_v8  ;;  %vm15412_vm0 = vcmask 261248  }
0x6236   : > { %19124 = vmatprep.subr.bf16.mxu0 %v20030_v1  ;;  %v15870_v1 = vld [vmem:[#allocation19] ss:$0 sm:$0xff] }
0x6239   : > { %19126 = vmatpush3.bf16.msra.mxu0 %v19125_v44 }
0x623c   : > { %18244 = vmatmul.mubr.msk.f32.vlgmr.msra.gmra.mrb[126].mxu0 %vm1875_vm5, %v15235_v53 }
0x630f   : > { %v15304_v37 = vpop.f32.mrb[126].mxu0 }
0x6310   : > { %v15315_v23 = vmul.f32 %v15868_v9, %v15304_v37  ;;  %v18245_v35 = vpop.f32.mrb[127].mxu0 }
0x6312   : > { %v15322_v8 = vadd.f32 %v15869_v50, %v15315_v23 }
0x6314   : > { %18255 = vmatmul.mubr.msk.f32.vlgmr.msra.gmra.mrb[104].mxu1 %vm1875_vm5, %v15322_v8 }
0x63e7   : > { %v15403_v17 = vpop.f32.mrb[104].mxu1 }
0x63e8   : > { %v15404_v0 = vadd.f32 %v15870_v1, %v15403_v17  ;;  %v18256_v34 = vpop.f32.mrb[105].mxu1 }
0x63ea   : > { %v15407_v39 = vadd.f32 %v15404_v0, %v22628_v5 }
0x63ec   : > { %15409 = vrot.lane.b32.xlu1 %v15407_v39, %s23027_s26 }
0x645e   : > { %v15410_v33 = vpop.permute.xlu1 %15409 }
0x645f   : > { %15413 = vst.msk [vmem:[%s21766_s3] sm:$0xff] %vm15412_vm0, %v15410_v33 }
0x6460 PF: > { %s134_s0 = sadd.s32 1, %s19962_s0  }
0x6461   : > { %p131_p10 = scmp.ge.s32.totalorder %s134_s0, 4  }
0x6463   :  { %133 = sbr.rel (!%p131_p10) target bundleno = 120 (0x78), region = 378 }
0x646a   :  { %15433 = vsyncpa [#allocation9], 1 }
0x646b   :  { %15435 = vsyncpa [#allocation9 + $0x1], 1 }
0x646c   :  { %15436 = vsyncpa [#allocation11], 1 }
0x646d   :  { %15437 = vsyncpa [#allocation14], 1 }
0x646e   :  { %15438 = vsyncpa [#allocation17], 1 }
0x646f   :  { %15439 = vsyncpa [#allocation20], 1 }

</bundles_post_ra>
